<compile_context>
chip_gen: v5e
topology: v5e:2x2
jax: 0.10.0
libtpu: 0.0.40
codegen_flags: <defaults>
</compile_context>

<pallas_src>
import jax
import jax.numpy as jnp
from jax import lax
from jax.experimental import pallas as pl
from jax.experimental.pallas import tpu as pltpu

NUM_TCN_BRANCHES = 4        # ms_cfg = [(3,1),(3,2),(3,3),(3,4),('max',3),'1x1']
NUM_BRANCHES = 6
DILATIONS = (1, 2, 3, 4)


def _round_up(x, m):
    return (x + m - 1) // m * m


# ---------------------------------------------------------------- the kernel
def _make_kernel(t, v, vp, cin, cm, cout, fuse_tconv):
    tin = NUM_BRANCHES * cm
    r = t * vp                      # flattened rows, t-major: row = time*vp + joint

    def kernel(x_ref, w1_ref, b1_ref, wt_ref, bpre_ref, coeff_ref,
               sttr_ref, wtr_ref, bout_ref, o_ref):
        mdt = w1_ref.dtype          # matmul operand dtype (bf16 or f32)

        # row index (time-major, vp joints per timestep); used by shift masks.
        row_ids = lax.broadcasted_iota(jnp.int32, (r, 1), 0)

        def shift_rows(a, off, fill=0.0):
            # result[row] = a[row + off]; rows that would read outside [0, r)
            # become `fill`.  off is a static multiple of vp (whole timesteps),
            # so the sublane rotate is 8-aligned, lands on the XLU, and the
            # boundary fix-up is one VPU select (no filler-concat buffers
            # through the store slot).
            if off == 0:
                return a
            rolled = pltpu.roll(a, (-off) % r, axis=0)
            valid = row_ids < (r - off) if off > 0 else row_ids >= (-off)
            return jnp.where(valid, rolled, fill)

        # ---- augmented joints: x was pre-padded to vp in the wrapper (rows
        #      >= v are zero); inject the global-mean joint at row v with a
        #      sublane mask select (no unaligned concatenate).
        xf = x_ref[0].astype(jnp.float32)                      # (T, vp, Cin)
        xg = jnp.sum(xf, axis=1, keepdims=True) * (1.0 / v)    # (T, 1, Cin)
        joint_ids = lax.broadcasted_iota(jnp.int32, (vp, 1), 0)
        h = jnp.where(joint_ids == v, xg, xf).reshape(r, cin)  # (R, Cin)

        # ---- all six branch 1x1 convs in ONE matmul; the folded-BN scale is
        #      already in the weight columns, so only the bias add remains.
        y = jnp.dot(h.astype(mdt), w1_ref[...],
                    preferred_element_type=jnp.float32)        # (R, 6*cm)
        y = y + b1_ref[0]

        # ---- one full-width masked ReLU: branches 0..4 ReLU, '1x1' passes.
        lane_ids = lax.broadcasted_iota(jnp.int32, (1, tin), 1)
        y = jnp.where(lane_ids < 5 * cm, jnp.maximum(y, 0.0), y)

        outs = []
        # ---- dilated temporal convs (kernel 3, dilation d, zero pad d)
        if fuse_tconv:
            # one block-diagonal matmul for all four branches (v6e/v7x: raises
            # MXU K-depth 4x and replaces 4 unaligned operand slices with one
            # offset-0 slice); per-branch taps live at lanes [3b*cm:3(b+1)*cm].
            z_all = jnp.dot(y[:, :4 * cm].astype(mdt), wt_ref[...],
                            preferred_element_type=jnp.float32)   # (R, 12*cm)
            for b, d in enumerate(DILATIONS):
                z = z_all[:, 3 * b * cm:3 * (b + 1) * cm]          # (R, 3*cm)
                outs.append(shift_rows(z[:, :cm], -d * vp)
                            + z[:, cm:2 * cm]
                            + shift_rows(z[:, 2 * cm:], d * vp))
        else:
            # per-branch matmuls (preferred on v5e's 128x128 MXU).
            for b, d in enumerate(DILATIONS):
                z = jnp.dot(y[:, b * cm:(b + 1) * cm].astype(mdt), wt_ref[b],
                            preferred_element_type=jnp.float32)    # (R, 3*cm)
                outs.append(shift_rows(z[:, :cm], -d * vp)
                            + z[:, cm:2 * cm]
                            + shift_rows(z[:, 2 * cm:], d * vp))

        # ---- ('max', 3) branch: temporal max-pool (k=3, pad 1).  The centre
        #      tap is a ReLU output (>= 0), so a 0.0 boundary fill is
        #      equivalent to the reference's -inf padding.
        y_m = y[:, 4 * cm:5 * cm]
        outs.append(jnp.maximum(jnp.maximum(shift_rows(y_m, -vp), y_m),
                                shift_rows(y_m, vp)))
        # ---- '1x1' branch: conv + bias only (already applied), no ReLU
        outs.append(y[:, 5 * cm:])

        # ---- concat branch channels + tcn output biases; add the global-joint
        #      row (scaled by add_coeff) to every local joint.  Padded joints
        #      have coeff 0 and just carry garbage that the wrapper slices off,
        #      so every reshape and the final store stay sublane-tile aligned.
        o_all = jnp.concatenate(outs, axis=-1) + bpre_ref[0]    # (R, tin)
        o3 = o_all.reshape(t, vp, tin)
        glob = o3[:, v:v + 1, :]                                # (T, 1, tin)
        feat = o3 + glob * coeff_ref[...]                       # (T, vp, tin)

        # ---- transform: BN -> ReLU -> 1x1 conv (final BN folded into weight)
        yt = jnp.maximum(feat * sttr_ref[0] + sttr_ref[1], 0.0)
        zt = jnp.dot(yt.reshape(r, tin).astype(mdt), wtr_ref[...],
                     preferred_element_type=jnp.float32)        # (R, cout)
        o_ref[0] = (zt + bout_ref[0]).astype(o_ref.dtype)

    return kernel


# ---------------------------------------------------------------- param packing
def _pack_kernel_params(p, vp, mm_dtype, fuse_tconv):
    # TODO(synk): generalize to unequal branch widths (rem_mid_channels !=
    # mid_channels, e.g. out_channels=256 -> mid=42, rem=46) before production.
    f32 = jnp.float32
    cin, cm = p["w1_max"].shape
    v = p["coeff"].shape[0]
    tin = NUM_BRANCHES * cm
    cout = p["w_tr"].shape[-1]

    # fused first 1x1 conv: six branch weights side by side on the out dim,
    # with the post-conv per-channel scale (folded BN / identity for '1x1')
    # folded into the columns IN F32; cast to the matmul dtype last.
    w1 = jnp.concatenate([p["w1_tcn"][b] for b in range(NUM_TCN_BRANCHES)]
                         + [p["w1_max"], p["w_1x1"]], axis=1)          # (cin, 6cm)
    s1 = jnp.concatenate([p["s1_tcn"][b, 0] for b in range(NUM_TCN_BRANCHES)]
                         + [p["s1_max"][0], jnp.ones((cm,), f32)])
    b1 = jnp.concatenate([p["t1_tcn"][b, 0] for b in range(NUM_TCN_BRANCHES)]
                         + [p["t1_max"][0], p["b_1x1"][0]]).reshape(1, tin)
    w1 = w1 * s1[None, :]

    # temporal-conv weights: 3 taps concatenated along the output dim; either
    # stacked per branch (v5e) or block-diagonal over all 4 branches (v6e/v7x).
    wt_branches = [jnp.concatenate([p["wt_tcn"][b, k] for k in range(3)], axis=1)
                   for b in range(NUM_TCN_BRANCHES)]                   # (cm, 3cm)
    if fuse_tconv:
        wt = jnp.zeros((4 * cm, 4 * 3 * cm), f32)
        for b in range(NUM_TCN_BRANCHES):
            wt = wt.at[b * cm:(b + 1) * cm,
                       3 * b * cm:3 * (b + 1) * cm].set(wt_branches[b])
    else:
        wt = jnp.stack(wt_branches)                                    # (4, cm, 3cm)

    # bias added to branch outputs before the transform (tcn branches only)
    bias_pre = jnp.concatenate(
        [p["bt_tcn"][b, 0] for b in range(NUM_TCN_BRANCHES)]
        + [jnp.zeros((2 * cm,), f32)]).reshape(1, tin)

    # add_coeff per joint, zero for the padded joints (rows >= v).
    coeff = jnp.pad(p["coeff"].astype(f32), ((0, vp - v), (0, 0)))     # (vp, 1)

    # transform BN (scale, bias); transform conv with the final BN folded in
    st_tr = jnp.stack([p["s_tr"].reshape(tin), p["t_tr"].reshape(tin)]).astype(f32)
    w_tr = p["w_tr"].reshape(tin, cout) * p["s_bn"]                    # (tin, cout)
    b_out = (p["b_tr"] * p["s_bn"] + p["t_bn"]).reshape(1, cout)

    return [w1.astype(mm_dtype), b1.astype(f32), wt.astype(mm_dtype),
            bias_pre.astype(f32), coeff, st_tr,
            w_tr.astype(mm_dtype), b_out.astype(f32)]


# ---------------------------------------------------------------- wrapper
def dgmstcn_sparse_forward(x, params, *, matmul_dtype=jnp.bfloat16,
                           out_dtype=None, fuse_tconv=True,
                           vmem_limit_bytes=48 * 1024 * 1024):
    n, t, v, cin = x.shape
    cm = params["w1_max"].shape[1]
    cout = params["w_tr"].shape[-1]
    vp = _round_up(v + 1, 8)            # augmented joints padded to a sublane tile
    out_dtype = x.dtype if out_dtype is None else out_dtype

    # pre-pad the joint dim to vp: tile-aligned DMA blocks; the global-mean
    # joint is injected inside the kernel at row v with a sublane select.
    xp = jnp.pad(x, ((0, 0), (0, 0), (0, vp - v), (0, 0)))

    plist = _pack_kernel_params(params, vp, matmul_dtype, fuse_tconv)

    def full_spec(p):
        nd = p.ndim
        # grid-invariant parameters: constant index map (fetched once) and
        # single-buffered so they do not hold 2x VMEM (matters in v7x 64 MiB).
        return pl.BlockSpec(p.shape, lambda i, nd=nd: (0,) * nd,
                            pipeline_mode=pl.Buffered(1))

    # TODO(synk): for production shapes (T~100, V~25, C>=256) add a T-tile grid
    # axis with a dilation-4 halo (overlapping blocks need pl.Element index
    # maps or a manual DMA); unnecessary at demo sizes.
    out_flat = pl.pallas_call(
        _make_kernel(t, v, vp, cin, cm, cout, fuse_tconv),
        out_shape=jax.ShapeDtypeStruct((n, t * vp, cout), out_dtype),
        grid=(n,),
        in_specs=[pl.BlockSpec((1, t, vp, cin), lambda i: (i, 0, 0, 0))]
                 + [full_spec(p) for p in plist],
        out_specs=pl.BlockSpec((1, t * vp, cout), lambda i: (i, 0, 0)),
        compiler_params=pltpu.CompilerParams(
            dimension_semantics=("parallel",),       # samples across megacore TCs
            vmem_limit_bytes=vmem_limit_bytes),
    )(xp, *plist)
    # (N, T*Vp, cout) -> (N, T, V, cout): cheap reshape + slice outside the kernel.
    return out_flat.reshape(n, t, vp, cout)[:, :, :v, :]


# ---------------------------------------------------------------- params
def make_params(key, cin, cout, v, num_branches=NUM_BRANCHES, eps=1e-5):
    cm = cout // num_branches
    rem = cout - cm * (num_branches - 1)
    assert rem == cm, "demo uses out_channels divisible by num_branches"
    tin = cm * num_branches
    ks = iter(jax.random.split(key, 64))

    def nrm(shape, s=0.3):
        return s * jax.random.normal(next(ks), shape, jnp.float32)

    def pos(shape):
        return 0.5 + jnp.abs(jax.random.normal(next(ks), shape, jnp.float32))

    def fold_bn(bias, gamma, beta, mean, var):
        scale = gamma / jnp.sqrt(var + eps)
        return scale, beta + (bias - mean) * scale

    # 4 dilated-tcn branches: conv1x1(+bias) -> BN -> ReLU -> temporal conv(+bias)
    w1_tcn = nrm((4, cin, cm))
    b1, g1, be1 = nrm((4, cm)), 1.0 + nrm((4, cm), 0.1), nrm((4, cm))
    mu1, va1 = nrm((4, cm)), pos((4, cm))
    s1, t1 = fold_bn(b1, g1, be1, mu1, va1)
    wt_tcn, bt = nrm((4, 3, cm, cm)), nrm((4, cm))

    # ('max', 3) branch
    w1m = nrm((cin, cm))
    b1m, g1m, be1m = nrm((cm,)), 1.0 + nrm((cm,), 0.1), nrm((cm,))
    mum, vam = nrm((cm,)), pos((cm,))
    s1m, t1m = fold_bn(b1m, g1m, be1m, mum, vam)

    # '1x1' branch
    w5, b5 = nrm((cin, cm)), nrm((cm,))

    # add_coeff (module inits to zeros; random here to exercise the global path)
    coeff = nrm((v,), 0.2)

    # transform: BN(tin) -> ReLU -> conv1x1(tin -> cout) + bias
    g_t, be_t, mu_t, va_t = 1.0 + nrm((tin,), 0.1), nrm((tin,)), nrm((tin,)), pos((tin,))
    s_t = g_t / jnp.sqrt(va_t + eps)
    t_t = be_t - mu_t * s_t
    w_tr, b_tr = nrm((tin, cout)), nrm((cout,))

    # final BN(cout)
    g_f, be_f, mu_f, va_f = 1.0 + nrm((cout,), 0.1), nrm((cout,)), nrm((cout,)), pos((cout,))
    s_f = g_f / jnp.sqrt(va_f + eps)
    t_f = be_f - mu_f * s_f

    return dict(
        w1_tcn=w1_tcn, s1_tcn=s1.reshape(4, 1, cm), t1_tcn=t1.reshape(4, 1, cm),
        wt_tcn=wt_tcn, bt_tcn=bt.reshape(4, 1, cm),
        w1_max=w1m, s1_max=s1m.reshape(1, cm), t1_max=t1m.reshape(1, cm),
        w_1x1=w5, b_1x1=b5.reshape(1, cm),
        coeff=coeff.reshape(v, 1),
        s_tr=s_t.reshape(num_branches, 1, cm), t_tr=t_t.reshape(num_branches, 1, cm),
        w_tr=w_tr.reshape(num_branches, cm, cout), b_tr=b_tr.reshape(1, cout),
        s_bn=s_f.reshape(1, cout), t_bn=t_f.reshape(1, cout),
    )


# ---------------------------------------------------------------- pure-JAX reference
def reference_forward(x, p):
    n, t, v, cin = x.shape
    xg = x.mean(axis=2, keepdims=True)
    xa = jnp.concatenate([x, xg], axis=2)            # (N, T, V+1, Cin)

    def c1(h, w):
        return jnp.einsum("ntvc,cd->ntvd", h, w)

    outs = []
    for i in range(NUM_TCN_BRANCHES):
        d = i + 1
        y = jnp.maximum(c1(xa, p["w1_tcn"][i]) * p["s1_tcn"][i] + p["t1_tcn"][i], 0.0)
        yp = jnp.pad(y, ((0, 0), (d, d), (0, 0), (0, 0)))
        o = 0.0
        for k in range(3):
            o = o + c1(yp[:, k * d:k * d + t], p["wt_tcn"][i, k])
        outs.append(o + p["bt_tcn"][i])
    y = jnp.maximum(c1(xa, p["w1_max"]) * p["s1_max"] + p["t1_max"], 0.0)
    yp = jnp.pad(y, ((0, 0), (1, 1), (0, 0), (0, 0)), constant_values=-jnp.inf)
    outs.append(jnp.maximum(jnp.maximum(yp[:, 0:t], yp[:, 1:t + 1]), yp[:, 2:t + 2]))
    outs.append(c1(xa, p["w_1x1"]) + p["b_1x1"])
    out = jnp.concatenate(outs, axis=-1)             # (N, T, V+1, tin)

    local = out[:, :, :v, :]
    glob = out[:, :, v, :]                           # (N, T, tin)
    coeff = p["coeff"][:, 0]
    feat = local + glob[:, :, None, :] * coeff[None, None, :, None]

    tin = out.shape[-1]
    s_tr = p["s_tr"].reshape(tin)
    t_tr = p["t_tr"].reshape(tin)
    w_tr = p["w_tr"].reshape(tin, -1)
    yt = jnp.maximum(feat * s_tr + t_tr, 0.0)
    z = jnp.einsum("ntvc,cd->ntvd", yt, w_tr) + p["b_tr"]
    return z * p["s_bn"] + p["t_bn"]


if __name__ == "__main__":
    # PyTorch input would be (N, C, T, V) = (2, 4, 16, 16); kernel layout (N, T, V, C).
    N, CIN, T, V = 2, 4, 16, 16
    COUT = 24                              # 6 branches -> mid = rem = 4
    key = jax.random.PRNGKey(0)
    kx, kp = jax.random.split(key)
    x = jax.random.normal(kx, (N, T, V, CIN), jnp.float32)
    params = make_params(kp, CIN, COUT, V)

    ref = reference_forward(x, params)

    # f32 operands, fused (block-diagonal) temporal conv: tight self-check.
    out = jax.block_until_ready(
        dgmstcn_sparse_forward(x, params, matmul_dtype=jnp.float32))
    assert out.shape == (N, T, V, COUT)
    err = float(jnp.max(jnp.abs(out - ref)))
    assert err < 1e-3, f"f32 fused max abs err {err}"

    # f32 operands, per-branch temporal-conv matmuls (the v5e layout).
    out_u = jax.block_until_ready(
        dgmstcn_sparse_forward(x, params, matmul_dtype=jnp.float32,
                               fuse_tconv=False))
    err_u = float(jnp.max(jnp.abs(out_u - ref)))
    assert err_u < 1e-3, f"f32 unfused max abs err {err_u}"

    # Default path: bf16 MXU operands + bf16 activations in / bf16 out.
    out_b = jax.block_until_ready(
        dgmstcn_sparse_forward(x.astype(jnp.bfloat16), params))
    assert out_b.shape == (N, T, V, COUT) and out_b.dtype == jnp.bfloat16
    err_b = float(jnp.max(jnp.abs(out_b.astype(jnp.float32) - ref)))
    tol_b = 0.1 * (1.0 + float(jnp.max(jnp.abs(ref))))
    assert err_b < tol_b, f"bf16 max abs err {err_b} (tol {tol_b})"

    print("KERNEL_OK")
</pallas_src>

<mosaic_0001>
module attributes {stable_mosaic.version = 11 : i64} {
  func.func @kernel(%arg0: i32, %arg1: memref<1x16x24x4xf32, #tpu.memory_space<vmem>>, %arg2: memref<4x24xf32, #tpu.memory_space<vmem>>, %arg3: memref<1x24xf32, #tpu.memory_space<vmem>>, %arg4: memref<16x48xf32, #tpu.memory_space<vmem>>, %arg5: memref<1x24xf32, #tpu.memory_space<vmem>>, %arg6: memref<24x1xf32, #tpu.memory_space<vmem>>, %arg7: memref<2x24xf32, #tpu.memory_space<vmem>>, %arg8: memref<24x24xf32, #tpu.memory_space<vmem>>, %arg9: memref<1x24xf32, #tpu.memory_space<vmem>>, %arg10: memref<1x384x24xf32, #tpu.memory_space<vmem>>) attributes {dimension_semantics = [#tpu.dimension_semantics<parallel>], iteration_bounds = array<i64: 2>, scalar_prefetch = 0 : i64, scratch_operands = 0 : i64, tpu.core_type = #tpu.core_type<tc>, window_params = [{transform_indices = @transform_0, window_bounds = array<i64: 1, 16, 24, 4>}, {pipeline_mode = #tpu.pipeline_mode<synchronous>, transform_indices = @transform_1, window_bounds = array<i64: 4, 24>}, {pipeline_mode = #tpu.pipeline_mode<synchronous>, transform_indices = @transform_2, window_bounds = array<i64: 1, 24>}, {pipeline_mode = #tpu.pipeline_mode<synchronous>, transform_indices = @transform_3, window_bounds = array<i64: 16, 48>}, {pipeline_mode = #tpu.pipeline_mode<synchronous>, transform_indices = @transform_4, window_bounds = array<i64: 1, 24>}, {pipeline_mode = #tpu.pipeline_mode<synchronous>, transform_indices = @transform_5, window_bounds = array<i64: 24, 1>}, {pipeline_mode = #tpu.pipeline_mode<synchronous>, transform_indices = @transform_6, window_bounds = array<i64: 2, 24>}, {pipeline_mode = #tpu.pipeline_mode<synchronous>, transform_indices = @transform_7, window_bounds = array<i64: 24, 24>}, {pipeline_mode = #tpu.pipeline_mode<synchronous>, transform_indices = @transform_8, window_bounds = array<i64: 1, 24>}, {transform_indices = @transform_9, window_bounds = array<i64: 1, 384, 24>}]} {
    %0 = tpu.iota {dimensions = array<i32: 0>} : vector<384x1xi32>
    %c0 = arith.constant 0 : index
    %c0_0 = arith.constant 0 : index
    %c0_1 = arith.constant 0 : index
    %c0_2 = arith.constant 0 : index
    %1 = vector.load %arg1[%c0, %c0_0, %c0_1, %c0_2] : memref<1x16x24x4xf32, #tpu.memory_space<vmem>>, vector<1x16x24x4xf32>
    %2 = vector.shape_cast %1 : vector<1x16x24x4xf32> to vector<16x24x4xf32>
    %cst = arith.constant dense<0.000000e+00> : vector<16x4xf32>
    %3 = vector.multi_reduction <add>, %2, %cst [1] : vector<16x24x4xf32> to vector<16x4xf32>
    %4 = vector.shape_cast %3 : vector<16x4xf32> to vector<16x1x4xf32>
    %cst_3 = arith.constant 6.250000e-02 : f32
    %5 = vector.broadcast %cst_3 : f32 to vector<16x1x4xf32>
    %6 = arith.mulf %4, %5 : vector<16x1x4xf32>
    %7 = tpu.iota {dimensions = array<i32: 0>} : vector<24x1xi32>
    %c16_i32 = arith.constant 16 : i32
    %8 = vector.broadcast %c16_i32 : i32 to vector<24x1xi32>
    %9 = arith.cmpi eq, %7, %8 : vector<24x1xi32>
    %10 = vector.shape_cast %9 : vector<24x1xi1> to vector<1x24x1xi1>
    %11 = vector.broadcast %10 : vector<1x24x1xi1> to vector<16x24x4xi1>
    %12 = vector.shape_cast %6 : vector<16x1x4xf32> to vector<16x1x4xf32>
    %13 = vector.broadcast %12 : vector<16x1x4xf32> to vector<16x24x4xf32>
    %14 = arith.select %11, %13, %2 : vector<16x24x4xi1>, vector<16x24x4xf32>
    %15 = vector.shape_cast %14 : vector<16x24x4xf32> to vector<384x4xf32>
    %c0_4 = arith.constant 0 : index
    %c0_5 = arith.constant 0 : index
    %16 = vector.load %arg2[%c0_4, %c0_5] : memref<4x24xf32, #tpu.memory_space<vmem>>, vector<4x24xf32>
    %cst_6 = arith.constant dense<0.000000e+00> : vector<384x24xf32>
    %17 = tpu.matmul %15, %16, %cst_6 {dimension_numbers = #tpu.dot_dimension_numbers<[1], [0], [0], [1], [0, 0, 1, 1], [], []>} : vector<384x4xf32>, vector<4x24xf32>, vector<384x24xf32> -> vector<384x24xf32>
    %c0_7 = arith.constant 0 : index
    %c0_8 = arith.constant 0 : index
    %18 = vector.load %arg3[%c0_7, %c0_8] : memref<1x24xf32, #tpu.memory_space<vmem>>, vector<1x24xf32>
    %19 = vector.shape_cast %18 : vector<1x24xf32> to vector<24xf32>
    %20 = vector.shape_cast %19 : vector<24xf32> to vector<1x24xf32>
    %21 = vector.broadcast %20 : vector<1x24xf32> to vector<384x24xf32>
    %22 = arith.addf %17, %21 : vector<384x24xf32>
    %23 = tpu.iota {dimensions = array<i32: 1>} : vector<1x24xi32>
    %c20_i32 = arith.constant 20 : i32
    %24 = vector.broadcast %c20_i32 : i32 to vector<1x24xi32>
    %25 = arith.cmpi slt, %23, %24 : vector<1x24xi32>
    %cst_9 = arith.constant 0.000000e+00 : f32
    %26 = vector.broadcast %cst_9 : f32 to vector<384x24xf32>
    %27 = arith.maximumf %22, %26 : vector<384x24xf32>
    %28 = vector.shape_cast %25 : vector<1x24xi1> to vector<1x24xi1>
    %29 = vector.broadcast %28 : vector<1x24xi1> to vector<384x24xi1>
    %30 = arith.select %29, %27, %22 : vector<384x24xi1>, vector<384x24xf32>
    %31 = vector.extract_strided_slice %30 {offsets = [0, 0], sizes = [384, 16], strides = [1, 1]} : vector<384x24xf32> to vector<384x16xf32>
    %c0_10 = arith.constant 0 : index
    %c0_11 = arith.constant 0 : index
    %32 = vector.load %arg4[%c0_10, %c0_11] : memref<16x48xf32, #tpu.memory_space<vmem>>, vector<16x48xf32>
    %cst_12 = arith.constant dense<0.000000e+00> : vector<384x48xf32>
    %33 = tpu.matmul %31, %32, %cst_12 {dimension_numbers = #tpu.dot_dimension_numbers<[1], [0], [0], [1], [0, 0, 1, 1], [], []>} : vector<384x16xf32>, vector<16x48xf32>, vector<384x48xf32> -> vector<384x48xf32>
    %34 = vector.extract_strided_slice %33 {offsets = [0, 0], sizes = [384, 12], strides = [1, 1]} : vector<384x48xf32> to vector<384x12xf32>
    %35 = vector.extract_strided_slice %34 {offsets = [0, 0], sizes = [384, 4], strides = [1, 1]} : vector<384x12xf32> to vector<384x4xf32>
    %c24_i32 = arith.constant 24 : i32
    %36 = tpu.dynamic_rotate %35 by %c24_i32 dim 0 : vector<384x4xf32>, i32 -> vector<384x4xf32>
    %c24_i32_13 = arith.constant 24 : i32
    %37 = vector.broadcast %c24_i32_13 : i32 to vector<384x1xi32>
    %38 = arith.cmpi sge, %0, %37 : vector<384x1xi32>
    %cst_14 = arith.constant 0.000000e+00 : f32
    %39 = vector.shape_cast %38 : vector<384x1xi1> to vector<384x1xi1>
    %40 = vector.broadcast %39 : vector<384x1xi1> to vector<384x4xi1>
    %41 = vector.broadcast %cst_14 : f32 to vector<384x4xf32>
    %42 = arith.select %40, %36, %41 : vector<384x4xi1>, vector<384x4xf32>
    %43 = vector.extract_strided_slice %34 {offsets = [0, 4], sizes = [384, 4], strides = [1, 1]} : vector<384x12xf32> to vector<384x4xf32>
    %44 = arith.addf %42, %43 : vector<384x4xf32>
    %45 = vector.extract_strided_slice %34 {offsets = [0, 8], sizes = [384, 4], strides = [1, 1]} : vector<384x12xf32> to vector<384x4xf32>
    %c360_i32 = arith.constant 360 : i32
    %46 = tpu.dynamic_rotate %45 by %c360_i32 dim 0 : vector<384x4xf32>, i32 -> vector<384x4xf32>
    %c360_i32_15 = arith.constant 360 : i32
    %47 = vector.broadcast %c360_i32_15 : i32 to vector<384x1xi32>
    %48 = arith.cmpi slt, %0, %47 : vector<384x1xi32>
    %cst_16 = arith.constant 0.000000e+00 : f32
    %49 = vector.shape_cast %48 : vector<384x1xi1> to vector<384x1xi1>
    %50 = vector.broadcast %49 : vector<384x1xi1> to vector<384x4xi1>
    %51 = vector.broadcast %cst_16 : f32 to vector<384x4xf32>
    %52 = arith.select %50, %46, %51 : vector<384x4xi1>, vector<384x4xf32>
    %53 = arith.addf %44, %52 : vector<384x4xf32>
    %54 = vector.extract_strided_slice %33 {offsets = [0, 12], sizes = [384, 12], strides = [1, 1]} : vector<384x48xf32> to vector<384x12xf32>
    %55 = vector.extract_strided_slice %54 {offsets = [0, 0], sizes = [384, 4], strides = [1, 1]} : vector<384x12xf32> to vector<384x4xf32>
    %c48_i32 = arith.constant 48 : i32
    %56 = tpu.dynamic_rotate %55 by %c48_i32 dim 0 : vector<384x4xf32>, i32 -> vector<384x4xf32>
    %c48_i32_17 = arith.constant 48 : i32
    %57 = vector.broadcast %c48_i32_17 : i32 to vector<384x1xi32>
    %58 = arith.cmpi sge, %0, %57 : vector<384x1xi32>
    %cst_18 = arith.constant 0.000000e+00 : f32
    %59 = vector.shape_cast %58 : vector<384x1xi1> to vector<384x1xi1>
    %60 = vector.broadcast %59 : vector<384x1xi1> to vector<384x4xi1>
    %61 = vector.broadcast %cst_18 : f32 to vector<384x4xf32>
    %62 = arith.select %60, %56, %61 : vector<384x4xi1>, vector<384x4xf32>
    %63 = vector.extract_strided_slice %54 {offsets = [0, 4], sizes = [384, 4], strides = [1, 1]} : vector<384x12xf32> to vector<384x4xf32>
    %64 = arith.addf %62, %63 : vector<384x4xf32>
    %65 = vector.extract_strided_slice %54 {offsets = [0, 8], sizes = [384, 4], strides = [1, 1]} : vector<384x12xf32> to vector<384x4xf32>
    %c336_i32 = arith.constant 336 : i32
    %66 = tpu.dynamic_rotate %65 by %c336_i32 dim 0 : vector<384x4xf32>, i32 -> vector<384x4xf32>
    %c336_i32_19 = arith.constant 336 : i32
    %67 = vector.broadcast %c336_i32_19 : i32 to vector<384x1xi32>
    %68 = arith.cmpi slt, %0, %67 : vector<384x1xi32>
    %cst_20 = arith.constant 0.000000e+00 : f32
    %69 = vector.shape_cast %68 : vector<384x1xi1> to vector<384x1xi1>
    %70 = vector.broadcast %69 : vector<384x1xi1> to vector<384x4xi1>
    %71 = vector.broadcast %cst_20 : f32 to vector<384x4xf32>
    %72 = arith.select %70, %66, %71 : vector<384x4xi1>, vector<384x4xf32>
    %73 = arith.addf %64, %72 : vector<384x4xf32>
    %74 = vector.extract_strided_slice %33 {offsets = [0, 24], sizes = [384, 12], strides = [1, 1]} : vector<384x48xf32> to vector<384x12xf32>
    %75 = vector.extract_strided_slice %74 {offsets = [0, 0], sizes = [384, 4], strides = [1, 1]} : vector<384x12xf32> to vector<384x4xf32>
    %c72_i32 = arith.constant 72 : i32
    %76 = tpu.dynamic_rotate %75 by %c72_i32 dim 0 : vector<384x4xf32>, i32 -> vector<384x4xf32>
    %c72_i32_21 = arith.constant 72 : i32
    %77 = vector.broadcast %c72_i32_21 : i32 to vector<384x1xi32>
    %78 = arith.cmpi sge, %0, %77 : vector<384x1xi32>
    %cst_22 = arith.constant 0.000000e+00 : f32
    %79 = vector.shape_cast %78 : vector<384x1xi1> to vector<384x1xi1>
    %80 = vector.broadcast %79 : vector<384x1xi1> to vector<384x4xi1>
    %81 = vector.broadcast %cst_22 : f32 to vector<384x4xf32>
    %82 = arith.select %80, %76, %81 : vector<384x4xi1>, vector<384x4xf32>
    %83 = vector.extract_strided_slice %74 {offsets = [0, 4], sizes = [384, 4], strides = [1, 1]} : vector<384x12xf32> to vector<384x4xf32>
    %84 = arith.addf %82, %83 : vector<384x4xf32>
    %85 = vector.extract_strided_slice %74 {offsets = [0, 8], sizes = [384, 4], strides = [1, 1]} : vector<384x12xf32> to vector<384x4xf32>
    %c312_i32 = arith.constant 312 : i32
    %86 = tpu.dynamic_rotate %85 by %c312_i32 dim 0 : vector<384x4xf32>, i32 -> vector<384x4xf32>
    %c312_i32_23 = arith.constant 312 : i32
    %87 = vector.broadcast %c312_i32_23 : i32 to vector<384x1xi32>
    %88 = arith.cmpi slt, %0, %87 : vector<384x1xi32>
    %cst_24 = arith.constant 0.000000e+00 : f32
    %89 = vector.shape_cast %88 : vector<384x1xi1> to vector<384x1xi1>
    %90 = vector.broadcast %89 : vector<384x1xi1> to vector<384x4xi1>
    %91 = vector.broadcast %cst_24 : f32 to vector<384x4xf32>
    %92 = arith.select %90, %86, %91 : vector<384x4xi1>, vector<384x4xf32>
    %93 = arith.addf %84, %92 : vector<384x4xf32>
    %94 = vector.extract_strided_slice %33 {offsets = [0, 36], sizes = [384, 12], strides = [1, 1]} : vector<384x48xf32> to vector<384x12xf32>
    %95 = vector.extract_strided_slice %94 {offsets = [0, 0], sizes = [384, 4], strides = [1, 1]} : vector<384x12xf32> to vector<384x4xf32>
    %c96_i32 = arith.constant 96 : i32
    %96 = tpu.dynamic_rotate %95 by %c96_i32 dim 0 : vector<384x4xf32>, i32 -> vector<384x4xf32>
    %c96_i32_25 = arith.constant 96 : i32
    %97 = vector.broadcast %c96_i32_25 : i32 to vector<384x1xi32>
    %98 = arith.cmpi sge, %0, %97 : vector<384x1xi32>
    %cst_26 = arith.constant 0.000000e+00 : f32
    %99 = vector.shape_cast %98 : vector<384x1xi1> to vector<384x1xi1>
    %100 = vector.broadcast %99 : vector<384x1xi1> to vector<384x4xi1>
    %101 = vector.broadcast %cst_26 : f32 to vector<384x4xf32>
    %102 = arith.select %100, %96, %101 : vector<384x4xi1>, vector<384x4xf32>
    %103 = vector.extract_strided_slice %94 {offsets = [0, 4], sizes = [384, 4], strides = [1, 1]} : vector<384x12xf32> to vector<384x4xf32>
    %104 = arith.addf %102, %103 : vector<384x4xf32>
    %105 = vector.extract_strided_slice %94 {offsets = [0, 8], sizes = [384, 4], strides = [1, 1]} : vector<384x12xf32> to vector<384x4xf32>
    %c288_i32 = arith.constant 288 : i32
    %106 = tpu.dynamic_rotate %105 by %c288_i32 dim 0 : vector<384x4xf32>, i32 -> vector<384x4xf32>
    %c288_i32_27 = arith.constant 288 : i32
    %107 = vector.broadcast %c288_i32_27 : i32 to vector<384x1xi32>
    %108 = arith.cmpi slt, %0, %107 : vector<384x1xi32>
    %cst_28 = arith.constant 0.000000e+00 : f32
    %109 = vector.shape_cast %108 : vector<384x1xi1> to vector<384x1xi1>
    %110 = vector.broadcast %109 : vector<384x1xi1> to vector<384x4xi1>
    %111 = vector.broadcast %cst_28 : f32 to vector<384x4xf32>
    %112 = arith.select %110, %106, %111 : vector<384x4xi1>, vector<384x4xf32>
    %113 = arith.addf %104, %112 : vector<384x4xf32>
    %114 = vector.extract_strided_slice %30 {offsets = [0, 16], sizes = [384, 4], strides = [1, 1]} : vector<384x24xf32> to vector<384x4xf32>
    %c24_i32_29 = arith.constant 24 : i32
    %115 = tpu.dynamic_rotate %114 by %c24_i32_29 dim 0 : vector<384x4xf32>, i32 -> vector<384x4xf32>
    %c24_i32_30 = arith.constant 24 : i32
    %116 = vector.broadcast %c24_i32_30 : i32 to vector<384x1xi32>
    %117 = arith.cmpi sge, %0, %116 : vector<384x1xi32>
    %cst_31 = arith.constant 0.000000e+00 : f32
    %118 = vector.shape_cast %117 : vector<384x1xi1> to vector<384x1xi1>
    %119 = vector.broadcast %118 : vector<384x1xi1> to vector<384x4xi1>
    %120 = vector.broadcast %cst_31 : f32 to vector<384x4xf32>
    %121 = arith.select %119, %115, %120 : vector<384x4xi1>, vector<384x4xf32>
    %122 = arith.maximumf %121, %114 : vector<384x4xf32>
    %c360_i32_32 = arith.constant 360 : i32
    %123 = tpu.dynamic_rotate %114 by %c360_i32_32 dim 0 : vector<384x4xf32>, i32 -> vector<384x4xf32>
    %c360_i32_33 = arith.constant 360 : i32
    %124 = vector.broadcast %c360_i32_33 : i32 to vector<384x1xi32>
    %125 = arith.cmpi slt, %0, %124 : vector<384x1xi32>
    %cst_34 = arith.constant 0.000000e+00 : f32
    %126 = vector.shape_cast %125 : vector<384x1xi1> to vector<384x1xi1>
    %127 = vector.broadcast %126 : vector<384x1xi1> to vector<384x4xi1>
    %128 = vector.broadcast %cst_34 : f32 to vector<384x4xf32>
    %129 = arith.select %127, %123, %128 : vector<384x4xi1>, vector<384x4xf32>
    %130 = arith.maximumf %122, %129 : vector<384x4xf32>
    %131 = vector.extract_strided_slice %30 {offsets = [0, 20], sizes = [384, 4], strides = [1, 1]} : vector<384x24xf32> to vector<384x4xf32>
    %132 = tpu.concatenate %53, %73, %93, %113, %130, %131 in 1 : vector<384x4xf32>, vector<384x4xf32>, vector<384x4xf32>, vector<384x4xf32>, vector<384x4xf32>, vector<384x4xf32> -> vector<384x24xf32>
    %c0_35 = arith.constant 0 : index
    %c0_36 = arith.constant 0 : index
    %133 = vector.load %arg5[%c0_35, %c0_36] : memref<1x24xf32, #tpu.memory_space<vmem>>, vector<1x24xf32>
    %134 = vector.shape_cast %133 : vector<1x24xf32> to vector<24xf32>
    %135 = vector.shape_cast %134 : vector<24xf32> to vector<1x24xf32>
    %136 = vector.broadcast %135 : vector<1x24xf32> to vector<384x24xf32>
    %137 = arith.addf %132, %136 : vector<384x24xf32>
    %138 = vector.shape_cast %137 : vector<384x24xf32> to vector<16x24x24xf32>
    %139 = vector.extract_strided_slice %138 {offsets = [0, 16, 0], sizes = [16, 1, 24], strides = [1, 1, 1]} : vector<16x24x24xf32> to vector<16x1x24xf32>
    %c0_37 = arith.constant 0 : index
    %c0_38 = arith.constant 0 : index
    %140 = vector.load %arg6[%c0_37, %c0_38] : memref<24x1xf32, #tpu.memory_space<vmem>>, vector<24x1xf32>
    %141 = vector.shape_cast %140 : vector<24x1xf32> to vector<1x24x1xf32>
    %142 = vector.broadcast %139 : vector<16x1x24xf32> to vector<16x24x24xf32>
    %143 = vector.broadcast %141 : vector<1x24x1xf32> to vector<16x24x24xf32>
    %144 = arith.mulf %142, %143 : vector<16x24x24xf32>
    %145 = arith.addf %138, %144 : vector<16x24x24xf32>
    %c0_39 = arith.constant 0 : index
    %c0_40 = arith.constant 0 : index
    %146 = vector.load %arg7[%c0_39, %c0_40] : memref<2x24xf32, #tpu.memory_space<vmem>>, vector<1x24xf32>
    %147 = vector.shape_cast %146 : vector<1x24xf32> to vector<24xf32>
    %148 = vector.shape_cast %147 : vector<24xf32> to vector<1x1x24xf32>
    %149 = vector.broadcast %148 : vector<1x1x24xf32> to vector<16x24x24xf32>
    %150 = arith.mulf %145, %149 : vector<16x24x24xf32>
    %c1 = arith.constant 1 : index
    %c0_41 = arith.constant 0 : index
    %151 = vector.load %arg7[%c1, %c0_41] : memref<2x24xf32, #tpu.memory_space<vmem>>, vector<1x24xf32>
    %152 = vector.shape_cast %151 : vector<1x24xf32> to vector<24xf32>
    %153 = vector.shape_cast %152 : vector<24xf32> to vector<1x1x24xf32>
    %154 = vector.broadcast %153 : vector<1x1x24xf32> to vector<16x24x24xf32>
    %155 = arith.addf %150, %154 : vector<16x24x24xf32>
    %cst_42 = arith.constant 0.000000e+00 : f32
    %156 = vector.broadcast %cst_42 : f32 to vector<16x24x24xf32>
    %157 = arith.maximumf %155, %156 : vector<16x24x24xf32>
    %158 = vector.shape_cast %157 : vector<16x24x24xf32> to vector<384x24xf32>
    %c0_43 = arith.constant 0 : index
    %c0_44 = arith.constant 0 : index
    %159 = vector.load %arg8[%c0_43, %c0_44] : memref<24x24xf32, #tpu.memory_space<vmem>>, vector<24x24xf32>
    %cst_45 = arith.constant dense<0.000000e+00> : vector<384x24xf32>
    %160 = tpu.matmul %158, %159, %cst_45 {dimension_numbers = #tpu.dot_dimension_numbers<[1], [0], [0], [1], [0, 0, 1, 1], [], []>} : vector<384x24xf32>, vector<24x24xf32>, vector<384x24xf32> -> vector<384x24xf32>
    %c0_46 = arith.constant 0 : index
    %c0_47 = arith.constant 0 : index
    %161 = vector.load %arg9[%c0_46, %c0_47] : memref<1x24xf32, #tpu.memory_space<vmem>>, vector<1x24xf32>
    %162 = vector.shape_cast %161 : vector<1x24xf32> to vector<24xf32>
    %163 = vector.shape_cast %162 : vector<24xf32> to vector<1x24xf32>
    %164 = vector.broadcast %163 : vector<1x24xf32> to vector<384x24xf32>
    %165 = arith.addf %160, %164 : vector<384x24xf32>
    %c0_48 = arith.constant 0 : index
    %c0_49 = arith.constant 0 : index
    %c0_50 = arith.constant 0 : index
    %166 = vector.load %arg10[%c0_48, %c0_49, %c0_50] : memref<1x384x24xf32, #tpu.memory_space<vmem>>, vector<1x384x24xf32>
    %167 = vector.shape_cast %166 : vector<1x384x24xf32> to vector<384x24xf32>
    %168 = vector.shape_cast %165 : vector<384x24xf32> to vector<1x384x24xf32>
    tpu.vector_store %arg10[%c0_48, %c0_49, %c0_50], %168 {strides = array<i32>} : memref<1x384x24xf32, #tpu.memory_space<vmem>>, vector<1x384x24xf32>,
    return
  }
  func.func @transform_0(%arg0: i32) -> (i32, i32, i32, i32) {
    %c0_i32 = arith.constant 0 : i32
    %c0_i32_0 = arith.constant 0 : i32
    %c0_i32_1 = arith.constant 0 : i32
    %c0_i32_2 = arith.constant 0 : i32
    return %arg0, %c0_i32, %c0_i32_0, %c0_i32_1 : i32, i32, i32, i32
  }
  func.func @transform_1(%arg0: i32) -> (i32, i32) {
    %c0_i32 = arith.constant 0 : i32
    %c0_i32_0 = arith.constant 0 : i32
    %c0_i32_1 = arith.constant 0 : i32
    return %c0_i32, %c0_i32_0 : i32, i32
  }
  func.func @transform_2(%arg0: i32) -> (i32, i32) {
    %c0_i32 = arith.constant 0 : i32
    %c0_i32_0 = arith.constant 0 : i32
    %c0_i32_1 = arith.constant 0 : i32
    return %c0_i32, %c0_i32_0 : i32, i32
  }
  func.func @transform_3(%arg0: i32) -> (i32, i32) {
    %c0_i32 = arith.constant 0 : i32
    %c0_i32_0 = arith.constant 0 : i32
    %c0_i32_1 = arith.constant 0 : i32
    return %c0_i32, %c0_i32_0 : i32, i32
  }
  func.func @transform_4(%arg0: i32) -> (i32, i32) {
    %c0_i32 = arith.constant 0 : i32
    %c0_i32_0 = arith.constant 0 : i32
    %c0_i32_1 = arith.constant 0 : i32
    return %c0_i32, %c0_i32_0 : i32, i32
  }
  func.func @transform_5(%arg0: i32) -> (i32, i32) {
    %c0_i32 = arith.constant 0 : i32
    %c0_i32_0 = arith.constant 0 : i32
    %c0_i32_1 = arith.constant 0 : i32
    return %c0_i32, %c0_i32_0 : i32, i32
  }
  func.func @transform_6(%arg0: i32) -> (i32, i32) {
    %c0_i32 = arith.constant 0 : i32
    %c0_i32_0 = arith.constant 0 : i32
    %c0_i32_1 = arith.constant 0 : i32
    return %c0_i32, %c0_i32_0 : i32, i32
  }
  func.func @transform_7(%arg0: i32) -> (i32, i32) {
    %c0_i32 = arith.constant 0 : i32
    %c0_i32_0 = arith.constant 0 : i32
    %c0_i32_1 = arith.constant 0 : i32
    return %c0_i32, %c0_i32_0 : i32, i32
  }
  func.func @transform_8(%arg0: i32) -> (i32, i32) {
    %c0_i32 = arith.constant 0 : i32
    %c0_i32_0 = arith.constant 0 : i32
    %c0_i32_1 = arith.constant 0 : i32
    return %c0_i32, %c0_i32_0 : i32, i32
  }
  func.func @transform_9(%arg0: i32) -> (i32, i32, i32) {
    %c0_i32 = arith.constant 0 : i32
    %c0_i32_0 = arith.constant 0 : i32
    %c0_i32_1 = arith.constant 0 : i32
    return %arg0, %c0_i32, %c0_i32_0 : i32, i32, i32
  }
}

</mosaic_0001>

<bundles_post_ra>
// kernel: tpu_custom_call.1
= control target key start
LH: loop header
LB: loop body
LE: loop exit
PB: predicated region body
PF: predicated region fallthrough
CT: control target
= control target key end

     0   :  { %s7322_s30 = smov 0   ;;  %s11896_s0 = inlined_call_operand.vmem [shape: f32[2,16,24,4], index: 0, kind: input, shape index: {}]   ;;  %s11897_s1 = inlined_call_operand.vmem [shape: f32[4,24], index: 1, kind: input, shape index: {}]   ;;  %s11898_s2 = inlined_call_operand.vmem [shape: f32[1,24], index: 2, kind: input, shape index: {}]   ;;  %s11899_s3 = inlined_call_operand.vmem [shape: f32[16,48], index: 3, kind: input, shape index: {}]   ;;  %s11900_s4 = inlined_call_operand.vmem [shape: f32[1,24], index: 4, kind: input, shape index: {}]   ;;  %s11901_s5 = inlined_call_operand.vmem [shape: f32[24,1], index: 5, kind: input, shape index: {}]   ;;  %s11902_s6 = inlined_call_operand.vmem [shape: f32[2,24], index: 6, kind: input, shape index: {}]   ;;  %s11903_s7 = inlined_call_operand.vmem [shape: f32[24,24], index: 7, kind: input, shape index: {}]   ;;  %s11904_s8 = inlined_call_operand.vmem [shape: f32[1,24], index: 8, kind: input, shape index: {}]   ;;  %s11905_s9 = inlined_call_operand.vmem [shape: f32[2,384,24], index: 9, kind: output, shape index: {}]  }
   0x1 LB: > { %s7048_s10 = sadd.s32 4294967295, %s7254_s30   ;;  %p7052_p0 = scmp.ge.s32.totalorder %s7254_s30, 1  ;;  %s7254_s30 = sphi %s7322_s30, %s19_s30  }
   0x2   : > { %p287_p1 = scmp.lt.s32.totalorder %s7254_s30, 3 }
   0x4   : > { %p288_p2 = pnand %p7052_p0, %p287_p1 }
   0x6   : > { %291 = sbr.rel (%p288_p2) target bundleno = 2450 (0x992), region = 56 }
   0xb   : > { %v680_v0 = vld [vmem:[%s11897_s1] sm:$0xf]  ;;  %vm829_vm0 = vcmask 1043456   ;;  %p323_p3 = scmp.lt.s32.totalorder %s7048_s10, 1  ;;  %vm430_vm1 = vcmask 31744   ;;  %v333_v14 = vlaneseq  ;;  %v1096_v61 = vld [vmem:[%s11899_s3 + $0x8] sm:$0xff] }
   0xc   : > { %7055 = vmatpush.msk.msra.mxu0 %vm829_vm0, %v680_v0  ;;  %7202 = vmatpush.msk.msra.mxu3 %vm829_vm0, %v680_v0  ;;  %v1095_v63 = vld [vmem:[%s11899_s3] sm:$0xff]  ;;  %vm1097_vm4 = vcmask 130048   ;;  %s7256_s23 = smov 124   ;;  %s7257_s24 = smov 116   ;;  %vm6107_vm5 = vcmask 64512   ;;  %vm6156_vm6 = vcmask 97280  }
   0xd   : > { %s13256_s10 = smov (!%p323_p3, %s7048_s10), 1  ;;  %v334_v19 = vshrl.u32 %v333_v14, 7  ;;  %1256 = vmatpush.msra.mxu1 %v1096_v61  ;;  %s7258_s25 = smov 112   ;;  %vm6253_vm7 = vcmask 162816   ;;  %vm6639_vm8 = vcmask 195584  }
   0xe   : > { %s7208_s13 = smul.u32 384, %s13256_s10  ;;  %7203 = vmatpush.msrb.mxu3 %v1096_v61  ;;  %s7259_s26 = smov 104  }
   0xf   : > { %v7358_v23 = vadd.s32 16, %v334_v19  ;;  %1257 = vmatpush.msra.mxu1 %v1095_v63  ;;  %s7260_s27 = smov 120   ;;  %s7261_s28 = smov 108  }
  0x10   : > { %s7341_s16 = scalar_lea.vmem %s11896_s0, %s7208_s13  ;;  %7204 = vmatpush.msrb.mxu3 %v1095_v63  ;;  %s7262_s12 = smov 100  }
  0x11   : > { %v382_v1 = vld [vmem:[%s7341_s16] sm:$0xff]  ;;  %v383_v2 = vld [vmem:[%s7341_s16 + $0x8] sm:$0xff]  ;;  %v384_v3 = vld [vmem:[%s7341_s16 + $0x10] sm:$0xff]  ;;  %vm625_vm2 = vcmp.eq.s32.totalorder %v7358_v23, 16  ;;  %s7263_s14 = smov 96   ;;  %s7264_s15 = smov 92  }
  0x12   : > { %v431_v4 = vsel %vm430_vm1, %v382_v1, 0.0  ;;  %7056 = vmatmul.msk.f32.vlgmr.msra.gmra.mxu0 %vm430_vm1, %v382_v1  ;;  %v432_v5 = vsel %vm430_vm1, %v383_v2, 0.0  ;;  %v434_v6 = vsel %vm430_vm1, %v384_v3, 0.0  ;;  %v385_v7 = vld [vmem:[%s7341_s16 + $0x18] sm:$0xff]  ;;  %v386_v8 = vld [vmem:[%s7341_s16 + $0x20] sm:$0xff]  ;;  %v387_v13 = vld [vmem:[%s7341_s16 + $0x28] sm:$0xff]  ;;  %s10997_s11 = scalar_lea.vmem %s11905_s9, %s7208_s13 }
  0x13   : > { %v433_v9 = vadd.f32 %v432_v5, %v431_v4  ;;  %v442_v10 = vsel %vm430_vm1, %v385_v7, 0.0  ;;  %v443_v11 = vsel %vm430_vm1, %v386_v8, 0.0  ;;  %v445_v17 = vsel %vm430_vm1, %v387_v13, 0.0  ;;  %v389_v31 = vld [vmem:[%s7341_s16 + $0x38] sm:$0xff]  ;;  %v388_v33 = vld [vmem:[%s7341_s16 + $0x30] sm:$0xff]  ;;  %v390_v36 = vld [vmem:[%s7341_s16 + $0x40] sm:$0xff] }
  0x14   : > { %v444_v16 = vadd.f32 %v443_v11, %v442_v10  ;;  %v453_v34 = vsel %vm430_vm1, %v388_v33, 0.0  ;;  %v454_v35 = vsel %vm430_vm1, %v389_v31, 0.0  ;;  %v456_v39 = vsel %vm430_vm1, %v390_v36, 0.0  ;;  %v391_v52 = vld [vmem:[%s7341_s16 + $0x48] sm:$0xff]  ;;  %v392_v54 = vld [vmem:[%s7341_s16 + $0x50] sm:$0xff]  ;;  %v393_v57 = vld [vmem:[%s7341_s16 + $0x58] sm:$0xff] }
  0x15   : > { %v435_v12 = vadd.f32 %v434_v6, %v433_v9  ;;  %v455_v38 = vadd.f32 %v454_v35, %v453_v34  ;;  %v464_v53 = vsel %vm430_vm1, %v391_v52, 0.0  ;;  %v465_v55 = vsel %vm430_vm1, %v392_v54, 0.0  ;;  %v7400_v6 = vld [vmem:[%s11898_s2] ss:$0 sm:$0xff]  ;;  %s7266_s17 = smov 84   ;;  %s7267_s18 = smov 4  }
  0x16   : > { %v446_v21 = vadd.f32 %v445_v17, %v444_v16  ;;  %v466_v56 = vadd.f32 %v465_v55, %v464_v53  ;;  %v467_v58 = vsel %vm430_vm1, %v393_v57, 0.0  ;;  %s7269_s19 = smov 12   ;;  %s7270_s20 = smov 16  }
  0x17   : > { %v436_v15 = vrot.slane %v435_v12, 4  ;;  %v457_v41 = vadd.f32 %v456_v39, %v455_v38  ;;  %s7271_s21 = smov 8  }
  0x18   : > { %v447_v25 = vrot.slane %v446_v21, 4  ;;  %v468_v59 = vadd.f32 %v467_v58, %v466_v56 }
  0x19   : > { %v437_v18 = vadd.f32 %v436_v15, %v435_v12  ;;  %v458_v43 = vrot.slane %v457_v41, 4 }
  0x1a   : > { %7057 = vmatmul.msk.f32.gmra.mxu0 %vm430_vm1, %v383_v2  ;;  %v448_v28 = vadd.f32 %v447_v25, %v446_v21  ;;  %v469_v60 = vrot.slane %v468_v59, 4 }
  0x1b   : > { %v438_v20 = vrot.slane %v437_v18, 2  ;;  %v459_v45 = vadd.f32 %v458_v43, %v457_v41 }
  0x1c   : > { %v449_v30 = vrot.slane %v448_v28, 2  ;;  %v470_v62 = vadd.f32 %v469_v60, %v468_v59 }
  0x1d   : > { %v439_v22 = vadd.f32 %v438_v20, %v437_v18  ;;  %v460_v46 = vrot.slane %v459_v45, 2  ;;  %v396_v20 = vld [vmem:[%s7341_s16 + $0x70] sm:$0xff] }
  0x1e   : > { %v450_v32 = vadd.f32 %v449_v30, %v448_v28  ;;  %v471_v0 = vrot.slane %v470_v62, 2 }
  0x1f   : > { %v440_v24 = vrot.slane %v439_v22, 1  ;;  %v461_v47 = vadd.f32 %v460_v46, %v459_v45  ;;  %v398_v46 = vld [vmem:[%s7341_s16 + $0x80] sm:$0xff] }
  0x20   : > { %v451_v37 = vrot.slane %v450_v32, 1  ;;  %v472_v1 = vadd.f32 %v471_v0, %v470_v62 }
  0x21   : > { %v441_v26 = vadd.f32 %v440_v24, %v439_v22  ;;  %v462_v48 = vrot.slane %v461_v47, 1  ;;  %v478_v22 = vsel %vm430_vm1, %v396_v20, 0.0 }
  0x22   : > { %v452_v40 = vadd.f32 %v451_v37, %v450_v32  ;;  %v473_v2 = vrot.slane %v472_v1, 1 }
  0x23   : > { %v607_v27 = vmul.f32 0.0625, %v441_v26  ;;  %v463_v49 = vadd.f32 %v462_v48, %v461_v47  ;;  %v487_v47 = vsel %vm430_vm1, %v398_v46, 0.0 }
  0x24   : > { %v608_v42 = vmul.f32 0.0625, %v452_v40 }
  0x25   : > { %v634_v29 = vsel %vm625_vm2, %v607_v27, %v384_v3  ;;  %v609_v50 = vmul.f32 0.0625, %v463_v49  ;;  %v474_v3 = vadd.f32 %v473_v2, %v472_v1 }
  0x26   : > { %7058 = vmatmul.msk.f32.gmra.mxu0 %vm430_vm1, %v634_v29  ;;  %v637_v44 = vsel %vm625_vm2, %v608_v42, %v387_v13  ;;  %v397_v42 = vld [vmem:[%s7341_s16 + $0x78] sm:$0xff] }
  0x27   : > { %v640_v51 = vsel %vm625_vm2, %v609_v50, %v390_v36  ;;  %v610_v4 = vmul.f32 0.0625, %v474_v3  ;;  %v399_v50 = vld [vmem:[%s7341_s16 + $0x88] sm:$0xff] }
  0x29   : > { %v643_v5 = vsel %vm625_vm2, %v610_v4, %v393_v57 }
  0x2e   : > { %7059 = vmatmul.msk.f32.gmra.mxu0 %vm430_vm1, %v385_v7  ;;  %v7403_v7 = vand.u32 127, %v333_v14  ;;  %v395_v14 = vld [vmem:[%s7341_s16 + $0x68] sm:$0xff] }
  0x2f   : > { %v476_v16 = vsel %vm430_vm1, %v395_v14, 0.0 }
  0x30   : > { %vm996_vm3 = vcmp.lt.s32.totalorder %v7403_v7, 20 }
  0x36   : > { %7060 = vmatmul.msk.f32.gmra.mxu0 %vm430_vm1, %v386_v8  ;;  %v394_v8 = vld [vmem:[%s7341_s16 + $0x60] sm:$0xff] }
  0x37   : > { %v475_v13 = vsel %vm430_vm1, %v394_v8, 0.0 }
  0x38   : > { %v477_v18 = vadd.f32 %v476_v16, %v475_v13 }
  0x3a   : > { %v479_v24 = vadd.f32 %v478_v22, %v477_v18 }
  0x3c   : > { %v480_v25 = vrot.slane %v479_v24, 4 }
  0x3e   : > { %7061 = vmatmul.msk.f32.gmra.mxu0 %vm430_vm1, %v637_v44  ;;  %v481_v26 = vadd.f32 %v480_v25, %v479_v24  ;;  %v486_v44 = vsel %vm430_vm1, %v397_v42, 0.0 }
  0x3f   : > { %v488_v49 = vadd.f32 %v487_v47, %v486_v44 }
  0x40   : > { %v482_v28 = vrot.slane %v481_v26, 2 }
  0x42   : > { %v483_v30 = vadd.f32 %v482_v28, %v481_v26 }
  0x44   : > { %v484_v32 = vrot.slane %v483_v30, 1 }
  0x46   : > { %7062 = vmatmul.msk.f32.gmra.mxu0 %vm430_vm1, %v388_v33  ;;  %v485_v34 = vadd.f32 %v484_v32, %v483_v30 }
  0x48   : > { %v611_v36 = vmul.f32 0.0625, %v485_v34 }
  0x4a   : > { %v646_v38 = vsel %vm625_vm2, %v611_v36, %v396_v20 }
  0x4e   : > { %7063 = vmatmul.msk.f32.gmra.mxu0 %vm430_vm1, %v389_v31 }
  0x56   : > { %7064 = vmatmul.msk.f32.gmra.mxu0 %vm430_vm1, %v640_v51  ;;  %v489_v51 = vsel %vm430_vm1, %v399_v50, 0.0 }
  0x57   : > { %v490_v53 = vadd.f32 %v489_v51, %v488_v49 }
  0x59   : > { %v491_v55 = vrot.slane %v490_v53, 4 }
  0x5b   : > { %v492_v57 = vadd.f32 %v491_v55, %v490_v53  ;;  %v403_v53 = vld [vmem:[%s7341_s16 + $0xa8] sm:$0xff] }
  0x5d   : > { %v493_v59 = vrot.slane %v492_v57, 2 }
  0x5e   : > { %7065 = vmatmul.msk.f32.gmra.mxu0 %vm430_vm1, %v391_v52 }
  0x5f   : > { %v494_v61 = vadd.f32 %v493_v59, %v492_v57 }
  0x61   : > { %v495_v63 = vrot.slane %v494_v61, 1 }
  0x63   : > { %v496_v1 = vadd.f32 %v495_v63, %v494_v61 }
  0x65   : > { %v612_v3 = vmul.f32 0.0625, %v496_v1 }
  0x66   : > { %7066 = vmatmul.msk.f32.gmra.mxu0 %vm430_vm1, %v392_v54 }
  0x6e   : > { %7067 = vmatmul.msk.f32.gmra.mxu0 %vm430_vm1, %v643_v5  ;;  %v649_v5 = vsel %vm625_vm2, %v612_v3, %v399_v50 }
  0x76   : > { %7068 = vmatmul.msk.f32.gmra.mxu0 %vm430_vm1, %v394_v8 }
  0x7e   : > { %7069 = vmatmul.msk.f32.gmra.mxu0 %vm430_vm1, %v395_v14 }
  0x86   : > { %7070 = vmatmul.msk.f32.gmra.mxu0 %vm430_vm1, %v646_v38 }
  0x8e   : > { %7071 = vmatmul.msk.f32.gmra.mxu0 %vm430_vm1, %v397_v42 }
  0x8f   : > { %v850_v9 = vpop.f32.mrf.mxu0 }
  0x90   : > { %v851_v10 = vadd.f32 %v7400_v6, %v850_v9 }
  0x92   : > { %v997_v11 = vmax.f32 %v851_v10, 0.0 }
  0x94   : > { %v7411_v12 = vsel %vm996_vm3, %v997_v11, %v851_v10  ;;  %v400_v11 = vld [vmem:[%s7341_s16 + $0x90] sm:$0xff] }
  0x95   : > { %12068 = vst [vmem:[#allocation2_spill] sm:$0xff] %v7411_v12  ;;  %7104 = vmatmul.msk.f32.vlgmr.msra.gmra.mxu1 %vm1097_vm4, %v7411_v12  ;;  %v497_v26 = vsel %vm430_vm1, %v400_v11, 0.0 }
  0x96   : > { %7072 = vmatmul.msk.f32.gmra.mxu0 %vm430_vm1, %v398_v46 }
  0x97   : > { %v853_v15 = vpop.f32.mrf.mxu0 }
  0x98   : > { %v854_v17 = vadd.f32 %v7400_v6, %v853_v15 }
  0x9a   : > { %v998_v19 = vmax.f32 %v854_v17, 0.0 }
  0x9c   : > { %v7423_v21 = vsel %vm996_vm3, %v998_v19, %v854_v17 }
  0x9d   : > { %12069 = vst [vmem:[#allocation3_spill] sm:$0xff] %v7423_v21  ;;  %7105 = vmatmul.msk.f32.gmra.mxu1 %vm1097_vm4, %v7423_v21 }
  0x9e   : > { %7073 = vmatmul.msk.f32.gmra.mxu0 %vm430_vm1, %v649_v5 }
  0xa3   : > { %v856_v27 = vpop.f32.mrf.mxu0 }
  0xa4   : > { %v857_v29 = vadd.f32 %v7400_v6, %v856_v27  ;;  %v401_v27 = vld [vmem:[%s7341_s16 + $0x98] sm:$0xff] }
  0xa6   : > { %v999_v31 = vmax.f32 %v857_v29, 0.0  ;;  %7074 = vmatmul.msk.f32.gmra.mxu0 %vm430_vm1, %v400_v11 }
  0xa8   : > { %v7431_v33 = vsel %vm996_vm3, %v999_v31, %v857_v29  ;;  %v498_v29 = vsel %vm430_vm1, %v401_v27, 0.0  ;;  %v402_v31 = vld [vmem:[%s7341_s16 + $0xa0] sm:$0xff] }
  0xa9   : > { %12070 = vst [vmem:[#allocation4_spill] sm:$0xff] %v7431_v33  ;;  %7106 = vmatmul.msk.f32.gmra.mxu1 %vm1097_vm4, %v7431_v33  ;;  %v499_v30 = vadd.f32 %v498_v29, %v497_v26  ;;  %v500_v32 = vsel %vm430_vm1, %v402_v31, 0.0  ;;  %v406_v29 = vld [vmem:[%s7341_s16 + $0xc0] sm:$0xff] }
  0xab   : > { %v859_v35 = vpop.f32.mrf.mxu0  ;;  %v501_v34 = vadd.f32 %v500_v32, %v499_v30  ;;  %v519_v30 = vsel %vm430_vm1, %v406_v29, 0.0 }
  0xac   : > { %v860_v37 = vadd.f32 %v7400_v6, %v859_v35 }
  0xad   : > { %v502_v35 = vrot.slane %v501_v34, 4 }
  0xae   : > { %v1000_v39 = vmax.f32 %v860_v37, 0.0  ;;  %7075 = vmatmul.msk.f32.gmra.mxu0 %vm430_vm1, %v401_v27 }
  0xaf   : > { %v503_v36 = vadd.f32 %v502_v35, %v501_v34 }
  0xb0   : > { %v7441_v40 = vsel %vm996_vm3, %v1000_v39, %v860_v37 }
  0xb1   : > { %12071 = vst [vmem:[#allocation5_spill] sm:$0xff] %v7441_v40  ;;  %7107 = vmatmul.msk.f32.gmra.mxu1 %vm1097_vm4, %v7441_v40  ;;  %v504_v38 = vrot.slane %v503_v36, 2 }
  0xb3   : > { %v862_v41 = vpop.f32.mrf.mxu0 }
  0xb4   : > { %v863_v43 = vadd.f32 %v7400_v6, %v862_v41  ;;  %v505_v41 = vadd.f32 %v504_v38, %v503_v36  ;;  %v408_v36 = vld [vmem:[%s7341_s16 + $0xd0] sm:$0xff] }
  0xb6   : > { %v1001_v45 = vmax.f32 %v863_v43, 0.0 }
  0xb8   : > { %v7453_v48 = vsel %vm996_vm3, %v1001_v45, %v863_v43  ;;  %v506_v43 = vrot.slane %v505_v41, 1 }
  0xb9   : > { %12072 = vst [vmem:[#allocation6_spill] sm:$0xff] %v7453_v48  ;;  %7108 = vmatmul.msk.f32.gmra.mxu1 %vm1097_vm4, %v7453_v48 }
  0xba   : > { %v507_v45 = vadd.f32 %v506_v43, %v505_v41 }
  0xbb   : > { %v865_v52 = vpop.f32.mrf.mxu0 }
  0xbc   : > { %v866_v54 = vadd.f32 %v7400_v6, %v865_v52  ;;  %v613_v46 = vmul.f32 0.0625, %v507_v45 }
  0xbe   : > { %v1002_v56 = vmax.f32 %v866_v54, 0.0  ;;  %v652_v47 = vsel %vm625_vm2, %v613_v46, %v402_v31  ;;  %v407_v31 = vld [vmem:[%s7341_s16 + $0xc8] sm:$0xff] }
  0xbf   : > { %7076 = vmatmul.msk.f32.gmra.mxu0 %vm430_vm1, %v652_v47  ;;  %v520_v32 = vsel %vm430_vm1, %v407_v31, 0.0 }
  0xc0   : > { %v7463_v58 = vsel %vm996_vm3, %v1002_v56, %v866_v54  ;;  %v508_v54 = vsel %vm430_vm1, %v403_v53, 0.0  ;;  %v404_v56 = vld [vmem:[%s7341_s16 + $0xb0] sm:$0xff]  ;;  %v521_v35 = vadd.f32 %v520_v32, %v519_v30 }
  0xc1   : > { %12073 = vst [vmem:[#allocation7_spill] sm:$0xff] %v7463_v58  ;;  %7109 = vmatmul.msk.f32.gmra.mxu1 %vm1097_vm4, %v7463_v58  ;;  %v509_v59 = vsel %vm430_vm1, %v404_v56, 0.0 }
  0xc2   : > { %v510_v61 = vadd.f32 %v509_v59, %v508_v54 }
  0xc3   : > { %v868_v60 = vpop.f32.mrf.mxu0 }
  0xc4   : > { %v869_v62 = vadd.f32 %v7400_v6, %v868_v60 }
  0xc6   : > { %v1003_v0 = vmax.f32 %v869_v62, 0.0 }
  0xc7   : > { %7077 = vmatmul.msk.f32.gmra.mxu0 %vm430_vm1, %v403_v53 }
  0xc8   : > { %v7470_v2 = vsel %vm996_vm3, %v1003_v0, %v869_v62  ;;  %v405_v62 = vld [vmem:[%s7341_s16 + $0xb8] sm:$0xff] }
  0xc9   : > { %12074 = vst [vmem:[#allocation8_spill] sm:$0xff] %v7470_v2  ;;  %7110 = vmatmul.msk.f32.gmra.mxu1 %vm1097_vm4, %v7470_v2  ;;  %v511_v0 = vsel %vm430_vm1, %v405_v62, 0.0 }
  0xca   : > { %v512_v1 = vadd.f32 %v511_v0, %v510_v61 }
  0xcb   : > { %v871_v4 = vpop.f32.mrf.mxu0 }
  0xcc   : > { %v872_v8 = vadd.f32 %v7400_v6, %v871_v4  ;;  %v513_v4 = vrot.slane %v512_v1, 4 }
  0xce   : > { %v1004_v9 = vmax.f32 %v872_v8, 0.0 }
  0xcf   : > { %7078 = vmatmul.msk.f32.gmra.mxu0 %vm430_vm1, %v404_v56 }
  0xd0   : > { %v7480_v10 = vsel %vm996_vm3, %v1004_v9, %v872_v8  ;;  %v514_v8 = vadd.f32 %v513_v4, %v512_v1 }
  0xd1   : > { %12075 = vst [vmem:[#allocation9_spill] sm:$0xff] %v7480_v10  ;;  %7111 = vmatmul.msk.f32.gmra.mxu1 %vm1097_vm4, %v7480_v10 }
  0xd2   : > { %v515_v9 = vrot.slane %v514_v8, 2 }
  0xd3   : > { %v874_v13 = vpop.f32.mrf.mxu0 }
  0xd4   : > { %v875_v14 = vadd.f32 %v7400_v6, %v874_v13  ;;  %v516_v11 = vadd.f32 %v515_v9, %v514_v8  ;;  %v409_v8 = vld [vmem:[%s7341_s16 + $0xd8] sm:$0xff] }
  0xd5   : > { %v530_v9 = vsel %vm430_vm1, %v409_v8, 0.0 }
  0xd6   : > { %v1005_v15 = vmax.f32 %v875_v14, 0.0 }
  0xd8   : > { %v7489_v16 = vsel %vm996_vm3, %v1005_v15, %v875_v14  ;;  %v517_v14 = vrot.slane %v516_v11, 1 }
  0xd9   : > { %12076 = vst [vmem:[#allocation10_spill] sm:$0xff] %v7489_v16  ;;  %7112 = vmatmul.msk.f32.gmra.mxu1 %vm1097_vm4, %v7489_v16 }
  0xda   : > { %v518_v15 = vadd.f32 %v517_v14, %v516_v11  ;;  %v410_v11 = vld [vmem:[%s7341_s16 + $0xe0] sm:$0xff] }
  0xdb   : > { %v877_v17 = vpop.f32.mrf.mxu0  ;;  %v531_v14 = vsel %vm430_vm1, %v410_v11, 0.0 }
  0xdc   : > { %v878_v18 = vadd.f32 %v7400_v6, %v877_v17 }
  0xde   : > { %v1006_v19 = vmax.f32 %v878_v18, 0.0 }
  0xe0   : > { %v7496_v20 = vsel %vm996_vm3, %v1006_v19, %v878_v18  ;;  %v614_v18 = vmul.f32 0.0625, %v518_v15  ;;  %v532_v15 = vadd.f32 %v531_v14, %v530_v9  ;;  %v413_v14 = vld [vmem:[%s7341_s16 + $0xf8] sm:$0xff] }
  0xe1   : > { %12077 = vst [vmem:[#allocation11_spill] sm:$0xff] %v7496_v20  ;;  %7113 = vmatmul.msk.f32.gmra.mxu1 %vm1097_vm4, %v7496_v20 }
  0xe3   : > { %v880_v22 = vpop.f32.mrf.mxu0 }
  0xe4   : > { %v881_v24 = vadd.f32 %v7400_v6, %v880_v22  ;;  %v655_v22 = vsel %vm625_vm2, %v614_v18, %v405_v62 }
  0xe5   : > { %7079 = vmatmul.msk.f32.gmra.mxu0 %vm430_vm1, %v655_v22 }
  0xe6   : > { %v1007_v25 = vmax.f32 %v881_v24, 0.0 }
  0xe8   : > { %v7505_v28 = vsel %vm996_vm3, %v1007_v25, %v881_v24 }
  0xe9   : > { %12078 = vst [vmem:[#allocation12_spill] sm:$0xff] %v7505_v28  ;;  %7114 = vmatmul.msk.f32.gmra.mxu1 %vm1097_vm4, %v7505_v28 }
  0xeb   : > { %v883_v37 = vpop.f32.mrf.mxu0 }
  0xec   : > { %v884_v39 = vadd.f32 %v7400_v6, %v883_v37 }
  0xed   : > { %7080 = vmatmul.msk.f32.gmra.mxu0 %vm430_vm1, %v406_v29 }
  0xee   : > { %v1008_v42 = vmax.f32 %v884_v39, 0.0 }
  0xf0   : > { %v7516_v44 = vsel %vm996_vm3, %v1008_v42, %v884_v39  ;;  %v522_v39 = vsel %vm430_vm1, %v408_v36, 0.0 }
  0xf1   : > { %12079 = vst [vmem:[#allocation13_spill] sm:$0xff] %v7516_v44  ;;  %7115 = vmatmul.msk.f32.gmra.mxu1 %vm1097_vm4, %v7516_v44  ;;  %v523_v41 = vadd.f32 %v522_v39, %v521_v35 }
  0xf3   : > { %v886_v50 = vpop.f32.mrf.mxu0  ;;  %v524_v43 = vrot.slane %v523_v41, 4 }
  0xf4   : > { %v887_v51 = vadd.f32 %v7400_v6, %v886_v50 }
  0xf5   : > { %7081 = vmatmul.msk.f32.gmra.mxu0 %vm430_vm1, %v407_v31  ;;  %v525_v46 = vadd.f32 %v524_v43, %v523_v41 }
  0xf6   : > { %v1009_v52 = vmax.f32 %v887_v51, 0.0 }
  0xf7   : > { %v526_v50 = vrot.slane %v525_v46, 2 }
  0xf8   : > { %v7533_v55 = vsel %vm996_vm3, %v1009_v52, %v887_v51 }
  0xf9   : > { %12081 = vst [vmem:[#allocation15_spill] sm:$0xff] %v7533_v55  ;;  %7116 = vmatmul.msk.f32.gmra.mxu1 %vm1097_vm4, %v7533_v55  ;;  %v527_v52 = vadd.f32 %v526_v50, %v525_v46 }
  0xfb   : > { %v889_v60 = vpop.f32.mrf.mxu0  ;;  %v528_v54 = vrot.slane %v527_v52, 1 }
  0xfc   : > { %v890_v63 = vadd.f32 %v7400_v6, %v889_v60 }
  0xfd   : > { %v529_v59 = vadd.f32 %v528_v54, %v527_v52 }
  0xfe   : > { %v1010_v3 = vmax.f32 %v890_v63, 0.0 }
  0xff   : > { %v615_v60 = vmul.f32 0.0625, %v529_v59 }
 0x100   : > { %v7551_v5 = vsel %vm996_vm3, %v1010_v3, %v890_v63 }
 0x101   : > { %12083 = vst [vmem:[#allocation17_spill] sm:$0xff] %v7551_v5  ;;  %7117 = vmatmul.msk.f32.gmra.mxu1 %vm1097_vm4, %v7551_v5  ;;  %v658_v61 = vsel %vm625_vm2, %v615_v60, %v408_v36 }
 0x102   : > { %7082 = vmatmul.msk.f32.gmra.mxu0 %vm430_vm1, %v658_v61 }
 0x103   : > { %v892_v17 = vpop.f32.mrf.mxu0 }
 0x104   : > { %v893_v19 = vadd.f32 %v7400_v6, %v892_v17  ;;  %v411_v17 = vld [vmem:[%s7341_s16 + $0xe8] sm:$0xff] }
 0x106   : > { %v1011_v24 = vmax.f32 %v893_v19, 0.0 }
 0x108   : > { %v7577_v26 = vsel %vm996_vm3, %v1011_v24, %v893_v19  ;;  %v533_v19 = vsel %vm430_vm1, %v411_v17, 0.0 }
 0x109   : > { %12086 = vst [vmem:[#allocation20_spill] sm:$0xff] %v7577_v26  ;;  %7118 = vmatmul.msk.f32.gmra.mxu1 %vm1097_vm4, %v7577_v26  ;;  %v534_v24 = vadd.f32 %v533_v19, %v532_v15 }
 0x10a   : > { %7083 = vmatmul.msk.f32.gmra.mxu0 %vm430_vm1, %v409_v8  ;;  %v412_v8 = vld [vmem:[%s7341_s16 + $0xf0] sm:$0xff] }
 0x10b   : > { %v895_v34 = vpop.f32.mrf.mxu0  ;;  %v535_v30 = vrot.slane %v534_v24, 4  ;;  %v541_v9 = vsel %vm430_vm1, %v412_v8, 0.0 }
 0x10c   : > { %v896_v38 = vadd.f32 %v7400_v6, %v895_v34 }
 0x10d   : > { %v536_v32 = vadd.f32 %v535_v30, %v534_v24 }
 0x10e   : > { %v1012_v42 = vmax.f32 %v896_v38, 0.0 }
 0x10f   : > { %v537_v35 = vrot.slane %v536_v32, 2 }
 0x110   : > { %v7614_v45 = vsel %vm996_vm3, %v1012_v42, %v896_v38 }
 0x111   : > { %12089 = vst [vmem:[#allocation23_spill] sm:$0xff] %v7614_v45  ;;  %7119 = vmatmul.msk.f32.gmra.mxu1 %vm1097_vm4, %v7614_v45  ;;  %v538_v38 = vadd.f32 %v537_v35, %v536_v32 }
 0x112   : > { %v7523_v49 = vpop.f32.mrf.mxu1  ;;  %7084 = vmatmul.msk.f32.gmra.mxu0 %vm430_vm1, %v410_v11 }
 0x113   : > { %12080 = vst [vmem:[#allocation14_spill] sm:$0xff] %v7523_v49  ;;  %1643 = vrot.lane.b32.xlu0 %v7523_v49, %s7256_s23  ;;  %v898_v47 = vpop.f32.mrf.mxu0  ;;  %v539_v41 = vrot.slane %v538_v38, 1 }
 0x114   : > { %v899_v51 = vadd.f32 %v7400_v6, %v898_v47 }
 0x115   : > { %v540_v43 = vadd.f32 %v539_v41, %v538_v38 }
 0x116   : > { %v1013_v53 = vmax.f32 %v899_v51, 0.0 }
 0x117   : > { %v616_v47 = vmul.f32 0.0625, %v540_v43 }
 0x118   : > { %v7627_v56 = vsel %vm996_vm3, %v1013_v53, %v899_v51 }
 0x119   : > { %12090 = vst [vmem:[#allocation24_spill] sm:$0xff] %v7627_v56  ;;  %7120 = vmatmul.msk.f32.gmra.mxu1 %vm1097_vm4, %v7627_v56  ;;  %v661_v50 = vsel %vm625_vm2, %v616_v47, %v411_v17  ;;  %v542_v17 = vsel %vm430_vm1, %v413_v14, 0.0 }
 0x11a   : > { %v7538_v57 = vpop.f32.mrf.mxu1  ;;  %7085 = vmatmul.msk.f32.gmra.mxu0 %vm430_vm1, %v661_v50  ;;  %v543_v19 = vadd.f32 %v542_v17, %v541_v9 }
 0x11b   : > { %12082 = vst [vmem:[#allocation16_spill] sm:$0xff] %v7538_v57  ;;  %2219 = vrot.lane.b32.xlu0 %v7523_v49, %s7257_s24  ;;  %2221 = vrot.lane.b32.xlu1 %v7538_v57, %s7257_s24  ;;  %v901_v62 = vpop.f32.mrf.mxu0 }
 0x11c   : > { %v902_v0 = vadd.f32 %v7400_v6, %v901_v62 }
 0x11e   : > { %v1014_v1 = vmax.f32 %v902_v0, 0.0 }
 0x120   : > { %v7651_v3 = vsel %vm996_vm3, %v1014_v1, %v902_v0 }
 0x121   : > { %12092 = vst [vmem:[#allocation26_spill] sm:$0xff] %v7651_v3  ;;  %7121 = vmatmul.msk.f32.gmra.mxu1 %vm1097_vm4, %v7651_v3 }
 0x122   : > { %7086 = vmatmul.msk.f32.gmra.mxu0 %vm430_vm1, %v412_v8 }
 0x123   : > { %2555 = vrot.lane.b32.xlu0 %v7523_v49, %s7258_s25  ;;  %2557 = vrot.lane.b32.xlu1 %v7538_v57, %s7258_s25  ;;  %v904_v22 = vpop.f32.mrf.mxu0 }
 0x124   : > { %v905_v29 = vadd.f32 %v7400_v6, %v904_v22  ;;  %v414_v22 = vld [vmem:[%s7341_s16 + $0x100] sm:$0xff] }
 0x125   : > { %v544_v24 = vsel %vm430_vm1, %v414_v22, 0.0 }
 0x126   : > { %v7559_v13 = vpop.f32.mrf.mxu1  ;;  %v1015_v31 = vmax.f32 %v905_v29, 0.0 }
 0x127   : > { %12084 = vst [vmem:[#allocation18_spill] sm:$0xff] %v7559_v13  ;;  %2223 = vrot.lane.b32.xlu2 %v7559_v13, %s7257_s24 }
 0x128   : > { %v7682_v34 = vsel %vm996_vm3, %v1015_v31, %v905_v29  ;;  %v545_v31 = vadd.f32 %v544_v24, %v543_v19 }
 0x129   : > { %12095 = vst [vmem:[#allocation29_spill] sm:$0xff] %v7682_v34  ;;  %7122 = vmatmul.msk.f32.gmra.mxu1 %vm1097_vm4, %v7682_v34 }
 0x12a   : > { %7087 = vmatmul.msk.f32.gmra.mxu0 %vm430_vm1, %v413_v14 }
 0x12b   : > { %3131 = vrot.lane.b32.xlu0 %v7523_v49, %s7259_s26  ;;  %3133 = vrot.lane.b32.xlu1 %v7538_v57, %s7259_s26  ;;  %v907_v36 = vpop.f32.mrf.mxu0 }
 0x12c   : > { %v908_v39 = vadd.f32 %v7400_v6, %v907_v36  ;;  %v546_v36 = vrot.slane %v545_v31, 4 }
 0x12e   : > { %v7573_v25 = vpop.f32.mrf.mxu1  ;;  %v1016_v42 = vmax.f32 %v908_v39, 0.0  ;;  %v547_v41 = vadd.f32 %v546_v36, %v545_v31 }
 0x12f   : > { %2559 = vrot.lane.b32.xlu2 %v7559_v13, %s7258_s25  ;;  %12085 = vst [vmem:[#allocation19_spill] sm:$0xff] %v7573_v25 }
 0x130   : > { %v7695_v46 = vsel %vm996_vm3, %v1016_v42, %v908_v39  ;;  %v548_v43 = vrot.slane %v547_v41, 2 }
 0x131   : > { %12096 = vst [vmem:[#allocation30_spill] sm:$0xff] %v7695_v46  ;;  %7123 = vmatmul.msk.f32.gmra.mxu1 %vm1097_vm4, %v7695_v46 }
 0x133   : > { %1645 = vrot.lane.b32.xlu0 %v7538_v57, %s7256_s23  ;;  %1647 = vrot.lane.b32.xlu1 %v7559_v13, %s7256_s23 }
 0x136   : > { %v7587_v27 = vpop.f32.mrf.mxu1 }
 0x137   : > { %3135 = vrot.lane.b32.xlu2 %v7559_v13, %s7259_s26  ;;  %12087 = vst [vmem:[#allocation21_spill] sm:$0xff] %v7587_v27 }
 0x13b   : > { %1841 = vrot.lane.b32.xlu0 %v7573_v25, %s7260_s27  ;;  %1649 = vrot.lane.b32.xlu1 %v7573_v25, %s7256_s23 }
 0x13c   : > { %v910_v52 = vpop.f32.mrf.mxu0 }
 0x13d   : > { %v911_v53 = vadd.f32 %v7400_v6, %v910_v52 }
 0x13e   : > { %v7605_v37 = vpop.f32.mrf.mxu1 }
 0x13f   : > { %1651 = vrot.lane.b32.xlu2 %v7587_v27, %s7256_s23  ;;  %12088 = vst [vmem:[#allocation22_spill] sm:$0xff] %v7605_v37  ;;  %v1017_v59 = vmax.f32 %v911_v53, 0.0 }
 0x141   : > { %v7723_v61 = vsel %vm996_vm3, %v1017_v59, %v911_v53  ;;  %v549_v53 = vadd.f32 %v548_v43, %v547_v41 }
 0x142   : > { %12100 = vst [vmem:[#allocation34_spill] sm:$0xff] %v7723_v61  ;;  %7124 = vmatmul.msk.f32.gmra.mxu1 %vm1097_vm4, %v7723_v61 }
 0x143   : > { %2225 = vrot.lane.b32.xlu0 %v7573_v25, %s7257_s24  ;;  %1843 = vrot.lane.b32.xlu1 %v7587_v27, %s7260_s27  ;;  %v550_v9 = vrot.slane %v549_v53, 1 }
 0x144   : > { %v913_v32 = vpop.f32.mrf.mxu0 }
 0x145   : > { %v914_v35 = vadd.f32 %v7400_v6, %v913_v32  ;;  %v551_v19 = vadd.f32 %v550_v9, %v549_v53 }
 0x146   : > { %v7640_v63 = vpop.f32.mrf.mxu1 }
 0x147   : > { %1653 = vrot.lane.b32.xlu2 %v7605_v37, %s7256_s23  ;;  %12091 = vst [vmem:[#allocation25_spill] sm:$0xff] %v7640_v63  ;;  %v1018_v39 = vmax.f32 %v914_v35, 0.0  ;;  %v617_v31 = vmul.f32 0.0625, %v551_v19 }
 0x149   : > { %v7770_v42 = vsel %vm996_vm3, %v1018_v39, %v914_v35  ;;  %v664_v36 = vsel %vm625_vm2, %v617_v31, %v414_v22  ;;  %v415_v31 = vld [vmem:[%s7341_s16 + $0x108] sm:$0xff] }
 0x14a   : > { %12109 = vst [vmem:[#allocation43_spill] sm:$0xff] %v7770_v42  ;;  %7125 = vmatmul.msk.f32.gmra.mxu1 %vm1097_vm4, %v7770_v42  ;;  %7088 = vmatmul.msk.f32.gmra.mxu0 %vm430_vm1, %v664_v36 }
 0x14b   : > { %2561 = vrot.lane.b32.xlu0 %v7573_v25, %s7258_s25  ;;  %2227 = vrot.lane.b32.xlu1 %v7587_v27, %s7257_s24 }
 0x14c   : > { %v916_v59 = vpop.f32.mrf.mxu0 }
 0x14d   : > { %v917_v8 = vadd.f32 %v7400_v6, %v916_v59 }
 0x14e   : > { %v7655_v4 = vpop.f32.mrf.mxu1 }
 0x14f   : > { %1845 = vrot.lane.b32.xlu2 %v7605_v37, %s7260_s27  ;;  %12093 = vst [vmem:[#allocation27_spill] sm:$0xff] %v7655_v4  ;;  %v1019_v17 = vmax.f32 %v917_v8, 0.0 }
 0x151   : > { %v7791_v24 = vsel %vm996_vm3, %v1019_v17, %v917_v8 }
 0x152   : > { %12114 = vst [vmem:[#allocation48_spill] sm:$0xff] %v7791_v24  ;;  %7126 = vmatmul.msk.f32.gmra.mxu1 %vm1097_vm4, %v7791_v24  ;;  %7089 = vmatmul.msk.f32.gmra.mxu0 %vm430_vm1, %v415_v31 }
 0x153   : > { %3137 = vrot.lane.b32.xlu0 %v7573_v25, %s7259_s26  ;;  %2563 = vrot.lane.b32.xlu1 %v7587_v27, %s7258_s25 }
 0x156   : > { %v7673_v18 = vpop.f32.mrf.mxu1 }
 0x157   : > { %2229 = vrot.lane.b32.xlu2 %v7605_v37, %s7257_s24  ;;  %12094 = vst [vmem:[#allocation28_spill] sm:$0xff] %v7673_v18 }
 0x15b   : > { %3139 = vrot.lane.b32.xlu1 %v7587_v27, %s7259_s26  ;;  %1655 = vrot.lane.b32.xlu0 %v7640_v63, %s7256_s23 }
 0x15e   : > { %v7719_v60 = vpop.f32.mrf.mxu1 }
 0x15f   : > { %2565 = vrot.lane.b32.xlu2 %v7605_v37, %s7258_s25  ;;  %12099 = vst [vmem:[#allocation33_spill] sm:$0xff] %v7719_v60 }
 0x162   : > { %v919_v41 = vpop.f32.mrf.mxu0 }
 0x163   : > { %1847 = vrot.lane.b32.xlu0 %v7640_v63, %s7260_s27  ;;  %1657 = vrot.lane.b32.xlu1 %v7655_v4, %s7256_s23  ;;  %v920_v43 = vadd.f32 %v7400_v6, %v919_v41  ;;  %v552_v41 = vsel %vm430_vm1, %v415_v31, 0.0 }
 0x165   : > { %v1020_v59 = vmax.f32 %v920_v43, 0.0 }
 0x166   : > { %v7745_v15 = vpop.f32.mrf.mxu1 }
 0x167   : > { %3141 = vrot.lane.b32.xlu2 %v7605_v37, %s7259_s26  ;;  %12105 = vst [vmem:[#allocation39_spill] sm:$0xff] %v7745_v15  ;;  %v7819_v8 = vsel %vm996_vm3, %v1020_v59, %v920_v43  ;;  %v416_v59 = vld [vmem:[%s7341_s16 + $0x110] sm:$0xff] }
 0x168   : > { %12120 = vst [vmem:[#allocation54_spill] sm:$0xff] %v7819_v8  ;;  %7127 = vmatmul.msk.f32.gmra.mxu1 %vm1097_vm4, %v7819_v8  ;;  %7090 = vmatmul.msk.f32.gmra.mxu0 %vm430_vm1, %v416_v59 }
 0x16b   : > { %2231 = vrot.lane.b32.xlu0 %v7640_v63, %s7257_s24  ;;  %1849 = vrot.lane.b32.xlu1 %v7655_v4, %s7260_s27 }
 0x16e   : > { %v7772_v47 = vpop.f32.mrf.mxu1 }
 0x16f   : > { %1659 = vrot.lane.b32.xlu2 %v7673_v18, %s7256_s23  ;;  %12110 = vst [vmem:[#allocation44_spill] sm:$0xff] %v7772_v47 }
 0x173   : > { %2567 = vrot.lane.b32.xlu0 %v7640_v63, %s7258_s25  ;;  %2233 = vrot.lane.b32.xlu1 %v7655_v4, %s7257_s24 }
 0x176   : > { %v7836_v36 = vpop.f32.mrf.mxu1 }
 0x177   : > { %1851 = vrot.lane.b32.xlu2 %v7673_v18, %s7260_s27  ;;  %12124 = vst [vmem:[#allocation58_spill] sm:$0xff] %v7836_v36 }
 0x17b   : > { %2759 = vrot.lane.b32.xlu0 %v7640_v63, %s7261_s28  ;;  %2569 = vrot.lane.b32.xlu1 %v7655_v4, %s7258_s25 }
 0x17f   : > { %2235 = vrot.lane.b32.xlu2 %v7673_v18, %s7257_s24 }
 0x181   : > { %v7708_v51 = vpop.permute.xlu2 %2223 }
 0x182   : > { %12097 = vst [vmem:[#allocation31_spill] sm:$0xff] %v7708_v51  ;;  %v420_v51 = vld [vmem:[%s7341_s16 + $0x130] sm:$0xff] }
 0x183   : > { %3143 = vrot.lane.b32.xlu0 %v7640_v63, %s7259_s26  ;;  %2761 = vrot.lane.b32.xlu1 %v7655_v4, %s7261_s28 }
 0x185   : > { %v7715_v54 = vpop.permute.xlu0 %1643 }
 0x186   : > { %12098 = vst [vmem:[#allocation32_spill] sm:$0xff] %v7715_v54  ;;  %v922_v54 = vpop.f32.mrf.mxu0 }
 0x187   : > { %2571 = vrot.lane.b32.xlu2 %v7673_v18, %s7258_s25 }
 0x189   : > { %v7725_v62 = vpop.permute.xlu2 %2559 }
 0x18a   : > { %12101 = vst [vmem:[#allocation35_spill] sm:$0xff] %v7725_v62 }
 0x18b   : > { %3145 = vrot.lane.b32.xlu1 %v7655_v4, %s7259_s26  ;;  %1661 = vrot.lane.b32.xlu0 %v7719_v60, %s7256_s23 }
 0x18d   : > { %v7733_v0 = vpop.permute.xlu0 %2219  ;;  %v7735_v1 = vpop.permute.xlu1 %2221 }
 0x18e   : > { %12102 = vst [vmem:[#allocation36_spill] sm:$0xff] %v7733_v0 }
 0x18f   : > { %12103 = vst [vmem:[#allocation37_spill] sm:$0xff] %v7735_v1  ;;  %2763 = vrot.lane.b32.xlu2 %v7673_v18, %s7261_s28 }
 0x191   : > { %v7742_v11 = vpop.permute.xlu2 %3135 }
 0x192   : > { %12104 = vst [vmem:[#allocation38_spill] sm:$0xff] %v7742_v11 }
 0x193   : > { %1853 = vrot.lane.b32.xlu0 %v7719_v60, %s7260_s27  ;;  %1663 = vrot.lane.b32.xlu1 %v7745_v15, %s7256_s23 }
 0x195   : > { %v7754_v29 = vpop.permute.xlu0 %2555  ;;  %v7756_v30 = vpop.permute.xlu1 %2557 }
 0x196   : > { %12106 = vst [vmem:[#allocation40_spill] sm:$0xff] %v7754_v29 }
 0x197   : > { %12107 = vst [vmem:[#allocation41_spill] sm:$0xff] %v7756_v30  ;;  %3147 = vrot.lane.b32.xlu2 %v7673_v18, %s7259_s26 }
 0x199   : > { %v7762_v38 = vpop.permute.xlu2 %1651 }
 0x19a   : > { %12108 = vst [vmem:[#allocation42_spill] sm:$0xff] %v7762_v38  ;;  %v553_v38 = vsel %vm430_vm1, %v416_v59, 0.0 }
 0x19b   : > { %2237 = vrot.lane.b32.xlu0 %v7719_v60, %s7257_s24  ;;  %1855 = vrot.lane.b32.xlu1 %v7745_v15, %s7260_s27 }
 0x19d   : > { %v7776_v50 = vpop.permute.xlu0 %3131  ;;  %v7778_v52 = vpop.permute.xlu1 %3133 }
 0x19e   : > { %12111 = vst [vmem:[#allocation45_spill] sm:$0xff] %v7776_v50  ;;  %v7860_v50 = vpop.f32.mrf.mxu1 }
 0x19f   : > { %12112 = vst [vmem:[#allocation46_spill] sm:$0xff] %v7778_v52  ;;  %1665 = vrot.lane.b32.xlu2 %v7772_v47, %s7256_s23 }
 0x1a0   : > { %12129 = vst [vmem:[#allocation63_spill] sm:$0xff] %v7860_v50 }
 0x1a1   : > { %v7783_v14 = vpop.permute.xlu2 %1653 }
 0x1a2   : > { %12113 = vst [vmem:[#allocation47_spill] sm:$0xff] %v7783_v14  ;;  %v417_v14 = vld [vmem:[%s7341_s16 + $0x118] sm:$0xff] }
 0x1a3   : > { %2573 = vrot.lane.b32.xlu0 %v7719_v60, %s7258_s25  ;;  %2239 = vrot.lane.b32.xlu1 %v7745_v15, %s7257_s24 }
 0x1a5   : > { %v7795_v32 = vpop.permute.xlu0 %1645  ;;  %v7797_v35 = vpop.permute.xlu1 %1647 }
 0x1a6   : > { %12115 = vst [vmem:[#allocation49_spill] sm:$0xff] %v7795_v32 }
 0x1a7   : > { %12116 = vst [vmem:[#allocation50_spill] sm:$0xff] %v7797_v35  ;;  %1857 = vrot.lane.b32.xlu2 %v7772_v47, %s7260_s27 }
 0x1a9   : > { %v7804_v39 = vpop.permute.xlu2 %1845 }
 0x1aa   : > { %12117 = vst [vmem:[#allocation51_spill] sm:$0xff] %v7804_v39  ;;  %v923_v39 = vadd.f32 %v7400_v6, %v922_v54 }
 0x1ab   : > { %2765 = vrot.lane.b32.xlu0 %v7719_v60, %s7261_s28  ;;  %2575 = vrot.lane.b32.xlu1 %v7745_v15, %s7258_s25 }
 0x1ad   : > { %v7811_v53 = vpop.permute.xlu0 %1841  ;;  %v7813_v22 = vpop.permute.xlu1 %1649 }
 0x1ae   : > { %12118 = vst [vmem:[#allocation52_spill] sm:$0xff] %v7811_v53 }
 0x1af   : > { %12119 = vst [vmem:[#allocation53_spill] sm:$0xff] %v7813_v22  ;;  %2241 = vrot.lane.b32.xlu2 %v7772_v47, %s7257_s24  ;;  %v554_v22 = vadd.f32 %v553_v38, %v552_v41  ;;  %v1021_v38 = vmax.f32 %v923_v39, 0.0 }
 0x1b1   : > { %v7821_v9 = vpop.permute.xlu2 %2229 }
 0x1b2   : > { %12121 = vst [vmem:[#allocation55_spill] sm:$0xff] %v7821_v9 }
 0x1b3   : > { %3149 = vrot.lane.b32.xlu0 %v7719_v60, %s7259_s26  ;;  %2767 = vrot.lane.b32.xlu1 %v7745_v15, %s7261_s28 }
 0x1b5   : > { %v7829_v17 = vpop.permute.xlu0 %2225  ;;  %v7831_v19 = vpop.permute.xlu1 %1843 }
 0x1b6   : > { %12122 = vst [vmem:[#allocation56_spill] sm:$0xff] %v7829_v17 }
 0x1b7   : > { %12123 = vst [vmem:[#allocation57_spill] sm:$0xff] %v7831_v19  ;;  %2577 = vrot.lane.b32.xlu2 %v7772_v47, %s7258_s25  ;;  %v555_v19 = vsel %vm430_vm1, %v417_v14, 0.0 }
 0x1b8   : > { %v556_v31 = vadd.f32 %v555_v19, %v554_v22  ;;  %v7868_v22 = vsel %vm996_vm3, %v1021_v38, %v923_v39 }
 0x1b9   : > { %v7840_v43 = vpop.permute.xlu2 %2565  ;;  %12130 = vst [vmem:[#allocation64_spill] sm:$0xff] %v7868_v22  ;;  %7128 = vmatmul.msk.f32.gmra.mxu1 %vm1097_vm4, %v7868_v22 }
 0x1ba   : > { %12125 = vst [vmem:[#allocation59_spill] sm:$0xff] %v7840_v43  ;;  %v557_v35 = vrot.slane %v556_v31, 4 }
 0x1bb   : > { %3151 = vrot.lane.b32.xlu1 %v7745_v15, %s7259_s26  ;;  %1667 = vrot.lane.b32.xlu0 %v7836_v36, %s7256_s23 }
 0x1bc   : > { %v558_v41 = vadd.f32 %v557_v35, %v556_v31  ;;  %v925_v31 = vpop.f32.mrf.mxu0 }
 0x1bd   : > { %v7850_v32 = vpop.permute.xlu0 %2561  ;;  %v7852_v53 = vpop.permute.xlu1 %2227 }
 0x1be   : > { %12126 = vst [vmem:[#allocation60_spill] sm:$0xff] %v7850_v32  ;;  %v559_v54 = vrot.slane %v558_v41, 2 }
 0x1bf   : > { %12127 = vst [vmem:[#allocation61_spill] sm:$0xff] %v7852_v53  ;;  %2769 = vrot.lane.b32.xlu2 %v7772_v47, %s7261_s28 }
 0x1c0   : > { %v560_v35 = vadd.f32 %v559_v54, %v558_v41 }
 0x1c1   : > { %v7858_v52 = vpop.permute.xlu2 %3141 }
 0x1c2   : > { %12128 = vst [vmem:[#allocation62_spill] sm:$0xff] %v7858_v52  ;;  %v926_v52 = vadd.f32 %v7400_v6, %v925_v31  ;;  %v561_v11 = vrot.slane %v560_v35, 1 }
 0x1c3   : > { %1859 = vrot.lane.b32.xlu0 %v7836_v36, %s7260_s27  ;;  %1669 = vrot.lane.b32.xlu1 %v7860_v50, %s7256_s23 }
 0x1c4   : > { %v1022_v39 = vmax.f32 %v926_v52, 0.0  ;;  %v562_v38 = vadd.f32 %v561_v11, %v560_v35 }
 0x1c5   : > { %v7872_v19 = vpop.permute.xlu0 %3137  ;;  %v7874_v59 = vpop.permute.xlu1 %2563 }
 0x1c6   : > { %12131 = vst [vmem:[#allocation65_spill] sm:$0xff] %v7872_v19  ;;  %v7887_v41 = vsel %vm996_vm3, %v1022_v39, %v926_v52  ;;  %v618_v54 = vmul.f32 0.0625, %v562_v38  ;;  %v7889_v19 = vpop.f32.mrf.mxu1  ;;  %v928_v39 = vpop.f32.mrf.mxu0 }
 0x1c7   : > { %12132 = vst [vmem:[#allocation66_spill] sm:$0xff] %v7874_v59  ;;  %3153 = vrot.lane.b32.xlu2 %v7772_v47, %s7259_s26  ;;  %7129 = vmatmul.msk.f32.gmra.mxu1 %vm1097_vm4, %v7887_v41  ;;  %v929_v38 = vadd.f32 %v7400_v6, %v928_v39  ;;  %v422_v59 = vld [vmem:[%s7341_s16 + $0x140] sm:$0xff] }
 0x1c8   : > { %12134 = vst [vmem:[#allocation68_spill] sm:$0xff] %v7887_v41  ;;  %v667_v35 = vsel %vm625_vm2, %v618_v54, %v417_v14  ;;  %v418_v54 = vld [vmem:[%s7341_s16 + $0x120] sm:$0xff]  ;;  %v575_v0 = vsel %vm430_vm1, %v422_v59, 0.0 }
 0x1c9   : > { %v7879_v9 = vpop.permute.xlu2 %1659  ;;  %12135 = vst [vmem:[#allocation69_spill] sm:$0xff] %v7889_v19  ;;  %7091 = vmatmul.msk.f32.gmra.mxu0 %vm430_vm1, %v667_v35  ;;  %v419_v35 = vld [vmem:[%s7341_s16 + $0x128] sm:$0xff] }
 0x1ca   : > { %12133 = vst [vmem:[#allocation67_spill] sm:$0xff] %v7879_v9  ;;  %v1023_v9 = vmax.f32 %v929_v38, 0.0  ;;  %7093 = vmatmul.msk.f32.vlgmr.msra.gmra.mxu3 %vm430_vm1, %v419_v35 }
 0x1cb   : > { %2243 = vrot.lane.b32.xlu0 %v7836_v36, %s7257_s24  ;;  %1861 = vrot.lane.b32.xlu1 %v7860_v50, %s7260_s27 }
 0x1cc   : > { %v7924_v39 = vsel %vm996_vm3, %v1023_v9, %v929_v38 }
 0x1cd   : > { %v7893_v31 = vpop.permute.xlu1 %3139  ;;  %v7895_v11 = vpop.permute.xlu0 %1655  ;;  %12141 = vst [vmem:[#allocation75_spill] sm:$0xff] %v7924_v39 }
 0x1ce   : > { %12136 = vst [vmem:[#allocation70_spill] sm:$0xff] %v7893_v31  ;;  %v563_v31 = vsel %vm430_vm1, %v418_v54, 0.0 }
 0x1cf   : > { %12137 = vst [vmem:[#allocation71_spill] sm:$0xff] %v7895_v11  ;;  %1671 = vrot.lane.b32.xlu2 %v7889_v19, %s7256_s23  ;;  %7130 = vmatmul.msk.f32.gmra.mxu1 %vm1097_vm4, %v7924_v39  ;;  %v426_v39 = vld [vmem:[%s7341_s16 + $0x160] sm:$0xff] }
 0x1d1   : > { %v7902_v52 = vpop.permute.xlu2 %1851  ;;  %7092 = vmatmul.msk.f32.gmra.mxu0 %vm430_vm1, %v418_v54 }
 0x1d2   : > { %12138 = vst [vmem:[#allocation72_spill] sm:$0xff] %v7902_v52  ;;  %v564_v52 = vsel %vm430_vm1, %v419_v35, 0.0 }
 0x1d3   : > { %2579 = vrot.lane.b32.xlu0 %v7836_v36, %s7258_s25  ;;  %2245 = vrot.lane.b32.xlu1 %v7860_v50, %s7257_s24 }
 0x1d5   : > { %v7909_v11 = vpop.permute.xlu0 %1847  ;;  %v7911_v14 = vpop.permute.xlu1 %1657 }
 0x1d6   : > { %12139 = vst [vmem:[#allocation73_spill] sm:$0xff] %v7909_v11  ;;  %v566_v11 = vsel %vm430_vm1, %v420_v51, 0.0 }
 0x1d7   : > { %12140 = vst [vmem:[#allocation74_spill] sm:$0xff] %v7911_v14  ;;  %1863 = vrot.lane.b32.xlu2 %v7889_v19, %s7260_s27  ;;  %v565_v14 = vadd.f32 %v564_v52, %v563_v31 }
 0x1d9   : > { %v7927_v53 = vpop.permute.xlu2 %2235  ;;  %v567_v54 = vadd.f32 %v566_v11, %v565_v14 }
 0x1da   : > { %12142 = vst [vmem:[#allocation76_spill] sm:$0xff] %v7927_v53 }
 0x1db   : > { %2771 = vrot.lane.b32.xlu0 %v7836_v36, %s7261_s28  ;;  %2581 = vrot.lane.b32.xlu1 %v7860_v50, %s7258_s25  ;;  %v568_v35 = vrot.slane %v567_v54, 4 }
 0x1dd   : > { %v7935_v43 = vpop.permute.xlu0 %2231  ;;  %v7937_v9 = vpop.permute.xlu1 %1849  ;;  %v569_v31 = vadd.f32 %v568_v35, %v567_v54 }
 0x1de   : > { %12143 = vst [vmem:[#allocation77_spill] sm:$0xff] %v7935_v43 }
 0x1df   : > { %12144 = vst [vmem:[#allocation78_spill] sm:$0xff] %v7937_v9  ;;  %2247 = vrot.lane.b32.xlu2 %v7889_v19, %s7257_s24  ;;  %v570_v52 = vrot.slane %v569_v31, 2  ;;  %v931_v9 = vpop.f32.mrf.mxu0 }
 0x1e0   : > { %v932_v35 = vadd.f32 %v7400_v6, %v931_v9 }
 0x1e1   : > { %v7941_v38 = vpop.permute.xlu2 %2571  ;;  %v571_v53 = vadd.f32 %v570_v52, %v569_v31 }
 0x1e2   : > { %12145 = vst [vmem:[#allocation79_spill] sm:$0xff] %v7941_v38  ;;  %v7954_v38 = vpop.f32.mrf.mxu1  ;;  %v1024_v17 = vmax.f32 %v932_v35, 0.0 }
 0x1e3   : > { %3155 = vrot.lane.b32.xlu0 %v7836_v36, %s7259_s26  ;;  %2773 = vrot.lane.b32.xlu1 %v7860_v50, %s7261_s28  ;;  %v572_v11 = vrot.slane %v571_v53, 1  ;;  %12148 = vst [vmem:[#allocation82_spill] sm:$0xff] %v7954_v38 }
 0x1e5   : > { %v7947_v14 = vpop.permute.xlu0 %2567  ;;  %v7949_v43 = vpop.permute.xlu1 %2233  ;;  %v573_v54 = vadd.f32 %v572_v11, %v571_v53  ;;  %v7966_v53 = vsel %vm996_vm3, %v1024_v17, %v932_v35 }
 0x1e6   : > { %12146 = vst [vmem:[#allocation80_spill] sm:$0xff] %v7947_v14  ;;  %7131 = vmatmul.msk.f32.gmra.mxu1 %vm1097_vm4, %v7966_v53 }
 0x1e7   : > { %12147 = vst [vmem:[#allocation81_spill] sm:$0xff] %v7949_v43  ;;  %2583 = vrot.lane.b32.xlu2 %v7889_v19, %s7258_s25  ;;  %v619_v31 = vmul.f32 0.0625, %v573_v54 }
 0x1e8   : > { %12150 = vst [vmem:[#allocation84_spill] sm:$0xff] %v7966_v53 }
 0x1e9   : > { %v7956_v52 = vpop.permute.xlu2 %2763  ;;  %v670_v1 = vsel %vm625_vm2, %v619_v31, %v420_v51  ;;  %v934_v51 = vpop.f32.mrf.mxu0 }
 0x1ea   : > { %12149 = vst [vmem:[#allocation83_spill] sm:$0xff] %v7956_v52  ;;  %7094 = vmatmul.msk.f32.gmra.mxu3 %vm430_vm1, %v670_v1  ;;  %v935_v54 = vadd.f32 %v7400_v6, %v934_v51  ;;  %v7980_v35 = vpop.f32.mrf.mxu1 }
 0x1eb   : > { %3157 = vrot.lane.b32.xlu1 %v7860_v50, %s7259_s26  ;;  %1673 = vrot.lane.b32.xlu0 %v7954_v38, %s7256_s23  ;;  %12154 = vst [vmem:[#allocation88_spill] sm:$0xff] %v7980_v35 }
 0x1ec   : > { %v1025_v17 = vmax.f32 %v935_v54, 0.0 }
 0x1ed   : > { %v7971_v9 = vpop.permute.xlu0 %2759  ;;  %v7973_v11 = vpop.permute.xlu1 %2569 }
 0x1ee   : > { %12151 = vst [vmem:[#allocation85_spill] sm:$0xff] %v7971_v9  ;;  %v7988_v1 = vsel %vm996_vm3, %v1025_v17, %v935_v54  ;;  %v421_v17 = vld [vmem:[%s7341_s16 + $0x138] sm:$0xff] }
 0x1ef   : > { %12152 = vst [vmem:[#allocation86_spill] sm:$0xff] %v7973_v11  ;;  %2775 = vrot.lane.b32.xlu2 %v7889_v19, %s7261_s28  ;;  %7132 = vmatmul.msk.f32.gmra.mxu1 %vm1097_vm4, %v7988_v1  ;;  %v574_v52 = vsel %vm430_vm1, %v421_v17, 0.0  ;;  %v425_v9 = vld [vmem:[%s7341_s16 + $0x158] sm:$0xff] }
 0x1f0   : > { %12155 = vst [vmem:[#allocation89_spill] sm:$0xff] %v7988_v1  ;;  %v576_v32 = vadd.f32 %v575_v0, %v574_v52  ;;  %v588_v1 = vsel %vm430_vm1, %v426_v39, 0.0 }
 0x1f1   : > { %v7978_v31 = vpop.permute.xlu2 %3147  ;;  %v937_v54 = vpop.f32.mrf.mxu0 }
 0x1f2   : > { %12153 = vst [vmem:[#allocation87_spill] sm:$0xff] %v7978_v31  ;;  %v8005_v11 = vpop.f32.mrf.mxu1  ;;  %7095 = vmatmul.msk.f32.gmra.mxu3 %vm430_vm1, %v421_v17 }
 0x1f3   : > { %1865 = vrot.lane.b32.xlu0 %v7954_v38, %s7260_s27  ;;  %1675 = vrot.lane.b32.xlu1 %v7980_v35, %s7256_s23  ;;  %12159 = vst [vmem:[#allocation93_spill] sm:$0xff] %v8005_v11 }
 0x1f5   : > { %v7992_v51 = vpop.permute.xlu0 %3143  ;;  %v7994_v31 = vpop.permute.xlu1 %2761 }
 0x1f6   : > { %12156 = vst [vmem:[#allocation90_spill] sm:$0xff] %v7992_v51  ;;  %v938_v51 = vadd.f32 %v7400_v6, %v937_v54 }
 0x1f7   : > { %12157 = vst [vmem:[#allocation91_spill] sm:$0xff] %v7994_v31  ;;  %3159 = vrot.lane.b32.xlu2 %v7889_v19, %s7259_s26  ;;  %v423_v31 = vld [vmem:[%s7341_s16 + $0x148] sm:$0xff] }
 0x1f8   : > { %v1026_v14 = vmax.f32 %v938_v51, 0.0  ;;  %v577_v54 = vsel %vm430_vm1, %v423_v31, 0.0 }
 0x1f9   : > { %v7998_v43 = vpop.permute.xlu2 %1665 }
 0x1fa   : > { %12158 = vst [vmem:[#allocation92_spill] sm:$0xff] %v7998_v43  ;;  %v8021_v6 = vsel %vm996_vm3, %v1026_v14, %v938_v51  ;;  %7096 = vmatmul.msk.f32.gmra.mxu3 %vm430_vm1, %v422_v59 }
 0x1fb   : > { %2249 = vrot.lane.b32.xlu0 %v7954_v38, %s7257_s24  ;;  %1867 = vrot.lane.b32.xlu1 %v7980_v35, %s7260_s27  ;;  %12162 = vst [vmem:[#allocation96_spill] sm:$0xff] %v8021_v6 }
 0x1fc   : > { %7133 = vmatmul.msk.f32.gmra.mxu1 %vm1097_vm4, %v8021_v6  ;;  %v586_v6 = vsel %vm430_vm1, %v425_v9, 0.0 }
 0x1fd   : > { %v8010_v62 = vpop.permute.xlu1 %3145  ;;  %v8012_v43 = vpop.permute.xlu0 %1661 }
 0x1fe   : > { %12160 = vst [vmem:[#allocation94_spill] sm:$0xff] %v8010_v62 }
 0x1ff   : > { %12161 = vst [vmem:[#allocation95_spill] sm:$0xff] %v8012_v43  ;;  %1677 = vrot.lane.b32.xlu2 %v8005_v11, %s7256_s23  ;;  %v578_v43 = vadd.f32 %v577_v54, %v576_v32 }
 0x201   : > { %v8024_v17 = vpop.permute.xlu2 %1857  ;;  %v579_v0 = vrot.slane %v578_v43, 4 }
 0x202   : > { %12163 = vst [vmem:[#allocation97_spill] sm:$0xff] %v8024_v17 }
 0x203   : > { %2585 = vrot.lane.b32.xlu0 %v7954_v38, %s7258_s25  ;;  %2251 = vrot.lane.b32.xlu1 %v7980_v35, %s7257_s24  ;;  %v580_v51 = vadd.f32 %v579_v0, %v578_v43  ;;  %v940_v43 = vpop.f32.mrf.mxu0 }
 0x205   : > { %v8033_v52 = vpop.permute.xlu0 %1853  ;;  %v8035_v14 = vpop.permute.xlu1 %1663  ;;  %v581_v17 = vrot.slane %v580_v51, 2 }
 0x206   : > { %12164 = vst [vmem:[#allocation98_spill] sm:$0xff] %v8033_v52 }
 0x207   : > { %12165 = vst [vmem:[#allocation99_spill] sm:$0xff] %v8035_v14  ;;  %1869 = vrot.lane.b32.xlu2 %v8005_v11, %s7260_s27  ;;  %v582_v32 = vadd.f32 %v581_v17, %v580_v51  ;;  %v8054_v17 = vld [vmem:[%s11898_s2] ss:$0 sm:$0xff] }
 0x208   : > { %v941_v0 = vadd.f32 %v8054_v17, %v940_v43 }
 0x209   : > { %v8039_v62 = vpop.permute.xlu2 %2241  ;;  %v583_v54 = vrot.slane %v582_v32, 1 }
 0x20a   : > { %12166 = vst [vmem:[#allocation100_spill] sm:$0xff] %v8039_v62  ;;  %v8057_v62 = vpop.f32.mrf.mxu1 }
 0x20b   : > { %2777 = vrot.lane.b32.xlu0 %v7954_v38, %s7261_s28  ;;  %2587 = vrot.lane.b32.xlu1 %v7980_v35, %s7258_s25  ;;  %v584_v14 = vadd.f32 %v583_v54, %v582_v32  ;;  %12169 = vst [vmem:[#allocation103_spill] sm:$0xff] %v8057_v62 }
 0x20d   : > { %v8045_v59 = vpop.permute.xlu0 %2237  ;;  %v8047_v52 = vpop.permute.xlu1 %1855  ;;  %v620_v51 = vmul.f32 0.0625, %v584_v14 }
 0x20e   : > { %12167 = vst [vmem:[#allocation101_spill] sm:$0xff] %v8045_v59  ;;  %v1027_v59 = vmax.f32 %v941_v0, 0.0 }
 0x20f   : > { %12168 = vst [vmem:[#allocation102_spill] sm:$0xff] %v8047_v52  ;;  %2253 = vrot.lane.b32.xlu2 %v8005_v11, %s7257_s24  ;;  %v673_v32 = vsel %vm625_vm2, %v620_v51, %v423_v31  ;;  %v943_v31 = vpop.f32.mrf.mxu0 }
 0x210   : > { %7097 = vmatmul.msk.f32.gmra.mxu3 %vm430_vm1, %v673_v32  ;;  %v8070_v54 = vsel %vm996_vm3, %v1027_v59, %v941_v0  ;;  %v944_v51 = vadd.f32 %v8054_v17, %v943_v31 }
 0x211   : > { %v8059_v30 = vpop.permute.xlu2 %2577  ;;  %12171 = vst [vmem:[#allocation105_spill] sm:$0xff] %v8070_v54  ;;  %7134 = vmatmul.msk.f32.gmra.mxu1 %vm1097_vm4, %v8070_v54 }
 0x212   : > { %12170 = vst [vmem:[#allocation104_spill] sm:$0xff] %v8059_v30  ;;  %v1028_v52 = vmax.f32 %v944_v51, 0.0  ;;  %v8083_v30 = vpop.f32.mrf.mxu1 }
 0x213   : > { %2779 = vrot.lane.b32.xlu1 %v7980_v35, %s7261_s28  ;;  %1679 = vrot.lane.b32.xlu0 %v8057_v62, %s7256_s23  ;;  %12175 = vst [vmem:[#allocation109_spill] sm:$0xff] %v8083_v30 }
 0x214   : > { %v8091_v59 = vsel %vm996_vm3, %v1028_v52, %v944_v51  ;;  %v424_v51 = vld [vmem:[%s7341_s16 + $0x150] sm:$0xff] }
 0x215   : > { %v8074_v14 = vpop.permute.xlu0 %2573  ;;  %v8076_v43 = vpop.permute.xlu1 %2239  ;;  %12176 = vst [vmem:[#allocation110_spill] sm:$0xff] %v8091_v59 }
 0x216   : > { %12172 = vst [vmem:[#allocation106_spill] sm:$0xff] %v8074_v14 }
 0x217   : > { %12173 = vst [vmem:[#allocation107_spill] sm:$0xff] %v8076_v43  ;;  %2589 = vrot.lane.b32.xlu2 %v8005_v11, %s7258_s25  ;;  %v946_v52 = vpop.f32.mrf.mxu0 }
 0x218   : > { %v947_v14 = vadd.f32 %v8054_v17, %v946_v52  ;;  %7098 = vmatmul.msk.f32.gmra.mxu3 %vm430_vm1, %v424_v51 }
 0x219   : > { %v8081_v32 = vpop.permute.xlu2 %2769  ;;  %7135 = vmatmul.msk.f32.gmra.mxu1 %vm1097_vm4, %v8091_v59 }
 0x21a   : > { %12174 = vst [vmem:[#allocation108_spill] sm:$0xff] %v8081_v32  ;;  %v8108_v32 = vpop.f32.mrf.mxu1  ;;  %v1029_v29 = vmax.f32 %v947_v14, 0.0 }
 0x21b   : > { %1871 = vrot.lane.b32.xlu0 %v8057_v62, %s7260_s27  ;;  %1681 = vrot.lane.b32.xlu1 %v8083_v30, %s7256_s23  ;;  %12180 = vst [vmem:[#allocation114_spill] sm:$0xff] %v8108_v32 }
 0x21c   : > { %v8124_v52 = vsel %vm996_vm3, %v1029_v29, %v947_v14 }
 0x21d   : > { %v8095_v0 = vpop.permute.xlu0 %2765  ;;  %v8097_v31 = vpop.permute.xlu1 %2575  ;;  %12183 = vst [vmem:[#allocation117_spill] sm:$0xff] %v8124_v52 }
 0x21e   : > { %12177 = vst [vmem:[#allocation111_spill] sm:$0xff] %v8095_v0 }
 0x21f   : > { %12178 = vst [vmem:[#allocation112_spill] sm:$0xff] %v8097_v31  ;;  %2781 = vrot.lane.b32.xlu2 %v8005_v11, %s7261_s28  ;;  %v585_v31 = vsel %vm430_vm1, %v424_v51, 0.0 }
 0x220   : > { %v587_v59 = vadd.f32 %v586_v6, %v585_v31  ;;  %7099 = vmatmul.msk.f32.gmra.mxu3 %vm430_vm1, %v425_v9 }
 0x221   : > { %v8101_v43 = vpop.permute.xlu2 %3153  ;;  %7136 = vmatmul.msk.f32.gmra.mxu1 %vm1097_vm4, %v8124_v52 }
 0x222   : > { %12179 = vst [vmem:[#allocation113_spill] sm:$0xff] %v8101_v43 }
 0x223   : > { %2255 = vrot.lane.b32.xlu0 %v8057_v62, %s7257_s24  ;;  %1873 = vrot.lane.b32.xlu1 %v8083_v30, %s7260_s27 }
 0x225   : > { %v8113_v0 = vpop.permute.xlu0 %3149  ;;  %v8115_v43 = vpop.permute.xlu1 %2767 }
 0x226   : > { %12181 = vst [vmem:[#allocation115_spill] sm:$0xff] %v8113_v0  ;;  %v589_v0 = vadd.f32 %v588_v1, %v587_v59 }
 0x227   : > { %12182 = vst [vmem:[#allocation116_spill] sm:$0xff] %v8115_v43  ;;  %1683 = vrot.lane.b32.xlu2 %v8108_v32, %s7256_s23 }
 0x228   : > { %v590_v6 = vrot.slane %v589_v0, 4 }
 0x229   : > { %v8127_v51 = vpop.permute.xlu2 %1671 }
 0x22a   : > { %12184 = vst [vmem:[#allocation118_spill] sm:$0xff] %v8127_v51  ;;  %v591_v14 = vadd.f32 %v590_v6, %v589_v0  ;;  %v949_v0 = vpop.f32.mrf.mxu0 }
 0x22b   : > { %2591 = vrot.lane.b32.xlu0 %v8057_v62, %s7258_s25  ;;  %2257 = vrot.lane.b32.xlu1 %v8083_v30, %s7257_s24  ;;  %v950_v6 = vadd.f32 %v8054_v17, %v949_v0  ;;  %v427_v0 = vld [vmem:[%s7341_s16 + $0x168] sm:$0xff] }
 0x22c   : > { %v592_v51 = vrot.slane %v591_v14, 2 }
 0x22d   : > { %v8136_v31 = vpop.permute.xlu1 %3151  ;;  %v8138_v29 = vpop.permute.xlu0 %1667  ;;  %v1030_v52 = vmax.f32 %v950_v6, 0.0 }
 0x22e   : > { %12185 = vst [vmem:[#allocation119_spill] sm:$0xff] %v8136_v31  ;;  %v593_v1 = vadd.f32 %v592_v51, %v591_v14  ;;  %v8155_v14 = vpop.f32.mrf.mxu1 }
 0x22f   : > { %12186 = vst [vmem:[#allocation120_spill] sm:$0xff] %v8138_v29  ;;  %1875 = vrot.lane.b32.xlu2 %v8108_v32, %s7260_s27 }
 0x230   : > { %v594_v59 = vrot.slane %v593_v1, 1  ;;  %12190 = vst [vmem:[#allocation124_spill] sm:$0xff] %v8155_v14 }
 0x231   : > { %v8142_v43 = vpop.permute.xlu2 %1863 }
 0x232   : > { %12187 = vst [vmem:[#allocation121_spill] sm:$0xff] %v8142_v43  ;;  %v595_v29 = vadd.f32 %v594_v59, %v593_v1 }
 0x233   : > { %2783 = vrot.lane.b32.xlu0 %v8057_v62, %s7261_s28  ;;  %2593 = vrot.lane.b32.xlu1 %v8083_v30, %s7258_s25 }
 0x234   : > { %v621_v51 = vmul.f32 0.0625, %v595_v29  ;;  %v8168_v29 = vsel %vm996_vm3, %v1030_v52, %v950_v6  ;;  %v596_v6 = vsel %vm430_vm1, %v427_v0, 0.0 }
 0x235   : > { %v8148_v9 = vpop.permute.xlu0 %1859  ;;  %v8150_v31 = vpop.permute.xlu1 %1669  ;;  %12192 = vst [vmem:[#allocation126_spill] sm:$0xff] %v8168_v29  ;;  %7137 = vmatmul.msk.f32.gmra.mxu1 %vm1097_vm4, %v8168_v29 }
 0x236   : > { %12188 = vst [vmem:[#allocation122_spill] sm:$0xff] %v8148_v9  ;;  %v676_v9 = vsel %vm625_vm2, %v621_v51, %v426_v39  ;;  %v952_v39 = vpop.f32.mrf.mxu0  ;;  %v428_v51 = vld [vmem:[%s7341_s16 + $0x170] sm:$0xff]  ;;  %v8185_v29 = vpop.f32.mrf.mxu1 }
 0x237   : > { %12189 = vst [vmem:[#allocation123_spill] sm:$0xff] %v8150_v31  ;;  %2259 = vrot.lane.b32.xlu2 %v8108_v32, %s7257_s24  ;;  %7100 = vmatmul.msk.f32.gmra.mxu3 %vm430_vm1, %v676_v9  ;;  %v953_v9 = vadd.f32 %v8054_v17, %v952_v39 }
 0x238   : > { %12196 = vst [vmem:[#allocation130_spill] sm:$0xff] %v8185_v29 }
 0x239   : > { %v8157_v43 = vpop.permute.xlu2 %2247  ;;  %v1031_v52 = vmax.f32 %v953_v9, 0.0 }
 0x23a   : > { %12191 = vst [vmem:[#allocation125_spill] sm:$0xff] %v8157_v43  ;;  %v597_v43 = vsel %vm430_vm1, %v428_v51, 0.0 }
 0x23b   : > { %2785 = vrot.lane.b32.xlu1 %v8083_v30, %s7261_s28  ;;  %1685 = vrot.lane.b32.xlu0 %v8155_v14, %s7256_s23  ;;  %v8195_v39 = vsel %vm996_vm3, %v1031_v52, %v953_v9 }
 0x23c   : > { %12197 = vst [vmem:[#allocation131_spill] sm:$0xff] %v8195_v39 }
 0x23d   : > { %v8172_v1 = vpop.permute.xlu0 %2243  ;;  %v8174_v59 = vpop.permute.xlu1 %1861  ;;  %7138 = vmatmul.msk.f32.gmra.mxu1 %vm1097_vm4, %v8195_v39 }
 0x23e   : > { %12193 = vst [vmem:[#allocation127_spill] sm:$0xff] %v8172_v1  ;;  %v429_v1 = vld [vmem:[%s7341_s16 + $0x178] sm:$0xff]  ;;  %s7265_s16 = smov 88  }
 0x23f   : > { %12194 = vst [vmem:[#allocation128_spill] sm:$0xff] %v8174_v59  ;;  %2595 = vrot.lane.b32.xlu2 %v8108_v32, %s7258_s25  ;;  %7101 = vmatmul.msk.f32.gmra.mxu3 %vm430_vm1, %v427_v0  ;;  %v598_v59 = vadd.f32 %v597_v43, %v596_v6 }
 0x241   : > { %v8181_v31 = vpop.permute.xlu2 %2583 }
 0x242   : > { %12195 = vst [vmem:[#allocation129_spill] sm:$0xff] %v8181_v31  ;;  %v599_v31 = vsel %vm430_vm1, %v429_v1, 0.0 }
 0x243   : > { %1877 = vrot.lane.b32.xlu0 %v8155_v14, %s7260_s27  ;;  %1687 = vrot.lane.b32.xlu1 %v8185_v29, %s7256_s23  ;;  %v600_v54 = vadd.f32 %v599_v31, %v598_v59  ;;  %v8213_v59 = vpop.f32.mrf.mxu1 }
 0x244   : > { %12201 = vst [vmem:[#allocation135_spill] sm:$0xff] %v8213_v59 }
 0x245   : > { %v8200_v8 = vpop.permute.xlu0 %2579  ;;  %v8202_v43 = vpop.permute.xlu1 %2245  ;;  %v601_v0 = vrot.slane %v600_v54, 4 }
 0x246   : > { %12198 = vst [vmem:[#allocation132_spill] sm:$0xff] %v8200_v8  ;;  %v955_v31 = vpop.f32.mrf.mxu0 }
 0x247   : > { %12199 = vst [vmem:[#allocation133_spill] sm:$0xff] %v8202_v43  ;;  %2787 = vrot.lane.b32.xlu2 %v8108_v32, %s7261_s28  ;;  %v602_v6 = vadd.f32 %v601_v0, %v600_v54  ;;  %7102 = vmatmul.msk.f32.gmra.mxu3 %vm430_vm1, %v428_v51  ;;  %v956_v52 = vadd.f32 %v8054_v17, %v955_v31 }
 0x249   : > { %v8206_v41 = vpop.permute.xlu2 %2775  ;;  %v603_v9 = vrot.slane %v602_v6, 2  ;;  %v1032_v0 = vmax.f32 %v956_v52, 0.0 }
 0x24a   : > { %12200 = vst [vmem:[#allocation134_spill] sm:$0xff] %v8206_v41 }
 0x24b   : > { %2261 = vrot.lane.b32.xlu0 %v8155_v14, %s7257_s24  ;;  %1879 = vrot.lane.b32.xlu1 %v8185_v29, %s7260_s27  ;;  %v604_v43 = vadd.f32 %v603_v9, %v602_v6  ;;  %v8224_v51 = vsel %vm996_vm3, %v1032_v0, %v956_v52 }
 0x24c   : > { %12204 = vst [vmem:[#allocation138_spill] sm:$0xff] %v8224_v51  ;;  %7139 = vmatmul.msk.f32.gmra.mxu1 %vm1097_vm4, %v8224_v51 }
 0x24d   : > { %v8216_v8 = vpop.permute.xlu0 %2771  ;;  %v8218_v54 = vpop.permute.xlu1 %2581  ;;  %v605_v41 = vrot.slane %v604_v43, 1 }
 0x24e   : > { %12202 = vst [vmem:[#allocation136_spill] sm:$0xff] %v8216_v8 }
 0x24f   : > { %12203 = vst [vmem:[#allocation137_spill] sm:$0xff] %v8218_v54  ;;  %1689 = vrot.lane.b32.xlu2 %v8213_v59, %s7256_s23  ;;  %v606_v39 = vadd.f32 %v605_v41, %v604_v43  ;;  %v958_v41 = vpop.f32.mrf.mxu0 }
 0x251   : > { %v8226_v53 = vpop.permute.xlu2 %3159  ;;  %v622_v6 = vmul.f32 0.0625, %v606_v39  ;;  %v959_v39 = vadd.f32 %v8054_v17, %v958_v41 }
 0x252   : > { %12205 = vst [vmem:[#allocation139_spill] sm:$0xff] %v8226_v53 }
 0x253   : > { %2597 = vrot.lane.b32.xlu0 %v8155_v14, %s7258_s25  ;;  %2263 = vrot.lane.b32.xlu1 %v8185_v29, %s7257_s24  ;;  %v679_v9 = vsel %vm625_vm2, %v622_v6, %v429_v1  ;;  %v1033_v0 = vmax.f32 %v959_v39, 0.0 }
 0x254   : > { %7103 = vmatmul.msk.f32.gmra.mxu3 %vm430_vm1, %v679_v9  ;;  %v961_v9 = vpop.f32.mrf.mxu3 }
 0x255   : > { %v8236_v31 = vpop.permute.xlu0 %3155  ;;  %v8238_v52 = vpop.permute.xlu1 %2773  ;;  %v8252_v23 = vsel %vm996_vm3, %v1033_v0, %v959_v39  ;;  %v962_v41 = vadd.f32 %v8054_v17, %v961_v9 }
 0x256   : > { %12206 = vst [vmem:[#allocation140_spill] sm:$0xff] %v8236_v31 }
 0x257   : > { %12207 = vst [vmem:[#allocation141_spill] sm:$0xff] %v8238_v52  ;;  %1881 = vrot.lane.b32.xlu2 %v8213_v59, %s7260_s27  ;;  %v1034_v53 = vmax.f32 %v962_v41, 0.0 }
 0x258   : > { %12209 = vst [vmem:[#allocation143_spill] sm:$0xff] %v8252_v23 }
 0x259   : > { %v8244_v43 = vpop.permute.xlu2 %1677  ;;  %v8273_v39 = vsel %vm996_vm3, %v1034_v53, %v962_v41 }
 0x25a   : > { %12208 = vst [vmem:[#allocation142_spill] sm:$0xff] %v8244_v43  ;;  %v8263_v43 = vpop.f32.mrf.mxu1 }
 0x25b   : > { %2789 = vrot.lane.b32.xlu0 %v8155_v14, %s7261_s28  ;;  %2599 = vrot.lane.b32.xlu1 %v8185_v29, %s7258_s25  ;;  %12212 = vst [vmem:[#allocation146_spill] sm:$0xff] %v8263_v43 }
 0x25c   : > { %7140 = vmatmul.msk.f32.vlgmr.msrb.gmra.mxu3 %vm1097_vm4, %v8252_v23  ;;  %12214 = vst [vmem:[#allocation148_spill] sm:$0xff] %v8273_v39 }
 0x25d   : > { %v8254_v1 = vpop.permute.xlu1 %3157  ;;  %v8256_v6 = vpop.permute.xlu0 %1673 }
 0x25e   : > { %12210 = vst [vmem:[#allocation144_spill] sm:$0xff] %v8254_v1 }
 0x25f   : > { %12211 = vst [vmem:[#allocation145_spill] sm:$0xff] %v8256_v6  ;;  %2265 = vrot.lane.b32.xlu2 %v8213_v59, %s7257_s24 }
 0x261   : > { %v8265_v31 = vpop.permute.xlu2 %1869 }
 0x262   : > { %12213 = vst [vmem:[#allocation147_spill] sm:$0xff] %v8265_v31  ;;  %v8285_v31 = vpop.f32.mrf.mxu1 }
 0x263   : > { %2791 = vrot.lane.b32.xlu1 %v8185_v29, %s7261_s28  ;;  %1691 = vrot.lane.b32.xlu0 %v8263_v43, %s7256_s23  ;;  %12218 = vst [vmem:[#allocation152_spill] sm:$0xff] %v8285_v31 }
 0x264   : > { %7141 = vmatmul.msk.f32.gmra.mxu3 %vm1097_vm4, %v8273_v39 }
 0x265   : > { %v8275_v0 = vpop.permute.xlu0 %1865  ;;  %v8277_v6 = vpop.permute.xlu1 %1675 }
 0x266   : > { %12215 = vst [vmem:[#allocation149_spill] sm:$0xff] %v8275_v0 }
 0x267   : > { %12216 = vst [vmem:[#allocation150_spill] sm:$0xff] %v8277_v6  ;;  %2601 = vrot.lane.b32.xlu2 %v8213_v59, %s7258_s25 }
 0x269   : > { %v8283_v9 = vpop.permute.xlu2 %2253 }
 0x26a   : > { %12217 = vst [vmem:[#allocation151_spill] sm:$0xff] %v8283_v9  ;;  %v8304_v54 = vpop.f32.mrf.mxu1 }
 0x26b   : > { %1883 = vrot.lane.b32.xlu0 %v8263_v43, %s7260_s27  ;;  %1693 = vrot.lane.b32.xlu1 %v8285_v31, %s7256_s23  ;;  %12222 = vst [vmem:[#allocation156_spill] sm:$0xff] %v8304_v54 }
 0x26d   : > { %v8291_v53 = vpop.permute.xlu0 %2249  ;;  %v8293_v41 = vpop.permute.xlu1 %1867 }
 0x26e   : > { %12219 = vst [vmem:[#allocation153_spill] sm:$0xff] %v8291_v53  ;;  %v964_v6 = vpop.f32.mrf.mxu3 }
 0x26f   : > { %12220 = vst [vmem:[#allocation154_spill] sm:$0xff] %v8293_v41  ;;  %2793 = vrot.lane.b32.xlu2 %v8213_v59, %s7261_s28  ;;  %v965_v0 = vadd.f32 %v8054_v17, %v964_v6 }
 0x271   : > { %v8298_v1 = vpop.permute.xlu2 %2589  ;;  %v1035_v9 = vmax.f32 %v965_v0, 0.0 }
 0x272   : > { %12221 = vst [vmem:[#allocation155_spill] sm:$0xff] %v8298_v1 }
 0x273   : > { %2267 = vrot.lane.b32.xlu0 %v8263_v43, %s7257_s24  ;;  %1885 = vrot.lane.b32.xlu1 %v8285_v31, %s7260_s27  ;;  %v8308_v41 = vsel %vm996_vm3, %v1035_v9, %v965_v0 }
 0x274   : > { %12223 = vst [vmem:[#allocation157_spill] sm:$0xff] %v8308_v41  ;;  %7142 = vmatmul.msk.f32.gmra.mxu3 %vm1097_vm4, %v8308_v41 }
 0x275   : > { %v8310_v53 = vpop.permute.xlu0 %2585  ;;  %v8312_v52 = vpop.permute.xlu1 %2251 }
 0x276   : > { %12224 = vst [vmem:[#allocation158_spill] sm:$0xff] %v8310_v53 }
 0x277   : > { %12225 = vst [vmem:[#allocation159_spill] sm:$0xff] %v8312_v52  ;;  %1695 = vrot.lane.b32.xlu2 %v8304_v54, %s7256_s23  ;;  %v967_v52 = vpop.f32.mrf.mxu3 }
 0x278   : > { %v968_v1 = vadd.f32 %v8054_v17, %v967_v52 }
 0x279   : > { %v8318_v6 = vpop.permute.xlu2 %2781 }
 0x27a   : > { %12226 = vst [vmem:[#allocation160_spill] sm:$0xff] %v8318_v6  ;;  %v1036_v8 = vmax.f32 %v968_v1, 0.0 }
 0x27b   : > { %2603 = vrot.lane.b32.xlu0 %v8263_v43, %s7258_s25  ;;  %2269 = vrot.lane.b32.xlu1 %v8285_v31, %s7257_s24 }
 0x27c   : > { %v8339_v6 = vsel %vm996_vm3, %v1036_v8, %v968_v1 }
 0x27d   : > { %v8324_v0 = vpop.permute.xlu0 %2777  ;;  %v8326_v9 = vpop.permute.xlu1 %2587  ;;  %12230 = vst [vmem:[#allocation164_spill] sm:$0xff] %v8339_v6  ;;  %7143 = vmatmul.msk.f32.gmra.mxu3 %vm1097_vm4, %v8339_v6 }
 0x27e   : > { %12227 = vst [vmem:[#allocation161_spill] sm:$0xff] %v8324_v0 }
 0x27f   : > { %12228 = vst [vmem:[#allocation162_spill] sm:$0xff] %v8326_v9  ;;  %1887 = vrot.lane.b32.xlu2 %v8304_v54, %s7260_s27  ;;  %v970_v52 = vpop.f32.mrf.mxu3 }
 0x280   : > { %v971_v41 = vadd.f32 %v8054_v17, %v970_v52 }
 0x281   : > { %v8331_v53 = vpop.permute.xlu2 %1683 }
 0x282   : > { %12229 = vst [vmem:[#allocation163_spill] sm:$0xff] %v8331_v53  ;;  %v8349_v53 = vpop.f32.mrf.mxu1  ;;  %v1037_v39 = vmax.f32 %v971_v41, 0.0 }
 0x283   : > { %2795 = vrot.lane.b32.xlu0 %v8263_v43, %s7261_s28  ;;  %2605 = vrot.lane.b32.xlu1 %v8285_v31, %s7258_s25  ;;  %12233 = vst [vmem:[#allocation167_spill] sm:$0xff] %v8349_v53 }
 0x284   : > { %v8360_v8 = vsel %vm996_vm3, %v1037_v39, %v971_v41 }
 0x285   : > { %v8341_v9 = vpop.permute.xlu1 %2779  ;;  %v8343_v0 = vpop.permute.xlu0 %1679  ;;  %12235 = vst [vmem:[#allocation169_spill] sm:$0xff] %v8360_v8  ;;  %7144 = vmatmul.msk.f32.gmra.mxu3 %vm1097_vm4, %v8360_v8 }
 0x286   : > { %12231 = vst [vmem:[#allocation165_spill] sm:$0xff] %v8341_v9 }
 0x287   : > { %12232 = vst [vmem:[#allocation166_spill] sm:$0xff] %v8343_v0  ;;  %2271 = vrot.lane.b32.xlu2 %v8304_v54, %s7257_s24 }
 0x289   : > { %v8352_v51 = vpop.permute.xlu2 %1875 }
 0x28a   : > { %12234 = vst [vmem:[#allocation168_spill] sm:$0xff] %v8352_v51  ;;  %v8372_v51 = vpop.f32.mrf.mxu1 }
 0x28b   : > { %2797 = vrot.lane.b32.xlu1 %v8285_v31, %s7261_s28  ;;  %1697 = vrot.lane.b32.xlu0 %v8349_v53, %s7256_s23  ;;  %12239 = vst [vmem:[#allocation173_spill] sm:$0xff] %v8372_v51 }
 0x28d   : > { %v8362_v1 = vpop.permute.xlu0 %1871  ;;  %v8364_v0 = vpop.permute.xlu1 %1681 }
 0x28e   : > { %12236 = vst [vmem:[#allocation170_spill] sm:$0xff] %v8362_v1 }
 0x28f   : > { %12237 = vst [vmem:[#allocation171_spill] sm:$0xff] %v8364_v0  ;;  %2607 = vrot.lane.b32.xlu2 %v8304_v54, %s7258_s25 }
 0x291   : > { %v8370_v52 = vpop.permute.xlu2 %2259 }
 0x292   : > { %12238 = vst [vmem:[#allocation172_spill] sm:$0xff] %v8370_v52 }
 0x293   : > { %1889 = vrot.lane.b32.xlu0 %v8349_v53, %s7260_s27  ;;  %1699 = vrot.lane.b32.xlu1 %v8372_v51, %s7256_s23  ;;  %v973_v0 = vpop.f32.mrf.mxu3 }
 0x294   : > { %v974_v1 = vadd.f32 %v8054_v17, %v973_v0 }
 0x295   : > { %v8378_v39 = vpop.permute.xlu0 %2255  ;;  %v8380_v41 = vpop.permute.xlu1 %1873 }
 0x296   : > { %12240 = vst [vmem:[#allocation174_spill] sm:$0xff] %v8378_v39  ;;  %v1038_v52 = vmax.f32 %v974_v1, 0.0 }
 0x297   : > { %12241 = vst [vmem:[#allocation175_spill] sm:$0xff] %v8380_v41  ;;  %2799 = vrot.lane.b32.xlu2 %v8304_v54, %s7261_s28  ;;  %v8395_v41 = vpop.f32.mrf.mxu1 }
 0x298   : > { %v8393_v39 = vsel %vm996_vm3, %v1038_v52, %v974_v1  ;;  %12244 = vst [vmem:[#allocation178_spill] sm:$0xff] %v8395_v41 }
 0x299   : > { %v8385_v9 = vpop.permute.xlu2 %2595  ;;  %12243 = vst [vmem:[#allocation177_spill] sm:$0xff] %v8393_v39  ;;  %7145 = vmatmul.msk.f32.gmra.mxu3 %vm1097_vm4, %v8393_v39 }
 0x29a   : > { %12242 = vst [vmem:[#allocation176_spill] sm:$0xff] %v8385_v9 }
 0x29b   : > { %2273 = vrot.lane.b32.xlu0 %v8349_v53, %s7257_s24  ;;  %1891 = vrot.lane.b32.xlu1 %v8372_v51, %s7260_s27 }
 0x29d   : > { %v8399_v8 = vpop.permute.xlu0 %2591  ;;  %v8401_v0 = vpop.permute.xlu1 %2257 }
 0x29e   : > { %12245 = vst [vmem:[#allocation179_spill] sm:$0xff] %v8399_v8  ;;  %v976_v8 = vpop.f32.mrf.mxu3 }
 0x29f   : > { %12246 = vst [vmem:[#allocation180_spill] sm:$0xff] %v8401_v0  ;;  %1701 = vrot.lane.b32.xlu2 %v8395_v41, %s7256_s23  ;;  %v977_v0 = vadd.f32 %v8054_v17, %v976_v8 }
 0x2a1   : > { %v8405_v9 = vpop.permute.xlu2 %2787  ;;  %v1039_v6 = vmax.f32 %v977_v0, 0.0 }
 0x2a2   : > { %12247 = vst [vmem:[#allocation181_spill] sm:$0xff] %v8405_v9 }
 0x2a3   : > { %2609 = vrot.lane.b32.xlu0 %v8349_v53, %s7258_s25  ;;  %2275 = vrot.lane.b32.xlu1 %v8372_v51, %s7257_s24  ;;  %v8426_v9 = vsel %vm996_vm3, %v1039_v6, %v977_v0 }
 0x2a4   : > { %12251 = vst [vmem:[#allocation185_spill] sm:$0xff] %v8426_v9  ;;  %7146 = vmatmul.msk.f32.gmra.mxu3 %vm1097_vm4, %v8426_v9 }
 0x2a5   : > { %v8411_v1 = vpop.permute.xlu0 %2783  ;;  %v8413_v52 = vpop.permute.xlu1 %2593 }
 0x2a6   : > { %12248 = vst [vmem:[#allocation182_spill] sm:$0xff] %v8411_v1  ;;  %v979_v8 = vpop.f32.mrf.mxu3 }
 0x2a7   : > { %12249 = vst [vmem:[#allocation183_spill] sm:$0xff] %v8413_v52  ;;  %1893 = vrot.lane.b32.xlu2 %v8395_v41, %s7260_s27  ;;  %v980_v23 = vadd.f32 %v8054_v17, %v979_v8 }
 0x2a9   : > { %v8418_v39 = vpop.permute.xlu2 %1689  ;;  %v1040_v24 = vmax.f32 %v980_v23, 0.0 }
 0x2aa   : > { %12250 = vst [vmem:[#allocation184_spill] sm:$0xff] %v8418_v39  ;;  %v8436_v39 = vpop.f32.mrf.mxu1 }
 0x2ab   : > { %2801 = vrot.lane.b32.xlu0 %v8349_v53, %s7261_s28  ;;  %2611 = vrot.lane.b32.xlu1 %v8372_v51, %s7258_s25  ;;  %12254 = vst [vmem:[#allocation188_spill] sm:$0xff] %v8436_v39  ;;  %v8447_v6 = vsel %vm996_vm3, %v1040_v24, %v980_v23 }
 0x2ac   : > { %12256 = vst [vmem:[#allocation190_spill] sm:$0xff] %v8447_v6  ;;  %7147 = vmatmul.msk.f32.gmra.mxu3 %vm1097_vm4, %v8447_v6 }
 0x2ad   : > { %v8428_v52 = vpop.permute.xlu1 %2785  ;;  %v8430_v1 = vpop.permute.xlu0 %1685 }
 0x2ae   : > { %12252 = vst [vmem:[#allocation186_spill] sm:$0xff] %v8428_v52 }
 0x2af   : > { %12253 = vst [vmem:[#allocation187_spill] sm:$0xff] %v8430_v1  ;;  %2277 = vrot.lane.b32.xlu2 %v8395_v41, %s7257_s24 }
 0x2b1   : > { %v8439_v61 = vpop.permute.xlu2 %1881 }
 0x2b2   : > { %12255 = vst [vmem:[#allocation189_spill] sm:$0xff] %v8439_v61  ;;  %v8459_v61 = vpop.f32.mrf.mxu1 }
 0x2b3   : > { %2803 = vrot.lane.b32.xlu1 %v8372_v51, %s7261_s28  ;;  %1703 = vrot.lane.b32.xlu0 %v8436_v39, %s7256_s23  ;;  %12260 = vst [vmem:[#allocation194_spill] sm:$0xff] %v8459_v61 }
 0x2b5   : > { %v8449_v0 = vpop.permute.xlu0 %1877  ;;  %v8451_v1 = vpop.permute.xlu1 %1687 }
 0x2b6   : > { %12257 = vst [vmem:[#allocation191_spill] sm:$0xff] %v8449_v0 }
 0x2b7   : > { %12258 = vst [vmem:[#allocation192_spill] sm:$0xff] %v8451_v1  ;;  %2613 = vrot.lane.b32.xlu2 %v8395_v41, %s7258_s25 }
 0x2b9   : > { %v8457_v8 = vpop.permute.xlu2 %2265 }
 0x2ba   : > { %12259 = vst [vmem:[#allocation193_spill] sm:$0xff] %v8457_v8  ;;  %v982_v1 = vpop.f32.mrf.mxu3 }
 0x2bb   : > { %1895 = vrot.lane.b32.xlu0 %v8436_v39, %s7260_s27  ;;  %1705 = vrot.lane.b32.xlu1 %v8459_v61, %s7256_s23  ;;  %v983_v0 = vadd.f32 %v8054_v17, %v982_v1 }
 0x2bd   : > { %v8465_v24 = vpop.permute.xlu0 %2261  ;;  %v8467_v23 = vpop.permute.xlu1 %1879  ;;  %v1041_v8 = vmax.f32 %v983_v0, 0.0 }
 0x2be   : > { %12261 = vst [vmem:[#allocation195_spill] sm:$0xff] %v8465_v24 }
 0x2bf   : > { %12262 = vst [vmem:[#allocation196_spill] sm:$0xff] %v8467_v23  ;;  %2805 = vrot.lane.b32.xlu2 %v8395_v41, %s7261_s28  ;;  %v8480_v24 = vsel %vm996_vm3, %v1041_v8, %v983_v0  ;;  %v8482_v23 = vpop.f32.mrf.mxu1 }
 0x2c0   : > { %12264 = vst [vmem:[#allocation198_spill] sm:$0xff] %v8480_v24  ;;  %7148 = vmatmul.msk.f32.gmra.mxu3 %vm1097_vm4, %v8480_v24 }
 0x2c1   : > { %v8472_v52 = vpop.permute.xlu2 %2601  ;;  %12265 = vst [vmem:[#allocation199_spill] sm:$0xff] %v8482_v23 }
 0x2c2   : > { %12263 = vst [vmem:[#allocation197_spill] sm:$0xff] %v8472_v52  ;;  %v985_v52 = vpop.f32.mrf.mxu3 }
 0x2c3   : > { %2279 = vrot.lane.b32.xlu0 %v8436_v39, %s7257_s24  ;;  %1897 = vrot.lane.b32.xlu1 %v8459_v61, %s7260_s27  ;;  %v986_v9 = vadd.f32 %v8054_v17, %v985_v52 }
 0x2c5   : > { %v8486_v6 = vpop.permute.xlu0 %2597  ;;  %v8488_v1 = vpop.permute.xlu1 %2263  ;;  %v1042_v3 = vmax.f32 %v986_v9, 0.0 }
 0x2c6   : > { %12266 = vst [vmem:[#allocation200_spill] sm:$0xff] %v8486_v6 }
 0x2c7   : > { %12267 = vst [vmem:[#allocation201_spill] sm:$0xff] %v8488_v1  ;;  %1707 = vrot.lane.b32.xlu2 %v8482_v23, %s7256_s23  ;;  %v8505_v1 = vsel %vm996_vm3, %v1042_v3, %v986_v9 }
 0x2c8   : > { %12271 = vst [vmem:[#allocation205_spill] sm:$0xff] %v8505_v1  ;;  %7149 = vmatmul.msk.f32.gmra.mxu3 %vm1097_vm4, %v8505_v1 }
 0x2c9   : > { %v8493_v22 = vpop.permute.xlu2 %2793 }
 0x2ca   : > { %12268 = vst [vmem:[#allocation202_spill] sm:$0xff] %v8493_v22  ;;  %v988_v52 = vpop.f32.mrf.mxu3 }
 0x2cb   : > { %2615 = vrot.lane.b32.xlu0 %v8436_v39, %s7258_s25  ;;  %2281 = vrot.lane.b32.xlu1 %v8459_v61, %s7257_s24  ;;  %v989_v22 = vadd.f32 %v8054_v17, %v988_v52  ;;  %v8530_v52 = vpop.f32.mrf.mxu1 }
 0x2cc   : > { %12276 = vst [vmem:[#allocation210_spill] sm:$0xff] %v8530_v52 }
 0x2cd   : > { %v8499_v0 = vpop.permute.xlu0 %2789  ;;  %v8501_v8 = vpop.permute.xlu1 %2599  ;;  %v1043_v24 = vmax.f32 %v989_v22, 0.0 }
 0x2ce   : > { %12269 = vst [vmem:[#allocation203_spill] sm:$0xff] %v8499_v0 }
 0x2cf   : > { %12270 = vst [vmem:[#allocation204_spill] sm:$0xff] %v8501_v8  ;;  %1899 = vrot.lane.b32.xlu2 %v8482_v23, %s7260_s27  ;;  %v8524_v8 = vsel %vm996_vm3, %v1043_v24, %v989_v22 }
 0x2d0   : > { %12275 = vst [vmem:[#allocation209_spill] sm:$0xff] %v8524_v8  ;;  %7150 = vmatmul.msk.f32.gmra.mxu3 %vm1097_vm4, %v8524_v8 }
 0x2d1   : > { %v8512_v6 = vpop.permute.xlu2 %1695 }
 0x2d2   : > { %12272 = vst [vmem:[#allocation206_spill] sm:$0xff] %v8512_v6 }
 0x2d3   : > { %2807 = vrot.lane.b32.xlu0 %v8436_v39, %s7261_s28  ;;  %2617 = vrot.lane.b32.xlu1 %v8459_v61, %s7258_s25 }
 0x2d5   : > { %v8518_v3 = vpop.permute.xlu1 %2791  ;;  %v8520_v9 = vpop.permute.xlu0 %1691 }
 0x2d6   : > { %12273 = vst [vmem:[#allocation207_spill] sm:$0xff] %v8518_v3 }
 0x2d7   : > { %12274 = vst [vmem:[#allocation208_spill] sm:$0xff] %v8520_v9  ;;  %2283 = vrot.lane.b32.xlu2 %v8482_v23, %s7257_s24  ;;  %v991_v6 = vpop.f32.mrf.mxu3 }
 0x2d8   : > { %v992_v1 = vadd.f32 %v8054_v17, %v991_v6  ;;  %v8553_v6 = vpop.f32.mrf.mxu1 }
 0x2d9   : > { %v8532_v0 = vpop.permute.xlu2 %1887  ;;  %12282 = vst [vmem:[#allocation216_spill] sm:$0xff] %v8553_v6 }
 0x2da   : > { %12277 = vst [vmem:[#allocation211_spill] sm:$0xff] %v8532_v0  ;;  %v1044_v22 = vmax.f32 %v992_v1, 0.0 }
 0x2db   : > { %2809 = vrot.lane.b32.xlu1 %v8459_v61, %s7261_s28  ;;  %1709 = vrot.lane.b32.xlu0 %v8530_v52, %s7256_s23 }
 0x2dc   : > { %v8545_v3 = vsel %vm996_vm3, %v1044_v22, %v992_v1 }
 0x2dd   : > { %v8539_v24 = vpop.permute.xlu0 %1883  ;;  %v8541_v9 = vpop.permute.xlu1 %1693  ;;  %12280 = vst [vmem:[#allocation214_spill] sm:$0xff] %v8545_v3  ;;  %7151 = vmatmul.msk.f32.gmra.mxu3 %vm1097_vm4, %v8545_v3 }
 0x2de   : > { %12278 = vst [vmem:[#allocation212_spill] sm:$0xff] %v8539_v24 }
 0x2df   : > { %12279 = vst [vmem:[#allocation213_spill] sm:$0xff] %v8541_v9  ;;  %2619 = vrot.lane.b32.xlu2 %v8482_v23, %s7258_s25 }
 0x2e0   : > { %v8571_v22 = vpop.f32.mrf.mxu1 }
 0x2e1   : > { %v8551_v17 = vpop.permute.xlu2 %2271  ;;  %12286 = vst [vmem:[#allocation220_spill] sm:$0xff] %v8571_v22 }
 0x2e2   : > { %12281 = vst [vmem:[#allocation215_spill] sm:$0xff] %v8551_v17 }
 0x2e3   : > { %1901 = vrot.lane.b32.xlu0 %v8530_v52, %s7260_s27  ;;  %1711 = vrot.lane.b32.xlu1 %v8553_v6, %s7256_s23 }
 0x2e5   : > { %v8559_v9 = vpop.permute.xlu0 %2267  ;;  %v8561_v7 = vpop.permute.xlu1 %1885 }
 0x2e6   : > { %12283 = vst [vmem:[#allocation217_spill] sm:$0xff] %v8559_v9 }
 0x2e7   : > { %12284 = vst [vmem:[#allocation218_spill] sm:$0xff] %v8561_v7  ;;  %2811 = vrot.lane.b32.xlu2 %v8482_v23, %s7261_s28 }
 0x2e9   : > { %v8565_v1 = vpop.permute.xlu2 %2607 }
 0x2ea   : > { %12285 = vst [vmem:[#allocation219_spill] sm:$0xff] %v8565_v1 }
 0x2eb   : > { %2285 = vrot.lane.b32.xlu0 %v8530_v52, %s7257_s24  ;;  %1903 = vrot.lane.b32.xlu1 %v8553_v6, %s7260_s27 }
 0x2ed   : > { %v8573_v24 = vpop.permute.xlu0 %2603  ;;  %v8575_v0 = vpop.permute.xlu1 %2269 }
 0x2ee   : > { %12287 = vst [vmem:[#allocation221_spill] sm:$0xff] %v8573_v24  ;;  %v8603_v24 = vpop.f32.mrf.mxu3 }
 0x2ef   : > { %12288 = vst [vmem:[#allocation222_spill] sm:$0xff] %v8575_v0  ;;  %1713 = vrot.lane.b32.xlu2 %v8571_v22, %s7256_s23 }
 0x2f0   : > { %12295 = vst [vmem:[#allocation229_spill] sm:$0xff] %v8603_v24 }
 0x2f1   : > { %v8579_v7 = vpop.permute.xlu2 %2799 }
 0x2f2   : > { %12289 = vst [vmem:[#allocation223_spill] sm:$0xff] %v8579_v7 }
 0x2f3   : > { %2621 = vrot.lane.b32.xlu0 %v8530_v52, %s7258_s25  ;;  %2287 = vrot.lane.b32.xlu1 %v8553_v6, %s7257_s24 }
 0x2f5   : > { %v8585_v17 = vpop.permute.xlu0 %2795  ;;  %v8587_v1 = vpop.permute.xlu1 %2605 }
 0x2f6   : > { %12290 = vst [vmem:[#allocation224_spill] sm:$0xff] %v8585_v17 }
 0x2f7   : > { %12291 = vst [vmem:[#allocation225_spill] sm:$0xff] %v8587_v1  ;;  %1905 = vrot.lane.b32.xlu2 %v8571_v22, %s7260_s27 }
 0x2f9   : > { %v8591_v9 = vpop.permute.xlu2 %1701 }
 0x2fa   : > { %12292 = vst [vmem:[#allocation226_spill] sm:$0xff] %v8591_v9 }
 0x2fb   : > { %2813 = vrot.lane.b32.xlu0 %v8530_v52, %s7261_s28  ;;  %2623 = vrot.lane.b32.xlu1 %v8553_v6, %s7258_s25 }
 0x2fd   : > { %v8597_v0 = vpop.permute.xlu1 %2797  ;;  %v8599_v7 = vpop.permute.xlu0 %1697 }
 0x2fe   : > { %12293 = vst [vmem:[#allocation227_spill] sm:$0xff] %v8597_v0  ;;  %v8619_v0 = vpop.f32.mrf.mxu3 }
 0x2ff   : > { %12294 = vst [vmem:[#allocation228_spill] sm:$0xff] %v8599_v7  ;;  %2289 = vrot.lane.b32.xlu2 %v8571_v22, %s7257_s24 }
 0x300   : > { %12300 = vst [vmem:[#allocation234_spill] sm:$0xff] %v8619_v0 }
 0x301   : > { %v8605_v1 = vpop.permute.xlu2 %1893 }
 0x302   : > { %12296 = vst [vmem:[#allocation230_spill] sm:$0xff] %v8605_v1 }
 0x303   : > { %1715 = vrot.lane.b32.xlu0 %v8603_v24, %s7256_s23  ;;  %2815 = vrot.lane.b32.xlu1 %v8553_v6, %s7261_s28 }
 0x305   : > { %v8611_v9 = vpop.permute.xlu0 %1889  ;;  %v8613_v17 = vpop.permute.xlu1 %1699 }
 0x306   : > { %12297 = vst [vmem:[#allocation231_spill] sm:$0xff] %v8611_v9  ;;  %v8637_v9 = vpop.f32.mrf.mxu3 }
 0x307   : > { %12298 = vst [vmem:[#allocation232_spill] sm:$0xff] %v8613_v17  ;;  %2625 = vrot.lane.b32.xlu2 %v8571_v22, %s7258_s25 }
 0x308   : > { %12304 = vst [vmem:[#allocation238_spill] sm:$0xff] %v8637_v9 }
 0x309   : > { %v8617_v7 = vpop.permute.xlu2 %2277 }
 0x30a   : > { %12299 = vst [vmem:[#allocation233_spill] sm:$0xff] %v8617_v7 }
 0x30b   : > { %1907 = vrot.lane.b32.xlu0 %v8603_v24, %s7260_s27  ;;  %1717 = vrot.lane.b32.xlu1 %v8619_v0, %s7256_s23 }
 0x30d   : > { %v8625_v1 = vpop.permute.xlu0 %2273  ;;  %v8627_v3 = vpop.permute.xlu1 %1891 }
 0x30e   : > { %12301 = vst [vmem:[#allocation235_spill] sm:$0xff] %v8625_v1 }
 0x30f   : > { %12302 = vst [vmem:[#allocation236_spill] sm:$0xff] %v8627_v3  ;;  %2817 = vrot.lane.b32.xlu2 %v8571_v22, %s7261_s28 }
 0x311   : > { %v8631_v17 = vpop.permute.xlu2 %2613 }
 0x312   : > { %12303 = vst [vmem:[#allocation237_spill] sm:$0xff] %v8631_v17 }
 0x313   : > { %2291 = vrot.lane.b32.xlu0 %v8603_v24, %s7257_s24  ;;  %1909 = vrot.lane.b32.xlu1 %v8619_v0, %s7260_s27 }
 0x315   : > { %v8639_v7 = vpop.permute.xlu0 %2609  ;;  %v8641_v8 = vpop.permute.xlu1 %2275 }
 0x316   : > { %12305 = vst [vmem:[#allocation239_spill] sm:$0xff] %v8639_v7 }
 0x317   : > { %12306 = vst [vmem:[#allocation240_spill] sm:$0xff] %v8641_v8  ;;  %1719 = vrot.lane.b32.xlu2 %v8637_v9, %s7256_s23 }
 0x319   : > { %v8645_v3 = vpop.permute.xlu2 %2805 }
 0x31a   : > { %12307 = vst [vmem:[#allocation241_spill] sm:$0xff] %v8645_v3 }
 0x31b   : > { %2627 = vrot.lane.b32.xlu0 %v8603_v24, %s7258_s25  ;;  %2293 = vrot.lane.b32.xlu1 %v8619_v0, %s7257_s24 }
 0x31d   : > { %v8651_v17 = vpop.permute.xlu0 %2801  ;;  %v8653_v1 = vpop.permute.xlu1 %2611 }
 0x31e   : > { %12308 = vst [vmem:[#allocation242_spill] sm:$0xff] %v8651_v17  ;;  %v8669_v17 = vpop.f32.mrf.mxu3 }
 0x31f   : > { %12309 = vst [vmem:[#allocation243_spill] sm:$0xff] %v8653_v1  ;;  %1911 = vrot.lane.b32.xlu2 %v8637_v9, %s7260_s27 }
 0x320   : > { %12313 = vst [vmem:[#allocation247_spill] sm:$0xff] %v8669_v17 }
 0x321   : > { %v8657_v7 = vpop.permute.xlu2 %1707 }
 0x322   : > { %12310 = vst [vmem:[#allocation244_spill] sm:$0xff] %v8657_v7 }
 0x323   : > { %2819 = vrot.lane.b32.xlu0 %v8603_v24, %s7261_s28  ;;  %2629 = vrot.lane.b32.xlu1 %v8619_v0, %s7258_s25 }
 0x325   : > { %v8663_v8 = vpop.permute.xlu1 %2803  ;;  %v8665_v3 = vpop.permute.xlu0 %1703 }
 0x326   : > { %12311 = vst [vmem:[#allocation245_spill] sm:$0xff] %v8663_v8  ;;  %v8685_v8 = vpop.f32.mrf.mxu3 }
 0x327   : > { %12312 = vst [vmem:[#allocation246_spill] sm:$0xff] %v8665_v3  ;;  %2295 = vrot.lane.b32.xlu2 %v8637_v9, %s7257_s24 }
 0x328   : > { %12318 = vst [vmem:[#allocation252_spill] sm:$0xff] %v8685_v8 }
 0x329   : > { %v8671_v1 = vpop.permute.xlu2 %1899 }
 0x32a   : > { %12314 = vst [vmem:[#allocation248_spill] sm:$0xff] %v8671_v1 }
 0x32b   : > { %1721 = vrot.lane.b32.xlu0 %v8669_v17, %s7256_s23  ;;  %2821 = vrot.lane.b32.xlu1 %v8619_v0, %s7261_s28 }
 0x32d   : > { %v8677_v7 = vpop.permute.xlu0 %1895  ;;  %v8679_v46 = vpop.permute.xlu1 %1705 }
 0x32e   : > { %12315 = vst [vmem:[#allocation249_spill] sm:$0xff] %v8677_v7  ;;  %v8703_v7 = vpop.f32.mrf.mxu3 }
 0x32f   : > { %12316 = vst [vmem:[#allocation250_spill] sm:$0xff] %v8679_v46  ;;  %2631 = vrot.lane.b32.xlu2 %v8637_v9, %s7258_s25 }
 0x330   : > { %12322 = vst [vmem:[#allocation256_spill] sm:$0xff] %v8703_v7 }
 0x331   : > { %v8683_v3 = vpop.permute.xlu2 %2283 }
 0x332   : > { %12317 = vst [vmem:[#allocation251_spill] sm:$0xff] %v8683_v3 }
 0x333   : > { %1913 = vrot.lane.b32.xlu0 %v8669_v17, %s7260_s27  ;;  %1723 = vrot.lane.b32.xlu1 %v8685_v8, %s7256_s23 }
 0x335   : > { %v8691_v1 = vpop.permute.xlu0 %2279  ;;  %v8693_v42 = vpop.permute.xlu1 %1897 }
 0x336   : > { %12319 = vst [vmem:[#allocation253_spill] sm:$0xff] %v8691_v1 }
 0x337   : > { %12320 = vst [vmem:[#allocation254_spill] sm:$0xff] %v8693_v42  ;;  %2823 = vrot.lane.b32.xlu2 %v8637_v9, %s7261_s28 }
 0x339   : > { %v8697_v46 = vpop.permute.xlu2 %2619 }
 0x33a   : > { %12321 = vst [vmem:[#allocation255_spill] sm:$0xff] %v8697_v46 }
 0x33b   : > { %2297 = vrot.lane.b32.xlu0 %v8669_v17, %s7257_s24  ;;  %1915 = vrot.lane.b32.xlu1 %v8685_v8, %s7260_s27 }
 0x33d   : > { %v8705_v3 = vpop.permute.xlu0 %2615  ;;  %v8707_v26 = vpop.permute.xlu1 %2281 }
 0x33e   : > { %12323 = vst [vmem:[#allocation257_spill] sm:$0xff] %v8705_v3 }
 0x33f   : > { %12324 = vst [vmem:[#allocation258_spill] sm:$0xff] %v8707_v26  ;;  %1725 = vrot.lane.b32.xlu2 %v8703_v7, %s7256_s23 }
 0x341   : > { %v8711_v42 = vpop.permute.xlu2 %2811 }
 0x342   : > { %12325 = vst [vmem:[#allocation259_spill] sm:$0xff] %v8711_v42 }
 0x343   : > { %2633 = vrot.lane.b32.xlu0 %v8669_v17, %s7258_s25  ;;  %2299 = vrot.lane.b32.xlu1 %v8685_v8, %s7257_s24 }
 0x345   : > { %v8717_v46 = vpop.permute.xlu0 %2807  ;;  %v8719_v1 = vpop.permute.xlu1 %2617 }
 0x346   : > { %12326 = vst [vmem:[#allocation260_spill] sm:$0xff] %v8717_v46  ;;  %v8735_v46 = vpop.f32.mrf.mxu3 }
 0x347   : > { %12327 = vst [vmem:[#allocation261_spill] sm:$0xff] %v8719_v1  ;;  %1917 = vrot.lane.b32.xlu2 %v8703_v7, %s7260_s27 }
 0x348   : > { %12331 = vst [vmem:[#allocation265_spill] sm:$0xff] %v8735_v46 }
 0x349   : > { %v8723_v3 = vpop.permute.xlu2 %1713 }
 0x34a   : > { %12328 = vst [vmem:[#allocation262_spill] sm:$0xff] %v8723_v3 }
 0x34b   : > { %2825 = vrot.lane.b32.xlu0 %v8669_v17, %s7261_s28  ;;  %2635 = vrot.lane.b32.xlu1 %v8685_v8, %s7258_s25 }
 0x34d   : > { %v8729_v26 = vpop.permute.xlu1 %2809  ;;  %v8731_v42 = vpop.permute.xlu0 %1709 }
 0x34e   : > { %12329 = vst [vmem:[#allocation263_spill] sm:$0xff] %v8729_v26  ;;  %v8751_v26 = vpop.f32.mrf.mxu3 }
 0x34f   : > { %12330 = vst [vmem:[#allocation264_spill] sm:$0xff] %v8731_v42  ;;  %2301 = vrot.lane.b32.xlu2 %v8703_v7, %s7257_s24 }
 0x350   : > { %12336 = vst [vmem:[#allocation270_spill] sm:$0xff] %v8751_v26 }
 0x351   : > { %v8737_v1 = vpop.permute.xlu2 %1905 }
 0x352   : > { %12332 = vst [vmem:[#allocation266_spill] sm:$0xff] %v8737_v1 }
 0x353   : > { %1727 = vrot.lane.b32.xlu0 %v8735_v46, %s7256_s23  ;;  %2827 = vrot.lane.b32.xlu1 %v8685_v8, %s7261_s28 }
 0x355   : > { %v8743_v3 = vpop.permute.xlu0 %1901  ;;  %v8745_v56 = vpop.permute.xlu1 %1711 }
 0x356   : > { %12333 = vst [vmem:[#allocation267_spill] sm:$0xff] %v8743_v3  ;;  %v8769_v3 = vpop.f32.mrf.mxu3 }
 0x357   : > { %12334 = vst [vmem:[#allocation268_spill] sm:$0xff] %v8745_v56  ;;  %2637 = vrot.lane.b32.xlu2 %v8703_v7, %s7258_s25 }
 0x358   : > { %12340 = vst [vmem:[#allocation274_spill] sm:$0xff] %v8769_v3 }
 0x359   : > { %v8749_v42 = vpop.permute.xlu2 %2289 }
 0x35a   : > { %12335 = vst [vmem:[#allocation269_spill] sm:$0xff] %v8749_v42 }
 0x35b   : > { %1919 = vrot.lane.b32.xlu0 %v8735_v46, %s7260_s27  ;;  %1729 = vrot.lane.b32.xlu1 %v8751_v26, %s7256_s23 }
 0x35d   : > { %v8757_v1 = vpop.permute.xlu0 %2285  ;;  %v8759_v34 = vpop.permute.xlu1 %1903 }
 0x35e   : > { %12337 = vst [vmem:[#allocation271_spill] sm:$0xff] %v8757_v1 }
 0x35f   : > { %12338 = vst [vmem:[#allocation272_spill] sm:$0xff] %v8759_v34  ;;  %2829 = vrot.lane.b32.xlu2 %v8703_v7, %s7261_s28 }
 0x361   : > { %v8763_v56 = vpop.permute.xlu2 %2625 }
 0x362   : > { %12339 = vst [vmem:[#allocation273_spill] sm:$0xff] %v8763_v56 }
 0x363   : > { %2639 = vrot.lane.b32.xlu0 %v8735_v46, %s7258_s25  ;;  %1921 = vrot.lane.b32.xlu1 %v8751_v26, %s7260_s27 }
 0x365   : > { %v8771_v42 = vpop.permute.xlu0 %2621  ;;  %v8773_v44 = vpop.permute.xlu1 %2287 }
 0x366   : > { %12341 = vst [vmem:[#allocation275_spill] sm:$0xff] %v8771_v42  ;;  %v8789_v42 = vpop.f32.mrf.mxu3 }
 0x367   : > { %12342 = vst [vmem:[#allocation276_spill] sm:$0xff] %v8773_v44  ;;  %1731 = vrot.lane.b32.xlu2 %v8769_v3, %s7256_s23 }
 0x369   : > { %v8777_v34 = vpop.permute.xlu2 %2817 }
 0x36a   : > { %12343 = vst [vmem:[#allocation277_spill] sm:$0xff] %v8777_v34 }
 0x36b   : > { %2831 = vrot.lane.b32.xlu0 %v8735_v46, %s7261_s28  ;;  %2641 = vrot.lane.b32.xlu1 %v8751_v26, %s7258_s25 }
 0x36d   : > { %v8783_v56 = vpop.permute.xlu0 %2813  ;;  %v8785_v1 = vpop.permute.xlu1 %2623 }
 0x36e   : > { %12344 = vst [vmem:[#allocation278_spill] sm:$0xff] %v8783_v56 }
 0x36f   : > { %12345 = vst [vmem:[#allocation279_spill] sm:$0xff] %v8785_v1  ;;  %1923 = vrot.lane.b32.xlu2 %v8769_v3, %s7260_s27 }
 0x371   : > { %v8791_v44 = vpop.permute.xlu2 %1719 }
 0x372   : > { %12346 = vst [vmem:[#allocation280_spill] sm:$0xff] %v8791_v44 }
 0x373   : > { %1733 = vrot.lane.b32.xlu0 %v8789_v42, %s7256_s23  ;;  %2833 = vrot.lane.b32.xlu1 %v8751_v26, %s7261_s28 }
 0x375   : > { %v8797_v34 = vpop.permute.xlu0 %1715  ;;  %v8799_v5 = vpop.permute.xlu1 %2815 }
 0x376   : > { %12347 = vst [vmem:[#allocation281_spill] sm:$0xff] %v8797_v34 }
 0x377   : > { %12348 = vst [vmem:[#allocation282_spill] sm:$0xff] %v8799_v5  ;;  %2643 = vrot.lane.b32.xlu2 %v8769_v3, %s7258_s25  ;;  %v8817_v5 = vpop.f32.mrf.mxu3 }
 0x379   : > { %v8803_v1 = vpop.permute.xlu2 %1911 }
 0x37a   : > { %12349 = vst [vmem:[#allocation283_spill] sm:$0xff] %v8803_v1 }
 0x37b   : > { %1925 = vrot.lane.b32.xlu0 %v8789_v42, %s7260_s27  ;;  %3163 = vrot.lane.b32.xlu1 %v7980_v35, %s7259_s26 }
 0x37d   : > { %v8809_v44 = vpop.permute.xlu0 %1907  ;;  %v8811_v56 = vpop.permute.xlu1 %1717 }
 0x37e   : > { %12350 = vst [vmem:[#allocation284_spill] sm:$0xff] %v8809_v44 }
 0x37f   : > { %12351 = vst [vmem:[#allocation285_spill] sm:$0xff] %v8811_v56  ;;  %2835 = vrot.lane.b32.xlu2 %v8769_v3, %s7261_s28  ;;  %v8851_v16 = vpop.f32.mrf.mxu3 }
 0x381   : > { %v8815_v34 = vpop.permute.xlu2 %2295 }
 0x382   : > { %12352 = vst [vmem:[#allocation286_spill] sm:$0xff] %v8815_v34 }
 0x383   : > { %2645 = vrot.lane.b32.xlu0 %v8789_v42, %s7258_s25  ;;  %1735 = vrot.lane.b32.xlu1 %v8817_v5, %s7256_s23 }
 0x385   : > { %v8823_v1 = vpop.permute.xlu0 %2291  ;;  %v8825_v45 = vpop.permute.xlu1 %1909 }
 0x386   : > { %12353 = vst [vmem:[#allocation287_spill] sm:$0xff] %v8823_v1 }
 0x387   : > { %12354 = vst [vmem:[#allocation288_spill] sm:$0xff] %v8825_v45  ;;  %3165 = vrot.lane.b32.xlu2 %v8005_v11, %s7259_s26 }
 0x389   : > { %v8829_v44 = vpop.permute.xlu2 %2631 }
 0x38a   : > { %12355 = vst [vmem:[#allocation289_spill] sm:$0xff] %v8829_v44 }
 0x38b   : > { %2837 = vrot.lane.b32.xlu0 %v8789_v42, %s7261_s28  ;;  %1927 = vrot.lane.b32.xlu1 %v8817_v5, %s7260_s27 }
 0x38d   : > { %v8835_v56 = vpop.permute.xlu0 %2627  ;;  %v8837_v34 = vpop.permute.xlu1 %2293 }
 0x38e   : > { %12356 = vst [vmem:[#allocation290_spill] sm:$0xff] %v8835_v56 }
 0x38f   : > { %12357 = vst [vmem:[#allocation291_spill] sm:$0xff] %v8837_v34  ;;  %3171 = vrot.lane.b32.xlu2 %v8108_v32, %s7259_s26 }
 0x391   : > { %v8841_v1 = vpop.permute.xlu2 %2823 }
 0x392   : > { %12358 = vst [vmem:[#allocation292_spill] sm:$0xff] %v8841_v1 }
 0x393   : > { %3161 = vrot.lane.b32.xlu0 %v7954_v38, %s7259_s26  ;;  %2647 = vrot.lane.b32.xlu1 %v8817_v5, %s7258_s25 }
 0x395   : > { %v8847_v45 = vpop.permute.xlu0 %2819  ;;  %v8849_v44 = vpop.permute.xlu1 %2629 }
 0x396   : > { %12359 = vst [vmem:[#allocation293_spill] sm:$0xff] %v8847_v45 }
 0x397   : > { %12360 = vst [vmem:[#allocation294_spill] sm:$0xff] %v8849_v44  ;;  %1737 = vrot.lane.b32.xlu2 %v8851_v16, %s7256_s23 }
 0x399   : > { %v8855_v34 = vpop.permute.xlu2 %1725 }
 0x39a   : > { %12361 = vst [vmem:[#allocation295_spill] sm:$0xff] %v8855_v34 }
 0x39b   : > { %3167 = vrot.lane.b32.xlu0 %v8057_v62, %s7259_s26  ;;  %2839 = vrot.lane.b32.xlu1 %v8817_v5, %s7261_s28 }
 0x39d   : > { %v8861_v1 = vpop.permute.xlu0 %1721  ;;  %v8863_v56 = vpop.permute.xlu1 %2821 }
 0x39e   : > { %12362 = vst [vmem:[#allocation296_spill] sm:$0xff] %v8861_v1 }
 0x39f   : > { %12363 = vst [vmem:[#allocation297_spill] sm:$0xff] %v8863_v56  ;;  %1929 = vrot.lane.b32.xlu2 %v8851_v16, %s7260_s27 }
 0x3a1   : > { %v8867_v44 = vpop.permute.xlu2 %1917 }
 0x3a2   : > { %12364 = vst [vmem:[#allocation298_spill] sm:$0xff] %v8867_v44 }
 0x3a3   : > { %3173 = vrot.lane.b32.xlu0 %v8155_v14, %s7259_s26  ;;  %3169 = vrot.lane.b32.xlu1 %v8083_v30, %s7259_s26 }
 0x3a5   : > { %v8873_v34 = vpop.permute.xlu0 %1913  ;;  %v8875_v45 = vpop.permute.xlu1 %1723 }
 0x3a6   : > { %12365 = vst [vmem:[#allocation299_spill] sm:$0xff] %v8873_v34 }
 0x3a7   : > { %12366 = vst [vmem:[#allocation300_spill] sm:$0xff] %v8875_v45  ;;  %2649 = vrot.lane.b32.xlu2 %v8851_v16, %s7258_s25 }
 0x3a9   : > { %v8879_v1 = vpop.permute.xlu2 %2301 }
 0x3aa   : > { %12367 = vst [vmem:[#allocation301_spill] sm:$0xff] %v8879_v1 }
 0x3ab   : > { %3179 = vrot.lane.b32.xlu0 %v8263_v43, %s7259_s26  ;;  %3175 = vrot.lane.b32.xlu1 %v8185_v29, %s7259_s26 }
 0x3ad   : > { %v8885_v44 = vpop.permute.xlu0 %2297  ;;  %v8887_v56 = vpop.permute.xlu1 %1915 }
 0x3ae   : > { %12368 = vst [vmem:[#allocation302_spill] sm:$0xff] %v8885_v44 }
 0x3af   : > { %12369 = vst [vmem:[#allocation303_spill] sm:$0xff] %v8887_v56  ;;  %2841 = vrot.lane.b32.xlu2 %v8851_v16, %s7261_s28 }
 0x3b1   : > { %v8891_v34 = vpop.permute.xlu2 %2637 }
 0x3b2   : > { %12370 = vst [vmem:[#allocation304_spill] sm:$0xff] %v8891_v34 }
 0x3b3   : > { %3185 = vrot.lane.b32.xlu0 %v8349_v53, %s7259_s26  ;;  %3181 = vrot.lane.b32.xlu1 %v8285_v31, %s7259_s26 }
 0x3b5   : > { %v8897_v45 = vpop.permute.xlu0 %2633  ;;  %v8899_v1 = vpop.permute.xlu1 %2299 }
 0x3b6   : > { %12371 = vst [vmem:[#allocation305_spill] sm:$0xff] %v8897_v45 }
 0x3b7   : > { %12372 = vst [vmem:[#allocation306_spill] sm:$0xff] %v8899_v1  ;;  %3177 = vrot.lane.b32.xlu2 %v8213_v59, %s7259_s26 }
 0x3b9   : > { %v8903_v44 = vpop.permute.xlu2 %2829 }
 0x3ba   : > { %12373 = vst [vmem:[#allocation307_spill] sm:$0xff] %v8903_v44 }
 0x3bb   : > { %3191 = vrot.lane.b32.xlu0 %v8436_v39, %s7259_s26  ;;  %3187 = vrot.lane.b32.xlu1 %v8372_v51, %s7259_s26 }
 0x3bd   : > { %v8909_v56 = vpop.permute.xlu0 %2825  ;;  %v8911_v34 = vpop.permute.xlu1 %2635 }
 0x3be   : > { %12374 = vst [vmem:[#allocation308_spill] sm:$0xff] %v8909_v56 }
 0x3bf   : > { %12375 = vst [vmem:[#allocation309_spill] sm:$0xff] %v8911_v34  ;;  %3183 = vrot.lane.b32.xlu2 %v8304_v54, %s7259_s26 }
 0x3c1   : > { %v8915_v45 = vpop.permute.xlu2 %1731 }
 0x3c2   : > { %12376 = vst [vmem:[#allocation310_spill] sm:$0xff] %v8915_v45 }
 0x3c3   : > { %3197 = vrot.lane.b32.xlu0 %v8530_v52, %s7259_s26  ;;  %3193 = vrot.lane.b32.xlu1 %v8459_v61, %s7259_s26 }
 0x3c5   : > { %v8921_v1 = vpop.permute.xlu0 %1727  ;;  %v8923_v44 = vpop.permute.xlu1 %2827 }
 0x3c6   : > { %12377 = vst [vmem:[#allocation311_spill] sm:$0xff] %v8921_v1 }
 0x3c7   : > { %12378 = vst [vmem:[#allocation312_spill] sm:$0xff] %v8923_v44  ;;  %3189 = vrot.lane.b32.xlu2 %v8395_v41, %s7259_s26 }
 0x3c9   : > { %v8927_v56 = vpop.permute.xlu2 %1923 }
 0x3ca   : > { %12379 = vst [vmem:[#allocation313_spill] sm:$0xff] %v8927_v56 }
 0x3cb   : > { %3203 = vrot.lane.b32.xlu0 %v8603_v24, %s7259_s26  ;;  %3199 = vrot.lane.b32.xlu1 %v8553_v6, %s7259_s26 }
 0x3cd   : > { %v8933_v45 = vpop.permute.xlu0 %1919  ;;  %v8935_v34 = vpop.permute.xlu1 %1729 }
 0x3ce   : > { %12380 = vst [vmem:[#allocation314_spill] sm:$0xff] %v8933_v45 }
 0x3cf   : > { %12381 = vst [vmem:[#allocation315_spill] sm:$0xff] %v8935_v34  ;;  %3195 = vrot.lane.b32.xlu2 %v8482_v23, %s7259_s26 }
 0x3d1   : > { %v8939_v1 = vpop.permute.xlu2 %2643 }
 0x3d2   : > { %12382 = vst [vmem:[#allocation316_spill] sm:$0xff] %v8939_v1 }
 0x3d3   : > { %3467 = vrot.lane.b32.xlu0 %v7523_v49, %s7262_s12  ;;  %3205 = vrot.lane.b32.xlu1 %v8619_v0, %s7259_s26 }
 0x3d5   : > { %v8945_v56 = vpop.permute.xlu0 %2639  ;;  %v8947_v44 = vpop.permute.xlu1 %1921 }
 0x3d6   : > { %12383 = vst [vmem:[#allocation317_spill] sm:$0xff] %v8945_v56 }
 0x3d7   : > { %12384 = vst [vmem:[#allocation318_spill] sm:$0xff] %v8947_v44  ;;  %3201 = vrot.lane.b32.xlu2 %v8571_v22, %s7259_s26 }
 0x3d9   : > { %v8951_v34 = vpop.permute.xlu2 %2835 }
 0x3da   : > { %12385 = vst [vmem:[#allocation319_spill] sm:$0xff] %v8951_v34 }
 0x3db   : > { %3473 = vrot.lane.b32.xlu0 %v7573_v25, %s7262_s12  ;;  %3469 = vrot.lane.b32.xlu1 %v7538_v57, %s7262_s12 }
 0x3dd   : > { %v8957_v45 = vpop.permute.xlu0 %2831  ;;  %v8959_v1 = vpop.permute.xlu1 %2641 }
 0x3de   : > { %12386 = vst [vmem:[#allocation320_spill] sm:$0xff] %v8957_v45 }
 0x3df   : > { %12387 = vst [vmem:[#allocation321_spill] sm:$0xff] %v8959_v1  ;;  %3207 = vrot.lane.b32.xlu2 %v8637_v9, %s7259_s26 }
 0x3e1   : > { %v8963_v56 = vpop.permute.xlu2 %3165 }
 0x3e2   : > { %12388 = vst [vmem:[#allocation322_spill] sm:$0xff] %v8963_v56 }
 0x3e3   : > { %3479 = vrot.lane.b32.xlu0 %v7640_v63, %s7262_s12  ;;  %3475 = vrot.lane.b32.xlu1 %v7587_v27, %s7262_s12 }
 0x3e5   : > { %v8969_v44 = vpop.permute.xlu0 %1733  ;;  %v8971_v34 = vpop.permute.xlu1 %2833 }
 0x3e6   : > { %12389 = vst [vmem:[#allocation323_spill] sm:$0xff] %v8969_v44 }
 0x3e7   : > { %12390 = vst [vmem:[#allocation324_spill] sm:$0xff] %v8971_v34  ;;  %3471 = vrot.lane.b32.xlu2 %v7559_v13, %s7262_s12 }
 0x3e9   : > { %v8975_v45 = vpop.permute.xlu2 %3171 }
 0x3ea   : > { %12391 = vst [vmem:[#allocation325_spill] sm:$0xff] %v8975_v45 }
 0x3eb   : > { %3485 = vrot.lane.b32.xlu0 %v7719_v60, %s7262_s12  ;;  %3481 = vrot.lane.b32.xlu1 %v7655_v4, %s7262_s12 }
 0x3ed   : > { %v8981_v1 = vpop.permute.xlu0 %1925  ;;  %v8983_v56 = vpop.permute.xlu1 %3163 }
 0x3ee   : > { %12392 = vst [vmem:[#allocation326_spill] sm:$0xff] %v8981_v1 }
 0x3ef   : > { %12393 = vst [vmem:[#allocation327_spill] sm:$0xff] %v8983_v56  ;;  %3477 = vrot.lane.b32.xlu2 %v7605_v37, %s7262_s12 }
 0x3f1   : > { %v8987_v44 = vpop.permute.xlu2 %1737 }
 0x3f2   : > { %12394 = vst [vmem:[#allocation328_spill] sm:$0xff] %v8987_v44 }
 0x3f3   : > { %3491 = vrot.lane.b32.xlu0 %v7836_v36, %s7262_s12  ;;  %3487 = vrot.lane.b32.xlu1 %v7745_v15, %s7262_s12 }
 0x3f5   : > { %v8993_v45 = vpop.permute.xlu0 %2645  ;;  %v8995_v34 = vpop.permute.xlu1 %1735 }
 0x3f6   : > { %12395 = vst [vmem:[#allocation329_spill] sm:$0xff] %v8993_v45 }
 0x3f7   : > { %12396 = vst [vmem:[#allocation330_spill] sm:$0xff] %v8995_v34  ;;  %3483 = vrot.lane.b32.xlu2 %v7673_v18, %s7262_s12 }
 0x3f9   : > { %v8999_v1 = vpop.permute.xlu2 %1929 }
 0x3fa   : > { %12397 = vst [vmem:[#allocation331_spill] sm:$0xff] %v8999_v1 }
 0x3fb   : > { %3497 = vrot.lane.b32.xlu0 %v7954_v38, %s7262_s12  ;;  %3493 = vrot.lane.b32.xlu1 %v7860_v50, %s7262_s12 }
 0x3fd   : > { %v9005_v44 = vpop.permute.xlu0 %2837  ;;  %v9007_v56 = vpop.permute.xlu1 %1927 }
 0x3fe   : > { %12398 = vst [vmem:[#allocation332_spill] sm:$0xff] %v9005_v44 }
 0x3ff   : > { %12399 = vst [vmem:[#allocation333_spill] sm:$0xff] %v9007_v56  ;;  %3489 = vrot.lane.b32.xlu2 %v7772_v47, %s7262_s12 }
 0x401   : > { %v9011_v45 = vpop.permute.xlu2 %2649 }
 0x402   : > { %12400 = vst [vmem:[#allocation334_spill] sm:$0xff] %v9011_v45 }
 0x403   : > { %3503 = vrot.lane.b32.xlu0 %v8057_v62, %s7262_s12  ;;  %3499 = vrot.lane.b32.xlu1 %v7980_v35, %s7262_s12 }
 0x405   : > { %v9017_v34 = vpop.permute.xlu0 %3161  ;;  %v9019_v1 = vpop.permute.xlu1 %2647 }
 0x406   : > { %12401 = vst [vmem:[#allocation335_spill] sm:$0xff] %v9017_v34 }
 0x407   : > { %12402 = vst [vmem:[#allocation336_spill] sm:$0xff] %v9019_v1  ;;  %3495 = vrot.lane.b32.xlu2 %v7889_v19, %s7262_s12 }
 0x409   : > { %v9023_v44 = vpop.permute.xlu2 %2841 }
 0x40a   : > { %12403 = vst [vmem:[#allocation337_spill] sm:$0xff] %v9023_v44 }
 0x40b   : > { %3509 = vrot.lane.b32.xlu0 %v8155_v14, %s7262_s12  ;;  %3505 = vrot.lane.b32.xlu1 %v8083_v30, %s7262_s12 }
 0x40d   : > { %v9029_v56 = vpop.permute.xlu0 %3167  ;;  %v9031_v45 = vpop.permute.xlu1 %2839 }
 0x40e   : > { %12404 = vst [vmem:[#allocation338_spill] sm:$0xff] %v9029_v56 }
 0x40f   : > { %12405 = vst [vmem:[#allocation339_spill] sm:$0xff] %v9031_v45  ;;  %3501 = vrot.lane.b32.xlu2 %v8005_v11, %s7262_s12 }
 0x411   : > { %v9035_v34 = vpop.permute.xlu2 %3177 }
 0x412   : > { %12406 = vst [vmem:[#allocation340_spill] sm:$0xff] %v9035_v34 }
 0x413   : > { %3515 = vrot.lane.b32.xlu0 %v8263_v43, %s7262_s12  ;;  %3511 = vrot.lane.b32.xlu1 %v8185_v29, %s7262_s12 }
 0x415   : > { %v9041_v1 = vpop.permute.xlu0 %3173  ;;  %v9043_v44 = vpop.permute.xlu1 %3169 }
 0x416   : > { %12407 = vst [vmem:[#allocation341_spill] sm:$0xff] %v9041_v1 }
 0x417   : > { %12408 = vst [vmem:[#allocation342_spill] sm:$0xff] %v9043_v44  ;;  %3507 = vrot.lane.b32.xlu2 %v8108_v32, %s7262_s12 }
 0x419   : > { %v9047_v56 = vpop.permute.xlu2 %3183 }
 0x41a   : > { %12409 = vst [vmem:[#allocation343_spill] sm:$0xff] %v9047_v56 }
 0x41b   : > { %3521 = vrot.lane.b32.xlu0 %v8349_v53, %s7262_s12  ;;  %3517 = vrot.lane.b32.xlu1 %v8285_v31, %s7262_s12 }
 0x41d   : > { %v9053_v34 = vpop.permute.xlu0 %3179  ;;  %v9055_v45 = vpop.permute.xlu1 %3175 }
 0x41e   : > { %12410 = vst [vmem:[#allocation344_spill] sm:$0xff] %v9053_v34 }
 0x41f   : > { %12411 = vst [vmem:[#allocation345_spill] sm:$0xff] %v9055_v45  ;;  %3513 = vrot.lane.b32.xlu2 %v8213_v59, %s7262_s12 }
 0x421   : > { %v9059_v1 = vpop.permute.xlu2 %3189 }
 0x422   : > { %12412 = vst [vmem:[#allocation346_spill] sm:$0xff] %v9059_v1 }
 0x423   : > { %3527 = vrot.lane.b32.xlu0 %v8436_v39, %s7262_s12  ;;  %3523 = vrot.lane.b32.xlu1 %v8372_v51, %s7262_s12 }
 0x425   : > { %v9065_v56 = vpop.permute.xlu0 %3185  ;;  %v9067_v44 = vpop.permute.xlu1 %3181 }
 0x426   : > { %12413 = vst [vmem:[#allocation347_spill] sm:$0xff] %v9065_v56 }
 0x427   : > { %12414 = vst [vmem:[#allocation348_spill] sm:$0xff] %v9067_v44  ;;  %3519 = vrot.lane.b32.xlu2 %v8304_v54, %s7262_s12 }
 0x429   : > { %v9071_v34 = vpop.permute.xlu2 %3195 }
 0x42a   : > { %12415 = vst [vmem:[#allocation349_spill] sm:$0xff] %v9071_v34 }
 0x42b   : > { %3533 = vrot.lane.b32.xlu0 %v8530_v52, %s7262_s12  ;;  %3529 = vrot.lane.b32.xlu1 %v8459_v61, %s7262_s12 }
 0x42d   : > { %v9077_v45 = vpop.permute.xlu0 %3191  ;;  %v9079_v1 = vpop.permute.xlu1 %3187 }
 0x42e   : > { %12416 = vst [vmem:[#allocation350_spill] sm:$0xff] %v9077_v45 }
 0x42f   : > { %12417 = vst [vmem:[#allocation351_spill] sm:$0xff] %v9079_v1  ;;  %3525 = vrot.lane.b32.xlu2 %v8395_v41, %s7262_s12 }
 0x431   : > { %v9083_v56 = vpop.permute.xlu2 %3201 }
 0x432   : > { %12418 = vst [vmem:[#allocation352_spill] sm:$0xff] %v9083_v56 }
 0x433   : > { %3539 = vrot.lane.b32.xlu0 %v8603_v24, %s7262_s12  ;;  %3535 = vrot.lane.b32.xlu1 %v8553_v6, %s7262_s12 }
 0x435   : > { %v9089_v44 = vpop.permute.xlu0 %3197  ;;  %v9091_v34 = vpop.permute.xlu1 %3193 }
 0x436   : > { %12419 = vst [vmem:[#allocation353_spill] sm:$0xff] %v9089_v44 }
 0x437   : > { %12420 = vst [vmem:[#allocation354_spill] sm:$0xff] %v9091_v34  ;;  %3531 = vrot.lane.b32.xlu2 %v8482_v23, %s7262_s12 }
 0x439   : > { %v9095_v45 = vpop.permute.xlu2 %3207 }
 0x43a   : > { %12421 = vst [vmem:[#allocation355_spill] sm:$0xff] %v9095_v45 }
 0x43b   : > { %3545 = vrot.lane.b32.xlu0 %v8669_v17, %s7262_s12  ;;  %3541 = vrot.lane.b32.xlu1 %v8619_v0, %s7262_s12 }
 0x43d   : > { %v9101_v56 = vpop.permute.xlu0 %3203  ;;  %v9103_v1 = vpop.permute.xlu1 %3199 }
 0x43e   : > { %12422 = vst [vmem:[#allocation356_spill] sm:$0xff] %v9101_v56 }
 0x43f   : > { %12423 = vst [vmem:[#allocation357_spill] sm:$0xff] %v9103_v1  ;;  %3537 = vrot.lane.b32.xlu2 %v8571_v22, %s7262_s12 }
 0x441   : > { %v9107_v44 = vpop.permute.xlu2 %3471 }
 0x442   : > { %12424 = vst [vmem:[#allocation358_spill] sm:$0xff] %v9107_v44 }
 0x443   : > { %3551 = vrot.lane.b32.xlu0 %v8735_v46, %s7262_s12  ;;  %3547 = vrot.lane.b32.xlu1 %v8685_v8, %s7262_s12 }
 0x445   : > { %v9113_v45 = vpop.permute.xlu0 %3467  ;;  %v9115_v34 = vpop.permute.xlu1 %3205 }
 0x446   : > { %12425 = vst [vmem:[#allocation359_spill] sm:$0xff] %v9113_v45 }
 0x447   : > { %12426 = vst [vmem:[#allocation360_spill] sm:$0xff] %v9115_v34  ;;  %3543 = vrot.lane.b32.xlu2 %v8637_v9, %s7262_s12 }
 0x449   : > { %v9119_v56 = vpop.permute.xlu2 %3477 }
 0x44a   : > { %12427 = vst [vmem:[#allocation361_spill] sm:$0xff] %v9119_v56 }
 0x44b   : > { %3557 = vrot.lane.b32.xlu0 %v8789_v42, %s7262_s12  ;;  %3553 = vrot.lane.b32.xlu1 %v8751_v26, %s7262_s12 }
 0x44d   : > { %v9125_v1 = vpop.permute.xlu0 %3473  ;;  %v9127_v44 = vpop.permute.xlu1 %3469 }
 0x44e   : > { %12428 = vst [vmem:[#allocation362_spill] sm:$0xff] %v9125_v1 }
 0x44f   : > { %12429 = vst [vmem:[#allocation363_spill] sm:$0xff] %v9127_v44  ;;  %3549 = vrot.lane.b32.xlu2 %v8703_v7, %s7262_s12 }
 0x451   : > { %v9131_v45 = vpop.permute.xlu2 %3483 }
 0x452   : > { %12430 = vst [vmem:[#allocation364_spill] sm:$0xff] %v9131_v45 }
 0x453   : > { %3677 = vrot.lane.b32.xlu0 %v7719_v60, %s7263_s14  ;;  %3559 = vrot.lane.b32.xlu1 %v8817_v5, %s7262_s12 }
 0x455   : > { %v9137_v34 = vpop.permute.xlu0 %3479  ;;  %v9139_v56 = vpop.permute.xlu1 %3475 }
 0x456   : > { %12431 = vst [vmem:[#allocation365_spill] sm:$0xff] %v9137_v34 }
 0x457   : > { %12432 = vst [vmem:[#allocation366_spill] sm:$0xff] %v9139_v56  ;;  %3555 = vrot.lane.b32.xlu2 %v8769_v3, %s7262_s12 }
 0x459   : > { %v9143_v1 = vpop.permute.xlu2 %3489 }
 0x45a   : > { %12433 = vst [vmem:[#allocation367_spill] sm:$0xff] %v9143_v1 }
 0x45b   : > { %3683 = vrot.lane.b32.xlu0 %v7836_v36, %s7263_s14  ;;  %3679 = vrot.lane.b32.xlu1 %v7745_v15, %s7263_s14 }
 0x45d   : > { %v9149_v45 = vpop.permute.xlu0 %3485  ;;  %v9151_v44 = vpop.permute.xlu1 %3481 }
 0x45e   : > { %12434 = vst [vmem:[#allocation368_spill] sm:$0xff] %v9149_v45 }
 0x45f   : > { %12435 = vst [vmem:[#allocation369_spill] sm:$0xff] %v9151_v44  ;;  %3561 = vrot.lane.b32.xlu2 %v8851_v16, %s7262_s12 }
 0x461   : > { %v9155_v34 = vpop.permute.xlu2 %3495 }
 0x462   : > { %12436 = vst [vmem:[#allocation370_spill] sm:$0xff] %v9155_v34 }
 0x463   : > { %3689 = vrot.lane.b32.xlu0 %v7954_v38, %s7263_s14  ;;  %3685 = vrot.lane.b32.xlu1 %v7860_v50, %s7263_s14 }
 0x465   : > { %v9161_v1 = vpop.permute.xlu0 %3491  ;;  %v9163_v56 = vpop.permute.xlu1 %3487 }
 0x466   : > { %12437 = vst [vmem:[#allocation371_spill] sm:$0xff] %v9161_v1 }
 0x467   : > { %12438 = vst [vmem:[#allocation372_spill] sm:$0xff] %v9163_v56  ;;  %3681 = vrot.lane.b32.xlu2 %v7772_v47, %s7263_s14 }
 0x469   : > { %v9167_v45 = vpop.permute.xlu2 %3501 }
 0x46a   : > { %12439 = vst [vmem:[#allocation373_spill] sm:$0xff] %v9167_v45 }
 0x46b   : > { %3695 = vrot.lane.b32.xlu0 %v8057_v62, %s7263_s14  ;;  %3691 = vrot.lane.b32.xlu1 %v7980_v35, %s7263_s14 }
 0x46d   : > { %v9173_v34 = vpop.permute.xlu0 %3497  ;;  %v9175_v44 = vpop.permute.xlu1 %3493 }
 0x46e   : > { %12440 = vst [vmem:[#allocation374_spill] sm:$0xff] %v9173_v34 }
 0x46f   : > { %12441 = vst [vmem:[#allocation375_spill] sm:$0xff] %v9175_v44  ;;  %3687 = vrot.lane.b32.xlu2 %v7889_v19, %s7263_s14 }
 0x471   : > { %v9179_v1 = vpop.permute.xlu2 %3507 }
 0x472   : > { %12442 = vst [vmem:[#allocation376_spill] sm:$0xff] %v9179_v1 }
 0x473   : > { %3701 = vrot.lane.b32.xlu0 %v8155_v14, %s7263_s14  ;;  %3697 = vrot.lane.b32.xlu1 %v8083_v30, %s7263_s14 }
 0x475   : > { %v9185_v45 = vpop.permute.xlu0 %3503  ;;  %v9187_v56 = vpop.permute.xlu1 %3499 }
 0x476   : > { %12443 = vst [vmem:[#allocation377_spill] sm:$0xff] %v9185_v45 }
 0x477   : > { %12444 = vst [vmem:[#allocation378_spill] sm:$0xff] %v9187_v56  ;;  %3693 = vrot.lane.b32.xlu2 %v8005_v11, %s7263_s14 }
 0x479   : > { %v9191_v34 = vpop.permute.xlu2 %3513 }
 0x47a   : > { %12445 = vst [vmem:[#allocation379_spill] sm:$0xff] %v9191_v34 }
 0x47b   : > { %3707 = vrot.lane.b32.xlu0 %v8263_v43, %s7263_s14  ;;  %3703 = vrot.lane.b32.xlu1 %v8185_v29, %s7263_s14 }
 0x47d   : > { %v9197_v1 = vpop.permute.xlu0 %3509  ;;  %v9199_v44 = vpop.permute.xlu1 %3505 }
 0x47e   : > { %12446 = vst [vmem:[#allocation380_spill] sm:$0xff] %v9197_v1 }
 0x47f   : > { %12447 = vst [vmem:[#allocation381_spill] sm:$0xff] %v9199_v44  ;;  %3699 = vrot.lane.b32.xlu2 %v8108_v32, %s7263_s14 }
 0x481   : > { %v9203_v45 = vpop.permute.xlu2 %3519 }
 0x482   : > { %12448 = vst [vmem:[#allocation382_spill] sm:$0xff] %v9203_v45 }
 0x483   : > { %3713 = vrot.lane.b32.xlu0 %v8349_v53, %s7263_s14  ;;  %3709 = vrot.lane.b32.xlu1 %v8285_v31, %s7263_s14 }
 0x485   : > { %v9209_v34 = vpop.permute.xlu0 %3515  ;;  %v9211_v56 = vpop.permute.xlu1 %3511 }
 0x486   : > { %12449 = vst [vmem:[#allocation383_spill] sm:$0xff] %v9209_v34 }
 0x487   : > { %12450 = vst [vmem:[#allocation384_spill] sm:$0xff] %v9211_v56  ;;  %3705 = vrot.lane.b32.xlu2 %v8213_v59, %s7263_s14 }
 0x489   : > { %v9215_v1 = vpop.permute.xlu2 %3525 }
 0x48a   : > { %12451 = vst [vmem:[#allocation385_spill] sm:$0xff] %v9215_v1 }
 0x48b   : > { %3719 = vrot.lane.b32.xlu0 %v8436_v39, %s7263_s14  ;;  %3715 = vrot.lane.b32.xlu1 %v8372_v51, %s7263_s14 }
 0x48d   : > { %v9221_v45 = vpop.permute.xlu0 %3521  ;;  %v9223_v44 = vpop.permute.xlu1 %3517 }
 0x48e   : > { %12452 = vst [vmem:[#allocation386_spill] sm:$0xff] %v9221_v45 }
 0x48f   : > { %12453 = vst [vmem:[#allocation387_spill] sm:$0xff] %v9223_v44  ;;  %3711 = vrot.lane.b32.xlu2 %v8304_v54, %s7263_s14 }
 0x491   : > { %v9227_v34 = vpop.permute.xlu2 %3531 }
 0x492   : > { %12454 = vst [vmem:[#allocation388_spill] sm:$0xff] %v9227_v34 }
 0x493   : > { %3725 = vrot.lane.b32.xlu0 %v8530_v52, %s7263_s14  ;;  %3721 = vrot.lane.b32.xlu1 %v8459_v61, %s7263_s14 }
 0x495   : > { %v9233_v1 = vpop.permute.xlu0 %3527  ;;  %v9235_v56 = vpop.permute.xlu1 %3523 }
 0x496   : > { %12455 = vst [vmem:[#allocation389_spill] sm:$0xff] %v9233_v1 }
 0x497   : > { %12456 = vst [vmem:[#allocation390_spill] sm:$0xff] %v9235_v56  ;;  %3717 = vrot.lane.b32.xlu2 %v8395_v41, %s7263_s14 }
 0x499   : > { %v9239_v45 = vpop.permute.xlu2 %3537 }
 0x49a   : > { %12457 = vst [vmem:[#allocation391_spill] sm:$0xff] %v9239_v45 }
 0x49b   : > { %3731 = vrot.lane.b32.xlu0 %v8603_v24, %s7263_s14  ;;  %3727 = vrot.lane.b32.xlu1 %v8553_v6, %s7263_s14 }
 0x49d   : > { %v9245_v34 = vpop.permute.xlu0 %3533  ;;  %v9247_v44 = vpop.permute.xlu1 %3529 }
 0x49e   : > { %12458 = vst [vmem:[#allocation392_spill] sm:$0xff] %v9245_v34 }
 0x49f   : > { %12459 = vst [vmem:[#allocation393_spill] sm:$0xff] %v9247_v44  ;;  %3723 = vrot.lane.b32.xlu2 %v8482_v23, %s7263_s14 }
 0x4a1   : > { %v9251_v1 = vpop.permute.xlu2 %3543 }
 0x4a2   : > { %12460 = vst [vmem:[#allocation394_spill] sm:$0xff] %v9251_v1 }
 0x4a3   : > { %3737 = vrot.lane.b32.xlu0 %v8669_v17, %s7263_s14  ;;  %3733 = vrot.lane.b32.xlu1 %v8619_v0, %s7263_s14 }
 0x4a5   : > { %v9257_v45 = vpop.permute.xlu0 %3539  ;;  %v9259_v56 = vpop.permute.xlu1 %3535 }
 0x4a6   : > { %12461 = vst [vmem:[#allocation395_spill] sm:$0xff] %v9257_v45 }
 0x4a7   : > { %12462 = vst [vmem:[#allocation396_spill] sm:$0xff] %v9259_v56  ;;  %3729 = vrot.lane.b32.xlu2 %v8571_v22, %s7263_s14 }
 0x4a9   : > { %v9263_v34 = vpop.permute.xlu2 %3549 }
 0x4aa   : > { %12463 = vst [vmem:[#allocation397_spill] sm:$0xff] %v9263_v34 }
 0x4ab   : > { %3743 = vrot.lane.b32.xlu0 %v8735_v46, %s7263_s14  ;;  %3739 = vrot.lane.b32.xlu1 %v8685_v8, %s7263_s14 }
 0x4ad   : > { %v9269_v44 = vpop.permute.xlu0 %3545  ;;  %v9271_v1 = vpop.permute.xlu1 %3541 }
 0x4ae   : > { %12464 = vst [vmem:[#allocation398_spill] sm:$0xff] %v9269_v44 }
 0x4af   : > { %12465 = vst [vmem:[#allocation399_spill] sm:$0xff] %v9271_v1  ;;  %3735 = vrot.lane.b32.xlu2 %v8637_v9, %s7263_s14 }
 0x4b1   : > { %v9275_v45 = vpop.permute.xlu2 %3555 }
 0x4b2   : > { %12466 = vst [vmem:[#allocation400_spill] sm:$0xff] %v9275_v45 }
 0x4b3   : > { %3749 = vrot.lane.b32.xlu0 %v8789_v42, %s7263_s14  ;;  %3745 = vrot.lane.b32.xlu1 %v8751_v26, %s7263_s14 }
 0x4b5   : > { %v9281_v56 = vpop.permute.xlu0 %3551  ;;  %v9283_v34 = vpop.permute.xlu1 %3547 }
 0x4b6   : > { %12467 = vst [vmem:[#allocation401_spill] sm:$0xff] %v9281_v56 }
 0x4b7   : > { %12468 = vst [vmem:[#allocation402_spill] sm:$0xff] %v9283_v34  ;;  %3741 = vrot.lane.b32.xlu2 %v8703_v7, %s7263_s14 }
 0x4b9   : > { %v9287_v44 = vpop.permute.xlu2 %3561 }
 0x4ba   : > { %12469 = vst [vmem:[#allocation403_spill] sm:$0xff] %v9287_v44 }
 0x4bb   : > { %4043 = vrot.lane.b32.xlu0 %v7523_v49, %s7264_s15  ;;  %3751 = vrot.lane.b32.xlu1 %v8817_v5, %s7263_s14 }
 0x4bd   : > { %v9293_v45 = vpop.permute.xlu0 %3557  ;;  %v9295_v1 = vpop.permute.xlu1 %3553 }
 0x4be   : > { %12470 = vst [vmem:[#allocation404_spill] sm:$0xff] %v9293_v45 }
 0x4bf   : > { %12471 = vst [vmem:[#allocation405_spill] sm:$0xff] %v9295_v1  ;;  %3747 = vrot.lane.b32.xlu2 %v8769_v3, %s7263_s14 }
 0x4c1   : > { %v9299_v56 = vpop.permute.xlu2 %3681 }
 0x4c2   : > { %12472 = vst [vmem:[#allocation406_spill] sm:$0xff] %v9299_v56 }
 0x4c3   : > { %4049 = vrot.lane.b32.xlu0 %v7573_v25, %s7264_s15  ;;  %4045 = vrot.lane.b32.xlu1 %v7538_v57, %s7264_s15 }
 0x4c5   : > { %v9305_v44 = vpop.permute.xlu0 %3677  ;;  %v9307_v34 = vpop.permute.xlu1 %3559 }
 0x4c6   : > { %12473 = vst [vmem:[#allocation407_spill] sm:$0xff] %v9305_v44 }
 0x4c7   : > { %12474 = vst [vmem:[#allocation408_spill] sm:$0xff] %v9307_v34  ;;  %3753 = vrot.lane.b32.xlu2 %v8851_v16, %s7263_s14 }
 0x4c9   : > { %v9311_v45 = vpop.permute.xlu2 %3687 }
 0x4ca   : > { %12475 = vst [vmem:[#allocation409_spill] sm:$0xff] %v9311_v45 }
 0x4cb   : > { %4055 = vrot.lane.b32.xlu0 %v7640_v63, %s7264_s15  ;;  %4051 = vrot.lane.b32.xlu1 %v7587_v27, %s7264_s15 }
 0x4cd   : > { %v9317_v1 = vpop.permute.xlu0 %3683  ;;  %v9319_v56 = vpop.permute.xlu1 %3679 }
 0x4ce   : > { %12476 = vst [vmem:[#allocation410_spill] sm:$0xff] %v9317_v1 }
 0x4cf   : > { %12477 = vst [vmem:[#allocation411_spill] sm:$0xff] %v9319_v56  ;;  %4047 = vrot.lane.b32.xlu2 %v7559_v13, %s7264_s15 }
 0x4d1   : > { %v9323_v44 = vpop.permute.xlu2 %3693 }
 0x4d2   : > { %12478 = vst [vmem:[#allocation412_spill] sm:$0xff] %v9323_v44 }
 0x4d3   : > { %4061 = vrot.lane.b32.xlu0 %v7719_v60, %s7264_s15  ;;  %4057 = vrot.lane.b32.xlu1 %v7655_v4, %s7264_s15 }
 0x4d5   : > { %v9329_v34 = vpop.permute.xlu0 %3689  ;;  %v9331_v45 = vpop.permute.xlu1 %3685 }
 0x4d6   : > { %12479 = vst [vmem:[#allocation413_spill] sm:$0xff] %v9329_v34 }
 0x4d7   : > { %12480 = vst [vmem:[#allocation414_spill] sm:$0xff] %v9331_v45  ;;  %4053 = vrot.lane.b32.xlu2 %v7605_v37, %s7264_s15 }
 0x4d9   : > { %v9335_v1 = vpop.permute.xlu2 %3699 }
 0x4da   : > { %12481 = vst [vmem:[#allocation415_spill] sm:$0xff] %v9335_v1 }
 0x4db   : > { %4067 = vrot.lane.b32.xlu0 %v7836_v36, %s7264_s15  ;;  %4063 = vrot.lane.b32.xlu1 %v7745_v15, %s7264_s15 }
 0x4dd   : > { %v9341_v44 = vpop.permute.xlu0 %3695  ;;  %v9343_v56 = vpop.permute.xlu1 %3691 }
 0x4de   : > { %12482 = vst [vmem:[#allocation416_spill] sm:$0xff] %v9341_v44 }
 0x4df   : > { %12483 = vst [vmem:[#allocation417_spill] sm:$0xff] %v9343_v56  ;;  %4059 = vrot.lane.b32.xlu2 %v7673_v18, %s7264_s15 }
 0x4e1   : > { %v9347_v34 = vpop.permute.xlu2 %3705 }
 0x4e2   : > { %12484 = vst [vmem:[#allocation418_spill] sm:$0xff] %v9347_v34 }
 0x4e3   : > { %4073 = vrot.lane.b32.xlu0 %v7954_v38, %s7264_s15  ;;  %4069 = vrot.lane.b32.xlu1 %v7860_v50, %s7264_s15 }
 0x4e5   : > { %v9353_v1 = vpop.permute.xlu0 %3701  ;;  %v9355_v45 = vpop.permute.xlu1 %3697 }
 0x4e6   : > { %12485 = vst [vmem:[#allocation419_spill] sm:$0xff] %v9353_v1 }
 0x4e7   : > { %12486 = vst [vmem:[#allocation420_spill] sm:$0xff] %v9355_v45  ;;  %4065 = vrot.lane.b32.xlu2 %v7772_v47, %s7264_s15 }
 0x4e9   : > { %v9359_v44 = vpop.permute.xlu2 %3711 }
 0x4ea   : > { %12487 = vst [vmem:[#allocation421_spill] sm:$0xff] %v9359_v44 }
 0x4eb   : > { %4079 = vrot.lane.b32.xlu0 %v8057_v62, %s7264_s15  ;;  %4075 = vrot.lane.b32.xlu1 %v7980_v35, %s7264_s15 }
 0x4ed   : > { %v9365_v34 = vpop.permute.xlu0 %3707  ;;  %v9367_v56 = vpop.permute.xlu1 %3703 }
 0x4ee   : > { %12488 = vst [vmem:[#allocation422_spill] sm:$0xff] %v9365_v34 }
 0x4ef   : > { %12489 = vst [vmem:[#allocation423_spill] sm:$0xff] %v9367_v56  ;;  %4071 = vrot.lane.b32.xlu2 %v7889_v19, %s7264_s15 }
 0x4f1   : > { %v9371_v1 = vpop.permute.xlu2 %3717 }
 0x4f2   : > { %12490 = vst [vmem:[#allocation424_spill] sm:$0xff] %v9371_v1 }
 0x4f3   : > { %4085 = vrot.lane.b32.xlu0 %v8155_v14, %s7264_s15  ;;  %4081 = vrot.lane.b32.xlu1 %v8083_v30, %s7264_s15 }
 0x4f5   : > { %v9377_v44 = vpop.permute.xlu0 %3713  ;;  %v9379_v45 = vpop.permute.xlu1 %3709 }
 0x4f6   : > { %12491 = vst [vmem:[#allocation425_spill] sm:$0xff] %v9377_v44 }
 0x4f7   : > { %12492 = vst [vmem:[#allocation426_spill] sm:$0xff] %v9379_v45  ;;  %4077 = vrot.lane.b32.xlu2 %v8005_v11, %s7264_s15 }
 0x4f9   : > { %v9383_v34 = vpop.permute.xlu2 %3723 }
 0x4fa   : > { %12493 = vst [vmem:[#allocation427_spill] sm:$0xff] %v9383_v34 }
 0x4fb   : > { %4091 = vrot.lane.b32.xlu0 %v8263_v43, %s7264_s15  ;;  %4087 = vrot.lane.b32.xlu1 %v8185_v29, %s7264_s15 }
 0x4fd   : > { %v9389_v1 = vpop.permute.xlu0 %3719  ;;  %v9391_v56 = vpop.permute.xlu1 %3715 }
 0x4fe   : > { %12494 = vst [vmem:[#allocation428_spill] sm:$0xff] %v9389_v1 }
 0x4ff   : > { %12495 = vst [vmem:[#allocation429_spill] sm:$0xff] %v9391_v56  ;;  %4083 = vrot.lane.b32.xlu2 %v8108_v32, %s7264_s15 }
 0x501   : > { %v9395_v44 = vpop.permute.xlu2 %3729 }
 0x502   : > { %12496 = vst [vmem:[#allocation430_spill] sm:$0xff] %v9395_v44 }
 0x503   : > { %4097 = vrot.lane.b32.xlu0 %v8349_v53, %s7264_s15  ;;  %4093 = vrot.lane.b32.xlu1 %v8285_v31, %s7264_s15 }
 0x505   : > { %v9401_v34 = vpop.permute.xlu0 %3725  ;;  %v9403_v45 = vpop.permute.xlu1 %3721 }
 0x506   : > { %12497 = vst [vmem:[#allocation431_spill] sm:$0xff] %v9401_v34 }
 0x507   : > { %12498 = vst [vmem:[#allocation432_spill] sm:$0xff] %v9403_v45  ;;  %4089 = vrot.lane.b32.xlu2 %v8213_v59, %s7264_s15 }
 0x509   : > { %v9407_v1 = vpop.permute.xlu2 %3735 }
 0x50a   : > { %12499 = vst [vmem:[#allocation433_spill] sm:$0xff] %v9407_v1 }
 0x50b   : > { %4103 = vrot.lane.b32.xlu0 %v8436_v39, %s7264_s15  ;;  %4099 = vrot.lane.b32.xlu1 %v8372_v51, %s7264_s15 }
 0x50d   : > { %v9413_v44 = vpop.permute.xlu0 %3731  ;;  %v9415_v56 = vpop.permute.xlu1 %3727 }
 0x50e   : > { %12500 = vst [vmem:[#allocation434_spill] sm:$0xff] %v9413_v44 }
 0x50f   : > { %12501 = vst [vmem:[#allocation435_spill] sm:$0xff] %v9415_v56  ;;  %4095 = vrot.lane.b32.xlu2 %v8304_v54, %s7264_s15 }
 0x511   : > { %v9419_v34 = vpop.permute.xlu2 %3741 }
 0x512   : > { %12502 = vst [vmem:[#allocation436_spill] sm:$0xff] %v9419_v34 }
 0x513   : > { %4109 = vrot.lane.b32.xlu0 %v8530_v52, %s7264_s15  ;;  %4105 = vrot.lane.b32.xlu1 %v8459_v61, %s7264_s15 }
 0x515   : > { %v9425_v1 = vpop.permute.xlu0 %3737  ;;  %v9427_v45 = vpop.permute.xlu1 %3733 }
 0x516   : > { %12503 = vst [vmem:[#allocation437_spill] sm:$0xff] %v9425_v1 }
 0x517   : > { %12504 = vst [vmem:[#allocation438_spill] sm:$0xff] %v9427_v45  ;;  %4101 = vrot.lane.b32.xlu2 %v8395_v41, %s7264_s15 }
 0x519   : > { %v9431_v44 = vpop.permute.xlu2 %3747 }
 0x51a   : > { %12505 = vst [vmem:[#allocation439_spill] sm:$0xff] %v9431_v44 }
 0x51b   : > { %4379 = vrot.lane.b32.xlu0 %v7523_v49, %s7265_s16  ;;  %4111 = vrot.lane.b32.xlu1 %v8553_v6, %s7264_s15 }
 0x51d   : > { %v9437_v34 = vpop.permute.xlu0 %3743  ;;  %v9439_v56 = vpop.permute.xlu1 %3739 }
 0x51e   : > { %12506 = vst [vmem:[#allocation440_spill] sm:$0xff] %v9437_v34 }
 0x51f   : > { %12507 = vst [vmem:[#allocation441_spill] sm:$0xff] %v9439_v56  ;;  %4107 = vrot.lane.b32.xlu2 %v8482_v23, %s7264_s15 }
 0x521   : > { %v9443_v1 = vpop.permute.xlu2 %3753 }
 0x522   : > { %12508 = vst [vmem:[#allocation442_spill] sm:$0xff] %v9443_v1 }
 0x523   : > { %4385 = vrot.lane.b32.xlu0 %v7573_v25, %s7265_s16  ;;  %4381 = vrot.lane.b32.xlu1 %v7538_v57, %s7265_s16 }
 0x525   : > { %v9449_v44 = vpop.permute.xlu0 %3749  ;;  %v9451_v45 = vpop.permute.xlu1 %3745 }
 0x526   : > { %12509 = vst [vmem:[#allocation443_spill] sm:$0xff] %v9449_v44 }
 0x527   : > { %12510 = vst [vmem:[#allocation444_spill] sm:$0xff] %v9451_v45  ;;  %4113 = vrot.lane.b32.xlu2 %v8571_v22, %s7264_s15 }
 0x529   : > { %v9455_v34 = vpop.permute.xlu2 %4047 }
 0x52b   : > { %4391 = vrot.lane.b32.xlu0 %v7640_v63, %s7265_s16  ;;  %4387 = vrot.lane.b32.xlu1 %v7587_v27, %s7265_s16 }
 0x52d   : > { %v9461_v56 = vpop.permute.xlu0 %4043  ;;  %v9463_v1 = vpop.permute.xlu1 %3751 }
 0x52e   : > { %12511 = vst [vmem:[#allocation445_spill] sm:$0xff] %v9463_v1 }
 0x52f   : > { %4383 = vrot.lane.b32.xlu2 %v7559_v13, %s7265_s16 }
 0x531   : > { %v9467_v44 = vpop.permute.xlu2 %4053 }
 0x532   : > { %12512 = vst [vmem:[#allocation446_spill] sm:$0xff] %v9467_v44 }
 0x533   : > { %4397 = vrot.lane.b32.xlu0 %v7719_v60, %s7265_s16  ;;  %4393 = vrot.lane.b32.xlu1 %v7655_v4, %s7265_s16 }
 0x535   : > { %v9473_v45 = vpop.permute.xlu0 %4049  ;;  %v9475_v63 = vpop.permute.xlu1 %4045 }
 0x536   : > { %12513 = vst [vmem:[#allocation447_spill] sm:$0xff] %v9473_v45 }
 0x537   : > { %4389 = vrot.lane.b32.xlu2 %v7605_v37, %s7265_s16 }
 0x539   : > { %v9479_v27 = vpop.permute.xlu2 %4059 }
 0x53a   : > { %12514 = vst [vmem:[#allocation448_spill] sm:$0xff] %v9479_v27 }
 0x53b   : > { %4403 = vrot.lane.b32.xlu0 %v7836_v36, %s7265_s16  ;;  %4399 = vrot.lane.b32.xlu1 %v7745_v15, %s7265_s16 }
 0x53d   : > { %v9485_v1 = vpop.permute.xlu0 %4055  ;;  %v9487_v60 = vpop.permute.xlu1 %4051 }
 0x53e   : > { %12515 = vst [vmem:[#allocation449_spill] sm:$0xff] %v9485_v1 }
 0x53f   : > { %12516 = vst [vmem:[#allocation450_spill] sm:$0xff] %v9487_v60  ;;  %4395 = vrot.lane.b32.xlu2 %v7673_v18, %s7265_s16 }
 0x541   : > { %v9491_v4 = vpop.permute.xlu2 %4065 }
 0x542   : > { %12517 = vst [vmem:[#allocation451_spill] sm:$0xff] %v9491_v4 }
 0x543   : > { %4409 = vrot.lane.b32.xlu0 %v7954_v38, %s7265_s16  ;;  %4405 = vrot.lane.b32.xlu1 %v7860_v50, %s7265_s16 }
 0x545   : > { %v9497_v25 = vpop.permute.xlu0 %4061  ;;  %v9499_v37 = vpop.permute.xlu1 %4057 }
 0x546   : > { %12518 = vst [vmem:[#allocation452_spill] sm:$0xff] %v9497_v25 }
 0x547   : > { %12519 = vst [vmem:[#allocation453_spill] sm:$0xff] %v9499_v37  ;;  %4401 = vrot.lane.b32.xlu2 %v7772_v47, %s7265_s16 }
 0x549   : > { %v9503_v15 = vpop.permute.xlu2 %4071 }
 0x54a   : > { %12520 = vst [vmem:[#allocation454_spill] sm:$0xff] %v9503_v15 }
 0x54b   : > { %4415 = vrot.lane.b32.xlu0 %v8057_v62, %s7265_s16  ;;  %4411 = vrot.lane.b32.xlu1 %v7980_v35, %s7265_s16 }
 0x54d   : > { %v9509_v18 = vpop.permute.xlu0 %4067  ;;  %v9511_v4 = vpop.permute.xlu1 %4063 }
 0x54e   : > { %12521 = vst [vmem:[#allocation455_spill] sm:$0xff] %v9509_v18 }
 0x54f   : > { %12522 = vst [vmem:[#allocation456_spill] sm:$0xff] %v9511_v4  ;;  %4407 = vrot.lane.b32.xlu2 %v7889_v19, %s7265_s16 }
 0x551   : > { %v9515_v25 = vpop.permute.xlu2 %4077 }
 0x552   : > { %12523 = vst [vmem:[#allocation457_spill] sm:$0xff] %v9515_v25 }
 0x553   : > { %4421 = vrot.lane.b32.xlu0 %v8155_v14, %s7265_s16  ;;  %4417 = vrot.lane.b32.xlu1 %v8083_v30, %s7265_s16 }
 0x555   : > { %v9521_v47 = vpop.permute.xlu0 %4073  ;;  %v9523_v15 = vpop.permute.xlu1 %4069 }
 0x556   : > { %12524 = vst [vmem:[#allocation458_spill] sm:$0xff] %v9521_v47 }
 0x557   : > { %12525 = vst [vmem:[#allocation459_spill] sm:$0xff] %v9523_v15  ;;  %4413 = vrot.lane.b32.xlu2 %v8005_v11, %s7265_s16 }
 0x559   : > { %v9527_v18 = vpop.permute.xlu2 %4083 }
 0x55a   : > { %12526 = vst [vmem:[#allocation460_spill] sm:$0xff] %v9527_v18 }
 0x55b   : > { %4427 = vrot.lane.b32.xlu0 %v8263_v43, %s7265_s16  ;;  %4423 = vrot.lane.b32.xlu1 %v8185_v29, %s7265_s16 }
 0x55d   : > { %v9533_v25 = vpop.permute.xlu0 %4079  ;;  %v9535_v4 = vpop.permute.xlu1 %4075 }
 0x55e   : > { %12527 = vst [vmem:[#allocation461_spill] sm:$0xff] %v9533_v25 }
 0x55f   : > { %12528 = vst [vmem:[#allocation462_spill] sm:$0xff] %v9535_v4  ;;  %4419 = vrot.lane.b32.xlu2 %v8108_v32, %s7265_s16 }
 0x561   : > { %v9539_v47 = vpop.permute.xlu2 %4089 }
 0x562   : > { %12529 = vst [vmem:[#allocation463_spill] sm:$0xff] %v9539_v47 }
 0x563   : > { %4433 = vrot.lane.b32.xlu0 %v8349_v53, %s7265_s16  ;;  %4429 = vrot.lane.b32.xlu1 %v8285_v31, %s7265_s16 }
 0x565   : > { %v9545_v18 = vpop.permute.xlu0 %4085  ;;  %v9547_v15 = vpop.permute.xlu1 %4081 }
 0x566   : > { %12530 = vst [vmem:[#allocation464_spill] sm:$0xff] %v9545_v18 }
 0x567   : > { %12531 = vst [vmem:[#allocation465_spill] sm:$0xff] %v9547_v15  ;;  %4425 = vrot.lane.b32.xlu2 %v8213_v59, %s7265_s16 }
 0x569   : > { %v9551_v25 = vpop.permute.xlu2 %4095 }
 0x56a   : > { %12532 = vst [vmem:[#allocation466_spill] sm:$0xff] %v9551_v25 }
 0x56b   : > { %4439 = vrot.lane.b32.xlu0 %v8436_v39, %s7265_s16  ;;  %4435 = vrot.lane.b32.xlu1 %v8372_v51, %s7265_s16 }
 0x56d   : > { %v9557_v47 = vpop.permute.xlu0 %4091  ;;  %v9559_v4 = vpop.permute.xlu1 %4087 }
 0x56e   : > { %12533 = vst [vmem:[#allocation467_spill] sm:$0xff] %v9557_v47 }
 0x56f   : > { %12534 = vst [vmem:[#allocation468_spill] sm:$0xff] %v9559_v4  ;;  %4431 = vrot.lane.b32.xlu2 %v8304_v54, %s7265_s16 }
 0x571   : > { %v9563_v18 = vpop.permute.xlu2 %4101 }
 0x572   : > { %12535 = vst [vmem:[#allocation469_spill] sm:$0xff] %v9563_v18 }
 0x573   : > { %4445 = vrot.lane.b32.xlu0 %v8530_v52, %s7265_s16  ;;  %4441 = vrot.lane.b32.xlu1 %v8459_v61, %s7265_s16 }
 0x575   : > { %v9569_v15 = vpop.permute.xlu0 %4097  ;;  %v9571_v25 = vpop.permute.xlu1 %4093 }
 0x576   : > { %12536 = vst [vmem:[#allocation470_spill] sm:$0xff] %v9569_v15 }
 0x577   : > { %12537 = vst [vmem:[#allocation471_spill] sm:$0xff] %v9571_v25  ;;  %4437 = vrot.lane.b32.xlu2 %v8395_v41, %s7265_s16 }
 0x579   : > { %v9575_v47 = vpop.permute.xlu2 %4107 }
 0x57a   : > { %12538 = vst [vmem:[#allocation472_spill] sm:$0xff] %v9575_v47 }
 0x57b   : > { %4451 = vrot.lane.b32.xlu0 %v8603_v24, %s7265_s16  ;;  %4447 = vrot.lane.b32.xlu1 %v8553_v6, %s7265_s16 }
 0x57d   : > { %v9581_v4 = vpop.permute.xlu0 %4103  ;;  %v9583_v18 = vpop.permute.xlu1 %4099 }
 0x57e   : > { %12539 = vst [vmem:[#allocation473_spill] sm:$0xff] %v9581_v4 }
 0x57f   : > { %12540 = vst [vmem:[#allocation474_spill] sm:$0xff] %v9583_v18  ;;  %4443 = vrot.lane.b32.xlu2 %v8482_v23, %s7265_s16 }
 0x581   : > { %v9587_v15 = vpop.permute.xlu2 %4113 }
 0x582   : > { %12541 = vst [vmem:[#allocation475_spill] sm:$0xff] %v9587_v15 }
 0x583   : > { %4457 = vrot.lane.b32.xlu0 %v8669_v17, %s7265_s16  ;;  %4453 = vrot.lane.b32.xlu1 %v8619_v0, %s7265_s16 }
 0x585   : > { %v9593_v47 = vpop.permute.xlu0 %4109  ;;  %v9595_v25 = vpop.permute.xlu1 %4105 }
 0x586   : > { %12542 = vst [vmem:[#allocation476_spill] sm:$0xff] %v9593_v47 }
 0x587   : > { %12543 = vst [vmem:[#allocation477_spill] sm:$0xff] %v9595_v25  ;;  %4449 = vrot.lane.b32.xlu2 %v8571_v22, %s7265_s16 }
 0x589   : > { %v9599_v4 = vpop.permute.xlu2 %4383 }
 0x58b   : > { %4463 = vrot.lane.b32.xlu0 %v8735_v46, %s7265_s16  ;;  %4459 = vrot.lane.b32.xlu1 %v8685_v8, %s7265_s16 }
 0x58d   : > { %v9605_v15 = vpop.permute.xlu0 %4379  ;;  %v9607_v18 = vpop.permute.xlu1 %4111 }
 0x58e   : > { %12544 = vst [vmem:[#allocation478_spill] sm:$0xff] %v9607_v18 }
 0x58f   : > { %4455 = vrot.lane.b32.xlu2 %v8637_v9, %s7265_s16 }
 0x591   : > { %v9611_v47 = vpop.permute.xlu2 %4389 }
 0x593   : > { %4469 = vrot.lane.b32.xlu0 %v8789_v42, %s7265_s16  ;;  %4465 = vrot.lane.b32.xlu1 %v8751_v26, %s7265_s16 }
 0x595   : > { %v9617_v25 = vpop.permute.xlu0 %4385  ;;  %v9619_v37 = vpop.permute.xlu1 %4381 }
 0x597   : > { %4461 = vrot.lane.b32.xlu2 %v8703_v7, %s7265_s16 }
 0x599   : > { %v9623_v57 = vpop.permute.xlu2 %4395 }
 0x59b   : > { %4595 = vrot.lane.b32.xlu0 %v7836_v36, %s7266_s17  ;;  %4471 = vrot.lane.b32.xlu1 %v8817_v5, %s7265_s16 }
 0x59d   : > { %v9629_v18 = vpop.permute.xlu0 %4391  ;;  %v9631_v1 = vpop.permute.xlu1 %4387 }
 0x59f   : > { %4467 = vrot.lane.b32.xlu2 %v8769_v3, %s7265_s16 }
 0x5a1   : > { %v9635_v49 = vpop.permute.xlu2 %4401 }
 0x5a3   : > { %4601 = vrot.lane.b32.xlu0 %v7954_v38, %s7266_s17  ;;  %4597 = vrot.lane.b32.xlu1 %v7860_v50, %s7266_s17 }
 0x5a5   : > { %v9641_v27 = vpop.permute.xlu0 %4397  ;;  %v9643_v36 = vpop.permute.xlu1 %4393 }
 0x5a7   : > { %4473 = vrot.lane.b32.xlu2 %v8851_v16, %s7265_s16 }
 0x5a9   : > { %v9647_v13 = vpop.permute.xlu2 %4407 }
 0x5ab   : > { %4607 = vrot.lane.b32.xlu0 %v8057_v62, %s7266_s17  ;;  %4603 = vrot.lane.b32.xlu1 %v7980_v35, %s7266_s17 }
 0x5ad   : > { %v9653_v60 = vpop.permute.xlu0 %4403  ;;  %v9655_v38 = vpop.permute.xlu1 %4399 }
 0x5af   : > { %4599 = vrot.lane.b32.xlu2 %v7889_v19, %s7266_s17 }
 0x5b1   : > { %v9659_v50 = vpop.permute.xlu2 %4413 }
 0x5b2   : > { %12545 = vst [vmem:[#allocation479_spill] sm:$0xff] %v9659_v50 }
 0x5b3   : > { %4613 = vrot.lane.b32.xlu0 %v8155_v14, %s7266_s17  ;;  %4609 = vrot.lane.b32.xlu1 %v8083_v30, %s7266_s17 }
 0x5b5   : > { %v9665_v45 = vpop.permute.xlu0 %4409  ;;  %v9667_v62 = vpop.permute.xlu1 %4405 }
 0x5b6   : > { %12546 = vst [vmem:[#allocation480_spill] sm:$0xff] %v9665_v45 }
 0x5b7   : > { %12547 = vst [vmem:[#allocation481_spill] sm:$0xff] %v9667_v62  ;;  %4605 = vrot.lane.b32.xlu2 %v8005_v11, %s7266_s17 }
 0x5b9   : > { %v9671_v35 = vpop.permute.xlu2 %4419 }
 0x5ba   : > { %12548 = vst [vmem:[#allocation482_spill] sm:$0xff] %v9671_v35 }
 0x5bb   : > { %4619 = vrot.lane.b32.xlu0 %v8263_v43, %s7266_s17  ;;  %4615 = vrot.lane.b32.xlu1 %v8185_v29, %s7266_s17 }
 0x5bd   : > { %v9677_v19 = vpop.permute.xlu0 %4415  ;;  %v9679_v14 = vpop.permute.xlu1 %4411 }
 0x5be   : > { %12549 = vst [vmem:[#allocation483_spill] sm:$0xff] %v9677_v19 }
 0x5bf   : > { %12550 = vst [vmem:[#allocation484_spill] sm:$0xff] %v9679_v14  ;;  %4611 = vrot.lane.b32.xlu2 %v8108_v32, %s7266_s17 }
 0x5c1   : > { %v9683_v30 = vpop.permute.xlu2 %4425 }
 0x5c2   : > { %12551 = vst [vmem:[#allocation485_spill] sm:$0xff] %v9683_v30 }
 0x5c3   : > { %4625 = vrot.lane.b32.xlu0 %v8349_v53, %s7266_s17  ;;  %4621 = vrot.lane.b32.xlu1 %v8285_v31, %s7266_s17 }
 0x5c5   : > { %v9689_v11 = vpop.permute.xlu0 %4421  ;;  %v9691_v43 = vpop.permute.xlu1 %4417 }
 0x5c6   : > { %12552 = vst [vmem:[#allocation486_spill] sm:$0xff] %v9689_v11  ;;  %v12611_v11 = vld [vmem:[#allocation126_spill] sm:$0xff] }
 0x5c7   : > { %12553 = vst [vmem:[#allocation487_spill] sm:$0xff] %v9691_v43  ;;  %4617 = vrot.lane.b32.xlu2 %v8213_v59, %s7266_s17  ;;  %v12639_v43 = vld [vmem:[#allocation41_spill] sm:$0xff] }
 0x5c9   : > { %v9695_v29 = vpop.permute.xlu2 %4431 }
 0x5ca   : > { %12554 = vst [vmem:[#allocation488_spill] sm:$0xff] %v9695_v29  ;;  %v12593_v29 = vld [vmem:[#allocation64_spill] sm:$0xff] }
 0x5cb   : > { %4631 = vrot.lane.b32.xlu0 %v8436_v39, %s7266_s17  ;;  %4627 = vrot.lane.b32.xlu1 %v8372_v51, %s7266_s17 }
 0x5cd   : > { %v9701_v32 = vpop.permute.xlu0 %4427  ;;  %v9703_v53 = vpop.permute.xlu1 %4423 }
 0x5ce   : > { %12555 = vst [vmem:[#allocation489_spill] sm:$0xff] %v9701_v32  ;;  %v12588_v32 = vld [vmem:[#allocation30_spill] sm:$0xff] }
 0x5cf   : > { %12556 = vst [vmem:[#allocation490_spill] sm:$0xff] %v9703_v53  ;;  %4623 = vrot.lane.b32.xlu2 %v8304_v54, %s7266_s17  ;;  %v12605_v53 = vld [vmem:[#allocation105_spill] sm:$0xff] }
 0x5d1   : > { %v9707_v31 = vpop.permute.xlu2 %4437 }
 0x5d2   : > { %12557 = vst [vmem:[#allocation491_spill] sm:$0xff] %v9707_v31 }
 0x5d3   : > { %4637 = vrot.lane.b32.xlu0 %v8530_v52, %s7266_s17  ;;  %4633 = vrot.lane.b32.xlu1 %v8459_v61, %s7266_s17 }
 0x5d5   : > { %v9713_v59 = vpop.permute.xlu0 %4433  ;;  %v9715_v39 = vpop.permute.xlu1 %4429 }
 0x5d6   : > { %12558 = vst [vmem:[#allocation492_spill] sm:$0xff] %v9713_v59  ;;  %v12584_v59 = vld [vmem:[#allocation24_spill] sm:$0xff] }
 0x5d7   : > { %12559 = vst [vmem:[#allocation493_spill] sm:$0xff] %v9715_v39  ;;  %4629 = vrot.lane.b32.xlu2 %v8395_v41, %s7266_s17 }
 0x5d9   : > { %v9719_v51 = vpop.permute.xlu2 %4443 }
 0x5da   : > { %12560 = vst [vmem:[#allocation494_spill] sm:$0xff] %v9719_v51 }
 0x5db   : > { %4643 = vrot.lane.b32.xlu0 %v8603_v24, %s7266_s17  ;;  %4639 = vrot.lane.b32.xlu1 %v8553_v6, %s7266_s17 }
 0x5dd   : > { %v9725_v54 = vpop.permute.xlu0 %4439  ;;  %v9727_v52 = vpop.permute.xlu1 %4435 }
 0x5de   : > { %12561 = vst [vmem:[#allocation495_spill] sm:$0xff] %v9725_v54 }
 0x5df   : > { %12562 = vst [vmem:[#allocation496_spill] sm:$0xff] %v9727_v52  ;;  %4635 = vrot.lane.b32.xlu2 %v8482_v23, %s7266_s17 }
 0x5e1   : > { %v9731_v61 = vpop.permute.xlu2 %4449 }
 0x5e2   : > { %12563 = vst [vmem:[#allocation497_spill] sm:$0xff] %v9731_v61 }
 0x5e3   : > { %4649 = vrot.lane.b32.xlu0 %v8669_v17, %s7266_s17  ;;  %4645 = vrot.lane.b32.xlu1 %v8619_v0, %s7266_s17 }
 0x5e5   : > { %v9737_v41 = vpop.permute.xlu0 %4445  ;;  %v9739_v24 = vpop.permute.xlu1 %4441 }
 0x5e6   : > { %12564 = vst [vmem:[#allocation498_spill] sm:$0xff] %v9737_v41 }
 0x5e7   : > { %12565 = vst [vmem:[#allocation499_spill] sm:$0xff] %v9739_v24  ;;  %4641 = vrot.lane.b32.xlu2 %v8571_v22, %s7266_s17  ;;  %v12579_v24 = vld [vmem:[#allocation10_spill] sm:$0xff]  ;;  %v12581_v22 = vld [vmem:[#allocation17_spill] sm:$0xff] }
 0x5e9   : > { %v9743_v6 = vpop.permute.xlu2 %4455 }
 0x5ea   : > { %12566 = vst [vmem:[#allocation500_spill] sm:$0xff] %v9743_v6 }
 0x5eb   : > { %4655 = vrot.lane.b32.xlu0 %v8735_v46, %s7266_s17  ;;  %4651 = vrot.lane.b32.xlu1 %v8685_v8, %s7266_s17 }
 0x5ed   : > { %v9749_v23 = vpop.permute.xlu0 %4451  ;;  %v9751_v17 = vpop.permute.xlu1 %4447 }
 0x5ee   : > { %12567 = vst [vmem:[#allocation501_spill] sm:$0xff] %v9749_v23 }
 0x5ef   : > { %12568 = vst [vmem:[#allocation502_spill] sm:$0xff] %v9751_v17  ;;  %4647 = vrot.lane.b32.xlu2 %v8637_v9, %s7266_s17 }
 0x5f1   : > { %v9755_v0 = vpop.permute.xlu2 %4461 }
 0x5f2   : > { %12569 = vst [vmem:[#allocation503_spill] sm:$0xff] %v9755_v0  ;;  %v12583_v0 = vld [vmem:[#allocation29_spill] sm:$0xff] }
 0x5f3   : > { %4661 = vrot.lane.b32.xlu0 %v8789_v42, %s7266_s17  ;;  %4657 = vrot.lane.b32.xlu1 %v8751_v26, %s7266_s17 }
 0x5f5   : > { %v9761_v41 = vpop.permute.xlu0 %4457  ;;  %v9763_v46 = vpop.permute.xlu1 %4453 }
 0x5f6   : > { %12570 = vst [vmem:[#allocation504_spill] sm:$0xff] %v9761_v41  ;;  %v12582_v41 = vld [vmem:[#allocation13_spill] sm:$0xff] }
 0x5f7   : > { %12571 = vst [vmem:[#allocation505_spill] sm:$0xff] %v9763_v46  ;;  %4653 = vrot.lane.b32.xlu2 %v8703_v7, %s7266_s17 }
 0x5f9   : > { %v9767_v8 = vpop.permute.xlu2 %4467 }
 0x5fa   : > { %12572 = vst [vmem:[#allocation506_spill] sm:$0xff] %v9767_v8 }
 0x5fb   : > { %4955 = vrot.lane.b32.xlu0 %v7411_v12, %s7258_s25  ;;  %4663 = vrot.lane.b32.xlu1 %v8817_v5, %s7266_s17 }
 0x5fd   : > { %v9773_v17 = vpop.permute.xlu0 %4463  ;;  %v9775_v42 = vpop.permute.xlu1 %4459 }
 0x5fe   : > { %12573 = vst [vmem:[#allocation507_spill] sm:$0xff] %v9773_v17  ;;  %v12580_v17 = vld [vmem:[#allocation23_spill] sm:$0xff] }
 0x5ff   : > { %12574 = vst [vmem:[#allocation508_spill] sm:$0xff] %v9775_v42  ;;  %4659 = vrot.lane.b32.xlu2 %v8769_v3, %s7266_s17 }
 0x601   : > { %v9779_v26 = vpop.permute.xlu2 %4473 }
 0x602   : > { %12575 = vst [vmem:[#allocation509_spill] sm:$0xff] %v9779_v26 }
 0x603   : > { %4961 = vrot.lane.b32.xlu0 %v7441_v40, %s7258_s25  ;;  %4957 = vrot.lane.b32.xlu1 %v7423_v21, %s7258_s25  ;;  %v12641_v40 = vld [vmem:[#allocation60_spill] sm:$0xff] }
 0x605   : > { %v9785_v7 = vpop.permute.xlu0 %4469  ;;  %v9787_v9 = vpop.permute.xlu1 %4465 }
 0x606   : > { %12576 = vst [vmem:[#allocation510_spill] sm:$0xff] %v9785_v7 }
 0x607   : > { %12577 = vst [vmem:[#allocation511_spill] sm:$0xff] %v9787_v9  ;;  %4665 = vrot.lane.b32.xlu2 %v8851_v16, %s7266_s17 }
 0x609   : > { %v9791_v5 = vpop.permute.xlu2 %4599 }
 0x60b   : > { %4967 = vrot.lane.b32.xlu0 %v7470_v2, %s7258_s25  ;;  %4963 = vrot.lane.b32.xlu1 %v7453_v48, %s7258_s25  ;;  %v12638_v48 = vld [vmem:[#allocation198_spill] sm:$0xff] }
 0x60d   : > { %v9797_v3 = vpop.permute.xlu0 %4595  ;;  %v9799_v26 = vpop.permute.xlu1 %4471 }
 0x60e   : > { %12578 = vst [vmem:[#allocation512_spill] sm:$0xff] %v9799_v26 }
 0x60f   : > { %4959 = vrot.lane.b32.xlu2 %v7431_v33, %s7258_s25  ;;  %v12667_v33 = vld [vmem:[#allocation31_spill] sm:$0xff] }
 0x611   : > { %v9803_v7 = vpop.permute.xlu2 %4605 }
 0x613   : > { %4973 = vrot.lane.b32.xlu0 %v7496_v20, %s7258_s25  ;;  %4969 = vrot.lane.b32.xlu1 %v7480_v10, %s7258_s25 }
 0x615   : > { %v9809_v16 = vpop.permute.xlu0 %4601  ;;  %v9811_v61 = vpop.permute.xlu1 %4597 }
 0x617   : > { %4965 = vrot.lane.b32.xlu2 %v7463_v58, %s7258_s25  ;;  %v12644_v58 = vld [vmem:[#allocation80_spill] sm:$0xff] }
 0x619   : > { %v9815_v9 = vpop.permute.xlu2 %4611 }
 0x61b   : > { %4979 = vrot.lane.b32.xlu0 %v7533_v55, %s7258_s25  ;;  %4975 = vrot.lane.b32.xlu1 %v7505_v28, %s7258_s25  ;;  %v12587_v55 = vld [vmem:[#allocation43_spill] sm:$0xff] }
 0x61d   : > { %v9821_v26 = vpop.permute.xlu0 %4607  ;;  %v9823_v54 = vpop.permute.xlu1 %4603 }
 0x61f   : > { %4971 = vrot.lane.b32.xlu2 %v12579_v24, %s7258_s25  ;;  %v12635_v24 = vld [vmem:[#allocation40_spill] sm:$0xff] }
 0x621   : > { %v9827_v8 = vpop.permute.xlu2 %4617 }
 0x623   : > { %4985 = vrot.lane.b32.xlu0 %v12580_v17, %s7258_s25  ;;  %4981 = vrot.lane.b32.xlu1 %v12581_v22, %s7258_s25  ;;  %v12585_v22 = vld [vmem:[#allocation20_spill] sm:$0xff] }
 0x625   : > { %v9833_v51 = vpop.permute.xlu0 %4613  ;;  %v9835_v42 = vpop.permute.xlu1 %4609 }
 0x627   : > { %4977 = vrot.lane.b32.xlu2 %v12582_v41, %s7258_s25  ;;  %v12599_v41 = vld [vmem:[#allocation84_spill] sm:$0xff] }
 0x629   : > { %v9839_v52 = vpop.permute.xlu2 %4623 }
 0x62b   : > { %4991 = vrot.lane.b32.xlu0 %v12583_v0, %s7258_s25  ;;  %4987 = vrot.lane.b32.xlu1 %v12584_v59, %s7258_s25  ;;  %v12591_v59 = vld [vmem:[#allocation26_spill] sm:$0xff] }
 0x62d   : > { %v9845_v39 = vpop.permute.xlu0 %4619  ;;  %v9847_v17 = vpop.permute.xlu1 %4615 }
 0x62f   : > { %4983 = vrot.lane.b32.xlu2 %v12585_v22, %s7258_s25  ;;  %v12594_v22 = vld [vmem:[#allocation48_spill] sm:$0xff] }
 0x631   : > { %v9851_v31 = vpop.permute.xlu2 %4629 }
 0x632   : > { %12586 = vst [vmem:[#allocation513_spill] sm:$0xff] %v9851_v31  ;;  %v12653_v31 = vld [vmem:[#allocation56_spill] sm:$0xff] }
 0x633   : > { %4997 = vrot.lane.b32.xlu0 %v12587_v55, %s7258_s25  ;;  %4993 = vrot.lane.b32.xlu1 %v12588_v32, %s7258_s25  ;;  %v12597_v32 = vld [vmem:[#allocation34_spill] sm:$0xff] }
 0x635   : > { %v9857_v46 = vpop.permute.xlu0 %4625  ;;  %v9859_v0 = vpop.permute.xlu1 %4621 }
 0x636   : > { %12589 = vst [vmem:[#allocation514_spill] sm:$0xff] %v9857_v46 }
 0x637   : > { %12590 = vst [vmem:[#allocation515_spill] sm:$0xff] %v9859_v0  ;;  %4989 = vrot.lane.b32.xlu2 %v12591_v59, %s7258_s25  ;;  %v12600_v59 = vld [vmem:[#allocation68_spill] sm:$0xff] }
 0x639   : > { %v9863_v28 = vpop.permute.xlu2 %4635 }
 0x63a   : > { %12592 = vst [vmem:[#allocation516_spill] sm:$0xff] %v9863_v28  ;;  %v12643_v28 = vld [vmem:[#allocation36_spill] sm:$0xff] }
 0x63b   : > { %5003 = vrot.lane.b32.xlu0 %v12593_v29, %s7258_s25  ;;  %4999 = vrot.lane.b32.xlu1 %v12594_v22, %s7258_s25  ;;  %v12603_v22 = vld [vmem:[#allocation54_spill] sm:$0xff]  ;;  %v2705_v35 = vadd.f32 %v12644_v58, %v12643_v28  ;;  %v12651_v28 = vld [vmem:[#allocation37_spill] sm:$0xff] }
 0x63d   : > { %v9869_v23 = vpop.permute.xlu0 %4631  ;;  %v9871_v55 = vpop.permute.xlu1 %4627 }
 0x63e   : > { %12595 = vst [vmem:[#allocation517_spill] sm:$0xff] %v9869_v23 }
 0x63f   : > { %12596 = vst [vmem:[#allocation518_spill] sm:$0xff] %v9871_v55  ;;  %4995 = vrot.lane.b32.xlu2 %v12597_v32, %s7258_s25  ;;  %v12606_v32 = vld [vmem:[#allocation89_spill] sm:$0xff] }
 0x641   : > { %v9875_v20 = vpop.permute.xlu2 %4641 }
 0x642   : > { %12598 = vst [vmem:[#allocation519_spill] sm:$0xff] %v9875_v20 }
 0x643   : > { %5009 = vrot.lane.b32.xlu0 %v12599_v41, %s7258_s25  ;;  %5005 = vrot.lane.b32.xlu1 %v12600_v59, %s7258_s25  ;;  %v12609_v59 = vld [vmem:[#allocation75_spill] sm:$0xff] }
 0x645   : > { %v9881_v10 = vpop.permute.xlu0 %4637  ;;  %v9883_v29 = vpop.permute.xlu1 %4633 }
 0x646   : > { %12601 = vst [vmem:[#allocation520_spill] sm:$0xff] %v9881_v10 }
 0x647   : > { %12602 = vst [vmem:[#allocation521_spill] sm:$0xff] %v9883_v29  ;;  %5001 = vrot.lane.b32.xlu2 %v12603_v22, %s7258_s25  ;;  %v12612_v22 = vld [vmem:[#allocation110_spill] sm:$0xff] }
 0x649   : > { %v9887_v6 = vpop.permute.xlu2 %4647 }
 0x64a   : > { %12604 = vst [vmem:[#allocation522_spill] sm:$0xff] %v9887_v6 }
 0x64b   : > { %5015 = vrot.lane.b32.xlu0 %v12605_v53, %s7258_s25  ;;  %5011 = vrot.lane.b32.xlu1 %v12606_v32, %s7258_s25  ;;  %v12615_v32 = vld [vmem:[#allocation96_spill] sm:$0xff] }
 0x64d   : > { %v9893_v2 = vpop.permute.xlu0 %4643  ;;  %v9895_v41 = vpop.permute.xlu1 %4639 }
 0x64e   : > { %12607 = vst [vmem:[#allocation523_spill] sm:$0xff] %v9893_v2 }
 0x64f   : > { %12608 = vst [vmem:[#allocation524_spill] sm:$0xff] %v9895_v41  ;;  %5007 = vrot.lane.b32.xlu2 %v12609_v59, %s7258_s25  ;;  %v12617_v41 = vld [vmem:[#allocation143_spill] sm:$0xff] }
 0x650   : > { %v12618_v59 = vld [vmem:[#allocation131_spill] sm:$0xff] }
 0x651   : > { %v9899_v10 = vpop.permute.xlu2 %4653 }
 0x652   : > { %12610 = vst [vmem:[#allocation525_spill] sm:$0xff] %v9899_v10 }
 0x653   : > { %5021 = vrot.lane.b32.xlu0 %v12611_v11, %s7258_s25  ;;  %5017 = vrot.lane.b32.xlu1 %v12612_v22, %s7258_s25  ;;  %v12621_v22 = vld [vmem:[#allocation117_spill] sm:$0xff] }
 0x655   : > { %v9905_v6 = vpop.permute.xlu0 %4649  ;;  %v9907_v53 = vpop.permute.xlu1 %4645 }
 0x656   : > { %12613 = vst [vmem:[#allocation526_spill] sm:$0xff] %v9905_v6 }
 0x657   : > { %12614 = vst [vmem:[#allocation527_spill] sm:$0xff] %v9907_v53  ;;  %5013 = vrot.lane.b32.xlu2 %v12615_v32, %s7258_s25  ;;  %v12623_v53 = vld [vmem:[#allocation164_spill] sm:$0xff] }
 0x658   : > { %v12624_v32 = vld [vmem:[#allocation148_spill] sm:$0xff] }
 0x659   : > { %v9911_v2 = vpop.permute.xlu2 %4659 }
 0x65a   : > { %12616 = vst [vmem:[#allocation528_spill] sm:$0xff] %v9911_v2 }
 0x65b   : > { %5027 = vrot.lane.b32.xlu0 %v12617_v41, %s7258_s25  ;;  %5023 = vrot.lane.b32.xlu1 %v12618_v59, %s7258_s25  ;;  %v12627_v59 = vld [vmem:[#allocation138_spill] sm:$0xff] }
 0x65d   : > { %v9917_v10 = vpop.permute.xlu0 %4655  ;;  %v9919_v11 = vpop.permute.xlu1 %4651 }
 0x65e   : > { %12619 = vst [vmem:[#allocation529_spill] sm:$0xff] %v9917_v10 }
 0x65f   : > { %12620 = vst [vmem:[#allocation530_spill] sm:$0xff] %v9919_v11  ;;  %5019 = vrot.lane.b32.xlu2 %v12621_v22, %s7258_s25  ;;  %v12628_v11 = vld [vmem:[#allocation185_spill] sm:$0xff] }
 0x660   : > { %v12629_v22 = vld [vmem:[#allocation169_spill] sm:$0xff] }
 0x661   : > { %v9923_v6 = vpop.permute.xlu2 %4665 }
 0x662   : > { %12622 = vst [vmem:[#allocation531_spill] sm:$0xff] %v9923_v6 }
 0x663   : > { %5033 = vrot.lane.b32.xlu0 %v12623_v53, %s7258_s25  ;;  %5029 = vrot.lane.b32.xlu1 %v12624_v32, %s7258_s25  ;;  %v12631_v32 = vld [vmem:[#allocation157_spill] sm:$0xff] }
 0x665   : > { %v9929_v2 = vpop.permute.xlu0 %4661  ;;  %v9931_v41 = vpop.permute.xlu1 %4657 }
 0x666   : > { %12625 = vst [vmem:[#allocation532_spill] sm:$0xff] %v9929_v2 }
 0x667   : > { %12626 = vst [vmem:[#allocation533_spill] sm:$0xff] %v9931_v41  ;;  %5025 = vrot.lane.b32.xlu2 %v12627_v59, %s7258_s25  ;;  %v12632_v41 = vld [vmem:[#allocation205_spill] sm:$0xff]  ;;  %v12633_v59 = vld [vmem:[#allocation190_spill] sm:$0xff] }
 0x669   : > { %v9935_v10 = vpop.permute.xlu2 %4959 }
 0x66b   : > { %5039 = vrot.lane.b32.xlu0 %v12628_v11, %s7258_s25  ;;  %5035 = vrot.lane.b32.xlu1 %v12629_v22, %s7258_s25  ;;  %v12634_v22 = vld [vmem:[#allocation177_spill] sm:$0xff] }
 0x66d   : > { %v9941_v6 = vpop.permute.xlu0 %4955  ;;  %v9943_v53 = vpop.permute.xlu1 %4663 }
 0x66e   : > { %12630 = vst [vmem:[#allocation534_spill] sm:$0xff] %v9943_v53  ;;  %v12636_v53 = vld [vmem:[#allocation85_spill] sm:$0xff] }
 0x66f   : > { %5031 = vrot.lane.b32.xlu2 %v12631_v32, %s7258_s25  ;;  %v3083_v30 = vadd.f32 %v12636_v53, %v12635_v24  ;;  %v12642_v53 = vld [vmem:[#allocation111_spill] sm:$0xff] }
 0x670   : > { %v3086_v24 = vadd.f32 %v12642_v53, %v12641_v40  ;;  %v12648_v40 = vld [vmem:[#allocation136_spill] sm:$0xff] }
 0x671   : > { %v9947_v2 = vpop.permute.xlu2 %4965  ;;  %v3089_v53 = vadd.f32 %v12648_v40, %v2705_v35  ;;  %v12655_v35 = vld [vmem:[#allocation141_spill] sm:$0xff] }
 0x673   : > { %5045 = vrot.lane.b32.xlu0 %v12632_v41, %s7258_s25  ;;  %5041 = vrot.lane.b32.xlu1 %v12633_v59, %s7258_s25  ;;  %v12637_v41 = vld [vmem:[#allocation209_spill] sm:$0xff] }
 0x675   : > { %v9953_v20 = vpop.permute.xlu0 %4961  ;;  %v9955_v11 = vpop.permute.xlu1 %4957 }
 0x677   : > { %5037 = vrot.lane.b32.xlu2 %v12634_v22, %s7258_s25  ;;  %v12640_v22 = vld [vmem:[#allocation91_spill] sm:$0xff] }
 0x678   : > { %v3084_v23 = vadd.f32 %v12640_v22, %v12639_v43  ;;  %v12646_v43 = vld [vmem:[#allocation66_spill] sm:$0xff]  ;;  %v12647_v22 = vld [vmem:[#allocation116_spill] sm:$0xff] }
 0x679   : > { %v9961_v29 = vpop.permute.xlu2 %4971  ;;  %v3087_v55 = vadd.f32 %v12647_v22, %v12646_v43  ;;  %v12654_v43 = vld [vmem:[#allocation106_spill] sm:$0xff] }
 0x67a   : > { %v2708_v22 = vadd.f32 %v12654_v43, %v12653_v31  ;;  %v12660_v31 = vld [vmem:[#allocation61_spill] sm:$0xff] }
 0x67b   : > { %5339 = vrot.lane.b32.xlu0 %v3083_v30, %s7267_s18  ;;  %5047 = vrot.lane.b32.xlu1 %v12637_v41, %s7258_s25  ;;  %v12662_v43 = vld [vmem:[#allocation77_spill] sm:$0xff] }
 0x67d   : > { %v9966_v32 = vpop.permute.xlu0 %4967  ;;  %v9968_v59 = vpop.permute.xlu1 %4963 }
 0x67f   : > { %5043 = vrot.lane.b32.xlu2 %v12638_v48, %s7258_s25  ;;  %v12645_v48 = vld [vmem:[#allocation214_spill] sm:$0xff] }
 0x681   : > { %v9976_v19 = vpop.permute.xlu2 %4977 }
 0x683   : > { %5345 = vrot.lane.b32.xlu0 %v3086_v24, %s7267_s18  ;;  %5341 = vrot.lane.b32.xlu1 %v3084_v23, %s7267_s18  ;;  %v12649_v23 = vld [vmem:[#allocation35_spill] sm:$0xff] }
 0x684   : > { %v12650_v24 = vld [vmem:[#allocation83_spill] sm:$0xff] }
 0x685   : > { %v9980_v30 = vpop.permute.xlu0 %4973  ;;  %v9982_v41 = vpop.permute.xlu1 %4969  ;;  %v3085_v46 = vadd.f32 %v12650_v24, %v12649_v23  ;;  %v12657_v23 = vld [vmem:[#allocation59_spill] sm:$0xff]  ;;  %v12658_v24 = vld [vmem:[#allocation108_spill] sm:$0xff] }
 0x686   : > { %v3088_v50 = vadd.f32 %v12658_v24, %v12657_v23  ;;  %v12668_v23 = vld [vmem:[#allocation79_spill] sm:$0xff] }
 0x687   : > { %5049 = vrot.lane.b32.xlu2 %v12645_v48, %s7258_s25  ;;  %v12652_v48 = vld [vmem:[#allocation86_spill] sm:$0xff]  ;;  %v2707_v24 = vadd.f32 %v12668_v23, %v12667_v33  ;;  %v12677_v23 = vld [vmem:[#allocation203_spill] sm:$0xff] }
 0x688   : > { %v2706_v45 = vadd.f32 %v12652_v48, %v12651_v28  ;;  %v12661_v28 = vld [vmem:[#allocation112_spill] sm:$0xff] }
 0x689   : > { %v9991_v14 = vpop.permute.xlu2 %4983 }
 0x68a   : > { %v3090_v40 = vadd.f32 %v12655_v35, %v2706_v45  ;;  %v12663_v45 = vld [vmem:[#allocation132_spill] sm:$0xff] }
 0x68b   : > { %5351 = vrot.lane.b32.xlu0 %v3089_v53, %s7267_s18  ;;  %5347 = vrot.lane.b32.xlu1 %v3087_v55, %s7267_s18  ;;  %v12656_v53 = vld [vmem:[#allocation161_spill] sm:$0xff]  ;;  %v2711_v35 = vadd.f32 %v12663_v45, %v12662_v43 }
 0x68c   : > { %v3092_v12 = vadd.f32 %v12656_v53, %v2708_v22  ;;  %v12664_v22 = vld [vmem:[#allocation165_spill] sm:$0xff] }
 0x68d   : > { %v9997_v21 = vpop.permute.xlu0 %4979  ;;  %v9999_v58 = vpop.permute.xlu1 %4975  ;;  %v12673_v45 = vld [vmem:[#allocation137_spill] sm:$0xff] }
 0x68f   : > { %5343 = vrot.lane.b32.xlu2 %v3085_v46, %s7267_s18  ;;  %v2709_v46 = vadd.f32 %v12661_v28, %v12660_v31 }
 0x691   : > { %v10008_v55 = vpop.permute.xlu2 %4989  ;;  %v3093_v53 = vadd.f32 %v12664_v22, %v2709_v46  ;;  %v12674_v22 = vld [vmem:[#allocation101_spill] sm:$0xff] }
 0x693   : > { %5357 = vrot.lane.b32.xlu0 %v3092_v12, %s7267_s18  ;;  %5353 = vrot.lane.b32.xlu1 %v3090_v40, %s7267_s18  ;;  %v12665_v12 = vld [vmem:[#allocation182_spill] sm:$0xff] }
 0x694   : > { %v3095_v0 = vadd.f32 %v12665_v12, %v2711_v35  ;;  %v12675_v35 = vld [vmem:[#allocation158_spill] sm:$0xff] }
 0x695   : > { %v10014_v44 = vpop.permute.xlu0 %4985  ;;  %v10016_v48 = vpop.permute.xlu1 %4981  ;;  %v2714_v12 = vadd.f32 %v12675_v35, %v12674_v22  ;;  %v12685_v35 = vld [vmem:[#allocation162_spill] sm:$0xff] }
 0x696   : > { %12659 = vst [vmem:[#allocation40_spill] sm:$0xff] %v10014_v44  ;;  %v12669_v44 = vld [vmem:[#allocation134_spill] sm:$0xff] }
 0x697   : > { %5349 = vrot.lane.b32.xlu2 %v3088_v50, %s7267_s18  ;;  %v3091_v31 = vadd.f32 %v12669_v44, %v2707_v24  ;;  %v12672_v50 = vld [vmem:[#allocation81_spill] sm:$0xff]  ;;  %v12680_v44 = vld [vmem:[#allocation104_spill] sm:$0xff] }
 0x698   : > { %v2712_v46 = vadd.f32 %v12673_v45, %v12672_v50 }
 0x699   : > { %v10025_v40 = vpop.permute.xlu2 %4995 }
 0x69a   : > { %12666 = vst [vmem:[#allocation85_spill] sm:$0xff] %v10025_v40  ;;  %v12676_v40 = vld [vmem:[#allocation186_spill] sm:$0xff] }
 0x69b   : > { %5363 = vrot.lane.b32.xlu0 %v3095_v0, %s7267_s18  ;;  %5359 = vrot.lane.b32.xlu1 %v3093_v53, %s7267_s18  ;;  %v3096_v33 = vadd.f32 %v12676_v40, %v2712_v46  ;;  %v3098_v0 = vadd.f32 %v12677_v23, %v2714_v12  ;;  %v12679_v53 = vld [vmem:[#allocation55_spill] sm:$0xff] }
 0x69c   : > { %v2710_v24 = vadd.f32 %v12680_v44, %v12679_v53  ;;  %v12686_v46 = vld [vmem:[#allocation127_spill] sm:$0xff]  ;;  %v12689_v44 = vld [vmem:[#allocation224_spill] sm:$0xff] }
 0x69d   : > { %v10032_v28 = vpop.permute.xlu0 %4991  ;;  %v10034_v43 = vpop.permute.xlu1 %4987  ;;  %v12687_v12 = vld [vmem:[#allocation179_spill] sm:$0xff] }
 0x69e   : > { %12670 = vst [vmem:[#allocation41_spill] sm:$0xff] %v10032_v28  ;;  %v12681_v28 = vld [vmem:[#allocation160_spill] sm:$0xff]  ;;  %v2717_v23 = vadd.f32 %v12687_v12, %v12686_v46  ;;  %v12697_v12 = vld [vmem:[#allocation183_spill] sm:$0xff] }
 0x69f   : > { %12671 = vst [vmem:[#allocation91_spill] sm:$0xff] %v10034_v43  ;;  %5355 = vrot.lane.b32.xlu2 %v3091_v31, %s7267_s18  ;;  %v3094_v50 = vadd.f32 %v12681_v28, %v2710_v24  ;;  %v12684_v31 = vld [vmem:[#allocation107_spill] sm:$0xff]  ;;  %v12692_v28 = vld [vmem:[#allocation129_spill] sm:$0xff] }
 0x6a0   : > { %v2715_v40 = vadd.f32 %v12685_v35, %v12684_v31 }
 0x6a1   : > { %v10043_v62 = vpop.permute.xlu2 %5001 }
 0x6a2   : > { %12678 = vst [vmem:[#allocation60_spill] sm:$0xff] %v10043_v62  ;;  %v12688_v62 = vld [vmem:[#allocation207_spill] sm:$0xff] }
 0x6a3   : > { %5369 = vrot.lane.b32.xlu0 %v3098_v0, %s7267_s18  ;;  %5365 = vrot.lane.b32.xlu1 %v3096_v33, %s7267_s18  ;;  %v3099_v53 = vadd.f32 %v12688_v62, %v2715_v40  ;;  %v3101_v0 = vadd.f32 %v12689_v44, %v2717_v23  ;;  %v12691_v33 = vld [vmem:[#allocation76_spill] sm:$0xff]  ;;  %v12698_v40 = vld [vmem:[#allocation153_spill] sm:$0xff] }
 0x6a4   : > { %v2713_v24 = vadd.f32 %v12692_v28, %v12691_v33  ;;  %v12699_v23 = vld [vmem:[#allocation200_spill] sm:$0xff]  ;;  %v12701_v28 = vld [vmem:[#allocation242_spill] sm:$0xff] }
 0x6a5   : > { %v10050_v45 = vpop.permute.xlu0 %4997  ;;  %v10052_v22 = vpop.permute.xlu1 %4993  ;;  %v2720_v44 = vadd.f32 %v12699_v23, %v12698_v40  ;;  %v12709_v23 = vld [vmem:[#allocation204_spill] sm:$0xff] }
 0x6a6   : > { %12682 = vst [vmem:[#allocation111_spill] sm:$0xff] %v10050_v45  ;;  %v12693_v45 = vld [vmem:[#allocation181_spill] sm:$0xff] }
 0x6a7   : > { %12683 = vst [vmem:[#allocation36_spill] sm:$0xff] %v10052_v22  ;;  %5361 = vrot.lane.b32.xlu2 %v3094_v50, %s7267_s18  ;;  %v3097_v31 = vadd.f32 %v12693_v45, %v2713_v24  ;;  %v12696_v50 = vld [vmem:[#allocation133_spill] sm:$0xff]  ;;  %v12704_v45 = vld [vmem:[#allocation155_spill] sm:$0xff] }
 0x6a8   : > { %v2718_v62 = vadd.f32 %v12697_v12, %v12696_v50 }
 0x6a9   : > { %v10061_v43 = vpop.permute.xlu2 %5007 }
 0x6aa   : > { %12690 = vst [vmem:[#allocation80_spill] sm:$0xff] %v10061_v43  ;;  %v12700_v43 = vld [vmem:[#allocation227_spill] sm:$0xff] }
 0x6ab   : > { %5375 = vrot.lane.b32.xlu0 %v3101_v0, %s7267_s18  ;;  %5371 = vrot.lane.b32.xlu1 %v3099_v53, %s7267_s18  ;;  %v3102_v33 = vadd.f32 %v12700_v43, %v2718_v62  ;;  %v3104_v0 = vadd.f32 %v12701_v28, %v2720_v44  ;;  %v12703_v53 = vld [vmem:[#allocation100_spill] sm:$0xff]  ;;  %v12710_v62 = vld [vmem:[#allocation174_spill] sm:$0xff]  ;;  %v12711_v44 = vld [vmem:[#allocation221_spill] sm:$0xff] }
 0x6ac   : > { %v2716_v24 = vadd.f32 %v12704_v45, %v12703_v53  ;;  %v2723_v28 = vadd.f32 %v12711_v44, %v12710_v62  ;;  %v12713_v45 = vld [vmem:[#allocation260_spill] sm:$0xff]  ;;  %v12721_v44 = vld [vmem:[#allocation225_spill] sm:$0xff] }
 0x6ad   : > { %v10068_v35 = vpop.permute.xlu0 %5003  ;;  %v10070_v46 = vpop.permute.xlu1 %4999 }
 0x6ae   : > { %12694 = vst [vmem:[#allocation66_spill] sm:$0xff] %v10068_v35  ;;  %v12705_v35 = vld [vmem:[#allocation202_spill] sm:$0xff] }
 0x6af   : > { %12695 = vst [vmem:[#allocation116_spill] sm:$0xff] %v10070_v46  ;;  %5367 = vrot.lane.b32.xlu2 %v3097_v31, %s7267_s18  ;;  %v3100_v50 = vadd.f32 %v12705_v35, %v2716_v24  ;;  %v12708_v31 = vld [vmem:[#allocation159_spill] sm:$0xff]  ;;  %v12716_v35 = vld [vmem:[#allocation176_spill] sm:$0xff] }
 0x6b0   : > { %v2721_v43 = vadd.f32 %v12709_v23, %v12708_v31 }
 0x6b1   : > { %v10079_v22 = vpop.permute.xlu2 %5013 }
 0x6b2   : > { %12702 = vst [vmem:[#allocation136_spill] sm:$0xff] %v10079_v22  ;;  %v12712_v22 = vld [vmem:[#allocation245_spill] sm:$0xff] }
 0x6b3   : > { %5381 = vrot.lane.b32.xlu0 %v3104_v0, %s7267_s18  ;;  %5377 = vrot.lane.b32.xlu1 %v3102_v33, %s7267_s18  ;;  %v3105_v53 = vadd.f32 %v12712_v22, %v2721_v43  ;;  %v3107_v0 = vadd.f32 %v12713_v45, %v2723_v28  ;;  %v12715_v33 = vld [vmem:[#allocation125_spill] sm:$0xff]  ;;  %v12722_v43 = vld [vmem:[#allocation195_spill] sm:$0xff] }
 0x6b4   : > { %v2719_v24 = vadd.f32 %v12716_v35, %v12715_v33  ;;  %v12723_v28 = vld [vmem:[#allocation239_spill] sm:$0xff]  ;;  %v12725_v35 = vld [vmem:[#allocation278_spill] sm:$0xff] }
 0x6b5   : > { %v10086_v12 = vpop.permute.xlu0 %5009  ;;  %v10088_v40 = vpop.permute.xlu1 %5005  ;;  %v2726_v45 = vadd.f32 %v12723_v28, %v12722_v43  ;;  %v12733_v28 = vld [vmem:[#allocation243_spill] sm:$0xff] }
 0x6b6   : > { %12706 = vst [vmem:[#allocation35_spill] sm:$0xff] %v10086_v12  ;;  %v12717_v12 = vld [vmem:[#allocation223_spill] sm:$0xff] }
 0x6b7   : > { %12707 = vst [vmem:[#allocation83_spill] sm:$0xff] %v10088_v40  ;;  %5373 = vrot.lane.b32.xlu2 %v3100_v50, %s7267_s18  ;;  %v3103_v31 = vadd.f32 %v12717_v12, %v2719_v24  ;;  %v12720_v50 = vld [vmem:[#allocation180_spill] sm:$0xff]  ;;  %v12728_v12 = vld [vmem:[#allocation197_spill] sm:$0xff] }
 0x6b8   : > { %v2724_v22 = vadd.f32 %v12721_v44, %v12720_v50 }
 0x6b9   : > { %v10097_v46 = vpop.permute.xlu2 %5019 }
 0x6ba   : > { %12714 = vst [vmem:[#allocation37_spill] sm:$0xff] %v10097_v46  ;;  %v12724_v46 = vld [vmem:[#allocation263_spill] sm:$0xff] }
 0x6bb   : > { %5387 = vrot.lane.b32.xlu0 %v3107_v0, %s7267_s18  ;;  %5383 = vrot.lane.b32.xlu1 %v3105_v53, %s7267_s18  ;;  %v3108_v33 = vadd.f32 %v12724_v46, %v2724_v22  ;;  %v3110_v0 = vadd.f32 %v12725_v35, %v2726_v45  ;;  %v12727_v53 = vld [vmem:[#allocation151_spill] sm:$0xff]  ;;  %v12734_v22 = vld [vmem:[#allocation217_spill] sm:$0xff] }
 0x6bc   : > { %v2722_v24 = vadd.f32 %v12728_v12, %v12727_v53  ;;  %v12735_v45 = vld [vmem:[#allocation257_spill] sm:$0xff] }
 0x6bd   : > { %v10104_v23 = vpop.permute.xlu0 %5015  ;;  %v10106_v62 = vpop.permute.xlu1 %5011  ;;  %v2729_v35 = vadd.f32 %v12735_v45, %v12734_v22  ;;  %v12737_v12 = vld [vmem:[#allocation293_spill] sm:$0xff] }
 0x6be   : > { %12718 = vst [vmem:[#allocation86_spill] sm:$0xff] %v10104_v23  ;;  %v12729_v23 = vld [vmem:[#allocation241_spill] sm:$0xff] }
 0x6bf   : > { %12719 = vst [vmem:[#allocation56_spill] sm:$0xff] %v10106_v62  ;;  %5379 = vrot.lane.b32.xlu2 %v3103_v31, %s7267_s18  ;;  %v3106_v50 = vadd.f32 %v12729_v23, %v2722_v24  ;;  %v12732_v31 = vld [vmem:[#allocation201_spill] sm:$0xff]  ;;  %v12736_v62 = vld [vmem:[#allocation282_spill] sm:$0xff]  ;;  %v12740_v23 = vld [vmem:[#allocation219_spill] sm:$0xff] }
 0x6c0   : > { %v2727_v46 = vadd.f32 %v12733_v28, %v12732_v31  ;;  %v12745_v45 = vld [vmem:[#allocation261_spill] sm:$0xff] }
 0x6c1   : > { %v10115_v40 = vpop.permute.xlu2 %5025 }
 0x6c2   : > { %12726 = vst [vmem:[#allocation106_spill] sm:$0xff] %v10115_v40  ;;  %v3111_v53 = vadd.f32 %v12736_v62, %v2727_v46  ;;  %v12746_v46 = vld [vmem:[#allocation235_spill] sm:$0xff] }
 0x6c3   : > { %5393 = vrot.lane.b32.xlu0 %v3110_v0, %s7267_s18  ;;  %5389 = vrot.lane.b32.xlu1 %v3108_v33, %s7267_s18  ;;  %v3113_v0 = vadd.f32 %v12737_v12, %v2729_v35  ;;  %v12739_v33 = vld [vmem:[#allocation172_spill] sm:$0xff]  ;;  %v12747_v35 = vld [vmem:[#allocation275_spill] sm:$0xff] }
 0x6c4   : > { %v2725_v24 = vadd.f32 %v12740_v23, %v12739_v33  ;;  %v2732_v12 = vadd.f32 %v12747_v35, %v12746_v46  ;;  %v12749_v23 = vld [vmem:[#allocation308_spill] sm:$0xff]  ;;  %v12757_v35 = vld [vmem:[#allocation279_spill] sm:$0xff] }
 0x6c5   : > { %v10122_v44 = vpop.permute.xlu0 %5021  ;;  %v10124_v43 = vpop.permute.xlu1 %5017 }
 0x6c6   : > { %12730 = vst [vmem:[#allocation141_spill] sm:$0xff] %v10122_v44  ;;  %v12748_v44 = vld [vmem:[#allocation297_spill] sm:$0xff] }
 0x6c7   : > { %12731 = vst [vmem:[#allocation161_spill] sm:$0xff] %v10124_v43  ;;  %5385 = vrot.lane.b32.xlu2 %v3106_v50, %s7267_s18  ;;  %v12741_v43 = vld [vmem:[#allocation259_spill] sm:$0xff]  ;;  %v12744_v50 = vld [vmem:[#allocation222_spill] sm:$0xff] }
 0x6c8   : > { %v3109_v31 = vadd.f32 %v12741_v43, %v2725_v24  ;;  %v2730_v62 = vadd.f32 %v12745_v45, %v12744_v50  ;;  %v12752_v43 = vld [vmem:[#allocation237_spill] sm:$0xff] }
 0x6c9   : > { %v10133_v40 = vpop.permute.xlu2 %5031 }
 0x6ca   : > { %12738 = vst [vmem:[#allocation59_spill] sm:$0xff] %v10133_v40  ;;  %v3114_v33 = vadd.f32 %v12748_v44, %v2730_v62  ;;  %v12758_v62 = vld [vmem:[#allocation253_spill] sm:$0xff] }
 0x6cb   : > { %5399 = vrot.lane.b32.xlu0 %v3113_v0, %s7267_s18  ;;  %5395 = vrot.lane.b32.xlu1 %v3111_v53, %s7267_s18  ;;  %v3116_v0 = vadd.f32 %v12749_v23, %v2732_v12  ;;  %v12751_v53 = vld [vmem:[#allocation193_spill] sm:$0xff]  ;;  %v12759_v12 = vld [vmem:[#allocation290_spill] sm:$0xff] }
 0x6cc   : > { %v2728_v24 = vadd.f32 %v12752_v43, %v12751_v53  ;;  %v2735_v23 = vadd.f32 %v12759_v12, %v12758_v62  ;;  %v12761_v43 = vld [vmem:[#allocation320_spill] sm:$0xff]  ;;  %v12769_v12 = vld [vmem:[#allocation294_spill] sm:$0xff] }
 0x6cd   : > { %v10140_v28 = vpop.permute.xlu0 %5027  ;;  %v10142_v22 = vpop.permute.xlu1 %5023 }
 0x6ce   : > { %12742 = vst [vmem:[#allocation108_spill] sm:$0xff] %v10140_v28  ;;  %v12760_v28 = vld [vmem:[#allocation312_spill] sm:$0xff] }
 0x6cf   : > { %12743 = vst [vmem:[#allocation61_spill] sm:$0xff] %v10142_v22  ;;  %5391 = vrot.lane.b32.xlu2 %v3109_v31, %s7267_s18  ;;  %v12753_v22 = vld [vmem:[#allocation277_spill] sm:$0xff]  ;;  %v12756_v31 = vld [vmem:[#allocation240_spill] sm:$0xff] }
 0x6d0   : > { %v3112_v50 = vadd.f32 %v12753_v22, %v2728_v24  ;;  %v2733_v44 = vadd.f32 %v12757_v35, %v12756_v31  ;;  %v12764_v22 = vld [vmem:[#allocation255_spill] sm:$0xff] }
 0x6d1   : > { %v10151_v40 = vpop.permute.xlu2 %5037 }
 0x6d2   : > { %12750 = vst [vmem:[#allocation112_spill] sm:$0xff] %v10151_v40  ;;  %v3117_v53 = vadd.f32 %v12760_v28, %v2733_v44  ;;  %v12770_v44 = vld [vmem:[#allocation271_spill] sm:$0xff] }
 0x6d3   : > { %5405 = vrot.lane.b32.xlu0 %v3116_v0, %s7267_s18  ;;  %5401 = vrot.lane.b32.xlu1 %v3114_v33, %s7267_s18  ;;  %v3119_v0 = vadd.f32 %v12761_v43, %v2735_v23  ;;  %v12763_v33 = vld [vmem:[#allocation215_spill] sm:$0xff]  ;;  %v12771_v23 = vld [vmem:[#allocation305_spill] sm:$0xff] }
 0x6d4   : > { %v2731_v24 = vadd.f32 %v12764_v22, %v12763_v33  ;;  %v2738_v43 = vadd.f32 %v12771_v23, %v12770_v44  ;;  %v12773_v22 = vld [vmem:[#allocation332_spill] sm:$0xff] }
 0x6d5   : > { %v10158_v45 = vpop.permute.xlu0 %5033  ;;  %v10160_v46 = vpop.permute.xlu1 %5029 }
 0x6d6   : > { %12754 = vst [vmem:[#allocation77_spill] sm:$0xff] %v10158_v45 }
 0x6d7   : > { %12755 = vst [vmem:[#allocation132_spill] sm:$0xff] %v10160_v46  ;;  %5397 = vrot.lane.b32.xlu2 %v3112_v50, %s7267_s18  ;;  %v12765_v46 = vld [vmem:[#allocation292_spill] sm:$0xff]  ;;  %v12768_v50 = vld [vmem:[#allocation258_spill] sm:$0xff] }
 0x6d8   : > { %v3115_v31 = vadd.f32 %v12765_v46, %v2731_v24  ;;  %v2736_v28 = vadd.f32 %v12769_v12, %v12768_v50  ;;  %v12775_v46 = vld [vmem:[#allocation233_spill] sm:$0xff]  ;;  %v12777_v50 = vld [vmem:[#allocation307_spill] sm:$0xff] }
 0x6d9   : > { %v10169_v40 = vpop.permute.xlu2 %5043  ;;  %v12776_v24 = vld [vmem:[#allocation273_spill] sm:$0xff] }
 0x6da   : > { %12762 = vst [vmem:[#allocation165_spill] sm:$0xff] %v10169_v40  ;;  %v12772_v40 = vld [vmem:[#allocation324_spill] sm:$0xff] }
 0x6db   : > { %5411 = vrot.lane.b32.xlu0 %v3119_v0, %s7267_s18  ;;  %5407 = vrot.lane.b32.xlu1 %v3117_v53, %s7267_s18  ;;  %v3120_v33 = vadd.f32 %v12772_v40, %v2736_v28  ;;  %v3122_v0 = vadd.f32 %v12773_v22, %v2738_v43  ;;  %v7268_v53 = vmov 0   ;;  %v12780_v40 = vld [vmem:[#allocation276_spill] sm:$0xff]  ;;  %v12781_v28 = vld [vmem:[#allocation309_spill] sm:$0xff]  ;;  %v12782_v43 = vld [vmem:[#allocation339_spill] sm:$0xff] }
 0x6dc   : > { %7234 = vset.pattern.permute.xlu0 %v7268_v53  ;;  %7233 = vset.pattern.permute.xlu2 %v7268_v53  ;;  %v2739_v23 = vadd.f32 %v12781_v28, %v12780_v40  ;;  %v4909_v53 = vadd.f32 %v9791_v5, %v9599_v4  ;;  %v5149_v28 = vmax.f32 %v9935_v10, 0.0  ;;  %v4907_v4 = vadd.f32 %v9797_v3, %v9605_v15  ;;  %v12789_v15 = vld [vmem:[#allocation363_spill] sm:$0xff] }
 0x6dd   : > { %v10176_v35 = vpop.permute.xlu0 %5039  ;;  %v10178_v62 = vpop.permute.xlu1 %5035  ;;  %v12790_v3 = vld [vmem:[#allocation411_spill] sm:$0xff] }
 0x6de   : > { %12766 = vst [vmem:[#allocation182_spill] sm:$0xff] %v10176_v35  ;;  %v2734_v35 = vadd.f32 %v12776_v24, %v12775_v46  ;;  %v3123_v22 = vadd.f32 %v12782_v43, %v2739_v23  ;;  %v5245_v5 = vmax.f32 %v5149_v28, %v9947_v2  ;;  %v12787_v43 = vld [vmem:[#allocation358_spill] sm:$0xff] }
 0x6df   : > { %12767 = vst [vmem:[#allocation31_spill] sm:$0xff] %v10178_v62  ;;  %5403 = vrot.lane.b32.xlu2 %v3115_v31, %s7267_s18 }
 0x6e0   : > { %v3118_v12 = vadd.f32 %v12777_v50, %v2734_v35  ;;  %v12785_v35 = vld [vmem:[#allocation319_spill] sm:$0xff] }
 0x6e1   : > { %v10187_v45 = vpop.permute.xlu2 %5049 }
 0x6e2   : > { %12774 = vst [vmem:[#allocation79_spill] sm:$0xff] %v10187_v45  ;;  %v12796_v45 = vld [vmem:[#allocation410_spill] sm:$0xff] }
 0x6e3   : > { %5417 = vrot.lane.b32.xlu0 %v3122_v0, %s7267_s18  ;;  %5413 = vrot.lane.b32.xlu1 %v3120_v33, %s7267_s18  ;;  %v12783_v0 = vld [vmem:[#allocation251_spill] sm:$0xff]  ;;  %v12784_v33 = vld [vmem:[#allocation289_spill] sm:$0xff] }
 0x6e4   : > { %v2737_v24 = vadd.f32 %v12784_v33, %v12783_v0 }
 0x6e5   : > { %v10194_v44 = vpop.permute.xlu0 %5045  ;;  %v10196_v31 = vpop.permute.xlu1 %5041 }
 0x6e6   : > { %12778 = vst [vmem:[#allocation134_spill] sm:$0xff] %v10194_v44  ;;  %v3121_v50 = vadd.f32 %v12785_v35, %v2737_v24  ;;  %v5147_v24 = vmax.f32 %v9941_v6, 0.0  ;;  %v3996_v35 = vadd.f32 %v12790_v3, %v12789_v15  ;;  %v6354_v3 = vld [vmem:[%s11901_s5] sm:$0xff] }
 0x6e7   : > { %12779 = vst [vmem:[#allocation81_spill] sm:$0xff] %v10196_v31  ;;  %5409 = vrot.lane.b32.xlu2 %v3118_v12, %s7267_s18 }
 0x6e9   : > { %v10204_v46 = vpop.permute.xlu2 %5343 }
 0x6eb   : > { %5419 = vrot.lane.b32.xlu1 %v3123_v22, %s7267_s18  ;;  %5727 = vrot.lane.b32.xlu0 %v4909_v53, %s7269_s19  ;;  %v12788_v22 = vld [vmem:[#allocation406_spill] sm:$0xff] }
 0x6ec   : > { %v3997_v53 = vadd.f32 %v12788_v22, %v12787_v43 }
 0x6ed   : > { %v10211_v40 = vpop.permute.xlu0 %5339  ;;  %v10213_v12 = vpop.permute.xlu1 %5047 }
 0x6ee   : > { %12786 = vst [vmem:[#allocation137_spill] sm:$0xff] %v10213_v12  ;;  %v12795_v12 = vld [vmem:[#allocation362_spill] sm:$0xff] }
 0x6ef   : > { %5415 = vrot.lane.b32.xlu2 %v3121_v50, %s7267_s18  ;;  %v5243_v50 = vmax.f32 %v5147_v24, %v9953_v20  ;;  %v4908_v24 = vadd.f32 %v9811_v61, %v9619_v37  ;;  %v3998_v37 = vadd.f32 %v12796_v45, %v12795_v12  ;;  %v4912_v45 = vadd.f32 %v9803_v7, %v9611_v47 }
 0x6f0   : > { %v4910_v47 = vadd.f32 %v9809_v16, %v9617_v25  ;;  %v4911_v16 = vadd.f32 %v9823_v54, %v9631_v1  ;;  %v4915_v1 = vadd.f32 %v9815_v9, %v9623_v57  ;;  %v12810_v57 = vld [vmem:[#allocation415_spill] sm:$0xff] }
 0x6f1   : > { %v10220_v23 = vpop.permute.xlu2 %5349 }
 0x6f3   : > { %5723 = vrot.lane.b32.xlu0 %v4907_v4, %s7269_s19  ;;  %5919 = vrot.lane.b32.xlu1 %v5245_v5, %s7270_s20  ;;  %v12791_v4 = vld [vmem:[#allocation359_spill] sm:$0xff] }
 0x6f4   : > { %v12792_v5 = vld [vmem:[#allocation407_spill] sm:$0xff] }
 0x6f5   : > { %v10226_v0 = vpop.permute.xlu0 %5345  ;;  %v10228_v33 = vpop.permute.xlu1 %5341  ;;  %v3995_v43 = vadd.f32 %v12792_v5, %v12791_v4  ;;  %v12793_v4 = vld [vmem:[#allocation361_spill] sm:$0xff] }
 0x6f6   : > { %v12794_v5 = vld [vmem:[#allocation409_spill] sm:$0xff] }
 0x6f7   : > { %5535 = vrot.lane.b32.xlu2 %v3997_v53, %s7271_s21  ;;  %v6355_v53 = vld [vmem:[%s11901_s5 + $0x8] sm:$0xff] }
 0x6f9   : > { %v10235_v28 = vpop.permute.xlu2 %5355 }
 0x6fb   : > { %5533 = vrot.lane.b32.xlu0 %v3996_v35, %s7271_s21  ;;  %5915 = vrot.lane.b32.xlu1 %v5243_v50, %s7270_s20 }
 0x6fd   : > { %v10241_v22 = vpop.permute.xlu0 %5351  ;;  %v10243_v44 = vpop.permute.xlu1 %5347 }
 0x6ff   : > { %5531 = vrot.lane.b32.xlu2 %v3995_v43, %s7271_s21  ;;  %v4000_v43 = vadd.f32 %v12794_v5, %v12793_v4  ;;  %v12798_v4 = vld [vmem:[#allocation414_spill] sm:$0xff] }
 0x701   : > { %v10251_v15 = vpop.permute.xlu2 %5361 }
 0x703   : > { %6380 = vperm.xlu0 %7234, %v6355_v53   ;;  %5725 = vrot.lane.b32.xlu1 %v4908_v24, %s7269_s19  ;;  %v5148_v53 = vmax.f32 %v9955_v11, 0.0 }
 0x705   : > { %v10257_v35 = vpop.permute.xlu0 %5357  ;;  %v10259_v50 = vpop.permute.xlu1 %5353  ;;  %v5244_v24 = vmax.f32 %v5148_v53, %v9968_v59 }
 0x707   : > { %6375 = vperm.xlu2 %7233, %v6354_v3   ;;  %v12797_v3 = vld [vmem:[#allocation366_spill] sm:$0xff] }
 0x708   : > { %v3999_v5 = vadd.f32 %v12798_v4, %v12797_v3  ;;  %v12801_v3 = vld [vmem:[#allocation412_spill] sm:$0xff] }
 0x709   : > { %v10265_v61 = vpop.permute.xlu2 %5367 }
 0x70b   : > { %5537 = vrot.lane.b32.xlu0 %v3998_v37, %s7271_s21  ;;  %5541 = vrot.lane.b32.xlu1 %v4000_v43, %s7271_s21  ;;  %v6356_v43 = vld [vmem:[%s11901_s5 + $0x10] sm:$0xff] }
 0x70d   : > { %v10271_v31 = vpop.permute.xlu0 %5363  ;;  %v10273_v62 = vpop.permute.xlu1 %5359 }
 0x70f   : > { %5917 = vrot.lane.b32.xlu2 %v5244_v24, %s7270_s20  ;;  %v12800_v24 = vld [vmem:[#allocation364_spill] sm:$0xff] }
 0x710   : > { %v4003_v4 = vadd.f32 %v12801_v3, %v12800_v24  ;;  %v12803_v24 = vld [vmem:[#allocation365_spill] sm:$0xff] }
 0x711   : > { %v10280_v12 = vpop.permute.xlu2 %5373  ;;  %v12804_v3 = vld [vmem:[#allocation413_spill] sm:$0xff] }
 0x712   : > { %v4001_v25 = vadd.f32 %v12804_v3, %v12803_v24  ;;  %v12806_v24 = vld [vmem:[#allocation417_spill] sm:$0xff] }
 0x713   : > { %5539 = vrot.lane.b32.xlu0 %v3999_v5, %s7271_s21  ;;  %5733 = vrot.lane.b32.xlu1 %v4912_v45, %s7269_s19  ;;  %v5152_v5 = vmax.f32 %v9935_v10, %v9947_v2  ;;  %v5150_v10 = vmax.f32 %v9941_v6, %v9953_v20  ;;  %v5151_v6 = vmax.f32 %v9955_v11, %v9968_v59 }
 0x714   : > { %v4913_v11 = vadd.f32 %v9821_v26, %v9629_v18  ;;  %v12813_v26 = vld [vmem:[#allocation416_spill] sm:$0xff] }
 0x715   : > { %v10287_v37 = vpop.permute.xlu0 %5369  ;;  %v10289_v53 = vpop.permute.xlu1 %5365  ;;  %v5248_v45 = vmax.f32 %v5152_v5, %v9961_v29 }
 0x716   : > { %12799 = vst [vmem:[#allocation101_spill] sm:$0xff] %v10287_v37 }
 0x717   : > { %6385 = vperm.xlu2 %7233, %v6356_v43  }
 0x719   : > { %v10295_v7 = vpop.permute.xlu2 %5379 }
 0x71a   : > { %12802 = vst [vmem:[#allocation158_spill] sm:$0xff] %v10295_v7 }
 0x71b   : > { %5547 = vrot.lane.b32.xlu0 %v4003_v4, %s7271_s21  ;;  %5729 = vrot.lane.b32.xlu1 %v4910_v47, %s7269_s19  ;;  %v5246_v4 = vmax.f32 %v5150_v10, %v9966_v32 }
 0x71d   : > { %v10302_v37 = vpop.permute.xlu0 %5375  ;;  %v10304_v43 = vpop.permute.xlu1 %5371 }
 0x71f   : > { %5925 = vrot.lane.b32.xlu2 %v5248_v45, %s7270_s20  ;;  %v12805_v45 = vld [vmem:[#allocation369_spill] sm:$0xff] }
 0x720   : > { %v4002_v54 = vadd.f32 %v12806_v24, %v12805_v45  ;;  %v12809_v45 = vld [vmem:[#allocation367_spill] sm:$0xff] }
 0x721   : > { %v10311_v7 = vpop.permute.xlu2 %5385 }
 0x723   : > { %5543 = vrot.lane.b32.xlu0 %v4001_v25, %s7271_s21  ;;  %5731 = vrot.lane.b32.xlu1 %v4911_v16, %s7269_s19  ;;  %v5247_v25 = vmax.f32 %v5151_v6, %v9982_v41 }
 0x725   : > { %v10318_v47 = vpop.permute.xlu0 %5381  ;;  %v10320_v5 = vpop.permute.xlu1 %5377 }
 0x727   : > { %5921 = vrot.lane.b32.xlu2 %v5246_v4, %s7270_s20  ;;  %v12808_v4 = vld [vmem:[#allocation38_spill] sm:$0xff] }
 0x728   : > { %v3622_v24 = vadd.f32 %v12809_v45, %v12808_v4  ;;  %v12812_v45 = vld [vmem:[#allocation368_spill] sm:$0xff] }
 0x729   : > { %v10327_v3 = vpop.permute.xlu2 %5391 }
 0x72a   : > { %12807 = vst [vmem:[#allocation186_spill] sm:$0xff] %v10327_v3  ;;  %v4006_v9 = vadd.f32 %v12810_v57, %v3622_v24 }
 0x72b   : > { %5545 = vrot.lane.b32.xlu0 %v4002_v54, %s7271_s21  ;;  %5739 = vrot.lane.b32.xlu1 %v4915_v1, %s7269_s19  ;;  %v5155_v54 = vmax.f32 %v9947_v2, %v9961_v29  ;;  %v4914_v2 = vadd.f32 %v9835_v42, %v9643_v36  ;;  %v12818_v36 = vld [vmem:[#allocation420_spill] sm:$0xff] }
 0x72d   : > { %v10334_v16 = vpop.permute.xlu0 %5387  ;;  %v10336_v10 = vpop.permute.xlu1 %5383  ;;  %v5251_v1 = vmax.f32 %v5155_v54, %v9976_v19 }
 0x72f   : > { %5923 = vrot.lane.b32.xlu2 %v5247_v25, %s7270_s20  ;;  %v12811_v25 = vld [vmem:[#allocation45_spill] sm:$0xff] }
 0x730   : > { %v3620_v24 = vadd.f32 %v12812_v45, %v12811_v25  ;;  %v12817_v45 = vld [vmem:[#allocation372_spill] sm:$0xff] }
 0x731   : > { %v10344_v3 = vpop.permute.xlu2 %5397 }
 0x732   : > { %v4004_v18 = vadd.f32 %v12813_v26, %v3620_v24 }
 0x733   : > { %5553 = vrot.lane.b32.xlu0 %v4006_v9, %s7271_s21  ;;  %5735 = vrot.lane.b32.xlu1 %v4913_v11, %s7269_s19  ;;  %v5153_v9 = vmax.f32 %v9953_v20, %v9966_v32  ;;  %v4918_v20 = vadd.f32 %v9827_v8, %v9635_v49  ;;  %v12824_v49 = vld [vmem:[#allocation418_spill] sm:$0xff] }
 0x735   : > { %v10351_v6 = vpop.permute.xlu0 %5393  ;;  %v10353_v4 = vpop.permute.xlu1 %5389  ;;  %v5249_v11 = vmax.f32 %v5153_v9, %v9980_v30 }
 0x737   : > { %5931 = vrot.lane.b32.xlu2 %v5251_v1, %s7270_s20  ;;  %v12816_v1 = vld [vmem:[#allocation46_spill] sm:$0xff] }
 0x738   : > { %v3621_v24 = vadd.f32 %v12817_v45, %v12816_v1  ;;  %v12823_v45 = vld [vmem:[#allocation370_spill] sm:$0xff] }
 0x739   : > { %v10361_v57 = vpop.permute.xlu2 %5403 }
 0x73a   : > { %12814 = vst [vmem:[#allocation203_spill] sm:$0xff] %v10361_v57  ;;  %v4005_v42 = vadd.f32 %v12818_v36, %v3621_v24 }
 0x73b   : > { %5549 = vrot.lane.b32.xlu0 %v4004_v18, %s7271_s21  ;;  %5737 = vrot.lane.b32.xlu1 %v4914_v2, %s7269_s19  ;;  %v5154_v18 = vmax.f32 %v9968_v59, %v9982_v41  ;;  %v4916_v59 = vadd.f32 %v9833_v51, %v9641_v27  ;;  %v12828_v27 = vld [vmem:[#allocation419_spill] sm:$0xff] }
 0x73d   : > { %v10368_v54 = vpop.permute.xlu0 %5399  ;;  %v10370_v25 = vpop.permute.xlu1 %5395  ;;  %v5250_v2 = vmax.f32 %v5154_v18, %v9999_v58 }
 0x73e   : > { %12815 = vst [vmem:[#allocation55_spill] sm:$0xff] %v10368_v54 }
 0x73f   : > { %5927 = vrot.lane.b32.xlu2 %v5249_v11, %s7270_s20  ;;  %v12822_v11 = vld [vmem:[#allocation62_spill] sm:$0xff] }
 0x740   : > { %v3625_v24 = vadd.f32 %v12823_v45, %v12822_v11  ;;  %v12827_v45 = vld [vmem:[#allocation371_spill] sm:$0xff] }
 0x741   : > { %v10378_v26 = vpop.permute.xlu2 %5409 }
 0x742   : > { %12819 = vst [vmem:[#allocation104_spill] sm:$0xff] %v10378_v26  ;;  %v4009_v8 = vadd.f32 %v12824_v49, %v3625_v24  ;;  %v12860_v26 = vld [vmem:[#allocation480_spill] sm:$0xff] }
 0x743   : > { %5551 = vrot.lane.b32.xlu0 %v4005_v42, %s7271_s21  ;;  %5745 = vrot.lane.b32.xlu1 %v4918_v20, %s7269_s19  ;;  %v5158_v42 = vmax.f32 %v9961_v29, %v9976_v19  ;;  %v4917_v29 = vadd.f32 %v9847_v17, %v9655_v38  ;;  %v6633_v38 = vld [vmem:[%s11903_s7 + $0x8] sm:$0xff] }
 0x744   : > { %v12830_v17 = vld [vmem:[#allocation375_spill] sm:$0xff] }
 0x745   : > { %v10385_v9 = vpop.permute.xlu0 %5405  ;;  %v10387_v1 = vpop.permute.xlu1 %5401  ;;  %v5254_v20 = vmax.f32 %v5158_v42, %v9991_v14 }
 0x746   : > { %12820 = vst [vmem:[#allocation160_spill] sm:$0xff] %v10385_v9  ;;  %v12845_v9 = vld [vmem:[#allocation515_spill] sm:$0xff] }
 0x747   : > { %12821 = vst [vmem:[#allocation107_spill] sm:$0xff] %v10387_v1  ;;  %5929 = vrot.lane.b32.xlu2 %v5250_v2, %s7270_s20  ;;  %v12826_v2 = vld [vmem:[#allocation65_spill] sm:$0xff] }
 0x748   : > { %v3623_v24 = vadd.f32 %v12827_v45, %v12826_v2 }
 0x749   : > { %v10395_v36 = vpop.permute.xlu2 %5415 }
 0x74a   : > { %v4007_v51 = vadd.f32 %v12828_v27, %v3623_v24  ;;  %v4537_v24 = vadd.f32 %v9647_v13, %v9455_v34  ;;  %v6632_v27 = vld [vmem:[%s11903_s7] sm:$0xff] }
 0x74b   : > { %5559 = vrot.lane.b32.xlu0 %v4009_v8, %s7271_s21  ;;  %5741 = vrot.lane.b32.xlu1 %v4916_v59, %s7269_s19  ;;  %v5156_v8 = vmax.f32 %v9966_v32, %v9980_v30  ;;  %v6634_v59 = vld [vmem:[%s11903_s7 + $0x10] sm:$0xff]  ;;  %v12829_v32 = vld [vmem:[#allocation70_spill] sm:$0xff] }
 0x74c   : > { %6797 = vmatpush.msra.mxu2 %v6634_v59  ;;  %7205 = vmatpush.msra.mxu3 %v6634_v59  ;;  %v3624_v45 = vadd.f32 %v12830_v17, %v12829_v32  ;;  %v5157_v32 = vmax.f32 %v9982_v41, %v9999_v58  ;;  %v12834_v17 = vld [vmem:[#allocation373_spill] sm:$0xff] }
 0x74d   : > { %v10402_v18 = vpop.permute.xlu0 %5411  ;;  %v10404_v11 = vpop.permute.xlu1 %5407  ;;  %v5252_v42 = vmax.f32 %v5156_v8, %v9997_v21  ;;  %v4921_v8 = vadd.f32 %v9839_v52, %v4537_v24  ;;  %v4535_v52 = vadd.f32 %v9653_v60, %v9461_v56  ;;  %v12835_v24 = vld [vmem:[#allocation50_spill] sm:$0xff] }
 0x74e   : > { %12825 = vst [vmem:[#allocation162_spill] sm:$0xff] %v10404_v11  ;;  %6798 = vmatpush.msra.mxu2 %v6633_v38  ;;  %7206 = vmatpush.msra.mxu3 %v6633_v38  ;;  %v5253_v13 = vmax.f32 %v5157_v32, %v10016_v48  ;;  %v12833_v38 = vld [vmem:[#allocation87_spill] sm:$0xff]  ;;  %v5161_v11 = vmax.f32 %v9976_v19, %v9991_v14  ;;  %v10465_v60 = vld [vmem:[%s11900_s4] ss:$0 sm:$0xff] }
 0x74f   : > { %5937 = vrot.lane.b32.xlu2 %v5254_v20, %s7270_s20 }
 0x750   : > { %6799 = vmatpush.msra.mxu2 %v6632_v27  ;;  %7207 = vmatpush.msra.mxu3 %v6632_v27  ;;  %v12836_v27 = vld [vmem:[#allocation51_spill] sm:$0xff] }
 0x751   : > { %v5536_v49 = vpop.permute.xlu2 %5535  ;;  %v2173_v41 = vadd.f32 %v12836_v27, %v12835_v24  ;;  %v12840_v27 = vld [vmem:[#allocation481_spill] sm:$0xff] }
 0x753   : > { %5555 = vrot.lane.b32.xlu0 %v4007_v51, %s7271_s21  ;;  %5743 = vrot.lane.b32.xlu1 %v4917_v29, %s7269_s19  ;;  %v12831_v51 = vld [vmem:[#allocation423_spill] sm:$0xff] }
 0x754   : > { %v4008_v29 = vadd.f32 %v12831_v51, %v3624_v45  ;;  %v3628_v45 = vadd.f32 %v12834_v17, %v12833_v38  ;;  %v12837_v51 = vld [vmem:[#allocation421_spill] sm:$0xff]  ;;  %v6061_v38 = vsel %vm430_vm1, %v2173_v41, %v10204_v46  ;;  %v12841_v41 = vld [vmem:[#allocation4_spill] sm:$0xff] }
 0x755   : > { %v10420_v20 = vpop.permute.xlu0 %5417  ;;  %v10422_v2 = vpop.permute.xlu1 %5413  ;;  %v6110_v56 = vsel %vm6107_vm5, %v6061_v38, %v5536_v49  ;;  %v4536_v49 = vadd.f32 %v12840_v27, %v9475_v63  ;;  %v12844_v38 = vld [vmem:[#allocation422_spill] sm:$0xff] }
 0x757   : > { %5933 = vrot.lane.b32.xlu2 %v5252_v42, %s7270_s20 }
 0x759   : > { %v5532_v59 = vpop.permute.xlu2 %5531 }
 0x75b   : > { %5557 = vrot.lane.b32.xlu0 %v4008_v29, %s7271_s21  ;;  %5751 = vrot.lane.b32.xlu1 %v4921_v8, %s7269_s19  ;;  %v4012_v29 = vadd.f32 %v12837_v51, %v3628_v45  ;;  %v4919_v8 = vadd.f32 %v9845_v39, %v4535_v52  ;;  %v5257_v39 = vmax.f32 %v5161_v11, %v10008_v55  ;;  %v12838_v45 = vld [vmem:[#allocation90_spill] sm:$0xff]  ;;  %v12842_v11 = vld [vmem:[#allocation32_spill] sm:$0xff] }
 0x75c   : > { %v12839_v52 = vld [vmem:[#allocation374_spill] sm:$0xff] }
 0x75d   : > { %v10442_v34 = vpop.permute.xlu1 %5419  ;;  %v5728_v42 = vpop.permute.xlu0 %5727  ;;  %v3626_v24 = vadd.f32 %v12839_v52, %v12838_v45  ;;  %v5159_v45 = vmax.f32 %v9980_v30, %v9997_v21  ;;  %v12846_v52 = vld [vmem:[#allocation40_spill] sm:$0xff]  ;;  %v12848_v30 = vld [vmem:[#allocation378_spill] sm:$0xff] }
 0x75e   : > { %12832 = vst [vmem:[#allocation127_spill] sm:$0xff] %v10442_v34 }
 0x75f   : > { %5935 = vrot.lane.b32.xlu2 %v5253_v13, %s7270_s20  ;;  %v6159_v13 = vsel %vm6156_vm6, %v6110_v56, %v5728_v42  ;;  %v4010_v56 = vadd.f32 %v12844_v38, %v3626_v24  ;;  %v5255_v27 = vmax.f32 %v5159_v45, %v12846_v52  ;;  %v12851_v38 = vld [vmem:[#allocation2_spill] sm:$0xff] }
 0x760   : > { %v12852_v45 = vld [vmem:[#allocation426_spill] sm:$0xff] }
 0x761   : > { %v10453_v32 = vpop.permute.xlu2 %6375 }
 0x763   : > { %5565 = vrot.lane.b32.xlu0 %v4012_v29, %s7271_s21  ;;  %5747 = vrot.lane.b32.xlu1 %v4919_v8, %s7269_s19  ;;  %v12843_v8 = vld [vmem:[#allocation52_spill] sm:$0xff] }
 0x764   : > { %v2171_v42 = vadd.f32 %v12843_v8, %v12842_v11  ;;  %v12849_v8 = vld [vmem:[#allocation446_spill] sm:$0xff] }
 0x765   : > { %v5724_v19 = vpop.permute.xlu0 %5723  ;;  %v5920_v17 = vpop.permute.xlu1 %5919 }
 0x766   : > { %v6207_v46 = vsel %vm1097_vm4, %v6159_v13, %v5920_v17  ;;  %v4920_v13 = vadd.f32 %v12845_v9, %v4536_v49  ;;  %v6059_v63 = vsel %vm430_vm1, %v2171_v42, %v10211_v40  ;;  %v12850_v40 = vld [vmem:[#allocation479_spill] sm:$0xff] }
 0x767   : > { %v6256_v51 = vsel %vm6253_vm7, %v6207_v46, %v12841_v41  ;;  %5943 = vrot.lane.b32.xlu2 %v5257_v39, %s7270_s20  ;;  %v6108_v39 = vsel %vm6107_vm5, %v6059_v63, %v5532_v59  ;;  %v4540_v42 = vadd.f32 %v12850_v40, %v12849_v8  ;;  %v5160_v40 = vmax.f32 %v9999_v58, %v10016_v48 }
 0x768   : > { %v6308_v29 = vadd.f32 %v10465_v60, %v6256_v51  ;;  %v6157_v24 = vsel %vm6156_vm6, %v6108_v39, %v5724_v19  ;;  %v12847_v51 = vld [vmem:[#allocation94_spill] sm:$0xff]  ;;  %v12853_v39 = vld [vmem:[#allocation513_spill] sm:$0xff] }
 0x769   : > { %v5918_v17 = vpop.permute.xlu2 %5917  ;;  %v3627_v11 = vadd.f32 %v12848_v30, %v12847_v51  ;;  %v10504_v19 = vld [vmem:[%s11902_s6] ss:$0 sm:$0xff]  ;;  %v12854_v51 = vld [vmem:[#allocation49_spill] sm:$0xff] }
 0x76a   : > { %v6357_v46 = vperm.slane %v6308_v29, 0  ;;  %v12855_v30 = vld [vmem:[#allocation57_spill] sm:$0xff] }
 0x76b   : > { %5561 = vrot.lane.b32.xlu0 %v4010_v56, %s7271_s21  ;;  %5749 = vrot.lane.b32.xlu1 %v4920_v13, %s7269_s19  ;;  %v4011_v63 = vadd.f32 %v12852_v45, %v3627_v11 }
 0x76c   : > { %v6388_v13 = vmul.f32 %v10453_v32, %v6357_v46 }
 0x76d   : > { %v5534_v41 = vpop.permute.xlu0 %5533  ;;  %v5916_v9 = vpop.permute.xlu1 %5915 }
 0x76e   : > { %v6205_v49 = vsel %vm1097_vm4, %v6157_v24, %v5916_v9  ;;  %v4924_v24 = vadd.f32 %v12853_v39, %v4540_v42 }
 0x76f   : > { %v6254_v56 = vsel %vm6253_vm7, %v6205_v49, %v12851_v38  ;;  %5939 = vrot.lane.b32.xlu2 %v5255_v27, %s7270_s20  ;;  %v2172_v49 = vadd.f32 %v12855_v30, %v12854_v51  ;;  %v10515_v27 = vld [vmem:[%s11902_s6 + $0x1] ss:$0 sm:$0xff]  ;;  %v12856_v38 = vld [vmem:[#allocation91_spill] sm:$0xff]  ;;  %v12857_v51 = vld [vmem:[#allocation113_spill] sm:$0xff] }
 0x770   : > { %v6306_v59 = vadd.f32 %v10465_v60, %v6254_v56  ;;  %v5256_v56 = vmax.f32 %v5160_v40, %v12856_v38  ;;  %v12862_v40 = vld [vmem:[#allocation424_spill] sm:$0xff] }
 0x771   : > { %v10508_v9 = vpop.permute.xlu2 %6385  ;;  %v6060_v11 = vsel %vm430_vm1, %v2172_v49, %v10228_v33  ;;  %v12861_v49 = vld [vmem:[#allocation3_spill] sm:$0xff] }
 0x772   : > { %v6436_v8 = vadd.f32 %v6388_v13, %v6306_v59  ;;  %v6109_v59 = vsel %vm6107_vm5, %v6060_v11, %v5534_v41 }
 0x773   : > { %5563 = vrot.lane.b32.xlu0 %v4011_v63, %s7271_s21  ;;  %5757 = vrot.lane.b32.xlu1 %v4924_v24, %s7269_s19  ;;  %v12858_v63 = vld [vmem:[#allocation376_spill] sm:$0xff]  ;;  %v12859_v24 = vld [vmem:[#allocation447_spill] sm:$0xff] }
 0x774   : > { %v6486_v42 = vmul.f32 %v10504_v19, %v6436_v8  ;;  %v3631_v30 = vadd.f32 %v12858_v63, %v12857_v51  ;;  %v4538_v1 = vadd.f32 %v12860_v26, %v12859_v24  ;;  %v6390_v26 = vmul.f32 %v10508_v9, %v6357_v46 }
 0x775   : > { %v10526_v13 = vpop.permute.xlu0 %6380  ;;  %v5726_v45 = vpop.permute.xlu1 %5725 }
 0x776   : > { %v6158_v39 = vsel %vm6156_vm6, %v6109_v59, %v5726_v45  ;;  %v6536_v58 = vadd.f32 %v10515_v27, %v6486_v42  ;;  %v4015_v11 = vadd.f32 %v12862_v40, %v3631_v30  ;;  %v12863_v59 = vld [vmem:[#allocation514_spill] sm:$0xff]  ;;  %v6389_v51 = vmul.f32 %v10526_v13, %v6357_v46  ;;  %v12868_v46 = vld [vmem:[#allocation484_spill] sm:$0xff] }
 0x777   : > { %v6206_v33 = vsel %vm1097_vm4, %v6158_v39, %v5918_v17  ;;  %5941 = vrot.lane.b32.xlu2 %v5256_v56, %s7270_s20  ;;  %v4922_v45 = vadd.f32 %v12863_v59, %v4538_v1  ;;  %v5164_v17 = vmax.f32 %v9991_v14, %v10008_v55  ;;  %v12864_v39 = vld [vmem:[#allocation85_spill] sm:$0xff]  ;;  %v6438_v24 = vadd.f32 %v6390_v26, %v6308_v29  ;;  %v12870_v59 = vld [vmem:[#allocation47_spill] sm:$0xff]  ;;  %v12873_v29 = vld [vmem:[#allocation72_spill] sm:$0xff] }
 0x778   : > { %v6255_v41 = vsel %vm6253_vm7, %v6206_v33, %v12861_v49  ;;  %v6584_v8 = vmax.f32 %v6536_v58, 0.0  ;;  %v12865_v33 = vld [vmem:[#allocation115_spill] sm:$0xff]  ;;  %v12866_v49 = vld [vmem:[#allocation377_spill] sm:$0xff] }
 0x779   : > { %v6307_v42 = vadd.f32 %v10465_v60, %v6255_v41  ;;  %v5926_v54 = vpop.permute.xlu2 %5925  ;;  %v5260_v58 = vmax.f32 %v5164_v17, %v12864_v39  ;;  %v3629_v41 = vadd.f32 %v12866_v49, %v12865_v33  ;;  %v12872_v17 = vld [vmem:[#allocation518_spill] sm:$0xff]  ;;  %v6488_v33 = vmul.f32 %v10504_v19, %v6438_v24 }
 0x77a   : > { %7152 = vmatmul.msk.f32.vlgmr.msra.gmra.mxu2 %vm6639_vm8, %v6584_v8  ;;  %v12867_v8 = vld [vmem:[#allocation450_spill] sm:$0xff]  ;;  %v5162_v49 = vmax.f32 %v9997_v21, %v12846_v52  ;;  %v12875_v21 = vld [vmem:[#allocation119_spill] sm:$0xff] }
 0x77b   : > { %5571 = vrot.lane.b32.xlu0 %v4015_v11, %s7271_s21  ;;  %5753 = vrot.lane.b32.xlu1 %v4922_v45, %s7269_s19  ;;  %v6437_v56 = vadd.f32 %v6389_v51, %v6307_v42  ;;  %v4539_v40 = vadd.f32 %v12868_v46, %v12867_v8  ;;  %v12869_v11 = vld [vmem:[#allocation18_spill] sm:$0xff]  ;;  %v12871_v42 = vld [vmem:[#allocation425_spill] sm:$0xff] }
 0x77c   : > { %v1792_v45 = vadd.f32 %v12870_v59, %v12869_v11  ;;  %v4013_v51 = vadd.f32 %v12871_v42, %v3629_v41  ;;  %v12876_v11 = vld [vmem:[#allocation381_spill] sm:$0xff] }
 0x77d   : > { %v5538_v1 = vpop.permute.xlu0 %5537  ;;  %v5542_v63 = vpop.permute.xlu1 %5541  ;;  %v6487_v30 = vmul.f32 %v10504_v19, %v6437_v56  ;;  %v4923_v57 = vadd.f32 %v12872_v17, %v4539_v40  ;;  %v3630_v59 = vadd.f32 %v12876_v11, %v12875_v21  ;;  %v12880_v17 = vld [vmem:[#allocation53_spill] sm:$0xff] }
 0x77e   : > { %v2176_v26 = vadd.f32 %v12873_v29, %v1792_v45  ;;  %v12877_v45 = vld [vmem:[#allocation448_spill] sm:$0xff]  ;;  %v12884_v21 = vld [vmem:[#allocation73_spill] sm:$0xff] }
 0x77f   : > { %5949 = vrot.lane.b32.xlu2 %v5260_v58, %s7270_s20  ;;  %v6537_v14 = vadd.f32 %v10515_v27, %v6487_v30  ;;  %v12874_v30 = vld [vmem:[#allocation41_spill] sm:$0xff] }
 0x780   : > { %v6064_v58 = vsel %vm430_vm1, %v2176_v26, %v10220_v23  ;;  %v5258_v41 = vmax.f32 %v5162_v49, %v12874_v30  ;;  %v12882_v26 = vld [vmem:[#allocation429_spill] sm:$0xff] }
 0x781   : > { %v5922_v34 = vpop.permute.xlu2 %5921  ;;  %v6585_v56 = vmax.f32 %v6537_v14, 0.0  ;;  %v6113_v8 = vsel %vm6107_vm5, %v6064_v58, %v5542_v63  ;;  %v6538_v14 = vadd.f32 %v10515_v27, %v6488_v33  ;;  %v12881_v63 = vld [vmem:[#allocation7_spill] sm:$0xff]  ;;  %v4014_v49 = vadd.f32 %v12882_v26, %v3630_v59  ;;  %v12883_v58 = vld [vmem:[#allocation516_spill] sm:$0xff] }
 0x783   : > { %5567 = vrot.lane.b32.xlu0 %v4013_v51, %s7271_s21  ;;  %5755 = vrot.lane.b32.xlu1 %v4923_v57, %s7269_s19  ;;  %v12878_v57 = vld [vmem:[#allocation482_spill] sm:$0xff] }
 0x784   : > { %7153 = vmatmul.msk.f32.gmra.mxu2 %vm6639_vm8, %v6585_v56  ;;  %v4543_v42 = vadd.f32 %v12878_v57, %v12877_v45  ;;  %v12879_v51 = vld [vmem:[#allocation14_spill] sm:$0xff]  ;;  %v6586_v45 = vmax.f32 %v6538_v14, 0.0 }
 0x785   : > { %v5540_v46 = vpop.permute.xlu0 %5539  ;;  %v5734_v40 = vpop.permute.xlu1 %5733  ;;  %v1790_v56 = vadd.f32 %v12880_v17, %v12879_v51  ;;  %v12887_v17 = vld [vmem:[#allocation379_spill] sm:$0xff] }
 0x786   : > { %v6162_v24 = vsel %vm6156_vm6, %v6113_v8, %v5734_v40  ;;  %v4927_v33 = vadd.f32 %v12883_v58, %v4543_v42  ;;  %v12891_v58 = vld [vmem:[#allocation42_spill] sm:$0xff] }
 0x787   : > { %v6210_v23 = vsel %vm1097_vm4, %v6162_v24, %v5926_v54  ;;  %5945 = vrot.lane.b32.xlu2 %v5258_v41, %s7270_s20  ;;  %v2174_v11 = vadd.f32 %v12884_v21, %v1790_v56  ;;  %v5163_v54 = vmax.f32 %v10016_v48, %v12856_v38  ;;  %v12885_v24 = vld [vmem:[#allocation36_spill] sm:$0xff]  ;;  %v12886_v48 = vld [vmem:[#allocation139_spill] sm:$0xff] }
 0x788   : > { %v6259_v29 = vsel %vm6253_vm7, %v6210_v23, %v12881_v63  ;;  %v3634_v56 = vadd.f32 %v12887_v17, %v12886_v48  ;;  %v12888_v63 = vld [vmem:[#allocation449_spill] sm:$0xff]  ;;  %v12895_v17 = vld [vmem:[#allocation78_spill] sm:$0xff] }
 0x789   : > { %v10586_v8 = vadd.f32 %v10465_v60, %v6259_v29  ;;  %v5924_v40 = vpop.permute.xlu2 %5923  ;;  %v6062_v41 = vsel %vm430_vm1, %v2174_v11, %v10226_v0  ;;  %v5259_v59 = vmax.f32 %v5163_v54, %v12885_v24  ;;  %v12889_v29 = vld [vmem:[#allocation483_spill] sm:$0xff]  ;;  %v12894_v54 = vld [vmem:[#allocation517_spill] sm:$0xff] }
 0x78a   : > { %v6111_v57 = vsel %vm6107_vm5, %v6062_v41, %v5538_v1  ;;  %v4541_v26 = vadd.f32 %v12889_v29, %v12888_v63  ;;  %v12892_v1 = vld [vmem:[#allocation5_spill] sm:$0xff]  ;;  %v12893_v11 = vld [vmem:[#allocation427_spill] sm:$0xff] }
 0x78b   : > { %5569 = vrot.lane.b32.xlu0 %v4014_v49, %s7271_s21  ;;  %5763 = vrot.lane.b32.xlu1 %v4927_v33, %s7269_s19  ;;  %v6358_v42 = vperm.slane %v10586_v8, 0  ;;  %v12890_v49 = vld [vmem:[#allocation16_spill] sm:$0xff] }
 0x78c   : > { %7154 = vmatmul.msk.f32.gmra.mxu2 %vm6639_vm8, %v6586_v45  ;;  %v1791_v33 = vadd.f32 %v12891_v58, %v12890_v49  ;;  %v4018_v45 = vadd.f32 %v12893_v11, %v3634_v56  ;;  %v4925_v41 = vadd.f32 %v12894_v54, %v4541_v26  ;;  %v12896_v56 = vld [vmem:[#allocation60_spill] sm:$0xff]  ;;  %v12899_v11 = vld [vmem:[#allocation453_spill] sm:$0xff] }
 0x78d   : > { %v5548_v23 = vpop.permute.xlu0 %5547  ;;  %v5730_v14 = vpop.permute.xlu1 %5729  ;;  %v6391_v48 = vmul.f32 %v10453_v32, %v6358_v42 }
 0x78e   : > { %v6160_v51 = vsel %vm6156_vm6, %v6111_v57, %v5730_v14  ;;  %v2175_v63 = vadd.f32 %v12895_v17, %v1791_v33  ;;  %v12897_v33 = vld [vmem:[#allocation140_spill] sm:$0xff] }
 0x78f   : > { %v6208_v0 = vsel %vm1097_vm4, %v6160_v51, %v5922_v34  ;;  %5947 = vrot.lane.b32.xlu2 %v5259_v59, %s7270_s20  ;;  %v5167_v34 = vmax.f32 %v10008_v55, %v12864_v39  ;;  %v12903_v17 = vld [vmem:[#allocation428_spill] sm:$0xff] }
 0x790   : > { %v6257_v21 = vsel %vm6253_vm7, %v6208_v0, %v12892_v1  ;;  %v6063_v51 = vsel %vm430_vm1, %v2175_v63, %v10243_v44  ;;  %v12898_v1 = vld [vmem:[#allocation380_spill] sm:$0xff] }
 0x791   : > { %v6309_v57 = vadd.f32 %v10465_v60, %v6257_v21  ;;  %v5932_v14 = vpop.permute.xlu2 %5931  ;;  %v5263_v29 = vmax.f32 %v5167_v34, %v12896_v56  ;;  %v6112_v26 = vsel %vm6107_vm5, %v6063_v51, %v5540_v46  ;;  %v3632_v21 = vadd.f32 %v12898_v1, %v12897_v33  ;;  %v12902_v46 = vld [vmem:[#allocation67_spill] sm:$0xff]  ;;  %v12904_v34 = vld [vmem:[#allocation6_spill] sm:$0xff]  ;;  %v12905_v51 = vld [vmem:[#allocation521_spill] sm:$0xff] }
 0x793   : > { %5577 = vrot.lane.b32.xlu0 %v4018_v45, %s7271_s21  ;;  %5759 = vrot.lane.b32.xlu1 %v4925_v41, %s7269_s19  ;;  %v6439_v59 = vadd.f32 %v6391_v48, %v6309_v57  ;;  %v12900_v45 = vld [vmem:[#allocation487_spill] sm:$0xff]  ;;  %v12901_v57 = vld [vmem:[#allocation22_spill] sm:$0xff]  ;;  %v4016_v63 = vadd.f32 %v12903_v17, %v3632_v21  ;;  %v12908_v17 = vld [vmem:[#allocation144_spill] sm:$0xff] }
 0x794   : > { %v4542_v54 = vadd.f32 %v12900_v45, %v12899_v11  ;;  %v1795_v48 = vadd.f32 %v12902_v46, %v12901_v57  ;;  %v5165_v11 = vmax.f32 %v12846_v52, %v12874_v30 }
 0x795   : > { %v5544_v0 = vpop.permute.xlu0 %5543  ;;  %v5732_v49 = vpop.permute.xlu1 %5731  ;;  %v6489_v58 = vmul.f32 %v10504_v19, %v6439_v59 }
 0x796   : > { %v6161_v55 = vsel %vm6156_vm6, %v6112_v26, %v5732_v49  ;;  %v4926_v33 = vadd.f32 %v12905_v51, %v4542_v54  ;;  %v12907_v54 = vld [vmem:[#allocation111_spill] sm:$0xff]  ;;  %v12911_v51 = vld [vmem:[#allocation485_spill] sm:$0xff] }
 0x797   : > { %v6209_v41 = vsel %vm1097_vm4, %v6161_v55, %v5924_v40  ;;  %5955 = vrot.lane.b32.xlu2 %v5263_v29, %s7270_s20  ;;  %v6539_v44 = vadd.f32 %v10515_v27, %v6489_v58  ;;  %v6392_v40 = vmul.f32 %v10526_v13, %v6358_v42  ;;  %v12906_v55 = vld [vmem:[#allocation97_spill] sm:$0xff]  ;;  %v6393_v58 = vmul.f32 %v10508_v9, %v6358_v42 }
 0x798   : > { %v6258_v59 = vsel %vm6253_vm7, %v6209_v41, %v12904_v34  ;;  %v2179_v29 = vadd.f32 %v12906_v55, %v1795_v48  ;;  %v5261_v41 = vmax.f32 %v5165_v11, %v12907_v54  ;;  %v12914_v55 = vld [vmem:[#allocation10_spill] sm:$0xff]  ;;  %v12915_v11 = vld [vmem:[#allocation432_spill] sm:$0xff] }
 0x799   : > { %v6310_v26 = vadd.f32 %v10465_v60, %v6258_v59  ;;  %v5928_v49 = vpop.permute.xlu2 %5927  ;;  %v6587_v1 = vmax.f32 %v6539_v44, 0.0  ;;  %v6441_v48 = vadd.f32 %v6393_v58, %v10586_v8  ;;  %v12910_v59 = vld [vmem:[#allocation451_spill] sm:$0xff] }
 0x79a   : > { %v6067_v45 = vsel %vm430_vm1, %v2179_v29, %v10235_v28  ;;  %v4546_v28 = vadd.f32 %v12911_v51, %v12910_v59  ;;  %v12916_v58 = vld [vmem:[#allocation519_spill] sm:$0xff] }
 0x79b   : > { %5573 = vrot.lane.b32.xlu0 %v4016_v63, %s7271_s21  ;;  %5761 = vrot.lane.b32.xlu1 %v4926_v33, %s7269_s19  ;;  %v6440_v21 = vadd.f32 %v6392_v40, %v6310_v26  ;;  %v6116_v44 = vsel %vm6107_vm5, %v6067_v45, %v5548_v23  ;;  %v12909_v63 = vld [vmem:[#allocation384_spill] sm:$0xff]  ;;  %v12912_v26 = vld [vmem:[#allocation19_spill] sm:$0xff] }
 0x79c   : > { %7155 = vmatmul.msk.f32.gmra.mxu2 %vm6639_vm8, %v6587_v1  ;;  %v3633_v34 = vadd.f32 %v12909_v63, %v12908_v17  ;;  %v12913_v1 = vld [vmem:[#allocation71_spill] sm:$0xff]  ;;  %v12918_v63 = vld [vmem:[#allocation116_spill] sm:$0xff] }
 0x79d   : > { %v5546_v57 = vpop.permute.xlu0 %5545  ;;  %v5740_v46 = vpop.permute.xlu1 %5739  ;;  %v6490_v42 = vmul.f32 %v10504_v19, %v6440_v21  ;;  %v1793_v40 = vadd.f32 %v12913_v1, %v12912_v26  ;;  %v4930_v21 = vadd.f32 %v12916_v58, %v4546_v28  ;;  %v12920_v26 = vld [vmem:[#allocation382_spill] sm:$0xff]  ;;  %v12925_v58 = vld [vmem:[#allocation8_spill] sm:$0xff] }
 0x79e   : > { %v6165_v52 = vsel %vm6156_vm6, %v6116_v44, %v5740_v46  ;;  %v4017_v8 = vadd.f32 %v12915_v11, %v3633_v34  ;;  %v12923_v11 = vld [vmem:[#allocation21_spill] sm:$0xff] }
 0x79f   : > { %v6213_v33 = vsel %vm1097_vm4, %v6165_v52, %v5932_v14  ;;  %5951 = vrot.lane.b32.xlu2 %v5261_v41, %s7270_s20  ;;  %v6540_v23 = vadd.f32 %v10515_v27, %v6490_v42  ;;  %v12917_v14 = vld [vmem:[#allocation98_spill] sm:$0xff]  ;;  %v6491_v41 = vmul.f32 %v10504_v19, %v6441_v48  ;;  %v5166_v42 = vmax.f32 %v12856_v38, %v12885_v24 }
 0x7a0   : > { %v6262_v29 = vsel %vm6253_vm7, %v6213_v33, %v12914_v55  ;;  %v2177_v52 = vadd.f32 %v12917_v14, %v1793_v40  ;;  %v12921_v40 = vld [vmem:[#allocation452_spill] sm:$0xff]  ;;  %v12922_v55 = vld [vmem:[#allocation486_spill] sm:$0xff] }
 0x7a1   : > { %v10668_v45 = vadd.f32 %v10465_v60, %v6262_v29  ;;  %v5930_v44 = vpop.permute.xlu2 %5929  ;;  %v6588_v46 = vmax.f32 %v6540_v23, 0.0  ;;  %v5262_v34 = vmax.f32 %v5166_v42, %v12918_v63  ;;  %v6541_v38 = vadd.f32 %v10515_v27, %v6491_v41  ;;  %v12919_v23 = vld [vmem:[#allocation322_spill] sm:$0xff] }
 0x7a2   : > { %v6065_v17 = vsel %vm430_vm1, %v2177_v52, %v10241_v22  ;;  %v3637_v1 = vadd.f32 %v12920_v26, %v12919_v23  ;;  %v4544_v22 = vadd.f32 %v12922_v55, %v12921_v40  ;;  %v12927_v52 = vld [vmem:[#allocation520_spill] sm:$0xff] }
 0x7a3   : > { %5575 = vrot.lane.b32.xlu0 %v4017_v8, %s7271_s21  ;;  %5769 = vrot.lane.b32.xlu1 %v4930_v21, %s7269_s19  ;;  %v6114_v59 = vsel %vm6107_vm5, %v6065_v17, %v5544_v0  ;;  %v6359_v51 = vperm.slane %v10668_v45, 0  ;;  %v12924_v0 = vld [vmem:[#allocation74_spill] sm:$0xff] }
 0x7a4   : > { %7156 = vmatmul.msk.f32.gmra.mxu2 %vm6639_vm8, %v6588_v46  ;;  %v1794_v8 = vadd.f32 %v12924_v0, %v12923_v11  ;;  %v12926_v46 = vld [vmem:[#allocation430_spill] sm:$0xff]  ;;  %v4928_v41 = vadd.f32 %v12927_v52, %v4544_v22  ;;  %v12930_v11 = vld [vmem:[#allocation456_spill] sm:$0xff] }
 0x7a5   : > { %v5554_v28 = vpop.permute.xlu0 %5553  ;;  %v5736_v48 = vpop.permute.xlu1 %5735  ;;  %v4021_v14 = vadd.f32 %v12926_v46, %v3637_v1  ;;  %v12929_v1 = vld [vmem:[#allocation80_spill] sm:$0xff]  ;;  %v12931_v0 = vld [vmem:[#allocation490_spill] sm:$0xff] }
 0x7a6   : > { %v6163_v33 = vsel %vm6156_vm6, %v6114_v59, %v5736_v48  ;;  %v6394_v59 = vmul.f32 %v10453_v32, %v6359_v51  ;;  %v12928_v48 = vld [vmem:[#allocation102_spill] sm:$0xff]  ;;  %v12933_v46 = vld [vmem:[#allocation92_spill] sm:$0xff] }
 0x7a7   : > { %v6211_v29 = vsel %vm1097_vm4, %v6163_v33, %v5928_v49  ;;  %5953 = vrot.lane.b32.xlu2 %v5262_v34, %s7270_s20  ;;  %v2178_v23 = vadd.f32 %v12928_v48, %v1794_v8  ;;  %v6589_v49 = vmax.f32 %v6541_v38, 0.0  ;;  %v5170_v34 = vmax.f32 %v12864_v39, %v12896_v56  ;;  %v12934_v52 = vld [vmem:[#allocation466_spill] sm:$0xff]  ;;  %v12937_v48 = vld [vmem:[#allocation524_spill] sm:$0xff] }
 0x7a8   : > { %v6260_v21 = vsel %vm6253_vm7, %v6211_v29, %v12925_v58  ;;  %v4545_v8 = vadd.f32 %v12931_v0, %v12930_v11  ;;  %v12939_v11 = vld [vmem:[#allocation66_spill] sm:$0xff] }
 0x7a9   : > { %v6312_v42 = vadd.f32 %v10465_v60, %v6260_v21  ;;  %v5938_v17 = vpop.permute.xlu2 %5937  ;;  %v6066_v26 = vsel %vm430_vm1, %v2178_v23, %v10259_v50  ;;  %v5266_v40 = vmax.f32 %v5170_v34, %v12929_v1  ;;  %v12932_v21 = vld [vmem:[#allocation28_spill] sm:$0xff] }
 0x7aa   : > { %v6115_v55 = vsel %vm6107_vm5, %v6066_v26, %v5546_v57  ;;  %v12935_v57 = vld [vmem:[#allocation500_spill] sm:$0xff]  ;;  %v4929_v23 = vadd.f32 %v12937_v48, %v4545_v8  ;;  %v12938_v26 = vld [vmem:[#allocation121_spill] sm:$0xff]  ;;  %v12945_v48 = vld [vmem:[#allocation95_spill] sm:$0xff] }
 0x7ab   : > { %5583 = vrot.lane.b32.xlu0 %v4021_v14, %s7271_s21  ;;  %5765 = vrot.lane.b32.xlu1 %v4928_v41, %s7269_s19  ;;  %v6442_v33 = vadd.f32 %v6394_v59, %v6312_v42  ;;  %v1798_v14 = vadd.f32 %v12933_v46, %v12932_v21  ;;  %v4561_v41 = vadd.f32 %v12935_v57, %v12934_v52  ;;  %v12936_v42 = vld [vmem:[#allocation9_spill] sm:$0xff]  ;;  %v12940_v46 = vld [vmem:[#allocation335_spill] sm:$0xff]  ;;  %v12942_v57 = vld [vmem:[#allocation346_spill] sm:$0xff] }
 0x7ac   : > { %7157 = vmatmul.msk.f32.gmra.mxu2 %vm6639_vm8, %v6589_v49 }
 0x7ad   : > { %v5550_v22 = vpop.permute.xlu0 %5549  ;;  %v5738_v29 = vpop.permute.xlu1 %5737  ;;  %v6492_v38 = vmul.f32 %v10504_v19, %v6442_v33 }
 0x7ae   : > { %v6164_v39 = vsel %vm6156_vm6, %v6115_v55, %v5738_v29  ;;  %v6396_v55 = vmul.f32 %v10508_v9, %v6359_v51  ;;  %v5168_v29 = vmax.f32 %v12874_v30, %v12907_v54 }
 0x7af   : > { %v6212_v58 = vsel %vm1097_vm4, %v6164_v39, %v5930_v44  ;;  %5961 = vrot.lane.b32.xlu2 %v5266_v40, %s7270_s20  ;;  %v6542_v50 = vadd.f32 %v10515_v27, %v6492_v38  ;;  %v6395_v44 = vmul.f32 %v10526_v13, %v6359_v51  ;;  %v2182_v40 = vadd.f32 %v12938_v26, %v1798_v14  ;;  %v12941_v14 = vld [vmem:[#allocation383_spill] sm:$0xff]  ;;  %v12948_v26 = vld [vmem:[#allocation442_spill] sm:$0xff] }
 0x7b0   : > { %v6261_v59 = vsel %vm6253_vm7, %v6212_v58, %v12936_v42  ;;  %v5264_v0 = vmax.f32 %v5168_v29, %v12939_v11  ;;  %v6444_v21 = vadd.f32 %v6396_v55, %v10668_v45  ;;  %v3635_v52 = vadd.f32 %v12941_v14, %v12940_v46 }
 0x7b1   : > { %v6313_v49 = vadd.f32 %v10465_v60, %v6261_v59  ;;  %v5934_v34 = vpop.permute.xlu2 %5933  ;;  %v6590_v33 = vmax.f32 %v6542_v50, 0.0  ;;  %v6070_v39 = vsel %vm430_vm1, %v2182_v40, %v10251_v15  ;;  %v12944_v59 = vld [vmem:[#allocation25_spill] sm:$0xff] }
 0x7b2   : > { %v6119_v8 = vsel %vm6107_vm5, %v6070_v39, %v5554_v28 }
 0x7b3   : > { %5799 = vrot.lane.b32.xlu0 %v4561_v41, %s7269_s19  ;;  %5767 = vrot.lane.b32.xlu1 %v4929_v23, %s7269_s19  ;;  %v6443_v38 = vadd.f32 %v6395_v44, %v6313_v49  ;;  %v12943_v41 = vld [vmem:[#allocation394_spill] sm:$0xff]  ;;  %v1796_v23 = vadd.f32 %v12945_v48, %v12944_v59  ;;  %v12946_v49 = vld [vmem:[#allocation13_spill] sm:$0xff]  ;;  %v12947_v44 = vld [vmem:[#allocation431_spill] sm:$0xff] }
 0x7b4   : > { %7158 = vmatmul.msk.f32.gmra.mxu2 %vm6639_vm8, %v6590_v33  ;;  %v3649_v15 = vadd.f32 %v12943_v41, %v12942_v57  ;;  %v4019_v45 = vadd.f32 %v12947_v44, %v3635_v52  ;;  %v5173_v41 = vmax.f32 %v12896_v56, %v12929_v1  ;;  %v12953_v59 = vld [vmem:[#allocation11_spill] sm:$0xff] }
 0x7b5   : > { %v5552_v58 = vpop.permute.xlu0 %5551  ;;  %v5746_v50 = vpop.permute.xlu1 %5745  ;;  %v6493_v51 = vmul.f32 %v10504_v19, %v6443_v38  ;;  %v12954_v48 = vld [vmem:[#allocation467_spill] sm:$0xff] }
 0x7b6   : > { %v6168_v30 = vsel %vm6156_vm6, %v6119_v8, %v5746_v50  ;;  %v4033_v40 = vadd.f32 %v12948_v26, %v3649_v15  ;;  %v5169_v8 = vmax.f32 %v12885_v24, %v12918_v63 }
 0x7b7   : > { %v6216_v42 = vsel %vm1097_vm4, %v6168_v30, %v5938_v17  ;;  %5957 = vrot.lane.b32.xlu2 %v5264_v0, %s7270_s20  ;;  %v6543_v28 = vadd.f32 %v10515_v27, %v6493_v51  ;;  %v12949_v17 = vld [vmem:[#allocation122_spill] sm:$0xff]  ;;  %v6494_v0 = vmul.f32 %v10504_v19, %v6444_v21  ;;  %v12950_v51 = vld [vmem:[#allocation83_spill] sm:$0xff] }
 0x7b8   : > { %v6265_v33 = vsel %vm6253_vm7, %v6216_v42, %v12946_v49  ;;  %v2180_v39 = vadd.f32 %v12949_v17, %v1796_v23  ;;  %v5265_v30 = vmax.f32 %v5169_v8, %v12950_v51  ;;  %v12952_v42 = vld [vmem:[#allocation99_spill] sm:$0xff]  ;;  %v12955_v23 = vld [vmem:[#allocation501_spill] sm:$0xff]  ;;  %v12958_v17 = vld [vmem:[#allocation454_spill] sm:$0xff] }
 0x7b9   : > { %v10752_v55 = vadd.f32 %v10465_v60, %v6265_v33  ;;  %v5936_v29 = vpop.permute.xlu2 %5935  ;;  %v6591_v38 = vmax.f32 %v6543_v28, 0.0  ;;  %v6544_v24 = vadd.f32 %v10515_v27, %v6494_v0  ;;  %v4559_v49 = vadd.f32 %v12955_v23, %v12954_v48  ;;  %v12956_v33 = vld [vmem:[#allocation136_spill] sm:$0xff] }
 0x7ba   : > { %v6068_v50 = vsel %vm430_vm1, %v2180_v39, %v10257_v35  ;;  %v12951_v35 = vld [vmem:[#allocation27_spill] sm:$0xff]  ;;  %v5269_v44 = vmax.f32 %v5173_v41, %v12956_v33  ;;  %v12959_v39 = vld [vmem:[#allocation488_spill] sm:$0xff] }
 0x7bb   : > { %5579 = vrot.lane.b32.xlu0 %v4019_v45, %s7271_s21  ;;  %5607 = vrot.lane.b32.xlu1 %v4033_v40, %s7271_s21  ;;  %v6117_v46 = vsel %vm6107_vm5, %v6068_v50, %v5550_v22  ;;  %v6360_v14 = vperm.slane %v10752_v55, 0  ;;  %v1797_v28 = vadd.f32 %v12952_v42, %v12951_v35  ;;  %v12957_v40 = vld [vmem:[#allocation128_spill] sm:$0xff]  ;;  %v4549_v0 = vadd.f32 %v12959_v39, %v12958_v17  ;;  %v12962_v35 = vld [vmem:[#allocation387_spill] sm:$0xff] }
 0x7bc   : > { %7159 = vmatmul.msk.f32.gmra.mxu2 %vm6639_vm8, %v6591_v38  ;;  %v6592_v38 = vmax.f32 %v6544_v24, 0.0 }
 0x7bd   : > { %v5560_v52 = vpop.permute.xlu0 %5559  ;;  %v5742_v21 = vpop.permute.xlu1 %5741  ;;  %v6397_v56 = vmul.f32 %v10453_v32, %v6360_v14 }
 0x7be   : > { %v6166_v57 = vsel %vm6156_vm6, %v6117_v46, %v5742_v21 }
 0x7bf   : > { %v6214_v15 = vsel %vm1097_vm4, %v6166_v57, %v5934_v34  ;;  %5959 = vrot.lane.b32.xlu2 %v5265_v30, %s7270_s20  ;;  %v2181_v34 = vadd.f32 %v12957_v40, %v1797_v28  ;;  %v12960_v30 = vld [vmem:[#allocation522_spill] sm:$0xff]  ;;  %v12968_v40 = vld [vmem:[#allocation12_spill] sm:$0xff] }
 0x7c0   : > { %v6263_v22 = vsel %vm6253_vm7, %v6214_v15, %v12953_v59  ;;  %v4933_v46 = vadd.f32 %v12960_v30, %v4549_v0  ;;  %v12961_v15 = vld [vmem:[#allocation327_spill] sm:$0xff] }
 0x7c1   : > { %v6315_v45 = vadd.f32 %v10465_v60, %v6263_v22  ;;  %v5944_v26 = vpop.permute.xlu2 %5943  ;;  %v6069_v50 = vsel %vm430_vm1, %v2181_v34, %v10273_v62  ;;  %v3636_v42 = vadd.f32 %v12962_v35, %v12961_v15  ;;  %v12963_v59 = vld [vmem:[#allocation347_spill] sm:$0xff] }
 0x7c2   : > { %v6118_v21 = vsel %vm6107_vm5, %v6069_v50, %v5552_v58  ;;  %v12964_v22 = vld [vmem:[#allocation395_spill] sm:$0xff]  ;;  %v12966_v58 = vld [vmem:[#allocation118_spill] sm:$0xff] }
 0x7c3   : > { %5795 = vrot.lane.b32.xlu0 %v4559_v49, %s7269_s19  ;;  %5967 = vrot.lane.b32.xlu1 %v5269_v44, %s7270_s20  ;;  %v6445_v8 = vadd.f32 %v6397_v56, %v6315_v45  ;;  %v3647_v48 = vadd.f32 %v12964_v22, %v12963_v59  ;;  %v12965_v49 = vld [vmem:[#allocation44_spill] sm:$0xff]  ;;  %v12967_v45 = vld [vmem:[#allocation435_spill] sm:$0xff] }
 0x7c4   : > { %7160 = vmatmul.msk.f32.gmra.mxu2 %vm6639_vm8, %v6592_v38  ;;  %v1801_v44 = vadd.f32 %v12966_v58, %v12965_v49  ;;  %v4020_v56 = vadd.f32 %v12967_v45, %v3636_v42  ;;  %v12969_v38 = vld [vmem:[#allocation443_spill] sm:$0xff]  ;;  %v12973_v42 = vld [vmem:[#allocation112_spill] sm:$0xff]  ;;  %v5171_v49 = vmax.f32 %v12907_v54, %v12939_v11 }
 0x7c5   : > { %v5556_v57 = vpop.permute.xlu0 %5555  ;;  %v5744_v41 = vpop.permute.xlu1 %5743  ;;  %v6495_v24 = vmul.f32 %v10504_v19, %v6445_v8  ;;  %v4031_v17 = vadd.f32 %v12969_v38, %v3647_v48  ;;  %v12970_v50 = vld [vmem:[#allocation147_spill] sm:$0xff]  ;;  %v12975_v45 = vld [vmem:[#allocation120_spill] sm:$0xff]  ;;  %v12978_v38 = vld [vmem:[#allocation505_spill] sm:$0xff] }
 0x7c6   : > { %v6167_v28 = vsel %vm6156_vm6, %v6118_v21, %v5744_v41  ;;  %v2185_v30 = vadd.f32 %v12970_v50, %v1801_v44  ;;  %v12971_v21 = vld [vmem:[#allocation59_spill] sm:$0xff]  ;;  %v12972_v41 = vld [vmem:[#allocation106_spill] sm:$0xff]  ;;  %v12974_v44 = vld [vmem:[#allocation33_spill] sm:$0xff] }
 0x7c7   : > { %v6215_v62 = vsel %vm1097_vm4, %v6167_v28, %v5936_v29  ;;  %5775 = vrot.lane.b32.xlu2 %v4933_v46, %s7269_s19  ;;  %v6545_v23 = vadd.f32 %v10515_v27, %v6495_v24  ;;  %v6398_v29 = vmul.f32 %v10526_v13, %v6360_v14  ;;  %v6399_v46 = vmul.f32 %v10508_v9, %v6360_v14 }
 0x7c8   : > { %v6264_v34 = vsel %vm6253_vm7, %v6215_v62, %v12968_v40  ;;  %v5185_v24 = vmax.f32 %v12972_v41, %v12971_v21  ;;  %v6073_v35 = vsel %vm430_vm1, %v2185_v30, %v10265_v61 }
 0x7c9   : > { %v6316_v39 = vadd.f32 %v10465_v60, %v6264_v34  ;;  %v5940_v0 = vpop.permute.xlu2 %5939  ;;  %v6593_v8 = vmax.f32 %v6545_v23, 0.0  ;;  %v6122_v59 = vsel %vm6107_vm5, %v6073_v35, %v5560_v52  ;;  %v6447_v23 = vadd.f32 %v6399_v46, %v10752_v55  ;;  %v12977_v34 = vld [vmem:[#allocation471_spill] sm:$0xff] }
 0x7ca   : > { %v5281_v28 = vmax.f32 %v5185_v24, %v12973_v42  ;;  %v1799_v52 = vadd.f32 %v12975_v45, %v12974_v44  ;;  %v12981_v46 = vld [vmem:[#allocation455_spill] sm:$0xff]  ;;  %v12982_v24 = vld [vmem:[#allocation489_spill] sm:$0xff]  ;;  %v12985_v44 = vld [vmem:[#allocation304_spill] sm:$0xff] }
 0x7cb   : > { %5581 = vrot.lane.b32.xlu0 %v4020_v56, %s7271_s21  ;;  %5603 = vrot.lane.b32.xlu1 %v4031_v17, %s7271_s21  ;;  %v6446_v15 = vadd.f32 %v6398_v29, %v6316_v39  ;;  %v12976_v56 = vld [vmem:[#allocation20_spill] sm:$0xff]  ;;  %v4560_v17 = vadd.f32 %v12978_v38, %v12977_v34  ;;  %v12979_v39 = vld [vmem:[#allocation35_spill] sm:$0xff]  ;;  %v12980_v29 = vld [vmem:[#allocation149_spill] sm:$0xff]  ;;  %v6497_v30 = vmul.f32 %v10504_v19, %v6447_v23 }
 0x7cc   : > { %7161 = vmatmul.msk.f32.gmra.mxu2 %vm6639_vm8, %v6593_v8  ;;  %v5267_v55 = vmax.f32 %v5171_v49, %v12979_v39  ;;  %v2183_v50 = vadd.f32 %v12980_v29, %v1799_v52  ;;  %v12986_v52 = vld [vmem:[#allocation351_spill] sm:$0xff] }
 0x7cd   : > { %v5558_v22 = vpop.permute.xlu0 %5557  ;;  %v5752_v48 = vpop.permute.xlu1 %5751  ;;  %v6496_v14 = vmul.f32 %v10504_v19, %v6446_v15  ;;  %v4547_v15 = vadd.f32 %v12982_v24, %v12981_v46  ;;  %v12988_v34 = vld [vmem:[#allocation39_spill] sm:$0xff] }
 0x7ce   : > { %v6171_v62 = vsel %vm6156_vm6, %v6122_v59, %v5752_v48  ;;  %v6071_v35 = vsel %vm430_vm1, %v2183_v50, %v10271_v31  ;;  %v12992_v50 = vld [vmem:[#allocation445_spill] sm:$0xff] }
 0x7cf   : > { %v6219_v58 = vsel %vm1097_vm4, %v6171_v62, %v5944_v26  ;;  %5991 = vrot.lane.b32.xlu2 %v5281_v28, %s7270_s20  ;;  %v6546_v61 = vadd.f32 %v10515_v27, %v6496_v14  ;;  %v12983_v28 = vld [vmem:[#allocation523_spill] sm:$0xff]  ;;  %v6120_v48 = vsel %vm6107_vm5, %v6071_v35, %v5556_v57  ;;  %v12993_v35 = vld [vmem:[#allocation154_spill] sm:$0xff] }
 0x7d0   : > { %v6268_v40 = vsel %vm6253_vm7, %v6219_v58, %v12976_v56  ;;  %v4931_v59 = vadd.f32 %v12983_v28, %v4547_v15  ;;  %v6547_v58 = vadd.f32 %v10515_v27, %v6497_v30  ;;  %v12987_v56 = vld [vmem:[#allocation399_spill] sm:$0xff] }
 0x7d1   : > { %v10835_v8 = vadd.f32 %v10465_v60, %v6268_v40  ;;  %v5942_v54 = vpop.permute.xlu2 %5941  ;;  %v6594_v26 = vmax.f32 %v6546_v61, 0.0  ;;  %v12984_v61 = vld [vmem:[#allocation269_spill] sm:$0xff]  ;;  %v3648_v31 = vadd.f32 %v12987_v56, %v12986_v52  ;;  %v12989_v57 = vld [vmem:[#allocation123_spill] sm:$0xff] }
 0x7d2   : > { %v2740_v45 = vadd.f32 %v12985_v44, %v12984_v61  ;;  %v1800_v38 = vadd.f32 %v12989_v57, %v12988_v34  ;;  %v12996_v44 = vld [vmem:[#allocation77_spill] sm:$0xff]  ;;  %v12998_v34 = vld [vmem:[#allocation491_spill] sm:$0xff] }
 0x7d3   : > { %5797 = vrot.lane.b32.xlu0 %v4560_v17, %s7269_s19  ;;  %5963 = vrot.lane.b32.xlu1 %v5267_v55, %s7270_s20  ;;  %v6361_v14 = vperm.slane %v10835_v8, 0  ;;  %v12990_v17 = vld [vmem:[#allocation15_spill] sm:$0xff]  ;;  %v4032_v30 = vadd.f32 %v12992_v50, %v3648_v31  ;;  %v13001_v50 = vld [vmem:[#allocation525_spill] sm:$0xff] }
 0x7d4   : > { %7162 = vmatmul.msk.f32.gmra.mxu2 %vm6639_vm8, %v6594_v26  ;;  %v12991_v26 = vld [vmem:[#allocation337_spill] sm:$0xff]  ;;  %v2184_v28 = vadd.f32 %v12993_v35, %v1800_v38  ;;  %v13003_v35 = vld [vmem:[#allocation56_spill] sm:$0xff] }
 0x7d5   : > { %v5566_v62 = vpop.permute.xlu0 %5565  ;;  %v5748_v23 = vpop.permute.xlu1 %5747  ;;  %v3124_v29 = vadd.f32 %v12991_v26, %v2740_v45  ;;  %v6400_v15 = vmul.f32 %v10453_v32, %v6361_v14  ;;  %v12999_v26 = vld [vmem:[#allocation69_spill] sm:$0xff] }
 0x7d6   : > { %v6169_v49 = vsel %vm6156_vm6, %v6120_v48, %v5748_v23  ;;  %v12994_v48 = vld [vmem:[#allocation108_spill] sm:$0xff]  ;;  %v6072_v61 = vsel %vm430_vm1, %v2184_v28, %v10289_v53 }
 0x7d7   : > { %v6217_v40 = vsel %vm1097_vm4, %v6169_v49, %v5940_v0  ;;  %5771 = vrot.lane.b32.xlu2 %v4931_v59, %s7269_s19  ;;  %v6595_v0 = vmax.f32 %v6547_v58, 0.0  ;;  %v12995_v59 = vld [vmem:[#allocation141_spill] sm:$0xff]  ;;  %v6121_v52 = vsel %vm6107_vm5, %v6072_v61, %v5558_v22  ;;  %v13000_v22 = vld [vmem:[#allocation142_spill] sm:$0xff] }
 0x7d8   : > { %v6266_v55 = vsel %vm6253_vm7, %v6217_v40, %v12990_v17  ;;  %v5183_v23 = vmax.f32 %v12995_v59, %v12994_v48  ;;  %v12997_v40 = vld [vmem:[#allocation457_spill] sm:$0xff]  ;;  %v5172_v17 = vmax.f32 %v12918_v63, %v12950_v51 }
 0x7d9   : > { %v6318_v46 = vadd.f32 %v10465_v60, %v6266_v55  ;;  %v5950_v24 = vpop.permute.xlu2 %5949  ;;  %v4552_v57 = vadd.f32 %v12998_v34, %v12997_v40 }
 0x7da   : > { %v5279_v45 = vmax.f32 %v5183_v23, %v12996_v44  ;;  %v5268_v28 = vmax.f32 %v5172_v17, %v13003_v35 }
 0x7db   : > { %5421 = vrot.lane.b32.xlu0 %v3124_v29, %s7267_s18  ;;  %5605 = vrot.lane.b32.xlu1 %v4032_v30, %s7271_s21  ;;  %v6448_v49 = vadd.f32 %v6400_v15, %v6318_v46  ;;  %v1804_v29 = vadd.f32 %v13000_v22, %v12999_v26  ;;  %v4936_v30 = vadd.f32 %v13001_v50, %v4552_v57  ;;  %v13002_v46 = vld [vmem:[#allocation17_spill] sm:$0xff]  ;;  %v13007_v57 = vld [vmem:[#allocation527_spill] sm:$0xff] }
 0x7dc   : > { %7163 = vmatmul.msk.f32.gmra.mxu2 %vm6639_vm8, %v6595_v0  ;;  %v13009_v50 = vld [vmem:[#allocation385_spill] sm:$0xff] }
 0x7dd   : > { %v5562_v56 = vpop.permute.xlu0 %5561  ;;  %v5750_v31 = vpop.permute.xlu1 %5749  ;;  %v6498_v58 = vmul.f32 %v10504_v19, %v6448_v49  ;;  %v13004_v49 = vld [vmem:[#allocation168_spill] sm:$0xff] }
 0x7de   : > { %v6170_v38 = vsel %vm6156_vm6, %v6121_v52, %v5750_v31  ;;  %v2188_v61 = vadd.f32 %v13004_v49, %v1804_v29  ;;  %v13005_v52 = vld [vmem:[#allocation459_spill] sm:$0xff]  ;;  %v13006_v31 = vld [vmem:[#allocation493_spill] sm:$0xff] }
 0x7df   : > { %v6218_v53 = vsel %vm1097_vm4, %v6170_v38, %v5942_v54  ;;  %5987 = vrot.lane.b32.xlu2 %v5279_v45, %s7270_s20  ;;  %v6548_v55 = vadd.f32 %v10515_v27, %v6498_v58  ;;  %v6401_v54 = vmul.f32 %v10526_v13, %v6361_v14  ;;  %v6402_v45 = vmul.f32 %v10508_v9, %v6361_v14  ;;  %v13008_v29 = vld [vmem:[#allocation325_spill] sm:$0xff] }
 0x7e0   : > { %v6267_v15 = vsel %vm6253_vm7, %v6218_v53, %v13002_v46  ;;  %v4548_v58 = vadd.f32 %v13006_v31, %v13005_v52  ;;  %v6076_v34 = vsel %vm430_vm1, %v2188_v61, %v10280_v12  ;;  %v5188_v12 = vmax.f32 %v12971_v21, %v12973_v42  ;;  %v13013_v49 = vld [vmem:[#allocation433_spill] sm:$0xff] }
 0x7e1   : > { %v6319_v0 = vadd.f32 %v10465_v60, %v6267_v15  ;;  %v5946_v23 = vpop.permute.xlu2 %5945  ;;  %v6596_v63 = vmax.f32 %v6548_v55, 0.0  ;;  %v6125_v17 = vsel %vm6107_vm5, %v6076_v34, %v5566_v62  ;;  %v6450_v22 = vadd.f32 %v6402_v45, %v10835_v8  ;;  %v13010_v15 = vld [vmem:[#allocation58_spill] sm:$0xff]  ;;  %v13014_v61 = vld [vmem:[#allocation165_spill] sm:$0xff] }
 0x7e2   : > { %v4932_v38 = vadd.f32 %v13007_v57, %v4548_v58  ;;  %v5284_v45 = vmax.f32 %v5188_v12, %v13014_v61  ;;  %v13016_v57 = vld [vmem:[#allocation132_spill] sm:$0xff] }
 0x7e3   : > { %5781 = vrot.lane.b32.xlu0 %v4936_v30, %s7269_s19  ;;  %5965 = vrot.lane.b32.xlu1 %v5268_v28, %s7270_s20  ;;  %v6449_v40 = vadd.f32 %v6401_v54, %v6319_v0  ;;  %v3640_v30 = vadd.f32 %v13009_v50, %v13008_v29  ;;  %v13011_v28 = vld [vmem:[#allocation145_spill] sm:$0xff]  ;;  %v6500_v34 = vmul.f32 %v10504_v19, %v6450_v22 }
 0x7e4   : > { %7164 = vmatmul.msk.f32.gmra.mxu2 %vm6639_vm8, %v6596_v63  ;;  %v1802_v0 = vadd.f32 %v13011_v28, %v13010_v15  ;;  %v13012_v63 = vld [vmem:[#allocation26_spill] sm:$0xff]  ;;  %v13021_v28 = vld [vmem:[#allocation492_spill] sm:$0xff] }
 0x7e5   : > { %v5564_v53 = vpop.permute.xlu0 %5563  ;;  %v5758_v55 = vpop.permute.xlu1 %5757  ;;  %v6499_v14 = vmul.f32 %v10504_v19, %v6449_v40  ;;  %v4024_v8 = vadd.f32 %v13013_v49, %v3640_v30  ;;  %v13020_v15 = vld [vmem:[#allocation458_spill] sm:$0xff] }
 0x7e6   : > { %v6174_v26 = vsel %vm6156_vm6, %v6125_v17, %v5758_v55  ;;  %v13018_v55 = vld [vmem:[#allocation101_spill] sm:$0xff]  ;;  %v13023_v49 = vld [vmem:[#allocation150_spill] sm:$0xff] }
 0x7e7   : > { %v6222_v46 = vsel %vm1097_vm4, %v6174_v26, %v5950_v24  ;;  %5773 = vrot.lane.b32.xlu2 %v4932_v38, %s7269_s19  ;;  %v6549_v62 = vadd.f32 %v10515_v27, %v6499_v14  ;;  %v13015_v24 = vld [vmem:[#allocation170_spill] sm:$0xff]  ;;  %v13017_v38 = vld [vmem:[#allocation61_spill] sm:$0xff]  ;;  %v13019_v26 = vld [vmem:[#allocation31_spill] sm:$0xff] }
 0x7e8   : > { %v6271_v54 = vsel %vm6253_vm7, %v6222_v46, %v13012_v63  ;;  %v2186_v40 = vadd.f32 %v13015_v24, %v1802_v0  ;;  %v5184_v17 = vmax.f32 %v13017_v38, %v13016_v57  ;;  %v4550_v0 = vadd.f32 %v13021_v28, %v13020_v15  ;;  %v13026_v24 = vld [vmem:[#allocation503_spill] sm:$0xff]  ;;  %v13029_v28 = vld [vmem:[#allocation349_spill] sm:$0xff] }
 0x7e9   : > { %v10920_v52 = vadd.f32 %v10465_v60, %v6271_v54  ;;  %v5948_v31 = vpop.permute.xlu2 %5947  ;;  %v6597_v58 = vmax.f32 %v6549_v62, 0.0  ;;  %v6550_v62 = vadd.f32 %v10515_v27, %v6500_v34  ;;  %v13022_v54 = vld [vmem:[#allocation63_spill] sm:$0xff] }
 0x7ea   : > { %v6074_v14 = vsel %vm430_vm1, %v2186_v40, %v13018_v55  ;;  %v5280_v29 = vmax.f32 %v5184_v17, %v13019_v26  ;;  %v13027_v17 = vld [vmem:[#allocation526_spill] sm:$0xff] }
 0x7eb   : > { %5589 = vrot.lane.b32.xlu1 %v4024_v8, %s7271_s21  ;;  %5997 = vrot.lane.b32.xlu0 %v5284_v45, %s7270_s20  ;;  %v6123_v50 = vsel %vm6107_vm5, %v6074_v14, %v5562_v56  ;;  %v6362_v30 = vperm.slane %v10920_v52, 0  ;;  %v1803_v8 = vadd.f32 %v13023_v49, %v13022_v54  ;;  %v13024_v45 = vld [vmem:[#allocation23_spill] sm:$0xff]  ;;  %v4934_v55 = vadd.f32 %v13027_v17, %v4550_v0  ;;  %v13030_v0 = vld [vmem:[#allocation397_spill] sm:$0xff] }
 0x7ec   : > { %7165 = vmatmul.msk.f32.gmra.mxu2 %vm6639_vm8, %v6597_v58  ;;  %v13025_v58 = vld [vmem:[#allocation469_spill] sm:$0xff] }
 0x7ed   : > { %v5572_v12 = vpop.permute.xlu0 %5571  ;;  %v5754_v22 = vpop.permute.xlu1 %5753  ;;  %v4564_v40 = vadd.f32 %v13026_v24, %v13025_v58 }
 0x7ee   : > { %v6172_v46 = vsel %vm6156_vm6, %v6123_v50, %v5754_v22  ;;  %v6403_v50 = vmul.f32 %v10453_v32, %v6362_v30  ;;  %v13028_v22 = vld [vmem:[#allocation175_spill] sm:$0xff] }
 0x7ef   : > { %v6220_v63 = vsel %vm1097_vm4, %v6172_v46, %v5946_v23  ;;  %5989 = vrot.lane.b32.xlu2 %v5280_v29, %s7270_s20  ;;  %v2187_v23 = vadd.f32 %v13028_v22, %v1803_v8  ;;  %v6598_v46 = vmax.f32 %v6550_v62, 0.0  ;;  %v13031_v62 = vld [vmem:[#allocation338_spill] sm:$0xff] }
 0x7f0   : > { %v6269_v56 = vsel %vm6253_vm7, %v6220_v63, %v13024_v45  ;;  %v3652_v63 = vadd.f32 %v13030_v0, %v13029_v28 }
 0x7f1   : > { %v6321_v34 = vadd.f32 %v10465_v60, %v6269_v56  ;;  %v5956_v14 = vpop.permute.xlu2 %5955  ;;  %v6075_v15 = vsel %vm430_vm1, %v2187_v23, %v10304_v43  ;;  %v13032_v56 = vld [vmem:[#allocation386_spill] sm:$0xff]  ;;  %v13036_v23 = vld [vmem:[#allocation24_spill] sm:$0xff] }
 0x7f2   : > { %v6124_v54 = vsel %vm6107_vm5, %v6075_v15, %v5564_v53  ;;  %v3638_v58 = vadd.f32 %v13032_v56, %v13031_v62  ;;  %v13034_v53 = vld [vmem:[#allocation163_spill] sm:$0xff]  ;;  %v5176_v62 = vmax.f32 %v12929_v1, %v12956_v33  ;;  %v10984_v56 = vld [vmem:[%s11904_s8] ss:$0 sm:$0xff] }
 0x7f3   : > { %5805 = vrot.lane.b32.xlu1 %v4564_v40, %s7269_s19  ;;  %5777 = vrot.lane.b32.xlu0 %v4934_v55, %s7269_s19  ;;  %v6451_v29 = vadd.f32 %v6403_v50, %v6321_v34  ;;  %v5186_v40 = vmax.f32 %v12994_v48, %v12996_v44  ;;  %v13033_v55 = vld [vmem:[#allocation93_spill] sm:$0xff]  ;;  %v13035_v50 = vld [vmem:[#allocation434_spill] sm:$0xff] }
 0x7f4   : > { %7166 = vmatmul.msk.f32.gmra.mxu2 %vm6639_vm8, %v6598_v46  ;;  %v1807_v34 = vadd.f32 %v13034_v53, %v13033_v55  ;;  %v4022_v22 = vadd.f32 %v13035_v50, %v3638_v58 }
 0x7f5   : > { %v5568_v49 = vpop.permute.xlu0 %5567  ;;  %v5756_v45 = vpop.permute.xlu1 %5755  ;;  %v6501_v8 = vmul.f32 %v10504_v19, %v6451_v29  ;;  %v13037_v29 = vld [vmem:[#allocation182_spill] sm:$0xff] }
 0x7f6   : > { %v6173_v24 = vsel %vm6156_vm6, %v6124_v54, %v5756_v45  ;;  %v5282_v15 = vmax.f32 %v5186_v40, %v13037_v29 }
 0x7f7   : > { %v6221_v43 = vsel %vm1097_vm4, %v6173_v24, %v5948_v31  ;;  %5613 = vrot.lane.b32.xlu2 %v3652_v63, %s7271_s21  ;;  %v6551_v17 = vadd.f32 %v10515_v27, %v6501_v8  ;;  %v6404_v31 = vmul.f32 %v10526_v13, %v6362_v30  ;;  %v13038_v63 = vld [vmem:[#allocation189_spill] sm:$0xff]  ;;  %v6405_v8 = vmul.f32 %v10508_v9, %v6362_v30  ;;  %v13039_v24 = vld [vmem:[#allocation158_spill] sm:$0xff] }
 0x7f8   : > { %v6270_v46 = vsel %vm6253_vm7, %v6221_v43, %v13036_v23  ;;  %v2191_v45 = vadd.f32 %v13038_v63, %v1807_v34  ;;  %v13040_v43 = vld [vmem:[#allocation37_spill] sm:$0xff]  ;;  %v13041_v23 = vld [vmem:[#allocation462_spill] sm:$0xff] }
 0x7f9   : > { %v6322_v28 = vadd.f32 %v10465_v60, %v6270_v46  ;;  %v5952_v0 = vpop.permute.xlu2 %5951  ;;  %v6599_v54 = vmax.f32 %v6551_v17, 0.0  ;;  %v5272_v30 = vmax.f32 %v5176_v62, %v13040_v43  ;;  %v13042_v46 = vld [vmem:[#allocation496_spill] sm:$0xff]  ;;  %v13044_v63 = vld [vmem:[#allocation166_spill] sm:$0xff] }
 0x7fa   : > { %v6079_v40 = vsel %vm430_vm1, %v2191_v45, %v13039_v24  ;;  %v13045_v62 = vld [vmem:[#allocation34_spill] sm:$0xff] }
 0x7fb   : > { %5585 = vrot.lane.b32.xlu1 %v4022_v22, %s7271_s21  ;;  %5993 = vrot.lane.b32.xlu0 %v5282_v15, %s7270_s20  ;;  %v6452_v58 = vadd.f32 %v6404_v31, %v6322_v28  ;;  %v6128_v17 = vsel %vm6107_vm5, %v6079_v40, %v5572_v12  ;;  %v6453_v22 = vadd.f32 %v6405_v8, %v10920_v52  ;;  %v13043_v31 = vld [vmem:[#allocation82_spill] sm:$0xff]  ;;  %v13047_v40 = vld [vmem:[#allocation504_spill] sm:$0xff] }
 0x7fc   : > { %7167 = vmatmul.msk.f32.gmra.mxu2 %vm6639_vm8, %v6599_v54  ;;  %v4551_v15 = vadd.f32 %v13042_v46, %v13041_v23  ;;  %v1805_v45 = vadd.f32 %v13044_v63, %v13043_v31  ;;  %v13046_v24 = vld [vmem:[#allocation470_spill] sm:$0xff] }
 0x7fd   : > { %v5570_v1 = vpop.permute.xlu0 %5569  ;;  %v5764_v55 = vpop.permute.xlu1 %5763  ;;  %v6502_v53 = vmul.f32 %v10504_v19, %v6452_v58  ;;  %v4562_v52 = vadd.f32 %v13047_v40, %v13046_v24  ;;  %v13048_v8 = vld [vmem:[#allocation530_spill] sm:$0xff] }
 0x7fe   : > { %v6177_v34 = vsel %vm6156_vm6, %v6128_v17, %v5764_v55  ;;  %v6801_v50 = vpop.f32.mrf.mxu2  ;;  %v4935_v17 = vadd.f32 %v13048_v8, %v4551_v15  ;;  %v13050_v46 = vld [vmem:[#allocation350_spill] sm:$0xff] }
 0x7ff   : > { %v6225_v12 = vsel %vm1097_vm4, %v6177_v34, %v5956_v14  ;;  %v6802_v28 = vadd.f32 %v10984_v56, %v6801_v50  ;;  %5973 = vrot.lane.b32.xlu2 %v5272_v30, %s7270_s20  ;;  %v6552_v54 = vadd.f32 %v10515_v27, %v6502_v53  ;;  %v13049_v34 = vld [vmem:[#allocation191_spill] sm:$0xff]  ;;  %v6503_v50 = vmul.f32 %v10504_v19, %v6453_v22 }
 0x800   : > { %v6274_v58 = vsel %vm6253_vm7, %v6225_v12, %v13045_v62  ;;  %v2189_v53 = vadd.f32 %v13049_v34, %v1805_v45  ;;  %v13052_v45 = vld [vmem:[#allocation342_spill] sm:$0xff] }
 0x801   : > { %v11015_v55 = vadd.f32 %v10465_v60, %v6274_v58  ;;  %6945 = vst.msk [vmem:[%s10997_s11] sm:$0xff] %vm6639_vm8, %v6802_v28  ;;  %v5954_v14 = vpop.permute.xlu2 %5953  ;;  %v6600_v30 = vmax.f32 %v6552_v54, 0.0  ;;  %v13051_v60 = vld [vmem:[#allocation398_spill] sm:$0xff]  ;;  %v6553_v63 = vadd.f32 %v10515_v27, %v6503_v50 }
 0x802   : > { %v6077_v23 = vsel %vm430_vm1, %v2189_v53, %v10302_v37  ;;  %v3650_v15 = vadd.f32 %v13051_v60, %v13050_v46  ;;  %v13053_v62 = vld [vmem:[#allocation390_spill] sm:$0xff]  ;;  %v5187_v37 = vmax.f32 %v13016_v57, %v13019_v26 }
 0x803   : > { %5801 = vrot.lane.b32.xlu1 %v4562_v52, %s7269_s19  ;;  %5779 = vrot.lane.b32.xlu0 %v4935_v17, %s7269_s19  ;;  %v6126_v12 = vsel %vm6107_vm5, %v6077_v23, %v5568_v49  ;;  %v6363_v28 = vperm.slane %v11015_v55, 0  ;;  %v3639_v58 = vadd.f32 %v13053_v62, %v13052_v45  ;;  %v13054_v49 = vld [vmem:[#allocation88_spill] sm:$0xff]  ;;  %v13055_v52 = vld [vmem:[#allocation171_spill] sm:$0xff]  ;;  %v13056_v17 = vld [vmem:[#allocation29_spill] sm:$0xff]  ;;  %v6601_v45 = vmax.f32 %v6553_v63, 0.0 }
 0x804   : > { %7168 = vmatmul.msk.f32.gmra.mxu2 %vm6639_vm8, %v6600_v30  ;;  %v1806_v8 = vadd.f32 %v13055_v52, %v13054_v49  ;;  %v13057_v53 = vld [vmem:[#allocation438_spill] sm:$0xff]  ;;  %v13058_v23 = vld [vmem:[#allocation81_spill] sm:$0xff]  ;;  %v5174_v62 = vmax.f32 %v12939_v11, %v12979_v39 }
 0x805   : > { %v5578_v54 = vpop.permute.xlu0 %5577  ;;  %v5760_v31 = vpop.permute.xlu1 %5759  ;;  %v4023_v50 = vadd.f32 %v13057_v53, %v3639_v58  ;;  %v5283_v46 = vmax.f32 %v5187_v37, %v13058_v23  ;;  %v11048_v60 = vld [vmem:[%s11900_s4] ss:$0 sm:$0xff]  ;;  %v13062_v53 = vld [vmem:[#allocation184_spill] sm:$0xff] }
 0x806   : > { %v6175_v22 = vsel %vm6156_vm6, %v6126_v12, %v5760_v31  ;;  %v6406_v12 = vmul.f32 %v10453_v32, %v6363_v28  ;;  %v13059_v31 = vld [vmem:[#allocation196_spill] sm:$0xff] }
 0x807   : > { %v6223_v24 = vsel %vm1097_vm4, %v6175_v22, %v5952_v0  ;;  %v6804_v40 = vpop.f32.mrf.mxu2  ;;  %5609 = vrot.lane.b32.xlu2 %v3650_v15, %s7271_s21  ;;  %v2190_v22 = vadd.f32 %v13059_v31, %v1806_v8 }
 0x808   : > { %v6272_v30 = vsel %vm6253_vm7, %v6223_v24, %v13056_v17  ;;  %v6805_v34 = vadd.f32 %v10984_v56, %v6804_v40  ;;  %v13060_v24 = vld [vmem:[#allocation86_spill] sm:$0xff] }
 0x809   : > { %v6324_v0 = vadd.f32 %v11048_v60, %v6272_v30  ;;  %v5962_v15 = vpop.permute.xlu2 %5961  ;;  %v6078_v37 = vsel %vm430_vm1, %v2190_v22, %v10320_v5  ;;  %v5270_v40 = vmax.f32 %v5174_v62, %v13060_v24  ;;  %v13066_v22 = vld [vmem:[#allocation474_spill] sm:$0xff] }
 0x80a   : > { %6946 = vst.msk [vmem:[%s10997_s11 + $0x8] sm:$0xff] %vm6639_vm8, %v6805_v34  ;;  %v6127_v49 = vsel %vm6107_vm5, %v6078_v37, %v5570_v1  ;;  %v13061_v34 = vld [vmem:[#allocation114_spill] sm:$0xff] }
 0x80b   : > { %5587 = vrot.lane.b32.xlu1 %v4023_v50, %s7271_s21  ;;  %5995 = vrot.lane.b32.xlu0 %v5283_v46, %s7270_s20  ;;  %v6454_v58 = vadd.f32 %v6406_v12, %v6324_v0  ;;  %v1810_v50 = vadd.f32 %v13062_v53, %v13061_v34  ;;  %v13063_v46 = vld [vmem:[#allocation352_spill] sm:$0xff]  ;;  %v13065_v12 = vld [vmem:[#allocation30_spill] sm:$0xff] }
 0x80c   : > { %7169 = vmatmul.msk.f32.gmra.mxu2 %vm6639_vm8, %v6601_v45  ;;  %v13064_v0 = vld [vmem:[#allocation400_spill] sm:$0xff] }
 0x80d   : > { %v5574_v52 = vpop.permute.xlu0 %5573  ;;  %v5762_v8 = vpop.permute.xlu1 %5761  ;;  %v6504_v63 = vmul.f32 %v10504_v19, %v6454_v58  ;;  %v3655_v1 = vadd.f32 %v13064_v0, %v13063_v46  ;;  %v13067_v45 = vld [vmem:[#allocation508_spill] sm:$0xff] }
 0x80e   : > { %v6176_v11 = vsel %vm6156_vm6, %v6127_v49, %v5762_v8  ;;  %v4563_v62 = vadd.f32 %v13067_v45, %v13066_v22  ;;  %v6408_v8 = vmul.f32 %v10508_v9, %v6363_v28  ;;  %v13072_v22 = vld [vmem:[#allocation187_spill] sm:$0xff] }
 0x80f   : > { %v6224_v17 = vsel %vm1097_vm4, %v6176_v11, %v5954_v14  ;;  %v6807_v30 = vpop.f32.mrf.mxu2  ;;  %5969 = vrot.lane.b32.xlu2 %v5270_v40, %s7270_s20  ;;  %v6554_v5 = vadd.f32 %v10515_v27, %v6504_v63  ;;  %v6407_v27 = vmul.f32 %v10526_v13, %v6363_v28  ;;  %v13068_v40 = vld [vmem:[#allocation211_spill] sm:$0xff]  ;;  %v11095_v28 = vld [vmem:[%s11902_s6] ss:$0 sm:$0xff] }
 0x810   : > { %v6273_v31 = vsel %vm6253_vm7, %v6224_v17, %v13065_v12  ;;  %v6808_v19 = vadd.f32 %v10984_v56, %v6807_v30  ;;  %v2194_v49 = vadd.f32 %v13068_v40, %v1810_v50  ;;  %v13069_v17 = vld [vmem:[#allocation354_spill] sm:$0xff] }
 0x811   : > { %v6325_v14 = vadd.f32 %v11048_v60, %v6273_v31  ;;  %v5958_v58 = vpop.permute.xlu2 %5957  ;;  %v6602_v37 = vmax.f32 %v6554_v5, 0.0  ;;  %v13070_v30 = vld [vmem:[#allocation402_spill] sm:$0xff] }
 0x812   : > { %6947 = vst.msk [vmem:[%s10997_s11 + $0x10] sm:$0xff] %vm6639_vm8, %v6808_v19  ;;  %v6082_v11 = vsel %vm430_vm1, %v2194_v49, %v10311_v7  ;;  %v3651_v5 = vadd.f32 %v13070_v30, %v13069_v17  ;;  %v6456_v7 = vadd.f32 %v6408_v8, %v11015_v55  ;;  %v13071_v19 = vld [vmem:[#allocation103_spill] sm:$0xff]  ;;  %v13076_v8 = vld [vmem:[#allocation212_spill] sm:$0xff]  ;;  %v5175_v17 = vmax.f32 %v12950_v51, %v13003_v35 }
 0x813   : > { %5803 = vrot.lane.b32.xlu1 %v4563_v62, %s7269_s19  ;;  %5619 = vrot.lane.b32.xlu0 %v3655_v1, %s7271_s21  ;;  %v6455_v63 = vadd.f32 %v6407_v27, %v6325_v14  ;;  %v6131_v34 = vsel %vm6107_vm5, %v6082_v11, %v5578_v54  ;;  %v5179_v1 = vmax.f32 %v12956_v33, %v13040_v43  ;;  %v11107_v54 = vld [vmem:[%s11902_s6 + $0x1] ss:$0 sm:$0xff] }
 0x814   : > { %7170 = vmatmul.msk.f32.gmra.mxu2 %vm6639_vm8, %v6602_v37  ;;  %v1808_v45 = vadd.f32 %v13072_v22, %v13071_v19  ;;  %v13073_v62 = vld [vmem:[#allocation54_spill] sm:$0xff]  ;;  %v13075_v37 = vld [vmem:[#allocation316_spill] sm:$0xff]  ;;  %v6506_v11 = vmul.f32 %v11095_v28, %v6456_v7 }
 0x815   : > { %v5576_v53 = vpop.permute.xlu0 %5575  ;;  %v5770_v50 = vpop.permute.xlu1 %5769  ;;  %v6505_v46 = vmul.f32 %v11095_v28, %v6455_v63  ;;  %v13074_v14 = vld [vmem:[#allocation286_spill] sm:$0xff] }
 0x816   : > { %v6180_v0 = vsel %vm6156_vm6, %v6131_v34, %v5770_v50  ;;  %v2743_v33 = vadd.f32 %v13075_v37, %v13074_v14  ;;  %v2192_v63 = vadd.f32 %v13076_v8, %v1808_v45  ;;  %v13081_v22 = vld [vmem:[#allocation494_spill] sm:$0xff]  ;;  %v13083_v14 = vld [vmem:[#allocation192_spill] sm:$0xff]  ;;  %v13085_v8 = vld [vmem:[#allocation437_spill] sm:$0xff] }
 0x817   : > { %v6228_v12 = vsel %vm1097_vm4, %v6180_v0, %v5962_v15  ;;  %5611 = vrot.lane.b32.xlu2 %v3651_v5, %s7271_s21  ;;  %v6555_v31 = vadd.f32 %v11107_v54, %v6505_v46  ;;  %v5275_v15 = vmax.f32 %v5179_v1, %v12972_v41  ;;  %v13077_v5 = vld [vmem:[#allocation161_spill] sm:$0xff]  ;;  %v6556_v1 = vadd.f32 %v11107_v54, %v6506_v11  ;;  %v13086_v11 = vld [vmem:[#allocation528_spill] sm:$0xff] }
 0x818   : > { %v6277_v55 = vsel %vm6253_vm7, %v6228_v12, %v13073_v62  ;;  %v6080_v30 = vsel %vm430_vm1, %v2192_v63, %v10318_v47  ;;  %v5271_v34 = vmax.f32 %v5175_v17, %v13077_v5  ;;  %v13078_v12 = vld [vmem:[#allocation341_spill] sm:$0xff]  ;;  %v13080_v47 = vld [vmem:[#allocation460_spill] sm:$0xff] }
 0x819   : > { %v11118_v27 = vadd.f32 %v11048_v60, %v6277_v55  ;;  %v5960_v40 = vpop.permute.xlu2 %5959  ;;  %v6603_v49 = vmax.f32 %v6555_v31, 0.0  ;;  %v6129_v50 = vsel %vm6107_vm5, %v6080_v30, %v5574_v52  ;;  %v13079_v31 = vld [vmem:[#allocation389_spill] sm:$0xff]  ;;  %v4555_v45 = vadd.f32 %v13081_v22, %v13080_v47 }
 0x81a   : > { %v3641_v19 = vadd.f32 %v13079_v31, %v13078_v12  ;;  %v13082_v52 = vld [vmem:[#allocation109_spill] sm:$0xff]  ;;  %v13088_v12 = vld [vmem:[#allocation340_spill] sm:$0xff] }
 0x81b   : > { %5427 = vrot.lane.b32.xlu1 %v2743_v33, %s7267_s18  ;;  %5979 = vrot.lane.b32.xlu0 %v5275_v15, %s7270_s20  ;;  %v6364_v46 = vperm.slane %v11118_v27, 0  ;;  %v1809_v37 = vadd.f32 %v13083_v14, %v13082_v52  ;;  %v13084_v33 = vld [vmem:[#allocation43_spill] sm:$0xff]  ;;  %v4939_v17 = vadd.f32 %v13086_v11, %v4555_v45  ;;  %v13089_v31 = vld [vmem:[#allocation388_spill] sm:$0xff]  ;;  %v13093_v11 = vld [vmem:[#allocation473_spill] sm:$0xff] }
 0x81c   : > { %7171 = vmatmul.msk.f32.gmra.mxu2 %vm6639_vm8, %v6603_v49  ;;  %v4025_v63 = vadd.f32 %v13085_v8, %v3641_v19  ;;  %v3643_v47 = vadd.f32 %v13089_v31, %v13088_v12  ;;  %v13090_v45 = vld [vmem:[#allocation436_spill] sm:$0xff] }
 0x81d   : > { %v11132_v0 = vpop.permute.xlu0 %5583  ;;  %v5766_v7 = vpop.permute.xlu1 %5765  ;;  %v13091_v8 = vld [vmem:[#allocation220_spill] sm:$0xff] }
 0x81e   : > { %v6178_v51 = vsel %vm6156_vm6, %v6129_v50, %v5766_v7  ;;  %v13087_v7 = vld [vmem:[#allocation218_spill] sm:$0xff] }
 0x81f   : > { %v6226_v62 = vsel %vm1097_vm4, %v6178_v51, %v5958_v58  ;;  %v6810_v55 = vpop.f32.mrf.mxu2  ;;  %5971 = vrot.lane.b32.xlu2 %v5271_v34, %s7270_s20  ;;  %v6409_v58 = vmul.f32 %v10453_v32, %v6364_v46  ;;  %v2193_v34 = vadd.f32 %v13087_v7, %v1809_v37  ;;  %v6604_v51 = vmax.f32 %v6556_v1, 0.0 }
 0x820   : > { %v6275_v15 = vsel %vm6253_vm7, %v6226_v62, %v13084_v33  ;;  %v6811_v49 = vadd.f32 %v10984_v56, %v6810_v55  ;;  %v4027_v62 = vadd.f32 %v13090_v45, %v3643_v47  ;;  %v5191_v33 = vmax.f32 %v12973_v42, %v13014_v61 }
 0x821   : > { %v6327_v30 = vadd.f32 %v11048_v60, %v6275_v15  ;;  %v11150_v50 = vpop.permute.xlu2 %5775  ;;  %v6081_v22 = vsel %vm430_vm1, %v2193_v34, %v10336_v10  ;;  %v6410_v47 = vmul.f32 %v10526_v13, %v6364_v46 }
 0x822   : > { %6948 = vst.msk [vmem:[%s10997_s11 + $0x18] sm:$0xff] %vm6639_vm8, %v6811_v49  ;;  %v6130_v55 = vsel %vm6107_vm5, %v6081_v22, %v5576_v53  ;;  %v13097_v22 = vld [vmem:[#allocation298_spill] sm:$0xff] }
 0x823   : > { %5787 = vrot.lane.b32.xlu1 %v4939_v17, %s7269_s19  ;;  %5591 = vrot.lane.b32.xlu0 %v4025_v63, %s7271_s21  ;;  %v6457_v19 = vadd.f32 %v6409_v58, %v6327_v30  ;;  %v13092_v63 = vld [vmem:[#allocation280_spill] sm:$0xff]  ;;  %v13094_v17 = vld [vmem:[#allocation507_spill] sm:$0xff] }
 0x824   : > { %7172 = vmatmul.msk.f32.gmra.mxu2 %vm6639_vm8, %v6604_v51  ;;  %v1825_v53 = vadd.f32 %v13092_v63, %v13091_v8  ;;  %v4565_v30 = vadd.f32 %v13094_v17, %v13093_v11  ;;  %v13095_v58 = vld [vmem:[#allocation48_spill] sm:$0xff]  ;;  %v13096_v51 = vld [vmem:[#allocation79_spill] sm:$0xff]  ;;  %v13101_v17 = vld [vmem:[#allocation321_spill] sm:$0xff] }
 0x825   : > { %v5800_v52 = vpop.permute.xlu0 %5799  ;;  %v5768_v14 = vpop.permute.xlu1 %5767  ;;  %v6507_v1 = vmul.f32 %v11095_v28, %v6457_v19  ;;  %v5287_v42 = vmax.f32 %v5191_v33, %v13096_v51  ;;  %v6411_v19 = vmul.f32 %v10508_v9, %v6364_v46  ;;  %v13100_v11 = vld [vmem:[#allocation291_spill] sm:$0xff] }
 0x826   : > { %v6179_v37 = vsel %vm6156_vm6, %v6130_v55, %v5768_v14  ;;  %v2209_v45 = vadd.f32 %v13097_v22, %v1825_v53  ;;  %v13098_v55 = vld [vmem:[#allocation472_spill] sm:$0xff]  ;;  %v13099_v14 = vld [vmem:[#allocation506_spill] sm:$0xff] }
 0x827   : > { %v6227_v15 = vsel %vm1097_vm4, %v6179_v37, %v5960_v40  ;;  %v6813_v49 = vpop.f32.mrf.mxu2  ;;  %5595 = vrot.lane.b32.xlu2 %v4027_v62, %s7271_s21  ;;  %v6557_v10 = vadd.f32 %v11107_v54, %v6507_v1  ;;  %v4567_v1 = vadd.f32 %v13099_v14, %v13098_v55  ;;  %v13108_v55 = vld [vmem:[#allocation317_spill] sm:$0xff] }
 0x828   : > { %v6276_v7 = vsel %vm6253_vm7, %v6227_v15, %v13095_v58  ;;  %v6814_v34 = vadd.f32 %v10984_v56, %v6813_v49  ;;  %v6097_v37 = vsel %vm430_vm1, %v2209_v45, %v10395_v36  ;;  %v13102_v36 = vld [vmem:[#allocation353_spill] sm:$0xff]  ;;  %v13106_v45 = vld [vmem:[#allocation230_spill] sm:$0xff] }
 0x829   : > { %v6328_v40 = vadd.f32 %v11048_v60, %v6276_v7  ;;  %v5992_v12 = vpop.permute.xlu2 %5991  ;;  %v6605_v31 = vmax.f32 %v6557_v10, 0.0  ;;  %v6459_v10 = vadd.f32 %v6411_v19, %v11118_v27  ;;  %v13103_v58 = vld [vmem:[#allocation401_spill] sm:$0xff] }
 0x82a   : > { %6949 = vst.msk [vmem:[%s10997_s11 + $0x20] sm:$0xff] %vm6639_vm8, %v6814_v34  ;;  %v3653_v7 = vadd.f32 %v13103_v58, %v13102_v36  ;;  %v13113_v58 = vld [vmem:[#allocation210_spill] sm:$0xff] }
 0x82b   : > { %5807 = vrot.lane.b32.xlu0 %v4565_v30, %s7269_s19  ;;  %6003 = vrot.lane.b32.xlu1 %v5287_v42, %s7270_s20  ;;  %v6458_v62 = vadd.f32 %v6410_v47, %v6328_v40  ;;  %v2742_v30 = vadd.f32 %v13101_v17, %v13100_v11  ;;  %v6509_v27 = vmul.f32 %v11095_v28, %v6459_v10  ;;  %v13105_v47 = vld [vmem:[#allocation206_spill] sm:$0xff] }
 0x82c   : > { %7173 = vmatmul.msk.f32.gmra.mxu2 %vm6639_vm8, %v6605_v31  ;;  %v13104_v31 = vld [vmem:[#allocation135_spill] sm:$0xff] }
 0x82d   : > { %v11193_v33 = vpop.permute.xlu0 %5579  ;;  %v5608_v15 = vpop.permute.xlu1 %5607  ;;  %v6508_v46 = vmul.f32 %v11095_v28, %v6458_v62  ;;  %v1813_v19 = vadd.f32 %v13105_v47, %v13104_v31  ;;  %v13107_v62 = vld [vmem:[#allocation287_spill] sm:$0xff] }
 0x82e   : > { %v6146_v49 = vsel %vm6107_vm5, %v6097_v37, %v5608_v15  ;;  %v2741_v14 = vadd.f32 %v13108_v55, %v13107_v62  ;;  %v6559_v15 = vadd.f32 %v11107_v54, %v6509_v27  ;;  %v13117_v62 = vld [vmem:[#allocation461_spill] sm:$0xff]  ;;  %v13118_v55 = vld [vmem:[#allocation495_spill] sm:$0xff] }
 0x82f   : > { %v6816_v8 = vpop.f32.mrf.mxu2  ;;  %5811 = vrot.lane.b32.xlu2 %v4567_v1, %s7269_s19  ;;  %v6558_v63 = vadd.f32 %v11107_v54, %v6508_v46  ;;  %v6195_v34 = vsel %vm6156_vm6, %v6146_v49, %v5800_v52  ;;  %v2197_v52 = vadd.f32 %v13106_v45, %v1813_v19  ;;  %v13109_v46 = vld [vmem:[#allocation465_spill] sm:$0xff]  ;;  %v13110_v49 = vld [vmem:[#allocation499_spill] sm:$0xff] }
 0x830   : > { %v6817_v53 = vadd.f32 %v10984_v56, %v6816_v8  ;;  %v6243_v22 = vsel %vm1097_vm4, %v6195_v34, %v5992_v12  ;;  %v4554_v10 = vadd.f32 %v13110_v49, %v13109_v46  ;;  %v5177_v8 = vmax.f32 %v12979_v39, %v13060_v24  ;;  %v13116_v45 = vld [vmem:[#allocation299_spill] sm:$0xff] }
 0x831   : > { %v11206_v42 = vpop.permute.xlu2 %5771  ;;  %v6606_v40 = vmax.f32 %v6558_v63, 0.0  ;;  %v13111_v63 = vld [vmem:[#allocation186_spill] sm:$0xff] }
 0x832   : > { %6950 = vst.msk [vmem:[%s10997_s11 + $0x28] sm:$0xff] %vm6639_vm8, %v6817_v53  ;;  %v6085_v12 = vsel %vm430_vm1, %v2197_v52, %v13111_v63  ;;  %v13112_v53 = vld [vmem:[#allocation157_spill] sm:$0xff]  ;;  %v5273_v39 = vmax.f32 %v5177_v8, %v12995_v59 }
 0x833   : > { %5425 = vrot.lane.b32.xlu0 %v2742_v30, %s7267_s18  ;;  %5615 = vrot.lane.b32.xlu1 %v3653_v7, %s7271_s21  ;;  %v6292_v11 = vsel %vm6253_vm7, %v6243_v22, %v13112_v53  ;;  %v6134_v30 = vsel %vm6107_vm5, %v6085_v12, %v11132_v0  ;;  %v13114_v7 = vld [vmem:[#allocation281_spill] sm:$0xff]  ;;  %v6607_v0 = vmax.f32 %v6559_v15, 0.0  ;;  %v13121_v53 = vld [vmem:[#allocation124_spill] sm:$0xff] }
 0x834   : > { %7174 = vmatmul.msk.f32.gmra.mxu2 %vm6639_vm8, %v6606_v40  ;;  %v1823_v34 = vadd.f32 %v13114_v7, %v13113_v58  ;;  %v13115_v40 = vld [vmem:[#allocation533_spill] sm:$0xff]  ;;  %v6183_v31 = vsel %vm6156_vm6, %v6134_v30, %v11150_v50  ;;  %v11240_v19 = vadd.f32 %v11048_v60, %v6292_v11  ;;  %v13122_v11 = vld [vmem:[#allocation208_spill] sm:$0xff] }
 0x835   : > { %v5796_v1 = vpop.permute.xlu0 %5795  ;;  %v5968_v37 = vpop.permute.xlu1 %5967  ;;  %v4938_v27 = vadd.f32 %v13115_v40, %v4554_v10  ;;  %v13119_v50 = vld [vmem:[#allocation529_spill] sm:$0xff] }
 0x836   : > { %v6231_v22 = vsel %vm1097_vm4, %v6183_v31, %v5968_v37  ;;  %v2207_v52 = vadd.f32 %v13116_v45, %v1823_v34  ;;  %v13120_v37 = vld [vmem:[#allocation75_spill] sm:$0xff]  ;;  %v11259_v63 = vperm.slane %v11240_v19, 0  ;;  %v13123_v30 = vld [vmem:[#allocation345_spill] sm:$0xff] }
 0x837   : > { %v6819_v17 = vpop.f32.mrf.mxu2  ;;  %5423 = vrot.lane.b32.xlu2 %v2741_v14, %s7267_s18  ;;  %v4553_v14 = vadd.f32 %v13118_v55, %v13117_v62  ;;  %v6280_v10 = vsel %vm6253_vm7, %v6231_v22, %v13120_v37  ;;  %v13125_v31 = vld [vmem:[#allocation231_spill] sm:$0xff] }
 0x838   : > { %v6820_v36 = vadd.f32 %v10984_v56, %v6819_v17  ;;  %v6095_v49 = vsel %vm430_vm1, %v2207_v52, %v10402_v18  ;;  %v1811_v17 = vadd.f32 %v13122_v11, %v13121_v53  ;;  %v5190_v18 = vmax.f32 %v13019_v26, %v13058_v23  ;;  %v13127_v52 = vld [vmem:[#allocation137_spill] sm:$0xff]  ;;  %v13128_v55 = vld [vmem:[#allocation143_spill] sm:$0xff] }
 0x839   : > { %v5988_v47 = vpop.permute.xlu2 %5987  ;;  %v4937_v46 = vadd.f32 %v13119_v50, %v4553_v14  ;;  %v11271_v40 = vadd.f32 %v11048_v60, %v6280_v10  ;;  %v6424_v50 = vmul.f32 %v10453_v32, %v11259_v63 }
 0x83a   : > { %6951 = vst.msk [vmem:[%s10997_s11 + $0x30] sm:$0xff] %vm6639_vm8, %v6820_v36  ;;  %v13124_v36 = vld [vmem:[#allocation393_spill] sm:$0xff]  ;;  %v2195_v22 = vadd.f32 %v13125_v31, %v1811_v17  ;;  %v5286_v62 = vmax.f32 %v5190_v18, %v13127_v52  ;;  %v13133_v31 = vld [vmem:[#allocation355_spill] sm:$0xff] }
 0x83b   : > { %5785 = vrot.lane.b32.xlu0 %v4938_v27, %s7269_s19  ;;  %5975 = vrot.lane.b32.xlu1 %v5273_v39, %s7270_s20  ;;  %v3642_v58 = vadd.f32 %v13124_v36, %v13123_v30  ;;  %v11296_v37 = vperm.slane %v11271_v40, 0  ;;  %v13130_v30 = vld [vmem:[#allocation64_spill] sm:$0xff] }
 0x83c   : > { %7175 = vmatmul.msk.f32.gmra.mxu2 %vm6639_vm8, %v6607_v0  ;;  %v13126_v0 = vld [vmem:[#allocation441_spill] sm:$0xff] }
 0x83d   : > { %v11256_v15 = vpop.permute.xlu0 %5581  ;;  %v5604_v8 = vpop.permute.xlu1 %5603  ;;  %v4026_v45 = vadd.f32 %v13126_v0, %v3642_v58  ;;  %v6412_v18 = vmul.f32 %v10453_v32, %v11296_v37 }
 0x83e   : > { %v6144_v12 = vsel %vm6107_vm5, %v6095_v49, %v5604_v8  ;;  %v13129_v8 = vld [vmem:[#allocation134_spill] sm:$0xff] }
 0x83f   : > { %v6193_v7 = vsel %vm6156_vm6, %v6144_v12, %v5796_v1  ;;  %v6822_v34 = vpop.f32.mrf.mxu2  ;;  %5783 = vrot.lane.b32.xlu2 %v4937_v46, %s7269_s19  ;;  %v6083_v46 = vsel %vm430_vm1, %v2195_v22, %v10334_v16  ;;  %v13134_v22 = vld [vmem:[#allocation403_spill] sm:$0xff] }
 0x840   : > { %v6241_v27 = vsel %vm1097_vm4, %v6193_v7, %v5988_v47  ;;  %v6823_v39 = vadd.f32 %v10984_v56, %v6822_v34  ;;  %v5189_v47 = vmax.f32 %v12996_v44, %v13037_v29  ;;  %v6132_v49 = vsel %vm6107_vm5, %v6083_v46, %v11193_v33  ;;  %v13131_v34 = vld [vmem:[#allocation216_spill] sm:$0xff] }
 0x841   : > { %v6290_v26 = vsel %vm6253_vm7, %v6241_v27, %v13128_v55  ;;  %v11280_v1 = vpop.permute.xlu2 %5773  ;;  %v6181_v53 = vsel %vm6156_vm6, %v6132_v49, %v11206_v42  ;;  %v13132_v27 = vld [vmem:[#allocation285_spill] sm:$0xff]  ;;  %v3658_v0 = vadd.f32 %v13134_v22, %v13133_v31  ;;  %v13142_v31 = vld [vmem:[#allocation236_spill] sm:$0xff] }
 0x842   : > { %v6342_v14 = vadd.f32 %v11048_v60, %v6290_v26  ;;  %6952 = vst.msk [vmem:[%s10997_s11 + $0x38] sm:$0xff] %vm6639_vm8, %v6823_v39  ;;  %v5285_v12 = vmax.f32 %v5189_v47, %v13129_v8  ;;  %v1824_v39 = vadd.f32 %v13132_v27, %v13131_v34  ;;  %v13137_v47 = vld [vmem:[#allocation303_spill] sm:$0xff] }
 0x843   : > { %6001 = vrot.lane.b32.xlu0 %v5286_v62, %s7270_s20  ;;  %5593 = vrot.lane.b32.xlu1 %v4026_v45, %s7271_s21  ;;  %v13135_v45 = vld [vmem:[#allocation477_spill] sm:$0xff]  ;;  %v13136_v62 = vld [vmem:[#allocation511_spill] sm:$0xff] }
 0x844   : > { %v6472_v10 = vadd.f32 %v6424_v50, %v6342_v14  ;;  %v4566_v55 = vadd.f32 %v13136_v62, %v13135_v45  ;;  %v2208_v46 = vadd.f32 %v13137_v47, %v1824_v39  ;;  %v13144_v45 = vld [vmem:[#allocation334_spill] sm:$0xff] }
 0x845   : > { %v5798_v44 = vpop.permute.xlu0 %5797  ;;  %v5964_v11 = vpop.permute.xlu1 %5963 }
 0x846   : > { %v6522_v16 = vmul.f32 %v11095_v28, %v6472_v10  ;;  %v6229_v17 = vsel %vm1097_vm4, %v6181_v53, %v5964_v11  ;;  %v13138_v10 = vld [vmem:[#allocation357_spill] sm:$0xff]  ;;  %v6096_v11 = vsel %vm430_vm1, %v2208_v46, %v10422_v2 }
 0x847   : > { %v6278_v36 = vsel %vm6253_vm7, %v6229_v17, %v13130_v30  ;;  %v6825_v33 = vpop.f32.mrf.mxu2  ;;  %5999 = vrot.lane.b32.xlu2 %v5285_v12, %s7270_s20  ;;  %v13139_v12 = vld [vmem:[#allocation405_spill] sm:$0xff] }
 0x848   : > { %v6330_v58 = vadd.f32 %v11048_v60, %v6278_v36  ;;  %v6826_v42 = vadd.f32 %v10984_v56, %v6825_v33  ;;  %v6572_v7 = vadd.f32 %v11107_v54, %v6522_v16  ;;  %v3654_v53 = vadd.f32 %v13139_v12, %v13138_v10  ;;  %v13140_v33 = vld [vmem:[#allocation130_spill] sm:$0xff] }
 0x849   : > { %v5990_v26 = vpop.permute.xlu2 %5989 }
 0x84a   : > { %v6460_v14 = vadd.f32 %v6412_v18, %v6330_v58  ;;  %6953 = vst.msk [vmem:[%s10997_s11 + $0x40] sm:$0xff] %vm6639_vm8, %v6826_v42  ;;  %v6620_v50 = vmax.f32 %v6572_v7, 0.0  ;;  %v13141_v58 = vld [vmem:[#allocation213_spill] sm:$0xff]  ;;  %v5182_v42 = vmax.f32 %v13040_v43, %v12972_v41 }
 0x84b   : > { %5625 = vrot.lane.b32.xlu0 %v3658_v0, %s7271_s21  ;;  %5809 = vrot.lane.b32.xlu1 %v4566_v55, %s7269_s19  ;;  %v1812_v18 = vadd.f32 %v13141_v58, %v13140_v33  ;;  %v13143_v0 = vld [vmem:[#allocation301_spill] sm:$0xff]  ;;  %v13148_v33 = vld [vmem:[#allocation463_spill] sm:$0xff] }
 0x84c   : > { %v6510_v49 = vmul.f32 %v11095_v28, %v6460_v14  ;;  %7188 = vmatmul.msk.f32.vlgmr.msra.gmra.mxu3 %vm6639_vm8, %v6620_v50  ;;  %v2746_v62 = vadd.f32 %v13144_v45, %v13143_v0  ;;  %v5278_v55 = vmax.f32 %v5182_v42, %v12971_v21  ;;  %v13145_v14 = vld [vmem:[#allocation148_spill] sm:$0xff]  ;;  %v6425_v50 = vmul.f32 %v10526_v13, %v11259_v63 }
 0x84d   : > { %v11328_v16 = vpop.permute.xlu0 %5421  ;;  %v5606_v17 = vpop.permute.xlu1 %5605  ;;  %v2196_v22 = vadd.f32 %v13142_v31, %v1812_v18  ;;  %v5178_v21 = vmax.f32 %v13003_v35, %v13077_v5  ;;  %v6414_v18 = vmul.f32 %v10508_v9, %v11296_v37  ;;  %v13150_v42 = vld [vmem:[#allocation68_spill] sm:$0xff]  ;;  %v13152_v31 = vld [vmem:[#allocation226_spill] sm:$0xff] }
 0x84e   : > { %v6145_v30 = vsel %vm6107_vm5, %v6096_v11, %v5606_v17  ;;  %v6560_v36 = vadd.f32 %v11107_v54, %v6510_v49  ;;  %v13146_v17 = vld [vmem:[#allocation344_spill] sm:$0xff] }
 0x84f   : > { %v6194_v7 = vsel %vm6156_vm6, %v6145_v30, %v5798_v44  ;;  %v6828_v34 = vpop.f32.mrf.mxu2  ;;  %5617 = vrot.lane.b32.xlu2 %v3654_v53, %s7271_s21  ;;  %v6426_v44 = vmul.f32 %v10508_v9, %v11259_v63  ;;  %v6084_v47 = vsel %vm430_vm1, %v2196_v22, %v10353_v4  ;;  %v5274_v63 = vmax.f32 %v5178_v21, %v13017_v38  ;;  %v13147_v30 = vld [vmem:[#allocation392_spill] sm:$0xff]  ;;  %v13156_v21 = vld [vmem:[#allocation343_spill] sm:$0xff] }
 0x850   : > { %v6242_v2 = vsel %vm1097_vm4, %v6194_v7, %v5990_v26  ;;  %v6829_v27 = vadd.f32 %v10984_v56, %v6828_v34  ;;  %v6608_v39 = vmax.f32 %v6560_v36, 0.0  ;;  %v6133_v46 = vsel %vm6107_vm5, %v6084_v47, %v11256_v15  ;;  %v13149_v15 = vld [vmem:[#allocation497_spill] sm:$0xff]  ;;  %v13153_v0 = vld [vmem:[#allocation440_spill] sm:$0xff]  ;;  %v13157_v47 = vld [vmem:[#allocation391_spill] sm:$0xff] }
 0x851   : > { %v6291_v41 = vsel %vm6253_vm7, %v6242_v2, %v13145_v14  ;;  %v11346_v43 = vpop.permute.xlu2 %5613  ;;  %v6182_v10 = vsel %vm6156_vm6, %v6133_v46, %v11280_v1  ;;  %v6474_v35 = vadd.f32 %v6426_v44, %v11240_v19  ;;  %v3644_v36 = vadd.f32 %v13147_v30, %v13146_v17 }
 0x852   : > { %v6343_v26 = vadd.f32 %v11048_v60, %v6291_v41  ;;  %6954 = vst.msk [vmem:[%s10997_s11 + $0x48] sm:$0xff] %vm6639_vm8, %v6829_v27  ;;  %7176 = vmatmul.msk.f32.gmra.mxu2 %vm6639_vm8, %v6608_v39  ;;  %v4558_v58 = vadd.f32 %v13149_v15, %v13148_v33  ;;  %v6413_v34 = vmul.f32 %v10526_v13, %v11296_v37  ;;  %v13151_v39 = vld [vmem:[#allocation156_spill] sm:$0xff] }
 0x853   : > { %5985 = vrot.lane.b32.xlu0 %v5278_v55, %s7270_s20  ;;  %5433 = vrot.lane.b32.xlu1 %v2746_v62, %s7267_s18  ;;  %v1816_v22 = vadd.f32 %v13152_v31, %v13151_v39  ;;  %v4028_v45 = vadd.f32 %v13153_v0, %v3644_v36  ;;  %v13154_v62 = vld [vmem:[#allocation531_spill] sm:$0xff]  ;;  %v3646_v46 = vadd.f32 %v13157_v47, %v13156_v21  ;;  %v13163_v39 = vld [vmem:[#allocation313_spill] sm:$0xff] }
 0x854   : > { %v6473_v49 = vadd.f32 %v6425_v50, %v6343_v26  ;;  %v4942_v55 = vadd.f32 %v13154_v62, %v4558_v58  ;;  %v6524_v26 = vmul.f32 %v11095_v28, %v6474_v35  ;;  %v13155_v50 = vld [vmem:[#allocation248_spill] sm:$0xff]  ;;  %v5194_v35 = vmax.f32 %v13014_v61, %v13096_v51  ;;  %v13164_v0 = vld [vmem:[#allocation475_spill] sm:$0xff] }
 0x855   : > { %v5782_v12 = vpop.permute.xlu0 %5781  ;;  %v5966_v53 = vpop.permute.xlu1 %5965  ;;  %v2200_v37 = vadd.f32 %v13155_v50, %v1816_v22  ;;  %v13159_v51 = vld [vmem:[#allocation476_spill] sm:$0xff] }
 0x856   : > { %v6230_v11 = vsel %vm1097_vm4, %v6182_v10, %v5966_v53  ;;  %v6523_v4 = vmul.f32 %v11095_v28, %v6473_v49  ;;  %v6462_v49 = vadd.f32 %v6414_v18, %v11271_v40  ;;  %v13158_v10 = vld [vmem:[#allocation439_spill] sm:$0xff]  ;;  %v6574_v40 = vadd.f32 %v11107_v54, %v6524_v26  ;;  %v13160_v18 = vld [vmem:[#allocation510_spill] sm:$0xff]  ;;  %v13166_v50 = vld [vmem:[#allocation96_spill] sm:$0xff] }
 0x857   : > { %v6279_v1 = vsel %vm6253_vm7, %v6230_v11, %v13150_v42  ;;  %v6831_v7 = vpop.f32.mrf.mxu2  ;;  %5977 = vrot.lane.b32.xlu2 %v5274_v63, %s7270_s20  ;;  %v4030_v53 = vadd.f32 %v13158_v10, %v3646_v46  ;;  %v6088_v11 = vsel %vm430_vm1, %v2200_v37, %v10344_v3  ;;  %v4568_v3 = vadd.f32 %v13160_v18, %v13159_v51 }
 0x858   : > { %v6331_v19 = vadd.f32 %v11048_v60, %v6279_v1  ;;  %v6832_v2 = vadd.f32 %v10984_v56, %v6831_v7  ;;  %v6573_v27 = vadd.f32 %v11107_v54, %v6523_v4  ;;  %v6512_v15 = vmul.f32 %v11095_v28, %v6462_v49  ;;  %v13167_v49 = vld [vmem:[#allocation146_spill] sm:$0xff] }
 0x859   : > { %v5974_v14 = vpop.permute.xlu2 %5973  ;;  %v5290_v42 = vmax.f32 %v5194_v35, 0.0  ;;  %v13170_v35 = vld [vmem:[#allocation336_spill] sm:$0xff] }
 0x85a   : > { %v6461_v41 = vadd.f32 %v6413_v34, %v6331_v19  ;;  %6955 = vst.msk [vmem:[%s10997_s11 + $0x50] sm:$0xff] %vm6639_vm8, %v6832_v2  ;;  %v6621_v44 = vmax.f32 %v6573_v27, 0.0  ;;  %v13161_v19 = vld [vmem:[#allocation238_spill] sm:$0xff]  ;;  %v13162_v34 = vld [vmem:[#allocation295_spill] sm:$0xff]  ;;  %v6622_v27 = vmax.f32 %v6574_v40, 0.0  ;;  %v13173_v40 = vld [vmem:[#allocation249_spill] sm:$0xff] }
 0x85b   : > { %5597 = vrot.lane.b32.xlu0 %v4028_v45, %s7271_s21  ;;  %5793 = vrot.lane.b32.xlu1 %v4942_v55, %s7269_s19  ;;  %v1828_v2 = vadd.f32 %v13162_v34, %v13161_v19  ;;  %v13165_v45 = vld [vmem:[#allocation509_spill] sm:$0xff] }
 0x85c   : > { %v6511_v63 = vmul.f32 %v11095_v28, %v6461_v41  ;;  %7189 = vmatmul.msk.f32.gmra.mxu3 %vm6639_vm8, %v6621_v44  ;;  %v4570_v62 = vadd.f32 %v13165_v45, %v13164_v0  ;;  %v13176_v19 = vld [vmem:[#allocation177_spill] sm:$0xff]  ;;  %v13180_v0 = vld [vmem:[#allocation296_spill] sm:$0xff] }
 0x85d   : > { %v5590_v4 = vpop.permute.xlu1 %5589  ;;  %v5998_v17 = vpop.permute.xlu0 %5997  ;;  %v2212_v31 = vadd.f32 %v13163_v39, %v1828_v2  ;;  %v13177_v2 = vld [vmem:[#allocation468_spill] sm:$0xff] }
 0x85e   : > { %v6137_v30 = vsel %vm6107_vm5, %v6088_v11, %v5590_v4  ;;  %v6561_v36 = vadd.f32 %v11107_v54, %v6511_v63  ;;  %v13168_v63 = vld [vmem:[#allocation228_spill] sm:$0xff] }
 0x85f   : > { %v6834_v33 = vpop.f32.mrf.mxu2  ;;  %5601 = vrot.lane.b32.xlu2 %v4030_v53, %s7271_s21  ;;  %v6186_v1 = vsel %vm6156_vm6, %v6137_v30, %v5782_v12  ;;  %v6562_v12 = vadd.f32 %v11107_v54, %v6512_v15  ;;  %v6100_v44 = vsel %vm430_vm1, %v2212_v31, %v11328_v16  ;;  %v1814_v10 = vadd.f32 %v13168_v63, %v13167_v49  ;;  %v13169_v53 = vld [vmem:[#allocation306_spill] sm:$0xff]  ;;  %v13171_v11 = vld [vmem:[#allocation356_spill] sm:$0xff] }
 0x860   : > { %v6835_v58 = vadd.f32 %v10984_v56, %v6834_v33  ;;  %v6609_v61 = vmax.f32 %v6561_v36, 0.0  ;;  %v6234_v22 = vsel %vm1097_vm4, %v6186_v1, %v5974_v14  ;;  %v6149_v26 = vsel %vm6107_vm5, %v6100_v44, %v11346_v43  ;;  %v13172_v4 = vld [vmem:[#allocation404_spill] sm:$0xff]  ;;  %v13181_v44 = vld [vmem:[#allocation534_spill] sm:$0xff] }
 0x861   : > { %v11413_v7 = vpop.permute.xlu2 %5609  ;;  %v6283_v37 = vsel %vm6253_vm7, %v6234_v22, %v13166_v50  ;;  %v6610_v46 = vmax.f32 %v6562_v12, 0.0  ;;  %v2745_v16 = vadd.f32 %v13170_v35, %v13169_v53  ;;  %v3656_v43 = vadd.f32 %v13172_v4, %v13171_v11  ;;  %v13179_v12 = vld [vmem:[#allocation229_spill] sm:$0xff]  ;;  %v13184_v49 = vld [vmem:[#allocation464_spill] sm:$0xff]  ;;  %v13185_v63 = vld [vmem:[#allocation498_spill] sm:$0xff] }
 0x862   : > { %6956 = vst.msk [vmem:[%s10997_s11 + $0x58] sm:$0xff] %vm6639_vm8, %v6835_v58  ;;  %7177 = vmatmul.msk.f32.gmra.mxu2 %vm6639_vm8, %v6609_v61  ;;  %v11444_v36 = vadd.f32 %v11048_v60, %v6283_v37  ;;  %v2198_v33 = vadd.f32 %v13173_v40, %v1814_v10  ;;  %v13174_v58 = vld [vmem:[#allocation302_spill] sm:$0xff]  ;;  %v13175_v61 = vld [vmem:[#allocation329_spill] sm:$0xff]  ;;  %v5180_v31 = vmax.f32 %v13060_v24, %v12995_v59  ;;  %v13182_v59 = vld [vmem:[#allocation84_spill] sm:$0xff] }
 0x863   : > { %5813 = vrot.lane.b32.xlu0 %v4568_v3, %s7269_s19  ;;  %6009 = vrot.lane.b32.xlu1 %v5290_v42, %s7270_s20  ;;  %v2744_v51 = vadd.f32 %v13175_v61, %v13174_v58  ;;  %v1826_v45 = vadd.f32 %v13180_v0, %v13179_v12  ;;  %v13186_v35 = vld [vmem:[#allocation532_spill] sm:$0xff]  ;;  %v5193_v11 = vmax.f32 %v13058_v23, %v13127_v52  ;;  %v13193_v0 = vld [vmem:[#allocation254_spill] sm:$0xff] }
 0x864   : > { %7190 = vmatmul.msk.f32.gmra.mxu3 %vm6639_vm8, %v6622_v27  ;;  %v6086_v18 = vsel %vm430_vm1, %v2198_v33, %v10351_v6  ;;  %v11458_v1 = vperm.slane %v11444_v36, 0  ;;  %v13178_v27 = vld [vmem:[#allocation502_spill] sm:$0xff]  ;;  %v5276_v50 = vmax.f32 %v5180_v31, %v12994_v48  ;;  %v4556_v48 = vadd.f32 %v13185_v63, %v13184_v49  ;;  %v13187_v33 = vld [vmem:[#allocation348_spill] sm:$0xff] }
 0x865   : > { %v5806_v55 = vpop.permute.xlu1 %5805  ;;  %v5778_v41 = vpop.permute.xlu0 %5777  ;;  %v4557_v39 = vadd.f32 %v13178_v27, %v13177_v2  ;;  %v5289_v31 = vmax.f32 %v5193_v11, 0.0  ;;  %v13196_v63 = vld [vmem:[#allocation478_spill] sm:$0xff] }
 0x866   : > { %v6198_v21 = vsel %vm6156_vm6, %v6149_v26, %v5806_v55 }
 0x867   : > { %v6837_v14 = vpop.f32.mrf.mxu2  ;;  %5817 = vrot.lane.b32.xlu2 %v4570_v62, %s7269_s19  ;;  %v6246_v15 = vsel %vm1097_vm4, %v6198_v21, %v5998_v17  ;;  %v4941_v26 = vadd.f32 %v13181_v44, %v4557_v39  ;;  %v5192_v39 = vmax.f32 %v13037_v29, %v13129_v8 }
 0x868   : > { %v6838_v47 = vadd.f32 %v10984_v56, %v6837_v14  ;;  %v6295_v34 = vsel %vm6253_vm7, %v6246_v15, %v13176_v19  ;;  %v13183_v14 = vld [vmem:[#allocation314_spill] sm:$0xff]  ;;  %v13188_v15 = vld [vmem:[#allocation396_spill] sm:$0xff] }
 0x869   : > { %v5970_v30 = vpop.permute.xlu2 %5969  ;;  %v11476_v37 = vadd.f32 %v11048_v60, %v6295_v34  ;;  %v2210_v21 = vadd.f32 %v13183_v14, %v1826_v45  ;;  %v3645_v58 = vadd.f32 %v13188_v15, %v13187_v33  ;;  %v13192_v34 = vld [vmem:[#allocation164_spill] sm:$0xff]  ;;  %v5288_v29 = vmax.f32 %v5192_v39, 0.0 }
 0x86a   : > { %6957 = vst.msk [vmem:[%s10997_s11 + $0x60] sm:$0xff] %vm6639_vm8, %v6838_v47  ;;  %7178 = vmatmul.msk.f32.gmra.mxu2 %vm6639_vm8, %v6610_v46  ;;  %v6415_v46 = vmul.f32 %v10453_v32, %v11458_v1  ;;  %v6416_v15 = vmul.f32 %v10526_v13, %v11458_v1 }
 0x86b   : > { %5431 = vrot.lane.b32.xlu0 %v2745_v16, %s7267_s18  ;;  %5621 = vrot.lane.b32.xlu1 %v3656_v43, %s7271_s21  ;;  %v6098_v10 = vsel %vm430_vm1, %v2210_v21, %v10420_v20  ;;  %v4940_v16 = vadd.f32 %v13186_v35, %v4556_v48  ;;  %v11500_v43 = vperm.slane %v11476_v37, 0  ;;  %v13194_v21 = vld [vmem:[#allocation234_spill] sm:$0xff]  ;;  %v13197_v48 = vld [vmem:[#allocation512_spill] sm:$0xff] }
 0x86c   : > { %v6147_v4 = vsel %vm6107_vm5, %v6098_v10, %v11413_v7  ;;  %v13191_v7 = vld [vmem:[#allocation444_spill] sm:$0xff]  ;;  %v4569_v10 = vadd.f32 %v13197_v48, %v13196_v63 }
 0x86d   : > { %v5586_v3 = vpop.permute.xlu1 %5585  ;;  %v5994_v42 = vpop.permute.xlu0 %5993  ;;  %v4029_v19 = vadd.f32 %v13191_v7, %v3645_v58  ;;  %v13200_v58 = vld [vmem:[#allocation127_spill] sm:$0xff] }
 0x86e   : > { %v6135_v17 = vsel %vm6107_vm5, %v6086_v18, %v5586_v3  ;;  %v13190_v18 = vld [vmem:[#allocation232_spill] sm:$0xff] }
 0x86f   : > { %v6184_v22 = vsel %vm6156_vm6, %v6135_v17, %v5778_v41  ;;  %v6840_v6 = vpop.f32.mrf.mxu2  ;;  %5429 = vrot.lane.b32.xlu2 %v2744_v51, %s7267_s18  ;;  %v13189_v51 = vld [vmem:[#allocation152_spill] sm:$0xff] }
 0x870   : > { %v6232_v62 = vsel %vm1097_vm4, %v6184_v22, %v5970_v30  ;;  %v6841_v55 = vadd.f32 %v10984_v56, %v6840_v6  ;;  %v1815_v3 = vadd.f32 %v13190_v18, %v13189_v51  ;;  %v13201_v51 = vld [vmem:[#allocation360_spill] sm:$0xff] }
 0x871   : > { %v6281_v24 = vsel %vm6253_vm7, %v6232_v62, %v13182_v59  ;;  %v11480_v41 = vpop.permute.xlu2 %5611  ;;  %v13202_v18 = vld [vmem:[#allocation408_spill] sm:$0xff] }
 0x872   : > { %v6333_v47 = vadd.f32 %v11048_v60, %v6281_v24  ;;  %6958 = vst.msk [vmem:[%s10997_s11 + $0x68] sm:$0xff] %vm6639_vm8, %v6841_v55  ;;  %v2199_v45 = vadd.f32 %v13193_v0, %v1815_v3  ;;  %v3657_v3 = vadd.f32 %v13202_v18, %v13201_v51 }
 0x873   : > { %5791 = vrot.lane.b32.xlu0 %v4941_v26, %s7269_s19  ;;  %5981 = vrot.lane.b32.xlu1 %v5276_v50, %s7270_s20 }
 0x874   : > { %v6463_v53 = vadd.f32 %v6415_v46, %v6333_v47  ;;  %v6087_v8 = vsel %vm430_vm1, %v2199_v45, %v10370_v25  ;;  %v13195_v47 = vld [vmem:[#allocation300_spill] sm:$0xff]  ;;  %v5181_v45 = vmax.f32 %v13077_v5, %v13017_v38 }
 0x875   : > { %v5802_v30 = vpop.permute.xlu1 %5801  ;;  %v5780_v40 = vpop.permute.xlu0 %5779  ;;  %v1827_v46 = vadd.f32 %v13195_v47, %v13194_v21  ;;  %v13205_v21 = vld [vmem:[#allocation310_spill] sm:$0xff] }
 0x876   : > { %v6196_v20 = vsel %vm6156_vm6, %v6147_v4, %v5802_v30  ;;  %v6513_v61 = vmul.f32 %v11095_v28, %v6463_v53  ;;  %v13198_v53 = vld [vmem:[#allocation89_spill] sm:$0xff]  ;;  %v13199_v4 = vld [vmem:[#allocation318_spill] sm:$0xff] }
 0x877   : > { %v6244_v23 = vsel %vm1097_vm4, %v6196_v20, %v5994_v42  ;;  %v6843_v52 = vpop.f32.mrf.mxu2  ;;  %5789 = vrot.lane.b32.xlu2 %v4940_v16, %s7269_s19  ;;  %v6427_v42 = vmul.f32 %v10453_v32, %v11500_v43  ;;  %v2211_v30 = vadd.f32 %v13199_v4, %v1827_v46  ;;  %v13206_v46 = vld [vmem:[#allocation331_spill] sm:$0xff]  ;;  %v13208_v4 = vld [vmem:[#allocation244_spill] sm:$0xff] }
 0x878   : > { %v6293_v17 = vsel %vm6253_vm7, %v6244_v23, %v13192_v34  ;;  %v6844_v2 = vadd.f32 %v10984_v56, %v6843_v52  ;;  %v6563_v27 = vadd.f32 %v11107_v54, %v6513_v61 }
 0x879   : > { %v6345_v22 = vadd.f32 %v11048_v60, %v6293_v17  ;;  %v5972_v6 = vpop.permute.xlu2 %5971  ;;  %v6099_v20 = vsel %vm430_vm1, %v2211_v30, %v13200_v58  ;;  %v13209_v58 = vld [vmem:[#allocation266_spill] sm:$0xff] }
 0x87a   : > { %6959 = vst.msk [vmem:[%s10997_s11 + $0x70] sm:$0xff] %vm6639_vm8, %v6844_v2  ;;  %v6611_v12 = vmax.f32 %v6563_v27, 0.0  ;;  %v6148_v23 = vsel %vm6107_vm5, %v6099_v20, %v11480_v41  ;;  %v13203_v27 = vld [vmem:[#allocation169_spill] sm:$0xff] }
 0x87b   : > { %v6475_v62 = vadd.f32 %v6427_v42, %v6345_v22  ;;  %6007 = vrot.lane.b32.xlu0 %v5289_v31, %s7270_s20  ;;  %5599 = vrot.lane.b32.xlu1 %v4029_v19, %s7271_s21  ;;  %v6429_v22 = vmul.f32 %v10508_v9, %v11500_v43  ;;  %v6428_v42 = vmul.f32 %v10526_v13, %v11500_v43 }
 0x87c   : > { %7179 = vmatmul.msk.f32.gmra.mxu2 %vm6639_vm8, %v6611_v12 }
 0x87d   : > { %v5588_v55 = vpop.permute.xlu1 %5587  ;;  %v5996_v44 = vpop.permute.xlu0 %5995  ;;  %v6525_v26 = vmul.f32 %v11095_v28, %v6475_v62 }
 0x87e   : > { %v6136_v50 = vsel %vm6107_vm5, %v6087_v8, %v5588_v55  ;;  %v6477_v8 = vadd.f32 %v6429_v22, %v11476_v37  ;;  %v13204_v37 = vld [vmem:[#allocation256_spill] sm:$0xff] }
 0x87f   : > { %v6185_v59 = vsel %vm6156_vm6, %v6136_v50, %v5780_v40  ;;  %v6846_v24 = vpop.f32.mrf.mxu2  ;;  %6005 = vrot.lane.b32.xlu2 %v5288_v29, %s7270_s20  ;;  %v6575_v14 = vadd.f32 %v11107_v54, %v6525_v26  ;;  %v6417_v40 = vmul.f32 %v10508_v9, %v11458_v1  ;;  %v5277_v29 = vmax.f32 %v5181_v45, %v13016_v57 }
 0x880   : > { %v6233_v49 = vsel %vm1097_vm4, %v6185_v59, %v5972_v6  ;;  %v6847_v25 = vadd.f32 %v10984_v56, %v6846_v24  ;;  %v1831_v47 = vadd.f32 %v13205_v21, %v13204_v37 }
 0x881   : > { %v6282_v35 = vsel %vm6253_vm7, %v6233_v49, %v13198_v53  ;;  %v11541_v16 = vpop.permute.xlu2 %5595  ;;  %v6623_v11 = vmax.f32 %v6575_v14, 0.0  ;;  %v6465_v1 = vadd.f32 %v6417_v40, %v11444_v36  ;;  %v6527_v14 = vmul.f32 %v11095_v28, %v6477_v8  ;;  %v11599_v53 = vld [vmem:[%s11904_s8] ss:$0 sm:$0xff] }
 0x882   : > { %v6334_v33 = vadd.f32 %v11048_v60, %v6282_v35  ;;  %6960 = vst.msk [vmem:[%s10997_s11 + $0x78] sm:$0xff] %vm6639_vm8, %v6847_v25  ;;  %v2215_v49 = vadd.f32 %v13206_v46, %v1831_v47 }
 0x883   : > { %5815 = vrot.lane.b32.xlu1 %v4569_v10, %s7269_s19  ;;  %7191 = vmatmul.msk.f32.gmra.mxu3 %vm6639_vm8, %v6623_v11  ;;  %v6515_v0 = vmul.f32 %v11095_v28, %v6465_v1  ;;  %v13207_v11 = vld [vmem:[#allocation178_spill] sm:$0xff] }
 0x884   : > { %v6464_v61 = vadd.f32 %v6416_v15, %v6334_v33  ;;  %v1819_v30 = vadd.f32 %v13208_v4, %v13207_v11 }
 0x885   : > { %v5804_v52 = vpop.permute.xlu1 %5803  ;;  %v5620_v7 = vpop.permute.xlu0 %5619  ;;  %v6565_v26 = vadd.f32 %v11107_v54, %v6515_v0 }
 0x886   : > { %v6197_v19 = vsel %vm6156_vm6, %v6148_v23, %v5804_v52  ;;  %v6514_v34 = vmul.f32 %v11095_v28, %v6464_v61  ;;  %v2203_v20 = vadd.f32 %v13209_v58, %v1819_v30  ;;  %v13210_v61 = vld [vmem:[#allocation203_spill] sm:$0xff] }
 0x887   : > { %v6245_v17 = vsel %vm1097_vm4, %v6197_v19, %v5996_v44  ;;  %v6849_v2 = vpop.f32.mrf.mxu2  ;;  %5623 = vrot.lane.b32.xlu2 %v3657_v3, %s7271_s21  ;;  %v6613_v57 = vmax.f32 %v6565_v26, 0.0  ;;  %v13211_v19 = vld [vmem:[#allocation198_spill] sm:$0xff] }
 0x888   : > { %v6294_v39 = vsel %vm6253_vm7, %v6245_v17, %v13203_v27  ;;  %v6850_v31 = vadd.f32 %v10984_v56, %v6849_v2  ;;  %v6564_v41 = vadd.f32 %v11107_v54, %v6514_v34  ;;  %v6091_v51 = vsel %vm430_vm1, %v2203_v20, %v13210_v61  ;;  %v13212_v27 = vld [vmem:[#allocation247_spill] sm:$0xff]  ;;  %v11660_v20 = vld [vmem:[%s11900_s4] ss:$0 sm:$0xff] }
 0x889   : > { %v6346_v36 = vadd.f32 %v11048_v60, %v6294_v39  ;;  %v5812_v6 = vpop.permute.xlu2 %5811  ;;  %v6140_v52 = vsel %vm6107_vm5, %v6091_v51, %v11541_v16  ;;  %v13213_v39 = vld [vmem:[#allocation311_spill] sm:$0xff]  ;;  %v13214_v16 = vld [vmem:[#allocation326_spill] sm:$0xff] }
 0x88a   : > { %6961 = vst.msk [vmem:[%s10997_s11 + $0x80] sm:$0xff] %vm6639_vm8, %v6850_v31  ;;  %v6612_v12 = vmax.f32 %v6564_v41, 0.0  ;;  %v1829_v31 = vadd.f32 %v13213_v39, %v13212_v27 }
 0x88b   : > { %v6476_v62 = vadd.f32 %v6428_v42, %v6346_v36 }
 0x88c   : > { %7180 = vmatmul.msk.f32.gmra.mxu2 %vm6639_vm8, %v6612_v12  ;;  %v2213_v42 = vadd.f32 %v13214_v16, %v1829_v31  ;;  %v13215_v12 = vld [vmem:[#allocation117_spill] sm:$0xff]  ;;  %v13226_v16 = vld [vmem:[#allocation252_spill] sm:$0xff] }
 0x88d   : > { %v5428_v55 = vpop.permute.xlu1 %5427  ;;  %v5980_v44 = vpop.permute.xlu0 %5979  ;;  %v6526_v43 = vmul.f32 %v11095_v28, %v6476_v62 }
 0x88e   : > { %v6103_v48 = vsel %vm430_vm1, %v2215_v49, %v5428_v55  ;;  %v13216_v55 = vld [vmem:[#allocation167_spill] sm:$0xff] }
 0x88f   : > { %v6852_v50 = vpop.f32.mrf.mxu2  ;;  %5983 = vrot.lane.b32.xlu2 %v5277_v29, %s7270_s20  ;;  %v6576_v59 = vadd.f32 %v11107_v54, %v6526_v43  ;;  %v6152_v15 = vsel %vm6107_vm5, %v6103_v48, %v5620_v7  ;;  %v13220_v49 = vld [vmem:[#allocation55_spill] sm:$0xff] }
 0x890   : > { %v6853_v38 = vadd.f32 %v10984_v56, %v6852_v50  ;;  %v6577_v56 = vadd.f32 %v11107_v54, %v6527_v14  ;;  %v6201_v23 = vsel %vm6156_vm6, %v6152_v15, %v5812_v6  ;;  %v13221_v15 = vld [vmem:[#allocation105_spill] sm:$0xff] }
 0x891   : > { %v5424_v5 = vpop.permute.xlu2 %5423  ;;  %v6624_v24 = vmax.f32 %v6576_v59, 0.0 }
 0x892   : > { %6962 = vst.msk [vmem:[%s10997_s11 + $0x88] sm:$0xff] %vm6639_vm8, %v6853_v38  ;;  %v6625_v33 = vmax.f32 %v6577_v56, 0.0  ;;  %v6101_v6 = vsel %vm430_vm1, %v2213_v42, %v5424_v5  ;;  %v13227_v42 = vld [vmem:[#allocation315_spill] sm:$0xff] }
 0x893   : > { %7192 = vmatmul.msk.f32.gmra.mxu3 %vm6639_vm8, %v6624_v24  ;;  %v13218_v24 = vld [vmem:[#allocation267_spill] sm:$0xff] }
 0x894   : > { %7181 = vmatmul.msk.f32.gmra.mxu2 %vm6639_vm8, %v6613_v57  ;;  %v13219_v57 = vld [vmem:[#allocation185_spill] sm:$0xff] }
 0x895   : > { %v5788_v25 = vpop.permute.xlu1 %5787  ;;  %v5592_v63 = vpop.permute.xlu0 %5591 }
 0x896   : > { %v6189_v7 = vsel %vm6156_vm6, %v6140_v52, %v5788_v25 }
 0x897   : > { %v6855_v10 = vpop.f32.mrf.mxu2  ;;  %v6237_v22 = vsel %vm1097_vm4, %v6189_v7, %v5980_v44  ;;  %v13217_v44 = vld [vmem:[#allocation246_spill] sm:$0xff] }
 0x898   : > { %v6856_v35 = vadd.f32 %v11599_v53, %v6855_v10  ;;  %v6286_v0 = vsel %vm6253_vm7, %v6237_v22, %v13215_v12  ;;  %v1817_v43 = vadd.f32 %v13217_v44, %v13216_v55  ;;  %v13228_v55 = vld [vmem:[#allocation333_spill] sm:$0xff] }
 0x899   : > { %v5784_v40 = vpop.permute.xlu2 %5783  ;;  %v6338_v59 = vadd.f32 %v11048_v60, %v6286_v0 }
 0x89a   : > { %6963 = vst.msk [vmem:[%s10997_s11 + $0x90] sm:$0xff] %vm6639_vm8, %v6856_v35  ;;  %v2201_v14 = vadd.f32 %v13218_v24, %v1817_v43  ;;  %v13229_v43 = vld [vmem:[#allocation110_spill] sm:$0xff] }
 0x89b   : > { %7193 = vmatmul.msk.f32.gmra.mxu3 %vm6639_vm8, %v6625_v33  ;;  %v6367_v56 = vperm.slane %v6338_v59, 0 }
 0x89c   : > { %v6089_v25 = vsel %vm430_vm1, %v2201_v14, %v13220_v49 }
 0x89d   : > { %v5808_v18 = vpop.permute.xlu0 %5807  ;;  %v6004_v3 = vpop.permute.xlu1 %6003  ;;  %v6138_v48 = vsel %vm6107_vm5, %v6089_v25, %v5592_v63  ;;  %v6418_v61 = vmul.f32 %v10453_v32, %v6367_v56  ;;  %v11697_v25 = vld [vmem:[%s11902_s6] ss:$0 sm:$0xff] }
 0x89e   : > { %v6249_v1 = vsel %vm1097_vm4, %v6201_v23, %v6004_v3  ;;  %v6187_v35 = vsel %vm6156_vm6, %v6138_v48, %v5784_v40  ;;  %v13223_v3 = vld [vmem:[#allocation250_spill] sm:$0xff] }
 0x89f   : > { %v6298_v34 = vsel %vm6253_vm7, %v6249_v1, %v13211_v19  ;;  %v6858_v17 = vpop.f32.mrf.mxu2  ;;  %v13224_v19 = vld [vmem:[#allocation272_spill] sm:$0xff] }
 0x8a0   : > { %v6859_v2 = vadd.f32 %v11599_v53, %v6858_v17  ;;  %v11623_v36 = vadd.f32 %v11048_v60, %v6298_v34 }
 0x8a1   : > { %v6000_v41 = vpop.permute.xlu2 %5999 }
 0x8a2   : > { %6964 = vst.msk [vmem:[%s10997_s11 + $0x98] sm:$0xff] %vm6639_vm8, %v6859_v2  ;;  %v11632_v29 = vperm.slane %v11623_v36, 0  ;;  %v13225_v2 = vld [vmem:[#allocation107_spill] sm:$0xff] }
 0x8a4   : > { %v6430_v47 = vmul.f32 %v10453_v32, %v11632_v29 }
 0x8a5   : > { %v5426_v45 = vpop.permute.xlu0 %5425  ;;  %v5616_v62 = vpop.permute.xlu1 %5615 }
 0x8a6   : > { %v6150_v8 = vsel %vm6107_vm5, %v6101_v6, %v5616_v62  ;;  %v1830_v6 = vadd.f32 %v13227_v42, %v13226_v16  ;;  %v13234_v16 = vld [vmem:[#allocation262_spill] sm:$0xff] }
 0x8a7   : > { %v6199_v26 = vsel %vm6156_vm6, %v6150_v8, %v5808_v18  ;;  %v6861_v50 = vpop.f32.mrf.mxu2  ;;  %v13222_v18 = vld [vmem:[#allocation173_spill] sm:$0xff] }
 0x8a8   : > { %v6247_v38 = vsel %vm1097_vm4, %v6199_v26, %v6000_v41  ;;  %v6862_v5 = vadd.f32 %v11599_v53, %v6861_v50  ;;  %v1818_v23 = vadd.f32 %v13223_v3, %v13222_v18  ;;  %v2214_v44 = vadd.f32 %v13228_v55, %v1830_v6 }
 0x8a9   : > { %v6296_v37 = vsel %vm6253_vm7, %v6247_v38, %v13219_v57  ;;  %v5618_v21 = vpop.permute.xlu2 %5617  ;;  %v6420_v38 = vmul.f32 %v10508_v9, %v6367_v56 }
 0x8aa   : > { %v6348_v46 = vadd.f32 %v11048_v60, %v6296_v37  ;;  %6965 = vst.msk [vmem:[%s10997_s11 + $0xa0] sm:$0xff] %vm6639_vm8, %v6862_v5  ;;  %v2202_v34 = vadd.f32 %v13224_v19, %v1818_v23  ;;  %v6419_v5 = vmul.f32 %v10526_v13, %v6367_v56  ;;  %v6102_v24 = vsel %vm430_vm1, %v2214_v44, %v5426_v45  ;;  %v13230_v45 = vld [vmem:[#allocation190_spill] sm:$0xff] }
 0x8ab   : > { %v6151_v57 = vsel %vm6107_vm5, %v6102_v24, %v5618_v21  ;;  %v13231_v19 = vld [vmem:[#allocation274_spill] sm:$0xff] }
 0x8ac   : > { %v6478_v10 = vadd.f32 %v6430_v47, %v6348_v46  ;;  %v6090_v27 = vsel %vm430_vm1, %v2202_v34, %v13225_v2  ;;  %v6468_v46 = vadd.f32 %v6420_v38, %v6338_v59  ;;  %v11707_v59 = vld [vmem:[%s11902_s6 + $0x1] ss:$0 sm:$0xff] }
 0x8ad   : > { %v5786_v11 = vpop.permute.xlu0 %5785  ;;  %v5976_v4 = vpop.permute.xlu1 %5975  ;;  %v13237_v24 = vld [vmem:[#allocation214_spill] sm:$0xff] }
 0x8ae   : > { %v6235_v30 = vsel %vm1097_vm4, %v6187_v35, %v5976_v4  ;;  %v6528_v33 = vmul.f32 %v11095_v28, %v6478_v10  ;;  %v6432_v4 = vmul.f32 %v10508_v9, %v11632_v29 }
 0x8af   : > { %v6284_v60 = vsel %vm6253_vm7, %v6235_v30, %v13221_v15  ;;  %v6864_v58 = vpop.f32.mrf.mxu2 }
 0x8b0   : > { %v6336_v63 = vadd.f32 %v11660_v20, %v6284_v60  ;;  %v6865_v40 = vadd.f32 %v11599_v53, %v6864_v58  ;;  %v6578_v51 = vadd.f32 %v11107_v54, %v6528_v33  ;;  %v6431_v33 = vmul.f32 %v10526_v13, %v11632_v29 }
 0x8b1   : > { %v5978_v52 = vpop.permute.xlu2 %5977  ;;  %v6518_v58 = vmul.f32 %v11697_v25, %v6468_v46 }
 0x8b2   : > { %v6466_v1 = vadd.f32 %v6418_v61, %v6336_v63  ;;  %6966 = vst.msk [vmem:[%s10997_s11 + $0xa8] sm:$0xff] %vm6639_vm8, %v6865_v40  ;;  %v6626_v7 = vmax.f32 %v6578_v51, 0.0  ;;  %v6480_v61 = vadd.f32 %v6432_v4, %v11623_v36  ;;  %v13232_v36 = vld [vmem:[#allocation328_spill] sm:$0xff] }
 0x8b3   : > { %v6568_v3 = vadd.f32 %v11707_v59, %v6518_v58  ;;  %v1834_v34 = vadd.f32 %v13232_v36, %v13231_v19 }
 0x8b4   : > { %v6516_v17 = vmul.f32 %v11095_v28, %v6466_v1  ;;  %7194 = vmatmul.msk.f32.gmra.mxu3 %vm6639_vm8, %v6626_v7  ;;  %v6530_v29 = vmul.f32 %v11697_v25, %v6480_v61 }
 0x8b5   : > { %v6002_v39 = vpop.permute.xlu0 %6001  ;;  %v5594_v31 = vpop.permute.xlu1 %5593  ;;  %v6616_v7 = vmax.f32 %v6568_v3, 0.0  ;;  %v13244_v3 = vld [vmem:[#allocation205_spill] sm:$0xff] }
 0x8b6   : > { %v6139_v41 = vsel %vm6107_vm5, %v6090_v27, %v5594_v31  ;;  %v6566_v22 = vadd.f32 %v11107_v54, %v6516_v17  ;;  %v6580_v2 = vadd.f32 %v11707_v59, %v6530_v29 }
 0x8b7   : > { %v6188_v12 = vsel %vm6156_vm6, %v6139_v41, %v5786_v11  ;;  %v6867_v0 = vpop.f32.mrf.mxu2 }
 0x8b8   : > { %v6236_v28 = vsel %vm1097_vm4, %v6188_v12, %v5978_v52  ;;  %v6868_v62 = vadd.f32 %v11599_v53, %v6867_v0  ;;  %v6614_v8 = vmax.f32 %v6566_v22, 0.0  ;;  %v13233_v22 = vld [vmem:[#allocation199_spill] sm:$0xff]  ;;  %v6628_v12 = vmax.f32 %v6580_v2, 0.0 }
 0x8b9   : > { %v6285_v26 = vsel %vm6253_vm7, %v6236_v28, %v13229_v43  ;;  %v5602_v50 = vpop.permute.xlu2 %5601  ;;  %v1822_v42 = vadd.f32 %v13234_v16, %v13233_v22  ;;  %v13235_v28 = vld [vmem:[#allocation283_spill] sm:$0xff] }
 0x8ba   : > { %v6337_v54 = vadd.f32 %v11660_v20, %v6285_v26  ;;  %6967 = vst.msk [vmem:[%s10997_s11 + $0xb0] sm:$0xff] %vm6639_vm8, %v6868_v62  ;;  %7182 = vmatmul.msk.f32.gmra.mxu2 %vm6639_vm8, %v6614_v8  ;;  %v13236_v8 = vld [vmem:[#allocation104_spill] sm:$0xff] }
 0x8bb   : > { %v2206_v62 = vadd.f32 %v13235_v28, %v1822_v42  ;;  %v13246_v42 = vld [vmem:[#allocation126_spill] sm:$0xff] }
 0x8bc   : > { %v6467_v14 = vadd.f32 %v6419_v5, %v6337_v54 }
 0x8bd   : > { %v5626_v37 = vpop.permute.xlu0 %5625  ;;  %v5810_v47 = vpop.permute.xlu1 %5809  ;;  %v6094_v55 = vsel %vm430_vm1, %v2206_v62, %v13236_v8 }
 0x8be   : > { %v6200_v49 = vsel %vm6156_vm6, %v6151_v57, %v5810_v47  ;;  %v6517_v56 = vmul.f32 %v11697_v25, %v6467_v14  ;;  %v6143_v26 = vsel %vm6107_vm5, %v6094_v55, %v5602_v50  ;;  %v13239_v50 = vld [vmem:[#allocation323_spill] sm:$0xff]  ;;  %v13247_v55 = vld [vmem:[#allocation194_spill] sm:$0xff] }
 0x8bf   : > { %v6248_v48 = vsel %vm1097_vm4, %v6200_v49, %v6002_v39  ;;  %v6870_v10 = vpop.f32.mrf.mxu2  ;;  %v13238_v49 = vld [vmem:[#allocation265_spill] sm:$0xff] }
 0x8c0   : > { %v6297_v35 = vsel %vm6253_vm7, %v6248_v48, %v13230_v45  ;;  %v6871_v21 = vadd.f32 %v11599_v53, %v6870_v10  ;;  %v6567_v11 = vadd.f32 %v11707_v59, %v6517_v56  ;;  %v1832_v56 = vadd.f32 %v13239_v50, %v13238_v49  ;;  %v13240_v45 = vld [vmem:[#allocation138_spill] sm:$0xff] }
 0x8c1   : > { %v6349_v30 = vadd.f32 %v11660_v20, %v6297_v35  ;;  %v5818_v15 = vpop.permute.xlu2 %5817 }
 0x8c2   : > { %6968 = vst.msk [vmem:[%s10997_s11 + $0xb8] sm:$0xff] %vm6639_vm8, %v6871_v21  ;;  %v6615_v60 = vmax.f32 %v6567_v11, 0.0 }
 0x8c3   : > { %v6479_v63 = vadd.f32 %v6431_v33, %v6349_v30  ;;  %v13241_v30 = vld [vmem:[#allocation188_spill] sm:$0xff] }
 0x8c4   : > { %7183 = vmatmul.msk.f32.gmra.mxu2 %vm6639_vm8, %v6615_v60  ;;  %v13242_v33 = vld [vmem:[#allocation264_spill] sm:$0xff] }
 0x8c5   : > { %v5986_v40 = vpop.permute.xlu0 %5985  ;;  %v5434_v51 = vpop.permute.xlu1 %5433  ;;  %v6529_v18 = vmul.f32 %v11697_v25, %v6479_v63 }
 0x8c6   : > { %v6106_v39 = vsel %vm430_vm1, %v1834_v34, %v5434_v51  ;;  %v13243_v51 = vld [vmem:[#allocation284_spill] sm:$0xff] }
 0x8c7   : > { %v6579_v23 = vadd.f32 %v11707_v59, %v6529_v18  ;;  %v6155_v0 = vsel %vm6107_vm5, %v6106_v39, %v5626_v37 }
 0x8c8   : > { %v6204_v43 = vsel %vm6156_vm6, %v6155_v0, %v5818_v15  ;;  %v1820_v15 = vadd.f32 %v13242_v33, %v13241_v30  ;;  %v13252_v30 = vld [vmem:[#allocation270_spill] sm:$0xff] }
 0x8c9   : > { %v5430_v52 = vpop.permute.xlu2 %5429  ;;  %v6627_v1 = vmax.f32 %v6579_v23, 0.0  ;;  %v13253_v33 = vld [vmem:[#allocation330_spill] sm:$0xff] }
 0x8ca   : > { %v6104_v10 = vsel %vm430_vm1, %v1832_v56, %v5430_v52  ;;  %v2204_v18 = vadd.f32 %v13243_v51, %v1820_v15  ;;  %v1833_v15 = vadd.f32 %v13253_v33, %v13252_v30 }
 0x8cb   : > { %7195 = vmatmul.msk.f32.gmra.mxu3 %vm6639_vm8, %v6627_v1 }
 0x8cc   : > { %7184 = vmatmul.msk.f32.gmra.mxu2 %vm6639_vm8, %v6616_v7  ;;  %v13245_v7 = vld [vmem:[#allocation160_spill] sm:$0xff] }
 0x8cd   : > { %v5794_v17 = vpop.permute.xlu1 %5793  ;;  %v5598_v27 = vpop.permute.xlu0 %5597  ;;  %v6092_v19 = vsel %vm430_vm1, %v2204_v18, %v13245_v7 }
 0x8ce   : > { %v6192_v5 = vsel %vm6156_vm6, %v6143_v26, %v5794_v17  ;;  %v6141_v36 = vsel %vm6107_vm5, %v6092_v19, %v5598_v27 }
 0x8cf   : > { %v6909_v31 = vpop.f32.mrf.mxu3  ;;  %v6240_v47 = vsel %vm1097_vm4, %v6192_v5, %v5986_v40 }
 0x8d0   : > { %v6910_v41 = vadd.f32 %v11599_v53, %v6909_v31  ;;  %v6289_v35 = vsel %vm6253_vm7, %v6240_v47, %v13240_v45 }
 0x8d1   : > { %v5790_v6 = vpop.permute.xlu2 %5789  ;;  %v6341_v63 = vadd.f32 %v11660_v20, %v6289_v35 }
 0x8d2   : > { %6981 = vst.msk [vmem:[%s10997_s11 + $0x120] sm:$0xff] %vm6639_vm8, %v6910_v41  ;;  %v6190_v2 = vsel %vm6156_vm6, %v6141_v36, %v5790_v6  ;;  %v13254_v36 = vld [vmem:[#allocation209_spill] sm:$0xff] }
 0x8d3   : > { %7196 = vmatmul.msk.f32.gmra.mxu3 %vm6639_vm8, %v6628_v12  ;;  %v6368_v34 = vperm.slane %v6341_v63, 0 }
 0x8d5   : > { %v6010_v44 = vpop.permute.xlu1 %6009  ;;  %v6873_v54 = vpop.f32.mrf.mxu2  ;;  %v6421_v62 = vmul.f32 %v10453_v32, %v6368_v34 }
 0x8d6   : > { %v6252_v38 = vsel %vm1097_vm4, %v6204_v43, %v6010_v44  ;;  %v6874_v57 = vadd.f32 %v11599_v53, %v6873_v54  ;;  %v5814_v37 = vpop.permute.xlu0 %5813  ;;  %v13248_v44 = vld [vmem:[#allocation268_spill] sm:$0xff] }
 0x8d7   : > { %v6301_v14 = vsel %vm6253_vm7, %v6252_v38, %v13237_v24  ;;  %v1821_v43 = vadd.f32 %v13248_v44, %v13247_v55  ;;  %v13249_v54 = vld [vmem:[#allocation288_spill] sm:$0xff] }
 0x8d8   : > { %6969 = vst.msk [vmem:[%s10997_s11 + $0xc0] sm:$0xff] %vm6639_vm8, %v6874_v57  ;;  %v11751_v46 = vadd.f32 %v11660_v20, %v6301_v14 }
 0x8d9   : > { %v6006_v48 = vpop.permute.xlu2 %6005  ;;  %v2205_v5 = vadd.f32 %v13249_v54, %v1821_v43 }
 0x8da   : > { %v11759_v11 = vperm.slane %v11751_v46, 0 }
 0x8dc   : > { %v6433_v29 = vmul.f32 %v10453_v32, %v11759_v11  ;;  %v13250_v32 = vld [vmem:[#allocation162_spill] sm:$0xff] }
 0x8dd   : > { %v5622_v21 = vpop.permute.xlu1 %5621  ;;  %v6093_v57 = vsel %vm430_vm1, %v2205_v5, %v13250_v32 }
 0x8de   : > { %v6153_v4 = vsel %vm6107_vm5, %v6104_v10, %v5622_v21  ;;  %v5432_v52 = vpop.permute.xlu0 %5431  ;;  %v13251_v21 = vld [vmem:[#allocation131_spill] sm:$0xff] }
 0x8df   : > { %v6202_v60 = vsel %vm6156_vm6, %v6153_v4, %v5814_v37  ;;  %v6912_v58 = vpop.f32.mrf.mxu3 }
 0x8e0   : > { %v6250_v61 = vsel %vm1097_vm4, %v6202_v60, %v6006_v48  ;;  %v6913_v40 = vadd.f32 %v11599_v53, %v6912_v58  ;;  %v6423_v60 = vmul.f32 %v10508_v9, %v6368_v34 }
 0x8e1   : > { %v6299_v23 = vsel %vm6253_vm7, %v6250_v61, %v13244_v3  ;;  %v5624_v39 = vpop.permute.xlu2 %5623  ;;  %v6422_v61 = vmul.f32 %v10526_v13, %v6368_v34 }
 0x8e2   : > { %v6351_v1 = vadd.f32 %v11660_v20, %v6299_v23  ;;  %6982 = vst.msk [vmem:[%s10997_s11 + $0x128] sm:$0xff] %vm6639_vm8, %v6913_v40  ;;  %v6105_v40 = vsel %vm430_vm1, %v1833_v15, %v5432_v52  ;;  %v6471_v23 = vadd.f32 %v6423_v60, %v6341_v63  ;;  %v6435_v52 = vmul.f32 %v10508_v9, %v11759_v11 }
 0x8e3   : > { %v6154_v18 = vsel %vm6107_vm5, %v6105_v40, %v5624_v39  ;;  %v6434_v63 = vmul.f32 %v10526_v13, %v11759_v11 }
 0x8e4   : > { %v6481_v17 = vadd.f32 %v6433_v29, %v6351_v1 }
 0x8e5   : > { %v5982_v31 = vpop.permute.xlu1 %5981  ;;  %v6876_v22 = vpop.f32.mrf.mxu2 }
 0x8e6   : > { %v6238_v41 = vsel %vm1097_vm4, %v6190_v2, %v5982_v31  ;;  %v6531_v16 = vmul.f32 %v11697_v25, %v6481_v17  ;;  %v6877_v0 = vadd.f32 %v11599_v53, %v6876_v22  ;;  %v5792_v24 = vpop.permute.xlu0 %5791  ;;  %v6521_v31 = vmul.f32 %v11697_v25, %v6471_v23 }
 0x8e7   : > { %v6287_v12 = vsel %vm6253_vm7, %v6238_v41, %v13246_v42  ;;  %v6915_v28 = vpop.f32.mrf.mxu3  ;;  %v6483_v22 = vadd.f32 %v6435_v52, %v11751_v46 }
 0x8e8   : > { %v6339_v27 = vadd.f32 %v11660_v20, %v6287_v12  ;;  %v6916_v6 = vadd.f32 %v11599_v53, %v6915_v28  ;;  %v6581_v8 = vadd.f32 %v11707_v59, %v6531_v16  ;;  %6970 = vst.msk [vmem:[%s10997_s11 + $0xc8] sm:$0xff] %vm6639_vm8, %v6877_v0  ;;  %v6571_v42 = vadd.f32 %v11707_v59, %v6521_v31 }
 0x8e9   : > { %v5984_v56 = vpop.permute.xlu2 %5983  ;;  %v6533_v13 = vmul.f32 %v11697_v25, %v6483_v22 }
 0x8ea   : > { %v6469_v26 = vadd.f32 %v6421_v62, %v6339_v27  ;;  %6983 = vst.msk [vmem:[%s10997_s11 + $0x130] sm:$0xff] %vm6639_vm8, %v6916_v6  ;;  %v6629_v38 = vmax.f32 %v6581_v8, 0.0  ;;  %v6619_v0 = vmax.f32 %v6571_v42, 0.0 }
 0x8eb   : > { %v6583_v46 = vadd.f32 %v11707_v59, %v6533_v13 }
 0x8ec   : > { %v6519_v14 = vmul.f32 %v11697_v25, %v6469_v26  ;;  %7197 = vmatmul.msk.f32.gmra.mxu3 %vm6639_vm8, %v6629_v38 }
 0x8ed   : > { %v5600_v37 = vpop.permute.xlu1 %5599  ;;  %v6879_v49 = vpop.f32.mrf.mxu2  ;;  %v6631_v62 = vmax.f32 %v6583_v46, 0.0 }
 0x8ee   : > { %v6142_v47 = vsel %vm6107_vm5, %v6093_v57, %v5600_v37  ;;  %v6569_v50 = vadd.f32 %v11707_v59, %v6519_v14  ;;  %v6880_v10 = vadd.f32 %v11599_v53, %v6879_v49  ;;  %v6008_v29 = vpop.permute.xlu0 %6007 }
 0x8ef   : > { %v6191_v48 = vsel %vm6156_vm6, %v6142_v47, %v5792_v24 }
 0x8f0   : > { %v6239_v45 = vsel %vm1097_vm4, %v6191_v48, %v5984_v56  ;;  %v6617_v35 = vmax.f32 %v6569_v50, 0.0  ;;  %6971 = vst.msk [vmem:[%s10997_s11 + $0xd0] sm:$0xff] %vm6639_vm8, %v6880_v10 }
 0x8f1   : > { %v6288_v4 = vsel %vm6253_vm7, %v6239_v45, %v13251_v21 }
 0x8f2   : > { %v6340_v58 = vadd.f32 %v11660_v20, %v6288_v4  ;;  %7185 = vmatmul.msk.f32.gmra.mxu2 %vm6639_vm8, %v6617_v35 }
 0x8f4   : > { %v6470_v51 = vadd.f32 %v6422_v61, %v6340_v58 }
 0x8f5   : > { %v5816_v3 = vpop.permute.xlu1 %5815 }
 0x8f6   : > { %v6203_v1 = vsel %vm6156_vm6, %v6154_v18, %v5816_v3  ;;  %v6520_v7 = vmul.f32 %v11697_v25, %v6470_v51 }
 0x8f7   : > { %v6251_v19 = vsel %vm1097_vm4, %v6203_v1, %v6008_v29 }
 0x8f8   : > { %v6300_v17 = vsel %vm6253_vm7, %v6251_v19, %v13254_v36  ;;  %v6570_v34 = vadd.f32 %v11707_v59, %v6520_v7 }
 0x8f9   : > { %v6352_v2 = vadd.f32 %v11660_v20, %v6300_v17 }
 0x8fa   : > { %v6618_v39 = vmax.f32 %v6570_v34, 0.0 }
 0x8fb   : > { %v6482_v41 = vadd.f32 %v6434_v63, %v6352_v2 }
 0x8fc   : > { %7186 = vmatmul.msk.f32.gmra.mxu2 %vm6639_vm8, %v6618_v39 }
 0x8fd   : > { %v6532_v16 = vmul.f32 %v11697_v25, %v6482_v41 }
 0x8ff   : > { %v6882_v12 = vpop.f32.mrf.mxu2  ;;  %v6582_v9 = vadd.f32 %v11707_v59, %v6532_v16 }
 0x900   : > { %v6883_v20 = vadd.f32 %v11599_v53, %v6882_v12 }
 0x901   : > { %v6630_v11 = vmax.f32 %v6582_v9, 0.0 }
 0x902   : > { %6972 = vst.msk [vmem:[%s10997_s11 + $0xd8] sm:$0xff] %vm6639_vm8, %v6883_v20 }
 0x903   : > { %7198 = vmatmul.msk.f32.gmra.mxu3 %vm6639_vm8, %v6630_v11 }
 0x904   : > { %7187 = vmatmul.msk.f32.gmra.mxu2 %vm6639_vm8, %v6619_v0 }
 0x906   : > { %v6918_v28 = vpop.f32.mrf.mxu3 }
 0x907   : > { %v6919_v27 = vadd.f32 %v11599_v53, %v6918_v28 }
 0x909   : > { %6984 = vst.msk [vmem:[%s10997_s11 + $0x138] sm:$0xff] %vm6639_vm8, %v6919_v27 }
 0x90b   : > { %7199 = vmatmul.msk.f32.gmra.mxu3 %vm6639_vm8, %v6631_v62 }
 0x90f   : > { %v6885_v25 = vpop.f32.mrf.mxu2 }
 0x910   : > { %v6886_v6 = vadd.f32 %v11599_v53, %v6885_v25 }
 0x912   : > { %6973 = vst.msk [vmem:[%s10997_s11 + $0xe0] sm:$0xff] %vm6639_vm8, %v6886_v6 }
 0x916   : > { %v6921_v8 = vpop.f32.mrf.mxu3 }
 0x917   : > { %v6922_v55 = vadd.f32 %v11599_v53, %v6921_v8  ;;  %v6888_v59 = vpop.f32.mrf.mxu2 }
 0x918   : > { %v6889_v44 = vadd.f32 %v11599_v53, %v6888_v59 }
 0x919   : > { %6985 = vst.msk [vmem:[%s10997_s11 + $0x140] sm:$0xff] %vm6639_vm8, %v6922_v55 }
 0x91a   : > { %6974 = vst.msk [vmem:[%s10997_s11 + $0xe8] sm:$0xff] %vm6639_vm8, %v6889_v44 }
 0x91e   : > { %v6924_v43 = vpop.f32.mrf.mxu3 }
 0x91f   : > { %v6925_v26 = vadd.f32 %v11599_v53, %v6924_v43 }
 0x921   : > { %6986 = vst.msk [vmem:[%s10997_s11 + $0x148] sm:$0xff] %vm6639_vm8, %v6925_v26 }
 0x937   : > { %v6927_v38 = vpop.f32.mrf.mxu3 }
 0x938   : > { %v6928_v54 = vadd.f32 %v11599_v53, %v6927_v38 }
 0x93a   : > { %6987 = vst.msk [vmem:[%s10997_s11 + $0x150] sm:$0xff] %vm6639_vm8, %v6928_v54 }
 0x93d   : > { %v6891_v5 = vpop.f32.mrf.mxu2 }
 0x93e   : > { %v6892_v24 = vadd.f32 %v11599_v53, %v6891_v5 }
 0x940   : > { %6975 = vst.msk [vmem:[%s10997_s11 + $0xf0] sm:$0xff] %vm6639_vm8, %v6892_v24 }
 0x947   : > { %v6894_v14 = vpop.f32.mrf.mxu2 }
 0x948   : > { %v6895_v32 = vadd.f32 %v11599_v53, %v6894_v14 }
 0x94a   : > { %6976 = vst.msk [vmem:[%s10997_s11 + $0xf8] sm:$0xff] %vm6639_vm8, %v6895_v32 }
 0x94e   : > { %v6930_v57 = vpop.f32.mrf.mxu3 }
 0x94f   : > { %v6931_v37 = vadd.f32 %v11599_v53, %v6930_v57  ;;  %v6897_v47 = vpop.f32.mrf.mxu2 }
 0x950   : > { %v6898_v49 = vadd.f32 %v11599_v53, %v6897_v47 }
 0x951   : > { %6988 = vst.msk [vmem:[%s10997_s11 + $0x158] sm:$0xff] %vm6639_vm8, %v6931_v37 }
 0x952   : > { %6977 = vst.msk [vmem:[%s10997_s11 + $0x100] sm:$0xff] %vm6639_vm8, %v6898_v49 }
 0x956   : > { %v6933_v50 = vpop.f32.mrf.mxu3 }
 0x957   : > { %v6934_v56 = vadd.f32 %v11599_v53, %v6933_v50 }
 0x959   : > { %6989 = vst.msk [vmem:[%s10997_s11 + $0x160] sm:$0xff] %vm6639_vm8, %v6934_v56 }
 0x96f   : > { %v6936_v48 = vpop.f32.mrf.mxu3 }
 0x970   : > { %v6937_v10 = vadd.f32 %v11599_v53, %v6936_v48 }
 0x972   : > { %6990 = vst.msk [vmem:[%s10997_s11 + $0x168] sm:$0xff] %vm6639_vm8, %v6937_v10 }
 0x975   : > { %v6900_v45 = vpop.f32.mrf.mxu2 }
 0x976   : > { %v6901_v35 = vadd.f32 %v11599_v53, %v6900_v45 }
 0x978   : > { %6978 = vst.msk [vmem:[%s10997_s11 + $0x108] sm:$0xff] %vm6639_vm8, %v6901_v35 }
 0x97f   : > { %v6903_v21 = vpop.f32.mrf.mxu2 }
 0x980   : > { %v6904_v4 = vadd.f32 %v11599_v53, %v6903_v21 }
 0x982   : > { %6979 = vst.msk [vmem:[%s10997_s11 + $0x110] sm:$0xff] %vm6639_vm8, %v6904_v4 }
 0x986   : > { %v6939_v30 = vpop.f32.mrf.mxu3 }
 0x987   : > { %v6940_v33 = vadd.f32 %v11599_v53, %v6939_v30  ;;  %v6906_v15 = vpop.f32.mrf.mxu2 }
 0x988   : > { %v6907_v60 = vadd.f32 %v11599_v53, %v6906_v15 }
 0x989   : > { %6991 = vst.msk [vmem:[%s10997_s11 + $0x170] sm:$0xff] %vm6639_vm8, %v6940_v33 }
 0x98a   : > { %6980 = vst.msk [vmem:[%s10997_s11 + $0x118] sm:$0xff] %vm6639_vm8, %v6907_v60 }
 0x98e   : > { %v6942_v58 = vpop.f32.mrf.mxu3 }
 0x98f   : > { %v6943_v61 = vadd.f32 %v11599_v53, %v6942_v58 }
 0x991   : > { %6992 = vst.msk [vmem:[%s10997_s11 + $0x178] sm:$0xff] %vm6639_vm8, %v6943_v61 }
 0x992 PF: > { %s19_s30 = sadd.s32 1, %s7254_s30  }
 0x993   : > { %p16_p4 = scmp.ge.s32.totalorder %s19_s30, 4  }
 0x995   :  { %18 = sbr.rel (!%p16_p4) target bundleno = 1 (0x1), region = 86 }

</bundles_post_ra>
